<compile_context>
chip_gen: v7x
topology: tpu7x:2x2x1
jax: 0.10.0
libtpu: 0.0.40
codegen_flags: <defaults>
</compile_context>

<pallas_src>
import math

import jax
import jax.numpy as jnp
from jax import lax
from jax.experimental import pallas as pl
from jax.experimental.pallas import tpu as pltpu


def _seg_refine_kernel(x_ref, w1_ref, b1_ref, w2_ref, w3_ref, b3_ref,
                       o1_ref, o2_ref,
                       xp_ref, y0p_ref, op_ref):
    """Fused conv1 -> classif1 -> conv2_conv for one batch element.

    x_ref : (1, H, W, Cin)    NHWC input tile (VMEM)
    w1_ref: (3, 3, Cin, C1)   conv1 weights, HWIO (VMEM)
    b1_ref: (1, C1)           conv1 bias (VMEM)
    w2_ref: (3, 3, C1)        classif1 weights (O=1 squeezed) (VMEM)
    w3_ref: (3, 3)            conv2_conv weights (SMEM scalars)
    b3_ref: (1, 1)            conv2_conv bias (SMEM scalar)
    o1_ref: (1, H, W)         classif1 output (channel squeezed)
    o2_ref: (1, H, W)         LeakyReLU(conv2_conv(...)) output
    xp_ref : (H+2, W+2, Cin)  VMEM scratch: padded input
    y0p_ref: (H+2, W+2, C1)   VMEM scratch: padded conv1 output
    op_ref : (H+2, W+2)       VMEM scratch: padded classif1 output
    """
    _, H, W, Cin = x_ref.shape
    C1 = b1_ref.shape[1]

    # ---- stage 0: build the 1-px zero halo in VMEM (no wrapper jnp.pad) ----
    xp_ref[...] = jnp.zeros_like(xp_ref)
    xp_ref[1:H + 1, 1:W + 1, :] = x_ref[0]
    xp = xp_ref[...]                                        # (H+2, W+2, Cin)

    # ---- stage 1: conv1 (Cin -> C1) + LeakyReLU(0.1) on the MXU ----------
    acc = jnp.zeros((H * W, C1), jnp.float32)
    for dh in range(3):
        for dw in range(3):
            patch = xp[dh:dh + H, dw:dw + W, :].reshape(H * W, Cin)
            acc = acc + jnp.dot(patch, w1_ref[dh, dw],
                                preferred_element_type=jnp.float32)
    y0 = acc + b1_ref[...]
    y0 = jnp.where(y0 >= 0, y0, 0.1 * y0)                   # LeakyReLU(0.1)
    y0 = y0.reshape(H, W, C1)

    # ---- stage 2: classif1 (C1 -> 1, bias=False) on the VPU ---------------
    # 9 multiply + channel-reduce ops over full (H, W) planes; no Cout=1
    # matmul and no 1-lane masked store (output channel dim is squeezed).
    y0p_ref[...] = jnp.zeros_like(y0p_ref)
    y0p_ref[1:H + 1, 1:W + 1, :] = y0
    y0p = y0p_ref[...]                                       # (H+2, W+2, C1)

    w2 = w2_ref[...]                                          # (3, 3, C1)
    out = jnp.zeros((H, W), jnp.float32)
    for dh in range(3):
        for dw in range(3):
            out = out + jnp.sum(y0p[dh:dh + H, dw:dw + W, :] * w2[dh, dw],
                                axis=-1)
    o1_ref[0] = out

    # ---- stage 3: conv2_conv (1 -> 1) + LeakyReLU(0.1) on the VPU ---------
    op_ref[...] = jnp.zeros_like(op_ref)
    op_ref[1:H + 1, 1:W + 1] = out
    op = op_ref[...]                                          # (H+2, W+2)

    out2 = jnp.zeros((H, W), jnp.float32)
    for dh in range(3):
        for dw in range(3):
            out2 = out2 + w3_ref[dh, dw] * op[dh:dh + H, dw:dw + W]
    out2 = out2 + b3_ref[0, 0]
    o2_ref[0] = jnp.where(out2 >= 0, out2, 0.1 * out2)


def seg_refine_forward(x_nhwc, params):
    """Full SegRefineNet forward in one pallas_call.

    x_nhwc: (N, H, W, Cin) f32.  Returns (output, output_conv2), both NHWC
    with shape (N, H, W, 1), matching the PyTorch module's two outputs.
    """
    w1, b1, w2, w3, b3 = params
    N, H, W, Cin = x_nhwc.shape
    C1 = w1.shape[-1]

    w1_k = w1.astype(jnp.float32)                   # (3, 3, Cin, C1) HWIO
    b1_k = b1.astype(jnp.float32).reshape(1, C1)    # (1, C1)
    w2_k = w2.astype(jnp.float32)[:, :, :, 0]       # (3, 3, C1)
    w3_k = w3.astype(jnp.float32)[:, :, 0, 0]       # (3, 3)   -> SMEM scalars
    b3_k = b3.astype(jnp.float32).reshape(1, 1)     # (1, 1)   -> SMEM scalar

    out1, out2 = pl.pallas_call(
        _seg_refine_kernel,
        out_shape=(jax.ShapeDtypeStruct((N, H, W), jnp.float32),
                   jax.ShapeDtypeStruct((N, H, W), jnp.float32)),
        grid_spec=pltpu.PrefetchScalarGridSpec(
            num_scalar_prefetch=0,
            grid=(N,),
            in_specs=[
                pl.BlockSpec((1, H, W, Cin), lambda n: (n, 0, 0, 0)),
                pl.BlockSpec((3, 3, Cin, C1), lambda n: (0, 0, 0, 0)),
                pl.BlockSpec((1, C1), lambda n: (0, 0)),
                pl.BlockSpec((3, 3, C1), lambda n: (0, 0, 0)),
                pl.BlockSpec(memory_space=pltpu.MemorySpace.SMEM),
                pl.BlockSpec(memory_space=pltpu.MemorySpace.SMEM),
            ],
            out_specs=(
                pl.BlockSpec((1, H, W), lambda n: (n, 0, 0)),
                pl.BlockSpec((1, H, W), lambda n: (n, 0, 0)),
            ),
            scratch_shapes=[
                pltpu.VMEM((H + 2, W + 2, Cin), jnp.float32),
                pltpu.VMEM((H + 2, W + 2, C1), jnp.float32),
                pltpu.VMEM((H + 2, W + 2), jnp.float32),
            ],
        ),
        compiler_params=pltpu.CompilerParams(
            dimension_semantics=("parallel",)),
    )(x_nhwc.astype(jnp.float32), w1_k, b1_k, w2_k, w3_k, b3_k)

    # Re-attach the (size-1) channel dim to match the PyTorch outputs.
    return out1[..., None], out2[..., None]


# ----------------------------- pure-JAX reference ---------------------------
def _ref_conv(x, w, b, lrelu):
    y = lax.conv_general_dilated(
        x, w, window_strides=(1, 1), padding="SAME",
        dimension_numbers=("NHWC", "HWIO", "NHWC"),
        precision=lax.Precision.HIGHEST)
    if b is not None:
        y = y + b[None, None, None, :]
    if lrelu:
        y = jnp.where(y >= 0, y, 0.1 * y)
    return y


def _ref_forward(x, params):
    w1, b1, w2, w3, b3 = params
    y0 = _ref_conv(x, w1, b1, True)          # conv1 + LeakyReLU
    out = _ref_conv(y0, w2, None, False)     # classif1 (no bias, no act)
    out2 = _ref_conv(out, w3, b3, True)      # conv2_conv + LeakyReLU
    return out, out2


if __name__ == "__main__":
    key = jax.random.PRNGKey(0)
    k_in, k1, kb1, k2, k3, kb3 = jax.random.split(key, 6)

    # Small shapes consistent with the module: in_planes=17, out_planes=8.
    N, Cin, H, W = 2, 17, 16, 16
    OUT_PLANES = 8

    x_nchw = jax.random.normal(k_in, (N, Cin, H, W), dtype=jnp.float32)
    x_nhwc = jnp.transpose(x_nchw, (0, 2, 3, 1))  # NCHW -> NHWC (boundary)

    # Deterministic synthetic parameters, matching PyTorch init statistics:
    #   Conv2d weight ~ N(0, sqrt(2 / (k*k*out_channels))), HWIO layout here.
    w1 = jax.random.normal(k1, (3, 3, Cin, OUT_PLANES), jnp.float32) * math.sqrt(2.0 / (9 * OUT_PLANES))
    b1 = jax.random.uniform(kb1, (OUT_PLANES,), jnp.float32,
                            minval=-1.0 / math.sqrt(Cin * 9),
                            maxval=1.0 / math.sqrt(Cin * 9))
    w2 = jax.random.normal(k2, (3, 3, OUT_PLANES, 1), jnp.float32) * math.sqrt(2.0 / (9 * 1))
    w3 = jax.random.normal(k3, (3, 3, 1, 1), jnp.float32) * math.sqrt(2.0 / (9 * 1))
    b3 = jax.random.uniform(kb3, (1,), jnp.float32, minval=-1.0 / 3.0, maxval=1.0 / 3.0)

    params = (w1, b1, w2, w3, b3)

    output, output_conv2 = jax.jit(seg_refine_forward)(x_nhwc, params)
    jax.block_until_ready((output, output_conv2))

    # Sanity check against a pure-JAX reference (XLA conv).
    ref_out, ref_out2 = _ref_forward(x_nhwc, params)
    assert output.shape == (N, H, W, 1) and output_conv2.shape == (N, H, W, 1)
    assert jnp.allclose(output, ref_out, atol=2e-3, rtol=2e-3)
    assert jnp.allclose(output_conv2, ref_out2, atol=2e-3, rtol=2e-3)

    print("KERNEL_OK")
</pallas_src>

<mosaic_0001>
module attributes {stable_mosaic.version = 11 : i64} {
  func.func @_seg_refine_kernel(%arg0: i32, %arg1: memref<1x16x16x17xf32, #tpu.memory_space<vmem>>, %arg2: memref<3x3x17x8xf32, #tpu.memory_space<vmem>>, %arg3: memref<1x8xf32, #tpu.memory_space<vmem>>, %arg4: memref<3x3x8xf32, #tpu.memory_space<vmem>>, %arg5: memref<3x3xf32, #tpu.memory_space<smem>>, %arg6: memref<1x1xf32, #tpu.memory_space<smem>>, %arg7: memref<1x16x16xf32, #tpu.memory_space<vmem>>, %arg8: memref<1x16x16xf32, #tpu.memory_space<vmem>>, %arg9: memref<18x18x17xf32, #tpu.memory_space<vmem>>, %arg10: memref<18x18x8xf32, #tpu.memory_space<vmem>>, %arg11: memref<18x18xf32, #tpu.memory_space<vmem>>) attributes {dimension_semantics = [#tpu.dimension_semantics<parallel>], iteration_bounds = array<i64: 2>, scalar_prefetch = 0 : i64, scratch_operands = 3 : i64, tpu.core_type = #tpu.core_type<tc>, window_params = [{transform_indices = @transform_0, window_bounds = array<i64: 1, 16, 16, 17>}, {pipeline_mode = #tpu.pipeline_mode<synchronous>, transform_indices = @transform_1, window_bounds = array<i64: 3, 3, 17, 8>}, {pipeline_mode = #tpu.pipeline_mode<synchronous>, transform_indices = @transform_2, window_bounds = array<i64: 1, 8>}, {pipeline_mode = #tpu.pipeline_mode<synchronous>, transform_indices = @transform_3, window_bounds = array<i64: 3, 3, 8>}, {transform_indices = @transform_4, window_bounds = array<i64: 3, 3>}, {transform_indices = @transform_5, window_bounds = array<i64: 1, 1>}, {transform_indices = @transform_6, window_bounds = array<i64: 1, 16, 16>}, {transform_indices = @transform_7, window_bounds = array<i64: 1, 16, 16>}]} {
    %cst = arith.constant 0.000000e+00 : f32
    %0 = vector.broadcast %cst : f32 to vector<18x18x17xf32>
    %c0 = arith.constant 0 : index
    %c0_0 = arith.constant 0 : index
    %c0_1 = arith.constant 0 : index
    %1 = vector.load %arg9[%c0, %c0_0, %c0_1] : memref<18x18x17xf32, #tpu.memory_space<vmem>>, vector<18x18x17xf32>
    tpu.vector_store %arg9[%c0, %c0_0, %c0_1], %0 {strides = array<i32>} : memref<18x18x17xf32, #tpu.memory_space<vmem>>, vector<18x18x17xf32>,
    %c0_2 = arith.constant 0 : index
    %c0_3 = arith.constant 0 : index
    %c0_4 = arith.constant 0 : index
    %c0_5 = arith.constant 0 : index
    %2 = vector.load %arg1[%c0_2, %c0_3, %c0_4, %c0_5] : memref<1x16x16x17xf32, #tpu.memory_space<vmem>>, vector<1x16x16x17xf32>
    %3 = vector.shape_cast %2 : vector<1x16x16x17xf32> to vector<16x16x17xf32>
    %c1 = arith.constant 1 : index
    %c1_6 = arith.constant 1 : index
    %c0_7 = arith.constant 0 : index
    %4 = vector.load %arg9[%c1, %c1_6, %c0_7] : memref<18x18x17xf32, #tpu.memory_space<vmem>>, vector<16x16x17xf32>
    tpu.vector_store %arg9[%c1, %c1_6, %c0_7], %3 {strides = array<i32>} : memref<18x18x17xf32, #tpu.memory_space<vmem>>, vector<16x16x17xf32>,
    %c0_8 = arith.constant 0 : index
    %c0_9 = arith.constant 0 : index
    %c0_10 = arith.constant 0 : index
    %5 = vector.load %arg9[%c0_8, %c0_9, %c0_10] : memref<18x18x17xf32, #tpu.memory_space<vmem>>, vector<18x18x17xf32>
    %cst_11 = arith.constant 0.000000e+00 : f32
    %6 = vector.broadcast %cst_11 : f32 to vector<256x8xf32>
    %7 = vector.extract_strided_slice %5 {offsets = [0, 0, 0], sizes = [16, 16, 17], strides = [1, 1, 1]} : vector<18x18x17xf32> to vector<16x16x17xf32>
    %8 = vector.shape_cast %7 : vector<16x16x17xf32> to vector<256x17xf32>
    %c0_12 = arith.constant 0 : index
    %c0_13 = arith.constant 0 : index
    %c0_14 = arith.constant 0 : index
    %c0_15 = arith.constant 0 : index
    %9 = vector.load %arg2[%c0_12, %c0_13, %c0_14, %c0_15] : memref<3x3x17x8xf32, #tpu.memory_space<vmem>>, vector<1x1x17x8xf32>
    %10 = vector.shape_cast %9 : vector<1x1x17x8xf32> to vector<17x8xf32>
    %cst_16 = arith.constant dense<0.000000e+00> : vector<256x8xf32>
    %11 = tpu.matmul %8, %10, %cst_16 {dimension_numbers = #tpu.dot_dimension_numbers<[1], [0], [0], [1], [0, 0, 1, 1], [], []>} : vector<256x17xf32>, vector<17x8xf32>, vector<256x8xf32> -> vector<256x8xf32>
    %12 = arith.addf %6, %11 : vector<256x8xf32>
    %13 = vector.extract_strided_slice %5 {offsets = [0, 1, 0], sizes = [16, 16, 17], strides = [1, 1, 1]} : vector<18x18x17xf32> to vector<16x16x17xf32>
    %14 = vector.shape_cast %13 : vector<16x16x17xf32> to vector<256x17xf32>
    %c0_17 = arith.constant 0 : index
    %c1_18 = arith.constant 1 : index
    %c0_19 = arith.constant 0 : index
    %c0_20 = arith.constant 0 : index
    %15 = vector.load %arg2[%c0_17, %c1_18, %c0_19, %c0_20] : memref<3x3x17x8xf32, #tpu.memory_space<vmem>>, vector<1x1x17x8xf32>
    %16 = vector.shape_cast %15 : vector<1x1x17x8xf32> to vector<17x8xf32>
    %cst_21 = arith.constant dense<0.000000e+00> : vector<256x8xf32>
    %17 = tpu.matmul %14, %16, %cst_21 {dimension_numbers = #tpu.dot_dimension_numbers<[1], [0], [0], [1], [0, 0, 1, 1], [], []>} : vector<256x17xf32>, vector<17x8xf32>, vector<256x8xf32> -> vector<256x8xf32>
    %18 = arith.addf %12, %17 : vector<256x8xf32>
    %19 = vector.extract_strided_slice %5 {offsets = [0, 2, 0], sizes = [16, 16, 17], strides = [1, 1, 1]} : vector<18x18x17xf32> to vector<16x16x17xf32>
    %20 = vector.shape_cast %19 : vector<16x16x17xf32> to vector<256x17xf32>
    %c0_22 = arith.constant 0 : index
    %c2 = arith.constant 2 : index
    %c0_23 = arith.constant 0 : index
    %c0_24 = arith.constant 0 : index
    %21 = vector.load %arg2[%c0_22, %c2, %c0_23, %c0_24] : memref<3x3x17x8xf32, #tpu.memory_space<vmem>>, vector<1x1x17x8xf32>
    %22 = vector.shape_cast %21 : vector<1x1x17x8xf32> to vector<17x8xf32>
    %cst_25 = arith.constant dense<0.000000e+00> : vector<256x8xf32>
    %23 = tpu.matmul %20, %22, %cst_25 {dimension_numbers = #tpu.dot_dimension_numbers<[1], [0], [0], [1], [0, 0, 1, 1], [], []>} : vector<256x17xf32>, vector<17x8xf32>, vector<256x8xf32> -> vector<256x8xf32>
    %24 = arith.addf %18, %23 : vector<256x8xf32>
    %25 = vector.extract_strided_slice %5 {offsets = [1, 0, 0], sizes = [16, 16, 17], strides = [1, 1, 1]} : vector<18x18x17xf32> to vector<16x16x17xf32>
    %26 = vector.shape_cast %25 : vector<16x16x17xf32> to vector<256x17xf32>
    %c1_26 = arith.constant 1 : index
    %c0_27 = arith.constant 0 : index
    %c0_28 = arith.constant 0 : index
    %c0_29 = arith.constant 0 : index
    %27 = vector.load %arg2[%c1_26, %c0_27, %c0_28, %c0_29] : memref<3x3x17x8xf32, #tpu.memory_space<vmem>>, vector<1x1x17x8xf32>
    %28 = vector.shape_cast %27 : vector<1x1x17x8xf32> to vector<17x8xf32>
    %cst_30 = arith.constant dense<0.000000e+00> : vector<256x8xf32>
    %29 = tpu.matmul %26, %28, %cst_30 {dimension_numbers = #tpu.dot_dimension_numbers<[1], [0], [0], [1], [0, 0, 1, 1], [], []>} : vector<256x17xf32>, vector<17x8xf32>, vector<256x8xf32> -> vector<256x8xf32>
    %30 = arith.addf %24, %29 : vector<256x8xf32>
    %31 = vector.extract_strided_slice %5 {offsets = [1, 1, 0], sizes = [16, 16, 17], strides = [1, 1, 1]} : vector<18x18x17xf32> to vector<16x16x17xf32>
    %32 = vector.shape_cast %31 : vector<16x16x17xf32> to vector<256x17xf32>
    %c1_31 = arith.constant 1 : index
    %c1_32 = arith.constant 1 : index
    %c0_33 = arith.constant 0 : index
    %c0_34 = arith.constant 0 : index
    %33 = vector.load %arg2[%c1_31, %c1_32, %c0_33, %c0_34] : memref<3x3x17x8xf32, #tpu.memory_space<vmem>>, vector<1x1x17x8xf32>
    %34 = vector.shape_cast %33 : vector<1x1x17x8xf32> to vector<17x8xf32>
    %cst_35 = arith.constant dense<0.000000e+00> : vector<256x8xf32>
    %35 = tpu.matmul %32, %34, %cst_35 {dimension_numbers = #tpu.dot_dimension_numbers<[1], [0], [0], [1], [0, 0, 1, 1], [], []>} : vector<256x17xf32>, vector<17x8xf32>, vector<256x8xf32> -> vector<256x8xf32>
    %36 = arith.addf %30, %35 : vector<256x8xf32>
    %37 = vector.extract_strided_slice %5 {offsets = [1, 2, 0], sizes = [16, 16, 17], strides = [1, 1, 1]} : vector<18x18x17xf32> to vector<16x16x17xf32>
    %38 = vector.shape_cast %37 : vector<16x16x17xf32> to vector<256x17xf32>
    %c1_36 = arith.constant 1 : index
    %c2_37 = arith.constant 2 : index
    %c0_38 = arith.constant 0 : index
    %c0_39 = arith.constant 0 : index
    %39 = vector.load %arg2[%c1_36, %c2_37, %c0_38, %c0_39] : memref<3x3x17x8xf32, #tpu.memory_space<vmem>>, vector<1x1x17x8xf32>
    %40 = vector.shape_cast %39 : vector<1x1x17x8xf32> to vector<17x8xf32>
    %cst_40 = arith.constant dense<0.000000e+00> : vector<256x8xf32>
    %41 = tpu.matmul %38, %40, %cst_40 {dimension_numbers = #tpu.dot_dimension_numbers<[1], [0], [0], [1], [0, 0, 1, 1], [], []>} : vector<256x17xf32>, vector<17x8xf32>, vector<256x8xf32> -> vector<256x8xf32>
    %42 = arith.addf %36, %41 : vector<256x8xf32>
    %43 = vector.extract_strided_slice %5 {offsets = [2, 0, 0], sizes = [16, 16, 17], strides = [1, 1, 1]} : vector<18x18x17xf32> to vector<16x16x17xf32>
    %44 = vector.shape_cast %43 : vector<16x16x17xf32> to vector<256x17xf32>
    %c2_41 = arith.constant 2 : index
    %c0_42 = arith.constant 0 : index
    %c0_43 = arith.constant 0 : index
    %c0_44 = arith.constant 0 : index
    %45 = vector.load %arg2[%c2_41, %c0_42, %c0_43, %c0_44] : memref<3x3x17x8xf32, #tpu.memory_space<vmem>>, vector<1x1x17x8xf32>
    %46 = vector.shape_cast %45 : vector<1x1x17x8xf32> to vector<17x8xf32>
    %cst_45 = arith.constant dense<0.000000e+00> : vector<256x8xf32>
    %47 = tpu.matmul %44, %46, %cst_45 {dimension_numbers = #tpu.dot_dimension_numbers<[1], [0], [0], [1], [0, 0, 1, 1], [], []>} : vector<256x17xf32>, vector<17x8xf32>, vector<256x8xf32> -> vector<256x8xf32>
    %48 = arith.addf %42, %47 : vector<256x8xf32>
    %49 = vector.extract_strided_slice %5 {offsets = [2, 1, 0], sizes = [16, 16, 17], strides = [1, 1, 1]} : vector<18x18x17xf32> to vector<16x16x17xf32>
    %50 = vector.shape_cast %49 : vector<16x16x17xf32> to vector<256x17xf32>
    %c2_46 = arith.constant 2 : index
    %c1_47 = arith.constant 1 : index
    %c0_48 = arith.constant 0 : index
    %c0_49 = arith.constant 0 : index
    %51 = vector.load %arg2[%c2_46, %c1_47, %c0_48, %c0_49] : memref<3x3x17x8xf32, #tpu.memory_space<vmem>>, vector<1x1x17x8xf32>
    %52 = vector.shape_cast %51 : vector<1x1x17x8xf32> to vector<17x8xf32>
    %cst_50 = arith.constant dense<0.000000e+00> : vector<256x8xf32>
    %53 = tpu.matmul %50, %52, %cst_50 {dimension_numbers = #tpu.dot_dimension_numbers<[1], [0], [0], [1], [0, 0, 1, 1], [], []>} : vector<256x17xf32>, vector<17x8xf32>, vector<256x8xf32> -> vector<256x8xf32>
    %54 = arith.addf %48, %53 : vector<256x8xf32>
    %55 = vector.extract_strided_slice %5 {offsets = [2, 2, 0], sizes = [16, 16, 17], strides = [1, 1, 1]} : vector<18x18x17xf32> to vector<16x16x17xf32>
    %56 = vector.shape_cast %55 : vector<16x16x17xf32> to vector<256x17xf32>
    %c2_51 = arith.constant 2 : index
    %c2_52 = arith.constant 2 : index
    %c0_53 = arith.constant 0 : index
    %c0_54 = arith.constant 0 : index
    %57 = vector.load %arg2[%c2_51, %c2_52, %c0_53, %c0_54] : memref<3x3x17x8xf32, #tpu.memory_space<vmem>>, vector<1x1x17x8xf32>
    %58 = vector.shape_cast %57 : vector<1x1x17x8xf32> to vector<17x8xf32>
    %cst_55 = arith.constant dense<0.000000e+00> : vector<256x8xf32>
    %59 = tpu.matmul %56, %58, %cst_55 {dimension_numbers = #tpu.dot_dimension_numbers<[1], [0], [0], [1], [0, 0, 1, 1], [], []>} : vector<256x17xf32>, vector<17x8xf32>, vector<256x8xf32> -> vector<256x8xf32>
    %60 = arith.addf %54, %59 : vector<256x8xf32>
    %c0_56 = arith.constant 0 : index
    %c0_57 = arith.constant 0 : index
    %61 = vector.load %arg3[%c0_56, %c0_57] : memref<1x8xf32, #tpu.memory_space<vmem>>, vector<1x8xf32>
    %62 = vector.broadcast %61 : vector<1x8xf32> to vector<256x8xf32>
    %63 = arith.addf %60, %62 : vector<256x8xf32>
    %cst_58 = arith.constant 0.000000e+00 : f32
    %64 = vector.broadcast %cst_58 : f32 to vector<256x8xf32>
    %65 = arith.cmpf oge, %63, %64 : vector<256x8xf32>
    %cst_59 = arith.constant 1.000000e-01 : f32
    %66 = vector.broadcast %cst_59 : f32 to vector<256x8xf32>
    %67 = arith.mulf %66, %63 : vector<256x8xf32>
    %68 = arith.select %65, %63, %67 : vector<256x8xi1>, vector<256x8xf32>
    %69 = vector.shape_cast %68 : vector<256x8xf32> to vector<16x16x8xf32>
    %cst_60 = arith.constant 0.000000e+00 : f32
    %70 = vector.broadcast %cst_60 : f32 to vector<18x18x8xf32>
    %c0_61 = arith.constant 0 : index
    %c0_62 = arith.constant 0 : index
    %c0_63 = arith.constant 0 : index
    %71 = vector.load %arg10[%c0_61, %c0_62, %c0_63] : memref<18x18x8xf32, #tpu.memory_space<vmem>>, vector<18x18x8xf32>
    tpu.vector_store %arg10[%c0_61, %c0_62, %c0_63], %70 {strides = array<i32>} : memref<18x18x8xf32, #tpu.memory_space<vmem>>, vector<18x18x8xf32>,
    %c1_64 = arith.constant 1 : index
    %c1_65 = arith.constant 1 : index
    %c0_66 = arith.constant 0 : index
    %72 = vector.load %arg10[%c1_64, %c1_65, %c0_66] : memref<18x18x8xf32, #tpu.memory_space<vmem>>, vector<16x16x8xf32>
    tpu.vector_store %arg10[%c1_64, %c1_65, %c0_66], %69 {strides = array<i32>} : memref<18x18x8xf32, #tpu.memory_space<vmem>>, vector<16x16x8xf32>,
    %c0_67 = arith.constant 0 : index
    %c0_68 = arith.constant 0 : index
    %c0_69 = arith.constant 0 : index
    %73 = vector.load %arg10[%c0_67, %c0_68, %c0_69] : memref<18x18x8xf32, #tpu.memory_space<vmem>>, vector<18x18x8xf32>
    %c0_70 = arith.constant 0 : index
    %c0_71 = arith.constant 0 : index
    %c0_72 = arith.constant 0 : index
    %74 = vector.load %arg4[%c0_70, %c0_71, %c0_72] : memref<3x3x8xf32, #tpu.memory_space<vmem>>, vector<3x3x8xf32>
    %cst_73 = arith.constant 0.000000e+00 : f32
    %75 = vector.broadcast %cst_73 : f32 to vector<16x16xf32>
    %76 = vector.extract_strided_slice %73 {offsets = [0, 0, 0], sizes = [16, 16, 8], strides = [1, 1, 1]} : vector<18x18x8xf32> to vector<16x16x8xf32>
    %77 = vector.extract_strided_slice %74 {offsets = [0, 0, 0], sizes = [1, 1, 8], strides = [1, 1, 1]} : vector<3x3x8xf32> to vector<1x1x8xf32>
    %78 = vector.shape_cast %77 : vector<1x1x8xf32> to vector<8xf32>
    %79 = vector.shape_cast %78 : vector<8xf32> to vector<1x1x8xf32>
    %80 = vector.broadcast %79 : vector<1x1x8xf32> to vector<16x16x8xf32>
    %81 = arith.mulf %76, %80 : vector<16x16x8xf32>
    %cst_74 = arith.constant dense<0.000000e+00> : vector<16x16xf32>
    %82 = vector.multi_reduction <add>, %81, %cst_74 [2] : vector<16x16x8xf32> to vector<16x16xf32>
    %83 = arith.addf %75, %82 : vector<16x16xf32>
    %84 = vector.extract_strided_slice %73 {offsets = [0, 1, 0], sizes = [16, 16, 8], strides = [1, 1, 1]} : vector<18x18x8xf32> to vector<16x16x8xf32>
    %85 = vector.extract_strided_slice %74 {offsets = [0, 1, 0], sizes = [1, 1, 8], strides = [1, 1, 1]} : vector<3x3x8xf32> to vector<1x1x8xf32>
    %86 = vector.shape_cast %85 : vector<1x1x8xf32> to vector<8xf32>
    %87 = vector.shape_cast %86 : vector<8xf32> to vector<1x1x8xf32>
    %88 = vector.broadcast %87 : vector<1x1x8xf32> to vector<16x16x8xf32>
    %89 = arith.mulf %84, %88 : vector<16x16x8xf32>
    %cst_75 = arith.constant dense<0.000000e+00> : vector<16x16xf32>
    %90 = vector.multi_reduction <add>, %89, %cst_75 [2] : vector<16x16x8xf32> to vector<16x16xf32>
    %91 = arith.addf %83, %90 : vector<16x16xf32>
    %92 = vector.extract_strided_slice %73 {offsets = [0, 2, 0], sizes = [16, 16, 8], strides = [1, 1, 1]} : vector<18x18x8xf32> to vector<16x16x8xf32>
    %93 = vector.extract_strided_slice %74 {offsets = [0, 2, 0], sizes = [1, 1, 8], strides = [1, 1, 1]} : vector<3x3x8xf32> to vector<1x1x8xf32>
    %94 = vector.shape_cast %93 : vector<1x1x8xf32> to vector<8xf32>
    %95 = vector.shape_cast %94 : vector<8xf32> to vector<1x1x8xf32>
    %96 = vector.broadcast %95 : vector<1x1x8xf32> to vector<16x16x8xf32>
    %97 = arith.mulf %92, %96 : vector<16x16x8xf32>
    %cst_76 = arith.constant dense<0.000000e+00> : vector<16x16xf32>
    %98 = vector.multi_reduction <add>, %97, %cst_76 [2] : vector<16x16x8xf32> to vector<16x16xf32>
    %99 = arith.addf %91, %98 : vector<16x16xf32>
    %100 = vector.extract_strided_slice %73 {offsets = [1, 0, 0], sizes = [16, 16, 8], strides = [1, 1, 1]} : vector<18x18x8xf32> to vector<16x16x8xf32>
    %101 = vector.extract_strided_slice %74 {offsets = [1, 0, 0], sizes = [1, 1, 8], strides = [1, 1, 1]} : vector<3x3x8xf32> to vector<1x1x8xf32>
    %102 = vector.shape_cast %101 : vector<1x1x8xf32> to vector<8xf32>
    %103 = vector.shape_cast %102 : vector<8xf32> to vector<1x1x8xf32>
    %104 = vector.broadcast %103 : vector<1x1x8xf32> to vector<16x16x8xf32>
    %105 = arith.mulf %100, %104 : vector<16x16x8xf32>
    %cst_77 = arith.constant dense<0.000000e+00> : vector<16x16xf32>
    %106 = vector.multi_reduction <add>, %105, %cst_77 [2] : vector<16x16x8xf32> to vector<16x16xf32>
    %107 = arith.addf %99, %106 : vector<16x16xf32>
    %108 = vector.extract_strided_slice %73 {offsets = [1, 1, 0], sizes = [16, 16, 8], strides = [1, 1, 1]} : vector<18x18x8xf32> to vector<16x16x8xf32>
    %109 = vector.extract_strided_slice %74 {offsets = [1, 1, 0], sizes = [1, 1, 8], strides = [1, 1, 1]} : vector<3x3x8xf32> to vector<1x1x8xf32>
    %110 = vector.shape_cast %109 : vector<1x1x8xf32> to vector<8xf32>
    %111 = vector.shape_cast %110 : vector<8xf32> to vector<1x1x8xf32>
    %112 = vector.broadcast %111 : vector<1x1x8xf32> to vector<16x16x8xf32>
    %113 = arith.mulf %108, %112 : vector<16x16x8xf32>
    %cst_78 = arith.constant dense<0.000000e+00> : vector<16x16xf32>
    %114 = vector.multi_reduction <add>, %113, %cst_78 [2] : vector<16x16x8xf32> to vector<16x16xf32>
    %115 = arith.addf %107, %114 : vector<16x16xf32>
    %116 = vector.extract_strided_slice %73 {offsets = [1, 2, 0], sizes = [16, 16, 8], strides = [1, 1, 1]} : vector<18x18x8xf32> to vector<16x16x8xf32>
    %117 = vector.extract_strided_slice %74 {offsets = [1, 2, 0], sizes = [1, 1, 8], strides = [1, 1, 1]} : vector<3x3x8xf32> to vector<1x1x8xf32>
    %118 = vector.shape_cast %117 : vector<1x1x8xf32> to vector<8xf32>
    %119 = vector.shape_cast %118 : vector<8xf32> to vector<1x1x8xf32>
    %120 = vector.broadcast %119 : vector<1x1x8xf32> to vector<16x16x8xf32>
    %121 = arith.mulf %116, %120 : vector<16x16x8xf32>
    %cst_79 = arith.constant dense<0.000000e+00> : vector<16x16xf32>
    %122 = vector.multi_reduction <add>, %121, %cst_79 [2] : vector<16x16x8xf32> to vector<16x16xf32>
    %123 = arith.addf %115, %122 : vector<16x16xf32>
    %124 = vector.extract_strided_slice %73 {offsets = [2, 0, 0], sizes = [16, 16, 8], strides = [1, 1, 1]} : vector<18x18x8xf32> to vector<16x16x8xf32>
    %125 = vector.extract_strided_slice %74 {offsets = [2, 0, 0], sizes = [1, 1, 8], strides = [1, 1, 1]} : vector<3x3x8xf32> to vector<1x1x8xf32>
    %126 = vector.shape_cast %125 : vector<1x1x8xf32> to vector<8xf32>
    %127 = vector.shape_cast %126 : vector<8xf32> to vector<1x1x8xf32>
    %128 = vector.broadcast %127 : vector<1x1x8xf32> to vector<16x16x8xf32>
    %129 = arith.mulf %124, %128 : vector<16x16x8xf32>
    %cst_80 = arith.constant dense<0.000000e+00> : vector<16x16xf32>
    %130 = vector.multi_reduction <add>, %129, %cst_80 [2] : vector<16x16x8xf32> to vector<16x16xf32>
    %131 = arith.addf %123, %130 : vector<16x16xf32>
    %132 = vector.extract_strided_slice %73 {offsets = [2, 1, 0], sizes = [16, 16, 8], strides = [1, 1, 1]} : vector<18x18x8xf32> to vector<16x16x8xf32>
    %133 = vector.extract_strided_slice %74 {offsets = [2, 1, 0], sizes = [1, 1, 8], strides = [1, 1, 1]} : vector<3x3x8xf32> to vector<1x1x8xf32>
    %134 = vector.shape_cast %133 : vector<1x1x8xf32> to vector<8xf32>
    %135 = vector.shape_cast %134 : vector<8xf32> to vector<1x1x8xf32>
    %136 = vector.broadcast %135 : vector<1x1x8xf32> to vector<16x16x8xf32>
    %137 = arith.mulf %132, %136 : vector<16x16x8xf32>
    %cst_81 = arith.constant dense<0.000000e+00> : vector<16x16xf32>
    %138 = vector.multi_reduction <add>, %137, %cst_81 [2] : vector<16x16x8xf32> to vector<16x16xf32>
    %139 = arith.addf %131, %138 : vector<16x16xf32>
    %140 = vector.extract_strided_slice %73 {offsets = [2, 2, 0], sizes = [16, 16, 8], strides = [1, 1, 1]} : vector<18x18x8xf32> to vector<16x16x8xf32>
    %141 = vector.extract_strided_slice %74 {offsets = [2, 2, 0], sizes = [1, 1, 8], strides = [1, 1, 1]} : vector<3x3x8xf32> to vector<1x1x8xf32>
    %142 = vector.shape_cast %141 : vector<1x1x8xf32> to vector<8xf32>
    %143 = vector.shape_cast %142 : vector<8xf32> to vector<1x1x8xf32>
    %144 = vector.broadcast %143 : vector<1x1x8xf32> to vector<16x16x8xf32>
    %145 = arith.mulf %140, %144 : vector<16x16x8xf32>
    %cst_82 = arith.constant dense<0.000000e+00> : vector<16x16xf32>
    %146 = vector.multi_reduction <add>, %145, %cst_82 [2] : vector<16x16x8xf32> to vector<16x16xf32>
    %147 = arith.addf %139, %146 : vector<16x16xf32>
    %c0_83 = arith.constant 0 : index
    %c0_84 = arith.constant 0 : index
    %c0_85 = arith.constant 0 : index
    %148 = vector.load %arg7[%c0_83, %c0_84, %c0_85] : memref<1x16x16xf32, #tpu.memory_space<vmem>>, vector<1x16x16xf32>
    %149 = vector.shape_cast %148 : vector<1x16x16xf32> to vector<16x16xf32>
    %150 = vector.shape_cast %147 : vector<16x16xf32> to vector<1x16x16xf32>
    tpu.vector_store %arg7[%c0_83, %c0_84, %c0_85], %150 {strides = array<i32>} : memref<1x16x16xf32, #tpu.memory_space<vmem>>, vector<1x16x16xf32>,
    %cst_86 = arith.constant 0.000000e+00 : f32
    %151 = vector.broadcast %cst_86 : f32 to vector<18x18xf32>
    %c0_87 = arith.constant 0 : index
    %c0_88 = arith.constant 0 : index
    %152 = vector.load %arg11[%c0_87, %c0_88] : memref<18x18xf32, #tpu.memory_space<vmem>>, vector<18x18xf32>
    tpu.vector_store %arg11[%c0_87, %c0_88], %151 {strides = array<i32>} : memref<18x18xf32, #tpu.memory_space<vmem>>, vector<18x18xf32>,
    %c1_89 = arith.constant 1 : index
    %c1_90 = arith.constant 1 : index
    %153 = vector.load %arg11[%c1_89, %c1_90] : memref<18x18xf32, #tpu.memory_space<vmem>>, vector<16x16xf32>
    tpu.vector_store %arg11[%c1_89, %c1_90], %147 {strides = array<i32>} : memref<18x18xf32, #tpu.memory_space<vmem>>, vector<16x16xf32>,
    %c0_91 = arith.constant 0 : index
    %c0_92 = arith.constant 0 : index
    %154 = vector.load %arg11[%c0_91, %c0_92] : memref<18x18xf32, #tpu.memory_space<vmem>>, vector<18x18xf32>
    %cst_93 = arith.constant 0.000000e+00 : f32
    %155 = vector.broadcast %cst_93 : f32 to vector<16x16xf32>
    %c0_94 = arith.constant 0 : index
    %c0_95 = arith.constant 0 : index
    %156 = memref.load %arg5[%c0_94, %c0_95] : memref<3x3xf32, #tpu.memory_space<smem>>
    %157 = vector.extract_strided_slice %154 {offsets = [0, 0], sizes = [16, 16], strides = [1, 1]} : vector<18x18xf32> to vector<16x16xf32>
    %158 = vector.broadcast %156 : f32 to vector<16x16xf32>
    %159 = arith.mulf %158, %157 : vector<16x16xf32>
    %160 = arith.addf %155, %159 : vector<16x16xf32>
    %c0_96 = arith.constant 0 : index
    %c1_97 = arith.constant 1 : index
    %161 = memref.load %arg5[%c0_96, %c1_97] : memref<3x3xf32, #tpu.memory_space<smem>>
    %162 = vector.extract_strided_slice %154 {offsets = [0, 1], sizes = [16, 16], strides = [1, 1]} : vector<18x18xf32> to vector<16x16xf32>
    %163 = vector.broadcast %161 : f32 to vector<16x16xf32>
    %164 = arith.mulf %163, %162 : vector<16x16xf32>
    %165 = arith.addf %160, %164 : vector<16x16xf32>
    %c0_98 = arith.constant 0 : index
    %c2_99 = arith.constant 2 : index
    %166 = memref.load %arg5[%c0_98, %c2_99] : memref<3x3xf32, #tpu.memory_space<smem>>
    %167 = vector.extract_strided_slice %154 {offsets = [0, 2], sizes = [16, 16], strides = [1, 1]} : vector<18x18xf32> to vector<16x16xf32>
    %168 = vector.broadcast %166 : f32 to vector<16x16xf32>
    %169 = arith.mulf %168, %167 : vector<16x16xf32>
    %170 = arith.addf %165, %169 : vector<16x16xf32>
    %c1_100 = arith.constant 1 : index
    %c0_101 = arith.constant 0 : index
    %171 = memref.load %arg5[%c1_100, %c0_101] : memref<3x3xf32, #tpu.memory_space<smem>>
    %172 = vector.extract_strided_slice %154 {offsets = [1, 0], sizes = [16, 16], strides = [1, 1]} : vector<18x18xf32> to vector<16x16xf32>
    %173 = vector.broadcast %171 : f32 to vector<16x16xf32>
    %174 = arith.mulf %173, %172 : vector<16x16xf32>
    %175 = arith.addf %170, %174 : vector<16x16xf32>
    %c1_102 = arith.constant 1 : index
    %c1_103 = arith.constant 1 : index
    %176 = memref.load %arg5[%c1_102, %c1_103] : memref<3x3xf32, #tpu.memory_space<smem>>
    %177 = vector.extract_strided_slice %154 {offsets = [1, 1], sizes = [16, 16], strides = [1, 1]} : vector<18x18xf32> to vector<16x16xf32>
    %178 = vector.broadcast %176 : f32 to vector<16x16xf32>
    %179 = arith.mulf %178, %177 : vector<16x16xf32>
    %180 = arith.addf %175, %179 : vector<16x16xf32>
    %c1_104 = arith.constant 1 : index
    %c2_105 = arith.constant 2 : index
    %181 = memref.load %arg5[%c1_104, %c2_105] : memref<3x3xf32, #tpu.memory_space<smem>>
    %182 = vector.extract_strided_slice %154 {offsets = [1, 2], sizes = [16, 16], strides = [1, 1]} : vector<18x18xf32> to vector<16x16xf32>
    %183 = vector.broadcast %181 : f32 to vector<16x16xf32>
    %184 = arith.mulf %183, %182 : vector<16x16xf32>
    %185 = arith.addf %180, %184 : vector<16x16xf32>
    %c2_106 = arith.constant 2 : index
    %c0_107 = arith.constant 0 : index
    %186 = memref.load %arg5[%c2_106, %c0_107] : memref<3x3xf32, #tpu.memory_space<smem>>
    %187 = vector.extract_strided_slice %154 {offsets = [2, 0], sizes = [16, 16], strides = [1, 1]} : vector<18x18xf32> to vector<16x16xf32>
    %188 = vector.broadcast %186 : f32 to vector<16x16xf32>
    %189 = arith.mulf %188, %187 : vector<16x16xf32>
    %190 = arith.addf %185, %189 : vector<16x16xf32>
    %c2_108 = arith.constant 2 : index
    %c1_109 = arith.constant 1 : index
    %191 = memref.load %arg5[%c2_108, %c1_109] : memref<3x3xf32, #tpu.memory_space<smem>>
    %192 = vector.extract_strided_slice %154 {offsets = [2, 1], sizes = [16, 16], strides = [1, 1]} : vector<18x18xf32> to vector<16x16xf32>
    %193 = vector.broadcast %191 : f32 to vector<16x16xf32>
    %194 = arith.mulf %193, %192 : vector<16x16xf32>
    %195 = arith.addf %190, %194 : vector<16x16xf32>
    %c2_110 = arith.constant 2 : index
    %c2_111 = arith.constant 2 : index
    %196 = memref.load %arg5[%c2_110, %c2_111] : memref<3x3xf32, #tpu.memory_space<smem>>
    %197 = vector.extract_strided_slice %154 {offsets = [2, 2], sizes = [16, 16], strides = [1, 1]} : vector<18x18xf32> to vector<16x16xf32>
    %198 = vector.broadcast %196 : f32 to vector<16x16xf32>
    %199 = arith.mulf %198, %197 : vector<16x16xf32>
    %200 = arith.addf %195, %199 : vector<16x16xf32>
    %c0_112 = arith.constant 0 : index
    %c0_113 = arith.constant 0 : index
    %201 = memref.load %arg6[%c0_112, %c0_113] : memref<1x1xf32, #tpu.memory_space<smem>>
    %202 = vector.broadcast %201 : f32 to vector<16x16xf32>
    %203 = arith.addf %200, %202 : vector<16x16xf32>
    %cst_114 = arith.constant 0.000000e+00 : f32
    %204 = vector.broadcast %cst_114 : f32 to vector<16x16xf32>
    %205 = arith.cmpf oge, %203, %204 : vector<16x16xf32>
    %cst_115 = arith.constant 1.000000e-01 : f32
    %206 = vector.broadcast %cst_115 : f32 to vector<16x16xf32>
    %207 = arith.mulf %206, %203 : vector<16x16xf32>
    %208 = arith.select %205, %203, %207 : vector<16x16xi1>, vector<16x16xf32>
    %c0_116 = arith.constant 0 : index
    %c0_117 = arith.constant 0 : index
    %c0_118 = arith.constant 0 : index
    %209 = vector.load %arg8[%c0_116, %c0_117, %c0_118] : memref<1x16x16xf32, #tpu.memory_space<vmem>>, vector<1x16x16xf32>
    %210 = vector.shape_cast %209 : vector<1x16x16xf32> to vector<16x16xf32>
    %211 = vector.shape_cast %208 : vector<16x16xf32> to vector<1x16x16xf32>
    tpu.vector_store %arg8[%c0_116, %c0_117, %c0_118], %211 {strides = array<i32>} : memref<1x16x16xf32, #tpu.memory_space<vmem>>, vector<1x16x16xf32>,
    return
  }
  func.func @transform_0(%arg0: i32) -> (i32, i32, i32, i32) {
    %c0_i32 = arith.constant 0 : i32
    %c0_i32_0 = arith.constant 0 : i32
    %c0_i32_1 = arith.constant 0 : i32
    %c0_i32_2 = arith.constant 0 : i32
    return %arg0, %c0_i32, %c0_i32_0, %c0_i32_1 : i32, i32, i32, i32
  }
  func.func @transform_1(%arg0: i32) -> (i32, i32, i32, i32) {
    %c0_i32 = arith.constant 0 : i32
    %c0_i32_0 = arith.constant 0 : i32
    %c0_i32_1 = arith.constant 0 : i32
    %c0_i32_2 = arith.constant 0 : i32
    %c0_i32_3 = arith.constant 0 : i32
    return %c0_i32, %c0_i32_0, %c0_i32_1, %c0_i32_2 : i32, i32, i32, i32
  }
  func.func @transform_2(%arg0: i32) -> (i32, i32) {
    %c0_i32 = arith.constant 0 : i32
    %c0_i32_0 = arith.constant 0 : i32
    %c0_i32_1 = arith.constant 0 : i32
    return %c0_i32, %c0_i32_0 : i32, i32
  }
  func.func @transform_3(%arg0: i32) -> (i32, i32, i32) {
    %c0_i32 = arith.constant 0 : i32
    %c0_i32_0 = arith.constant 0 : i32
    %c0_i32_1 = arith.constant 0 : i32
    %c0_i32_2 = arith.constant 0 : i32
    return %c0_i32, %c0_i32_0, %c0_i32_1 : i32, i32, i32
  }
  func.func @transform_4(%arg0: i32) -> (i32, i32) {
    %c0_i32 = arith.constant 0 : i32
    %c0_i32_0 = arith.constant 0 : i32
    %c0_i32_1 = arith.constant 0 : i32
    return %c0_i32, %c0_i32_0 : i32, i32
  }
  func.func @transform_5(%arg0: i32) -> (i32, i32) {
    %c0_i32 = arith.constant 0 : i32
    %c0_i32_0 = arith.constant 0 : i32
    %c0_i32_1 = arith.constant 0 : i32
    return %c0_i32, %c0_i32_0 : i32, i32
  }
  func.func @transform_6(%arg0: i32) -> (i32, i32, i32) {
    %c0_i32 = arith.constant 0 : i32
    %c0_i32_0 = arith.constant 0 : i32
    %c0_i32_1 = arith.constant 0 : i32
    return %arg0, %c0_i32, %c0_i32_0 : i32, i32, i32
  }
  func.func @transform_7(%arg0: i32) -> (i32, i32, i32) {
    %c0_i32 = arith.constant 0 : i32
    %c0_i32_0 = arith.constant 0 : i32
    %c0_i32_1 = arith.constant 0 : i32
    return %arg0, %c0_i32, %c0_i32_0 : i32, i32, i32
  }
}

</mosaic_0001>

<bundles_post_ra>
// kernel: seg_refine_forward.1
= control target key start
LH: loop header
LB: loop body
LE: loop exit
PB: predicated region body
PF: predicated region fallthrough
CT: control target
= control target key end

     0   :  { %s13099_s0 = inlined_call_operand.hbm [shape: f32[2,16,16,17], index: 0, kind: input, shape index: {}]   ;;  %s13100_s1 = inlined_call_operand.vmem [shape: f32[3,3,17,8], index: 1, kind: input, shape index: {}]   ;;  %s13101_s2 = inlined_call_operand.vmem [shape: f32[1,8], index: 2, kind: input, shape index: {}]   ;;  %s13102_s3 = inlined_call_operand.vmem [shape: f32[3,3,8], index: 3, kind: input, shape index: {}]   ;;  %s13103_s4 = inlined_call_operand.vmem [shape: f32[3,3], index: 4, kind: input, shape index: {}]   ;;  %s13104_s5 = inlined_call_operand.<no memory space> [shape: f32[1,1], index: 5, kind: input, shape index: {}]   ;;  %s13105_s6 = inlined_call_operand.hbm [shape: f32[2,16,16], index: 6, kind: output, shape index: {0}]   ;;  %s13106_s7 = inlined_call_operand.hbm [shape: f32[2,16,16], index: 7, kind: output, shape index: {1}]  }
   0x1   :  { %13 = sst [smem:[#allocation5]] %s13104_s5 }
   0x2   :  { %14 = vsyncpa [#allocation7], 0 }
   0x3   :  { %16 = vsyncpa [#allocation7 + $0x1], 0 }
   0x4   :  { %17 = vsyncpa [#allocation9], 0 }
   0x5   :  { %18 = vsyncpa [#allocation8], 0 }
   0x6   :  { %20 = vsyncpa [#allocation8 + $0x1], 0 }
   0x7   :  { %21 = vsyncpa [#allocation13], 0 }
   0x8   :  { %23 = vsyncpa [#allocation13 + $0x1], 0  ;;  %s8938_s26 = smov 0   ;;  %s8940_s27 = smov 0  }
   0x9   :  { %s8942_s28 = smov 0   ;;  %s8944_s29 = smov 0  }
   0xa LB: > { %s8959_s5 = sadd.s32 4294967295, %s8881_s29   ;;  %s7158_s30 = sadd.s32 4294967294, %s8881_s29   ;;  %s8881_s29 = sphi %s8944_s29, %s13414_s29   ;;  %s8877_s28 = sphi %s8942_s28, %s13413_s28   ;;  %s8873_s27 = sphi %s8940_s27, %s13412_s27   ;;  %s8869_s26 = sphi %s8938_s26, %s13411_s26  }
   0xb   : > { %s8963_s8 = sadd.s32 1, %s8881_s29   ;;  %s36_s9 = sadd.s32 1, %s8877_s28 }
   0xc   : > { %s33_s10 = ssub.s32 %s8881_s29, %s8963_s8  ;;  %p43_p0 = scmp.ne.s32.totalorder %s8877_s28, %s8873_s27 }
   0xd   : > { %p34_p1 = scmp.eq.s32.totalorder %s33_s10, 0  ;;  %p44_p2 = scmp.eq.s32.totalorder %s8881_s29, 0 }
   0xe   : > { %p49_p3 = scmp.ne.s32.totalorder %s8873_s27, %s8869_s26  ;;  %p13108_p4 = scmp.eq.s32.totalorder %s8959_s5, 0 }
   0xf   : > { %s8975_s11 = scalar_select %p34_p1, %s8877_s28, %s36_s9  }
  0x10   : > { %p8977_p5 = por %p44_p2, %p43_p0  ;;  %p8983_p6 = por %p13108_p4, %p49_p3 }
  0x11   : > { %p178_p7 = scmp.eq.s32.totalorder %s8959_s5, 1  ;;  %p184_p8 = scmp.eq.s32.totalorder %s7158_s30, 1 }
  0x12   : > { %s13203_s13 = scalar_select %p8983_p6, 1, 0 }
  0x13   : > { %p7159_p9 = scmp.ge.s32.totalorder %s8881_s29, 1  ;;  %p217_p10 = scmp.lt.s32.totalorder %s8881_s29, 3 }
  0x14   : > { %p8990_p11 = por %p178_p7, %p43_p0  ;;  %p8994_p12 = por %p184_p8, %p49_p3 }
  0x15   : > { %p8998_p13 = pnand %p7159_p9, %p217_p10  ;;  %s239_s19 = sshll.u32 %s13103_s4, 4  ;;  %s240_s19 = int_to_ptr.vmem [resolvable:$true] %s239_s19 }
  0x16   : > { %s13204_s14 = scalar_select %p8990_p11, 1, 0 }
  0x17   : > { %s13205_s15 = scalar_select %p8994_p12, 1, 0 }
  0x18   : > { %p8618_p1 = pneg %p8998_p13  ;;  %p8634_p2 = scmp.lt.s32.totalorder %s8881_s29, 2 }
  0x19   : > { %s253_s21 = sand.u32 1, %s8877_s28   ;;  %s8734_s24 = scalar_lea.vmem %s240_s19, 64 }
  0x1a   : > { %p9011_p7 = pnand %p8618_p1, %p13108_p4  ;;  %p9018_p3 = pnand %p8634_p2, %p8977_p5 }
  0x1b   : > { %s7162_s23 = sshll.u32 %s253_s21, 8  ;;  %p8735_p8 = scmp.ne.s32.totalorder %s240_s19, %s8734_s24 }
  0x1c   : > { %p8736_p9 = pneg %p9011_p7  ;;  %p8742_p12 = scmp.lt.s32.totalorder %s240_s19, %s240_s19 }
  0x1d   : > { %p8743_p11 = scmp.lt.s32.totalorder %s8734_s24, %s8734_s24 }
  0x1e   : > { %p8737_p10 = pnand %p8736_p9, %p8735_p8 }
  0x1f   : > { %p8744_p1 = por %p8743_p11, %p8742_p12 }
  0x20   : > { %p8738_p0 = pneg %p8737_p10 }
  0x22   : > { %p8745_p4 = pnand %p8744_p1, %p8738_p0 }
  0x24   : > { %8748 = shalt.err (!%p8745_p4)
}
  0x25   : > { %s8883_s25 = smov [#allocation10]   ;;  %s7508_s30 = sshll.u32 %s8881_s29, 12 }
  0x26   : > { %8621 = dma.vmem_to_smem (!%p9011_p7), %s240_s19, 64, %s8883_s25, [#allocation9]  }
  0x27   : > { %s257_s9 = scalar_lea.vmem [#allocation6], %s7162_s23  ;;  %s9030_s18 = scalar_lea.hbm %s13099_s0, %s7508_s30 }
  0x28   : > { %s264_s10 = sshll.u32 %s257_s9, 4  ;;  %s9034_s24 = scalar_lea.sflag [#allocation7], %s253_s21  ;;  %s9032_s10 = int_to_ptr.vmem [resolvable:$true] %s264_s10 }
  0x29   : > { %s8749_s20 = scalar_lea.hbm %s9030_s18, 4096  ;;  %p8751_p5 = pneg %p9018_p3 }
  0x2a   : > { %p8750_p4 = scmp.ne.s32.totalorder %s9030_s18, %s8749_s20  ;;  %s8754_s25 = scalar_lea.hbm %s13099_s0, 8192 }
  0x2b   : > { %p8755_p0 = scmp.lt.u32.totalorder %s9030_s18, %s13099_s0  ;;  %p8756_p2 = scmp.lt.u32.totalorder %s8754_s25, %s8749_s20 }
  0x2c   : > { %p8752_p11 = pnand %p8751_p5, %p8750_p4  ;;  %p8758_p8 = scmp.lt.u32.totalorder %s8749_s20, %s9030_s18 }
  0x2d   : > { %p8757_p7 = por %p8756_p2, %p8755_p0 }
  0x2e   : > { %p8753_p12 = pneg %p8752_p11 }
  0x2f   : > { %p8759_p9 = por %p8758_p8, %p8757_p7 }
  0x31   : > { %p8760_p10 = pnand %p8759_p9, %p8753_p12 }
  0x33   : > { %8763 = shalt.err (!%p8760_p10)
}
  0x34   : > { %s8764_s21 = scalar_lea.vmem %s9032_s10, 4096  ;;  %s8884_s12 = smov [#allocation6]  }
  0x35   : > { %p8765_p1 = scmp.ne.s32.totalorder %s9032_s10, %s8764_s21  ;;  %s8769_s17 = sshll.u32 %s8884_s12, 4  ;;  %s8770_s17 = int_to_ptr.vmem [resolvable:$false] %s8769_s17 }
  0x36   : > { %s8771_s19 = scalar_lea.vmem %s8770_s17, 8192  ;;  %p8772_p6 = scmp.lt.s32.totalorder %s9032_s10, %s8770_s17 }
  0x37   : > { %p8767_p4 = pnand %p8765_p1, %p8751_p5  ;;  %p8773_p0 = scmp.lt.s32.totalorder %s8771_s19, %s8764_s21 }
  0x39   : > { %p8768_p11 = pneg %p8767_p4  ;;  %p8774_p2 = por %p8773_p0, %p8772_p6 }
  0x3b   : > { %p8775_p7 = pnand %p8774_p2, %p8768_p11 }
  0x3d   : > { %8778 = shalt.err (!%p8775_p7)
}
  0x3e   : > { %s8885_s20 = smov 128   ;;  %s8886_s23 = smov 8  }
  0x3f   : > { %8625 = dma.hbm_to_vmem [thread:$0]  (!%p9018_p3), %s9030_s18, 4096, %s9032_s10, %s9034_s24, %s8885_s20, %s8885_s20, %s8886_s23  }
  0x40   : > { %276 = sbr.rel (%p8998_p13) target bundleno = 1790 (0x6fe), region = 44 }
  0x47   : > { %s9065_s25 = sand.u32 1, %s8873_s27   ;;  %p13209_p6 = scmp.ne.s32.totalorder %s13203_s13, 0 }
  0x48   : > { %s7166_s30 = sshll.u32 %s9065_s25, 8  ;;  %s279_s9 = scalar_lea.sflag [#allocation7], %s9065_s25 }
  0x49   : > { %s9069_s21 = scalar_lea.vmem [#allocation6], %s7166_s30 }
  0x4a   : > { %8852 = dma.done.wait (%p13209_p6), %s279_s9, 4096  }
  0x4b   : > { %8854 = vsyncadd (%p13209_p6), %s279_s9, 4294963200  ;;  %p13210_p3 = scmp.eq.s32.totalorder %s8959_s5, 0 }
  0x4d   : > { %8856 = dma.done.wait (%p13210_p3), [#allocation9], 64   ;;  %p13211_p13 = pmov %p13210_p3 }
  0x4f   : > { %8858 = vsyncadd (%p13211_p13), [#allocation9], 4294967232 }
  0x50   : > { %291 = sfence }
  0x51   : > { %v7170_v0 = vld [vmem:[%s13100_s1 + $0x18] sm:$0xff]  ;;  %v7171_v1 = vld [vmem:[%s13100_s1 + $0x20] sm:$0xff]  ;;  %vm323_vm0 = vcmask 138240   ;;  %v7312_v4 = vld [vmem:[%s13100_s1 + $0x68] sm:$0xff]  ;;  %v13110_v7 = vmov 0.0   ;;  %vm698_vm1 = vcmask 1040384  }
  0x52   : > { %v7311_v2 = vld [vmem:[%s13100_s1 + $0x60] sm:$0xff]  ;;  %v9088_v3 = vpack.c.bf16 %v7171_v1, %v7170_v0  ;;  %v9096_v5 = vld [vmem:[%s13100_s1 + $0x28] sm:$0x1]  ;;  %v9101_v6 = vld [vmem:[%s13100_s1 + $0x70] sm:$0x1]  ;;  %324 = vst.msk [vmem:[#allocation2] sm:$0xff] %vm323_vm0, %v13110_v7 }
  0x53   : > { %325 = vst.msk [vmem:[#allocation2 + $0x8] sm:$0xff] %vm323_vm0, %v13110_v7  ;;  %328 = vst.msk [vmem:[#allocation2 + $0x18] sm:$0xff] %vm323_vm0, %v13110_v7  ;;  %v9175_v8 = vpack.c.bf16 %v7312_v4, %v7311_v2  ;;  %vm326_vm2 = vcmask 132096   ;;  %v379_v9 = vld [vmem:[%s9069_s21] sm:$0xff]  ;;  %v380_v10 = vld [vmem:[%s9069_s21 + $0x8] sm:$0xff]  ;;  %vm549_vm3 = vcmask 1046528  }
  0x54   : > { %329 = vst.msk [vmem:[#allocation2 + $0x20] sm:$0xff] %vm323_vm0, %v13110_v7  ;;  %331 = vst.msk [vmem:[#allocation2 + $0x30] sm:$0xff] %vm323_vm0, %v13110_v7  ;;  %v7347_v11 = vld [vmem:[%s13100_s1 + $0x78] sm:$0xff]  ;;  %8313 = vmatprep.subr.bf16.mxu1 %v9088_v3  ;;  %v7348_v12 = vld [vmem:[%s13100_s1 + $0x80] sm:$0xff]  ;;  %vm1219_vm4 = vcmask 1045504   ;;  %vm3397_vm5 = vcmask 64512  }
  0x55   : > { %332 = vst.msk [vmem:[#allocation2 + $0x38] sm:$0xff] %vm323_vm0, %v13110_v7  ;;  %334 = vst.msk [vmem:[#allocation2 + $0x48] sm:$0xff] %vm323_vm0, %v13110_v7  ;;  %v381_v13 = vld [vmem:[%s9069_s21 + $0x10] sm:$0xff]  ;;  %v382_v14 = vld [vmem:[%s9069_s21 + $0x18] sm:$0xff]  ;;  %8329 = vmatprep.subr.bf16.mxu0 %v9175_v8  ;;  %8315 = vmatpush3.bf16.msra.mxu1 %v9088_v3  ;;  %v8332_v21 = vpack.c.bf16 %v7348_v12, %v7347_v11  ;;  %vm3400_vm6 = vcmask 58368   ;;  %vm3759_vm7 = vcmask 64513  }
  0x56   : > { %335 = vst.msk [vmem:[#allocation2 + $0x50] sm:$0xff] %vm323_vm0, %v13110_v7  ;;  %337 = vst.msk [vmem:[#allocation2 + $0x60] sm:$0xff] %vm323_vm0, %v13110_v7  ;;  %v383_v15 = vld [vmem:[%s9069_s21 + $0x20] sm:$0xff]  ;;  %v384_v16 = vld [vmem:[%s9069_s21 + $0x28] sm:$0xff]  ;;  %8331 = vmatpush3.bf16.msra.mxu0 %v9175_v8  ;;  %7830 = vmatprep.subr.msk.mxu1 %vm698_vm1, %v9096_v5  ;;  %vm3766_vm8 = vcmask 57344   ;;  %vm4149_vm9 = vcmask 64514  }
  0x57   : > { %338 = vst.msk [vmem:[#allocation2 + $0x68] sm:$0xff] %vm323_vm0, %v13110_v7  ;;  %340 = vst.msk [vmem:[#allocation2 + $0x78] sm:$0xff] %vm323_vm0, %v13110_v7  ;;  %v385_v17 = vld [vmem:[%s9069_s21 + $0x30] sm:$0xff]  ;;  %v386_v18 = vld [vmem:[%s9069_s21 + $0x38] sm:$0xff]  ;;  %8046 = vmatprep.subr.msk.mxu0 %vm698_vm1, %v9101_v6  ;;  %s7168_s20 = sshll.u32 %s9065_s25, 4  ;;  %s12884_s23 = sld [smem:[#allocation10 + $0x1]] }
  0x58   : > { %341 = vst.msk [vmem:[#allocation2 + $0x80] sm:$0xff] %vm323_vm0, %v13110_v7  ;;  %343 = vst.msk [vmem:[#allocation2 + $0x90] sm:$0xff] %vm323_vm0, %v13110_v7  ;;  %v387_v19 = vld [vmem:[%s9069_s21 + $0x40] sm:$0xff]  ;;  %v388_v20 = vld [vmem:[%s9069_s21 + $0x48] sm:$0xff]  ;;  %s12904_s30 = scalar_lea.vmem [#allocation11], %s7168_s20  ;;  %s12915_s9 = sld [smem:[#allocation10 + $0x2]] }
  0x59   : > { %344 = vst.msk [vmem:[#allocation2 + $0x98] sm:$0xff] %vm323_vm0, %v13110_v7  ;;  %346 = vst.msk [vmem:[#allocation2 + $0xa8] sm:$0xff] %vm323_vm0, %v13110_v7  ;;  %v389_v22 = vld [vmem:[%s9069_s21 + $0x50] sm:$0xff]  ;;  %v390_v23 = vld [vmem:[%s9069_s21 + $0x58] sm:$0xff]  ;;  %7831 = vmatpush3.msk.msra.mxu1 %vm698_vm1, %v9096_v5  ;;  %s7495_s16 = sld [smem:[#allocation10 + $0x81]]  ;;  %s7496_s22 = sld [smem:[#allocation10 + $0x82]] }
  0x5a   : > { %347 = vst.msk [vmem:[#allocation2 + $0xb0] sm:$0xff] %vm323_vm0, %v13110_v7  ;;  %349 = vst.msk [vmem:[#allocation2 + $0xc0] sm:$0xff] %vm323_vm0, %v13110_v7  ;;  %v391_v24 = vld [vmem:[%s9069_s21 + $0x60] sm:$0xff]  ;;  %v392_v25 = vld [vmem:[%s9069_s21 + $0x68] sm:$0xff]  ;;  %8047 = vmatpush3.msk.msra.mxu0 %vm698_vm1, %v9101_v6  ;;  %s7498_s10 = sld [smem:[#allocation10 + $0x101]]  ;;  %s8889_s18 = smov 127  }
  0x5b   : > { %350 = vst.msk [vmem:[#allocation2 + $0xc8] sm:$0xff] %vm323_vm0, %v13110_v7  ;;  %352 = vst.msk [vmem:[#allocation2 + $0xd8] sm:$0xff] %vm323_vm0, %v13110_v7  ;;  %v393_v26 = vld [vmem:[%s9069_s21 + $0x70] sm:$0xff]  ;;  %v9256_v27 = vld [vmem:[#allocation2] sm:$0xff]  ;;  %8333 = vmatprep.subr.bf16.mxu0 %v8332_v21  ;;  %s7499_s24 = sld [smem:[#allocation10 + $0x102]]  ;;  %s8890_s12 = smov 126  }
  0x5c   : > { %353 = vst.msk [vmem:[#allocation2 + $0xe0] sm:$0xff] %vm323_vm0, %v13110_v7  ;;  %355 = vst.msk [vmem:[#allocation2 + $0xf0] sm:$0xff] %vm323_vm0, %v13110_v7  ;;  %v9258_v28 = vld [vmem:[#allocation2 + $0x8] sm:$0xff]  ;;  %v394_v29 = vld [vmem:[%s9069_s21 + $0x78] sm:$0xff]  ;;  %v550_v30 = vrot.slane %v9256_v27, 1  ;;  %s7497_s13 = sld [smem:[#allocation10 + $0x100]] }
  0x5d   : > { %356 = vst.msk [vmem:[#allocation2 + $0xf8] sm:$0xff] %vm323_vm0, %v13110_v7  ;;  %358 = vst.msk [vmem:[#allocation2 + $0x108] sm:$0xff] %vm323_vm0, %v13110_v7  ;;  %v551_v31 = vrot.slane %v9258_v28, 1  ;;  %v498_v32 = vld [vmem:[%s13100_s1] sm:$0xff]  ;;  %v499_v33 = vld [vmem:[%s13100_s1 + $0x8] sm:$0xff]  ;;  %s7509_s17 = sshll.u32 %s8959_s5, 8 }
  0x5e   : > { %359 = vst.msk [vmem:[#allocation2 + $0x110] sm:$0xff] %vm323_vm0, %v13110_v7  ;;  %361 = vst.msk [vmem:[#allocation2 + $0x120] sm:$0xff] %vm323_vm0, %v13110_v7  ;;  %v8316_v36 = vpack.c.bf16 %v499_v33, %v498_v32  ;;  %v7349_v53 = vld [vmem:[%s13100_s1 + $0x88] sm:$0x1]  ;;  %v7383_v59 = vld [vmem:[%s13100_s1 + $0x90] sm:$0xff]  ;;  %p13408_p12 = scmp.ne.s32.totalorder %s13204_s14, 0 }
  0x5f   : > { %362 = vst.msk [vmem:[#allocation2 + $0x128] sm:$0xff] %vm323_vm0, %v13110_v7  ;;  %364 = vst.msk [vmem:[#allocation2 + $0x138] sm:$0xff] %vm323_vm0, %v13110_v7  ;;  %v552_v37 = vsel %vm549_vm3, %v550_v30, %v551_v31  ;;  %v7384_v63 = vld [vmem:[%s13100_s1 + $0x98] sm:$0xff]  ;;  %v404_v30 = vld [vmem:[%s9069_s21 + $0xc8] sm:$0xff] }
  0x60   : > { %365 = vst.msk [vmem:[#allocation2 + $0x140] sm:$0xff] %vm323_vm0, %v13110_v7  ;;  %367 = vst.msk [vmem:[#allocation2 + $0x150] sm:$0xff] %vm323_vm0, %v13110_v7  ;;  %7832 = vmatprep.mubr.msk.f32.mxu1 %vm323_vm0, %v552_v37  ;;  %8317 = vmatprep.subr.bf16.mxu1 %v8316_v36  ;;  %v9344_v6 = vpack.c.bf16 %v7384_v63, %v7383_v59  ;;  %v395_v12 = vld [vmem:[%s9069_s21 + $0x80] sm:$0xff]  ;;  %v406_v32 = vld [vmem:[%s9069_s21 + $0xd8] sm:$0xff] }
  0x61   : > { %368 = vst.msk [vmem:[#allocation2 + $0x158] sm:$0xff] %vm323_vm0, %v13110_v7  ;;  %370 = vst.msk [vmem:[#allocation2 + $0x168] sm:$0xff] %vm323_vm0, %v13110_v7  ;;  %v407_v33 = vld [vmem:[%s9069_s21 + $0xe0] sm:$0xff]  ;;  %v500_v37 = vld [vmem:[%s13100_s1 + $0x10] sm:$0x1] }
  0x62   : > { %371 = vst.msk [vmem:[#allocation2 + $0x170] sm:$0xff] %vm323_vm0, %v13110_v7  ;;  %373 = vst.msk [vmem:[#allocation2 + $0x180] sm:$0xff] %vm323_vm0, %v13110_v7 }
  0x63   : > { %374 = vst.msk [vmem:[#allocation2 + $0x188] sm:$0xff] %vm323_vm0, %v13110_v7  ;;  %376 = vst.msk [vmem:[#allocation2 + $0x198] sm:$0xff] %vm323_vm0, %v13110_v7 }
  0x64   : > { %377 = vst.msk [vmem:[#allocation2 + $0x1a0] sm:$0xff] %vm323_vm0, %v13110_v7  ;;  %412 = vst.msk [vmem:[#allocation2 + $0x19] sm:$0xff] %vm323_vm0, %v379_v9 }
  0x65   : > { %327 = vst.msk [vmem:[#allocation2 + $0x10] sm:$0x3] %vm326_vm2, %v13110_v7  ;;  %330 = vst.msk [vmem:[#allocation2 + $0x28] sm:$0x3] %vm326_vm2, %v13110_v7 }
  0x66   : > { %333 = vst.msk [vmem:[#allocation2 + $0x40] sm:$0x3] %vm326_vm2, %v13110_v7  ;;  %336 = vst.msk [vmem:[#allocation2 + $0x58] sm:$0x3] %vm326_vm2, %v13110_v7 }
  0x67   : > { %339 = vst.msk [vmem:[#allocation2 + $0x70] sm:$0x3] %vm326_vm2, %v13110_v7  ;;  %342 = vst.msk [vmem:[#allocation2 + $0x88] sm:$0x3] %vm326_vm2, %v13110_v7 }
  0x68   : > { %345 = vst.msk [vmem:[#allocation2 + $0xa0] sm:$0x3] %vm326_vm2, %v13110_v7  ;;  %348 = vst.msk [vmem:[#allocation2 + $0xb8] sm:$0x3] %vm326_vm2, %v13110_v7 }
  0x69   : > { %351 = vst.msk [vmem:[#allocation2 + $0xd0] sm:$0x3] %vm326_vm2, %v13110_v7  ;;  %354 = vst.msk [vmem:[#allocation2 + $0xe8] sm:$0x3] %vm326_vm2, %v13110_v7 }
  0x6a   : > { %357 = vst.msk [vmem:[#allocation2 + $0x100] sm:$0x3] %vm326_vm2, %v13110_v7  ;;  %360 = vst.msk [vmem:[#allocation2 + $0x118] sm:$0x3] %vm326_vm2, %v13110_v7 }
  0x6b   : > { %363 = vst.msk [vmem:[#allocation2 + $0x130] sm:$0x3] %vm326_vm2, %v13110_v7  ;;  %366 = vst.msk [vmem:[#allocation2 + $0x148] sm:$0x3] %vm326_vm2, %v13110_v7  ;;  %v9277_v35 = vld [vmem:[#allocation2 + $0x18] sm:$0xff] }
  0x6c   : > { %369 = vst.msk [vmem:[#allocation2 + $0x160] sm:$0x3] %vm326_vm2, %v13110_v7  ;;  %372 = vst.msk [vmem:[#allocation2 + $0x178] sm:$0x3] %vm326_vm2, %v13110_v7  ;;  %v9275_v34 = vld [vmem:[#allocation2 + $0x10] sm:$0x3] }
  0x6d   : > { %375 = vst.msk [vmem:[#allocation2 + $0x190] sm:$0x3] %vm326_vm2, %v13110_v7  ;;  %378 = vst.msk [vmem:[#allocation2 + $0x1a8] sm:$0x3] %vm326_vm2, %v13110_v7  ;;  %v553_v38 = vrot.slane %v9275_v34, 1  ;;  %v555_v40 = vrot.slane %v9277_v35, 1 }
  0x6e   : > { %413 = vst.msk [vmem:[#allocation2 + $0x21] sm:$0xff] %vm323_vm0, %v380_v10  ;;  %414 = vst.msk [vmem:[#allocation2 + $0x31] sm:$0xff] %vm323_vm0, %v381_v13  ;;  %v396_v13 = vld [vmem:[%s9069_s21 + $0x88] sm:$0xff] }
  0x6f   : > { %415 = vst.msk [vmem:[#allocation2 + $0x39] sm:$0xff] %vm323_vm0, %v382_v14  ;;  %416 = vst.msk [vmem:[#allocation2 + $0x49] sm:$0xff] %vm323_vm0, %v383_v15  ;;  %v554_v47 = vsel %vm549_vm3, %v551_v31, %v553_v38  ;;  %v397_v14 = vld [vmem:[%s9069_s21 + $0x90] sm:$0xff] }
  0x70   : > { %417 = vst.msk [vmem:[#allocation2 + $0x51] sm:$0xff] %vm323_vm0, %v384_v16  ;;  %418 = vst.msk [vmem:[#allocation2 + $0x61] sm:$0xff] %vm323_vm0, %v385_v17  ;;  %7833 = vmatmul.mubr.msk.f32.vlgmr.msra.gmra.mrb[0].mxu1 %vm323_vm0, %v554_v47  ;;  %v405_v31 = vld [vmem:[%s9069_s21 + $0xd0] sm:$0xff] }
  0x71   : > { %419 = vst.msk [vmem:[#allocation2 + $0x69] sm:$0xff] %vm323_vm0, %v386_v18  ;;  %420 = vst.msk [vmem:[#allocation2 + $0x79] sm:$0xff] %vm323_vm0, %v387_v19  ;;  %8319 = vmatpush3.bf16.msra.mxu1 %v8316_v36  ;;  %v398_v19 = vld [vmem:[%s9069_s21 + $0x98] sm:$0xff]  ;;  %v408_v36 = vld [vmem:[%s9069_s21 + $0xe8] sm:$0xff] }
  0x72   : > { %421 = vst.msk [vmem:[#allocation2 + $0x81] sm:$0xff] %vm323_vm0, %v388_v20  ;;  %422 = vst.msk [vmem:[#allocation2 + $0x91] sm:$0xff] %vm323_vm0, %v389_v22  ;;  %v399_v20 = vld [vmem:[%s9069_s21 + $0xa0] sm:$0xff]  ;;  %7884 = vmatprep.subr.msk.mxu1 %vm698_vm1, %v500_v37 }
  0x73   : > { %423 = vst.msk [vmem:[#allocation2 + $0x99] sm:$0xff] %vm323_vm0, %v390_v23  ;;  %424 = vst.msk [vmem:[#allocation2 + $0xa9] sm:$0xff] %vm323_vm0, %v391_v24 }
  0x74   : > { %425 = vst.msk [vmem:[#allocation2 + $0xb1] sm:$0xff] %vm323_vm0, %v392_v25  ;;  %426 = vst.msk [vmem:[#allocation2 + $0xc1] sm:$0xff] %vm323_vm0, %v393_v26  ;;  %v401_v25 = vld [vmem:[%s9069_s21 + $0xb0] sm:$0xff]  ;;  %v402_v26 = vld [vmem:[%s9069_s21 + $0xb8] sm:$0xff] }
  0x75   : > { %427 = vst.msk [vmem:[#allocation2 + $0xc9] sm:$0xff] %vm323_vm0, %v394_v29  ;;  %13212 = vst [vmem:[#allocation18_spill] sm:$0xff] %v9277_v35  ;;  %v9281_v39 = vld [vmem:[#allocation2 + $0x20] sm:$0xff]  ;;  %v9284_v41 = vld [vmem:[#allocation2 + $0x28] sm:$0x3]  ;;  %7885 = vmatpush3.msk.msra.mxu1 %vm698_vm1, %v500_v37 }
  0x76   : > { %13213 = vst [vmem:[#allocation19_spill] sm:$0xff] %v9281_v39  ;;  %v556_v42 = vrot.slane %v9281_v39, 1  ;;  %v558_v43 = vrot.slane %v9284_v41, 1  ;;  %v9289_v44 = vld [vmem:[#allocation2 + $0x30] sm:$0xff]  ;;  %v9291_v45 = vld [vmem:[#allocation2 + $0x38] sm:$0xff]  ;;  %v9293_v46 = vld [vmem:[#allocation2 + $0x48] sm:$0xff] }
  0x77   : > { %v560_v48 = vrot.slane %v9289_v44, 1  ;;  %v561_v49 = vrot.slane %v9291_v45, 1  ;;  %v9298_v50 = vld [vmem:[#allocation2 + $0x40] sm:$0x3]  ;;  %v9300_v51 = vld [vmem:[#allocation2 + $0x50] sm:$0xff]  ;;  %v565_v52 = vrot.slane %v9293_v46, 1 }
  0x78   : > { %v557_v54 = vsel %vm549_vm3, %v555_v40, %v556_v42  ;;  %v559_v55 = vsel %vm549_vm3, %v556_v42, %v558_v43  ;;  %v563_v56 = vrot.slane %v9298_v50, 1  ;;  %v566_v57 = vrot.slane %v9300_v51, 1  ;;  %v9311_v58 = vld [vmem:[#allocation2 + $0x58] sm:$0x3]  ;;  %v9321_v61 = vld [vmem:[#allocation2 + $0x60] sm:$0xff]  ;;  %v9323_v62 = vld [vmem:[#allocation2 + $0x68] sm:$0xff] }
  0x79   : > { %8048 = vmatprep.mubr.msk.f32.mxu0 %vm323_vm0, %v557_v54  ;;  %7835 = vmatprep.mubr.msk.f32.mxu1 %vm323_vm0, %v557_v54  ;;  %v9319_v60 = vsel %vm549_vm3, %v560_v48, %v561_v49  ;;  %v568_v1 = vrot.slane %v9311_v58, 1  ;;  %v570_v3 = vrot.slane %v9321_v61, 1  ;;  %v571_v4 = vrot.slane %v9323_v62, 1  ;;  %v9341_v5 = vld [vmem:[#allocation2 + $0x70] sm:$0x3]  ;;  %v9348_v9 = vld [vmem:[#allocation2 + $0x78] sm:$0xff] }
  0x7a   : > { %13214 = vst [vmem:[#allocation20_spill] sm:$0xff] %v9319_v60  ;;  %8049 = vmatmul.mubr.msk.f32.vlgmr.msra.gmra.mrb[0].mxu0 %vm323_vm0, %v559_v55  ;;  %v9332_v0 = vsel %vm549_vm3, %v561_v49, %v563_v56  ;;  %7836 = vmatmul.mubr.msk.f32.gmra.mrb[2].mxu1 %vm323_vm0, %v559_v55  ;;  %v9337_v2 = vsel %vm549_vm3, %v565_v52, %v566_v57  ;;  %v9350_v10 = vld [vmem:[#allocation2 + $0x80] sm:$0xff]  ;;  %v9354_v11 = vld [vmem:[#allocation2 + $0x88] sm:$0x3]  ;;  %v573_v16 = vrot.slane %v9341_v5, 1  ;;  %v9366_v17 = vld [vmem:[#allocation2 + $0x90] sm:$0xff] }
  0x7b   : > { %8335 = vmatpush3.bf16.msra.mxu0 %v8332_v21  ;;  %8051 = vmatprep.mubr.msk.f32.mxu0 %vm323_vm0, %v9319_v60  ;;  %13215 = vst [vmem:[#allocation21_spill] sm:$0xff] %v9332_v0  ;;  %13216 = vst [vmem:[#allocation22_spill] sm:$0xff] %v9337_v2  ;;  %v9362_v15 = vsel %vm549_vm3, %v566_v57, %v568_v1  ;;  %v9368_v18 = vld [vmem:[#allocation2 + $0x98] sm:$0xff]  ;;  %v400_v21 = vld [vmem:[%s9069_s21 + $0xa8] sm:$0xff]  ;;  %v9379_v22 = vsel %vm549_vm3, %v570_v3, %v571_v4  ;;  %v575_v23 = vrot.slane %v9348_v9, 1 }
  0x7c   : > { %8100 = vmatprep.subr.msk.mxu0 %vm698_vm1, %v7349_v53  ;;  %7838 = vmatprep.mubr.msk.f32.mxu1 %vm323_vm0, %v9319_v60  ;;  %13217 = vst [vmem:[#allocation23_spill] sm:$0xff] %v9362_v15  ;;  %428 = vst.msk [vmem:[#allocation2 + $0xd9] sm:$0xff] %vm323_vm0, %v395_v12  ;;  %v576_v24 = vrot.slane %v9350_v10, 1  ;;  %v403_v29 = vld [vmem:[%s9069_s21 + $0xc0] sm:$0xff]  ;;  %v9411_v38 = vsel %vm549_vm3, %v571_v4, %v573_v16  ;;  %v578_v40 = vrot.slane %v9354_v11, 1  ;;  %v409_v42 = vld [vmem:[%s9069_s21 + $0xf0] sm:$0xff] }
  0x7d   : > { %429 = vst.msk [vmem:[#allocation2 + $0xe1] sm:$0xff] %vm323_vm0, %v396_v13  ;;  %430 = vst.msk [vmem:[#allocation2 + $0xf1] sm:$0xff] %vm323_vm0, %v397_v14  ;;  %v580_v47 = vrot.slane %v9366_v17, 1  ;;  %v581_v48 = vrot.slane %v9368_v18, 1  ;;  %v9425_v49 = vld [vmem:[#allocation2 + $0xa0] sm:$0x3] }
  0x7e   : > { %8052 = vmatmul.mubr.msk.f32.gmra.mrb[2].mxu0 %vm323_vm0, %v9332_v0  ;;  %7839 = vmatmul.mubr.msk.f32.gmra.mrb[4].mxu1 %vm323_vm0, %v9332_v0  ;;  %13218 = vst [vmem:[#allocation24_spill] sm:$0xff] %v9379_v22  ;;  %431 = vst.msk [vmem:[#allocation2 + $0xf9] sm:$0xff] %vm323_vm0, %v398_v19  ;;  %v9421_v43 = vsel %vm549_vm3, %v575_v23, %v576_v24  ;;  %v410_v52 = vld [vmem:[%s9069_s21 + $0xf8] sm:$0xff]  ;;  %v9442_v55 = vsel %vm549_vm3, %v576_v24, %v578_v40  ;;  %v583_v56 = vrot.slane %v9425_v49, 1  ;;  %v9452_v1 = vld [vmem:[#allocation2 + $0xb8] sm:$0x3] }
  0x7f   : > { %8054 = vmatprep.mubr.msk.f32.mxu0 %vm323_vm0, %v9337_v2  ;;  %8101 = vmatpush3.msk.msra.mxu0 %vm698_vm1, %v7349_v53  ;;  %432 = vst.msk [vmem:[#allocation2 + $0x109] sm:$0xff] %vm323_vm0, %v399_v20  ;;  %433 = vst.msk [vmem:[#allocation2 + $0x111] sm:$0xff] %vm323_vm0, %v400_v21  ;;  %v9431_v53 = vld [vmem:[#allocation2 + $0xa8] sm:$0xff]  ;;  %v9433_v54 = vld [vmem:[#allocation2 + $0xb0] sm:$0xff]  ;;  %v9448_v57 = vsel %vm549_vm3, %v580_v47, %v581_v48  ;;  %v588_v13 = vrot.slane %v9452_v1, 1  ;;  %v1235_v7 = vrot.slane %v9293_v46, 2 }
  0x80   : > { %8337 = vmatprep.subr.bf16.mxu0 %v9344_v6  ;;  %7841 = vmatprep.mubr.msk.f32.mxu1 %vm323_vm0, %v9337_v2  ;;  %434 = vst.msk [vmem:[#allocation2 + $0x121] sm:$0xff] %vm323_vm0, %v401_v25  ;;  %435 = vst.msk [vmem:[#allocation2 + $0x129] sm:$0xff] %vm323_vm0, %v402_v26  ;;  %v585_v59 = vrot.slane %v9431_v53, 1  ;;  %v586_v63 = vrot.slane %v9433_v54, 1  ;;  %v9456_v3 = vld [vmem:[#allocation2 + $0xc0] sm:$0xff]  ;;  %v9458_v4 = vld [vmem:[#allocation2 + $0xc8] sm:$0xff]  ;;  %v9465_v12 = vsel %vm549_vm3, %v581_v48, %v583_v56 }
  0x81   : > { %436 = vst.msk [vmem:[#allocation2 + $0x139] sm:$0xff] %vm323_vm0, %v403_v29  ;;  %437 = vst.msk [vmem:[#allocation2 + $0x141] sm:$0xff] %vm323_vm0, %v404_v30  ;;  %v590_v16 = vrot.slane %v9456_v3, 1  ;;  %v591_v19 = vrot.slane %v9458_v4, 1  ;;  %v9475_v20 = vld [vmem:[#allocation2 + $0xd0] sm:$0x3] }
  0x82   : > { %8055 = vmatmul.mubr.msk.f32.gmra.mrb[4].mxu0 %vm323_vm0, %v9362_v15  ;;  %438 = vst.msk [vmem:[#allocation2 + $0x151] sm:$0xff] %vm323_vm0, %v405_v31  ;;  %439 = vst.msk [vmem:[#allocation2 + $0x159] sm:$0xff] %vm323_vm0, %v406_v32  ;;  %7842 = vmatmul.mubr.msk.f32.gmra.mrb[6].mxu1 %vm323_vm0, %v9362_v15  ;;  %v9471_v14 = vsel %vm549_vm3, %v585_v59, %v586_v63  ;;  %v9484_v21 = vsel %vm549_vm3, %v586_v63, %v588_v13  ;;  %v593_v23 = vrot.slane %v9475_v20, 1  ;;  %s7494_s21 = sld [smem:[#allocation10 + $0x80]] }
  0x83   : > { %8057 = vmatprep.mubr.msk.f32.mxu0 %vm323_vm0, %v9379_v22  ;;  %13219 = vst [vmem:[#allocation25_spill] sm:$0xff] %v9411_v38  ;;  %440 = vst.msk [vmem:[#allocation2 + $0x169] sm:$0xff] %vm323_vm0, %v407_v33  ;;  %7844 = vmatprep.mubr.msk.f32.mxu1 %vm323_vm0, %v9379_v22  ;;  %v9487_v24 = vld [vmem:[#allocation2 + $0xd8] sm:$0xff]  ;;  %v9494_v26 = vsel %vm549_vm3, %v590_v16, %v591_v19  ;;  %v1225_v29 = vrot.slane %v9277_v35, 2  ;;  %v1226_v30 = vrot.slane %v9281_v39, 2  ;;  %v1230_v48 = vrot.slane %v9289_v44, 2 }
  0x84   : > { %441 = vst.msk [vmem:[#allocation2 + $0x171] sm:$0xff] %vm323_vm0, %v408_v36  ;;  %13220 = vst [vmem:[#allocation26_spill] sm:$0xff] %v9421_v43  ;;  %v9489_v25 = vld [vmem:[#allocation2 + $0xe0] sm:$0xff]  ;;  %v595_v31 = vrot.slane %v9487_v24, 1  ;;  %v9504_v33 = vld [vmem:[#allocation2 + $0xe8] sm:$0x3]  ;;  %v9510_v37 = vsel %vm549_vm3, %v591_v19, %v593_v23 }
  0x85   : > { %442 = vst.msk [vmem:[#allocation2 + $0x181] sm:$0xff] %vm323_vm0, %v409_v42  ;;  %443 = vst.msk [vmem:[#allocation2 + $0x189] sm:$0xff] %vm323_vm0, %v410_v52  ;;  %v596_v32 = vrot.slane %v9489_v25, 1  ;;  %v1228_v36 = vrot.slane %v9284_v41, 2  ;;  %v9512_v40 = vld [vmem:[#allocation2 + $0xf0] sm:$0xff]  ;;  %v9514_v42 = vld [vmem:[#allocation2 + $0xf8] sm:$0xff]  ;;  %v9519_v47 = vsel %vm1219_vm4, %v1225_v29, %v1226_v30 }
  0x86   : > { %8058 = vmatmul.mubr.msk.f32.gmra.mrb[6].mxu0 %vm323_vm0, %v9411_v38  ;;  %13221 = vst [vmem:[#allocation27_spill] sm:$0xff] %v9442_v55  ;;  %7845 = vmatmul.mubr.msk.f32.gmra.mrb[8].mxu1 %vm323_vm0, %v9411_v38  ;;  %13222 = vst [vmem:[#allocation28_spill] sm:$0xff] %v9448_v57  ;;  %v1231_v41 = vrot.slane %v9291_v45, 2  ;;  %v598_v52 = vrot.slane %v9504_v33, 1  ;;  %v600_v59 = vrot.slane %v9512_v40, 1  ;;  %v601_v63 = vrot.slane %v9514_v42, 1 }
  0x87   : > { %8060 = vmatprep.mubr.msk.f32.mxu0 %vm323_vm0, %v9421_v43  ;;  %7847 = vmatprep.mubr.msk.f32.mxu1 %vm323_vm0, %v9421_v43  ;;  %13223 = vst [vmem:[#allocation29_spill] sm:$0xff] %v9465_v12  ;;  %13224 = vst [vmem:[#allocation30_spill] sm:$0xff] %v9471_v14  ;;  %v9529_v56 = vsel %vm549_vm3, %v595_v31, %v596_v32  ;;  %v9533_v13 = vld [vmem:[#allocation2 + $0x100] sm:$0x3]  ;;  %v9538_v16 = vsel %vm1219_vm4, %v1226_v30, %v1228_v36  ;;  %v1233_v19 = vrot.slane %v9298_v50, 2  ;;  %v9541_v23 = vld [vmem:[#allocation2 + $0x108] sm:$0xff] }
  0x88   : > { %13225 = vst [vmem:[#allocation31_spill] sm:$0xff] %v9484_v21  ;;  %13226 = vst [vmem:[#allocation32_spill] sm:$0xff] %v9494_v26  ;;  %v9543_v29 = vld [vmem:[#allocation2 + $0x110] sm:$0xff]  ;;  %v9548_v31 = vsel %vm1219_vm4, %v1230_v48, %v1231_v41  ;;  %v9555_v30 = vsel %vm549_vm3, %v596_v32, %v598_v52  ;;  %v603_v50 = vrot.slane %v9533_v13, 1  ;;  %v7385_v36 = vld [vmem:[%s13100_s1 + $0xa0] sm:$0x1]  ;;  %v9570_v32 = vsel %vm549_vm3, %v600_v59, %v601_v63 }
  0x89   : > { %13227 = vst [vmem:[#allocation33_spill] sm:$0xff] %v9510_v37  ;;  %13228 = vst [vmem:[#allocation34_spill] sm:$0xff] %v9529_v56  ;;  %v7239_v48 = vld [vmem:[%s13100_s1 + $0x30] sm:$0xff]  ;;  %v605_v52 = vrot.slane %v9541_v23, 1  ;;  %v9586_v59 = vsel %vm1219_vm4, %v1231_v41, %v1233_v19  ;;  %v9591_v43 = vld [vmem:[#allocation2 + $0x128] sm:$0xff]  ;;  %v1241_v22 = vrot.slane %v9323_v62, 2 }
  0x8a   : > { %8061 = vmatmul.mubr.msk.f32.gmra.mrb[8].mxu0 %vm323_vm0, %v9442_v55  ;;  %7848 = vmatmul.mubr.msk.f32.gmra.mrb[10].mxu1 %vm323_vm0, %v9442_v55  ;;  %13229 = vst [vmem:[#allocation35_spill] sm:$0xff] %v9555_v30  ;;  %13230 = vst [vmem:[#allocation36_spill] sm:$0xff] %v9570_v32  ;;  %v9589_v55 = vld [vmem:[#allocation2 + $0x120] sm:$0xff]  ;;  %v1246_v2 = vrot.slane %v9350_v10, 2  ;;  %v9663_v0 = vld [vmem:[#allocation2 + $0x158] sm:$0xff]  ;;  %v1250_v60 = vrot.slane %v9366_v17, 2 }
  0x8b   : > { %8063 = vmatprep.mubr.msk.f32.mxu0 %vm323_vm0, %v9448_v57  ;;  %7850 = vmatprep.mubr.msk.f32.mxu1 %vm323_vm0, %v9448_v57  ;;  %13231 = vst [vmem:[#allocation37_spill] sm:$0xff] %v9586_v59  ;;  %v1238_v57 = vrot.slane %v9311_v58, 2  ;;  %v9606_v58 = vsel %vm549_vm3, %v601_v63, %v603_v50  ;;  %v610_v15 = vrot.slane %v9589_v55, 1  ;;  %v9627_v63 = vld [vmem:[#allocation2 + $0x138] sm:$0xff]  ;;  %v9629_v50 = vld [vmem:[#allocation2 + $0x140] sm:$0xff] }
  0x8c   : > { %13233 = vst [vmem:[#allocation39_spill] sm:$0xff] %v9606_v58 }
  0x8e   : > { %8064 = vmatmul.mubr.msk.f32.gmra.mrb[10].mxu0 %vm323_vm0, %v9465_v12  ;;  %7851 = vmatmul.mubr.msk.f32.gmra.mrb[12].mxu1 %vm323_vm0, %v9465_v12  ;;  %v7420_v12 = vld [vmem:[%s13100_s1 + $0xb0] sm:$0xff] }
  0x8f   : > { %8066 = vmatprep.mubr.msk.f32.mxu0 %vm323_vm0, %v9471_v14  ;;  %7853 = vmatprep.mubr.msk.f32.mxu1 %vm323_vm0, %v9471_v14  ;;  %v7419_v14 = vld [vmem:[%s13100_s1 + $0xa8] sm:$0xff] }
  0x92   : > { %8067 = vmatmul.mubr.msk.f32.gmra.mrb[12].mxu0 %vm323_vm0, %v9484_v21  ;;  %7854 = vmatmul.mubr.msk.f32.gmra.mrb[14].mxu1 %vm323_vm0, %v9484_v21  ;;  %v9574_v21 = vld [vmem:[#allocation2 + $0x118] sm:$0x3] }
  0x93   : > { %8069 = vmatprep.mubr.msk.f32.mxu0 %vm323_vm0, %v9494_v26  ;;  %7856 = vmatprep.mubr.msk.f32.mxu1 %vm323_vm0, %v9494_v26  ;;  %v1236_v26 = vrot.slane %v9300_v51, 2  ;;  %v608_v19 = vrot.slane %v9574_v21, 1 }
  0x95   : > { %v9596_v38 = vsel %vm1219_vm4, %v1235_v7, %v1236_v26 }
  0x96   : > { %8070 = vmatmul.mubr.msk.f32.gmra.mrb[14].mxu0 %vm323_vm0, %v9510_v37  ;;  %7857 = vmatmul.mubr.msk.f32.gmra.mrb[16].mxu1 %vm323_vm0, %v9510_v37  ;;  %v7240_v37 = vld [vmem:[%s13100_s1 + $0x38] sm:$0xff]  ;;  %13232 = vst [vmem:[#allocation38_spill] sm:$0xff] %v9596_v38 }
  0x97   : > { %8102 = vmatprep.mubr.msk.f32.mxu0 %vm323_vm0, %v9519_v47  ;;  %7859 = vmatprep.mubr.msk.f32.mxu1 %vm323_vm0, %v9529_v56  ;;  %v606_v56 = vrot.slane %v9543_v29, 1  ;;  %v9601_v41 = vpack.c.bf16 %v7240_v37, %v7239_v48  ;;  %v611_v37 = vrot.slane %v9591_v43, 1  ;;  %v9618_v48 = vld [vmem:[#allocation2 + $0x130] sm:$0x3] }
  0x99   : > { %v9614_v7 = vsel %vm549_vm3, %v605_v52, %v606_v56  ;;  %8321 = vmatprep.subr.bf16.mxu1 %v9601_v41 }
  0x9a   : > { %8103 = vmatmul.mubr.msk.f32.vlgmr.msra.gmra.mrb[0].mxu0 %vm323_vm0, %v9538_v16  ;;  %7860 = vmatmul.mubr.msk.f32.gmra.mrb[18].mxu1 %vm323_vm0, %v9555_v30  ;;  %v9609_v30 = vpack.c.bf16 %v7420_v12, %v7419_v14  ;;  %13234 = vst [vmem:[#allocation40_spill] sm:$0xff] %v9614_v7  ;;  %v9624_v12 = vsel %vm1219_vm4, %v1236_v26, %v1238_v57  ;;  %v1243_v14 = vrot.slane %v9341_v5, 2  ;;  %v613_v57 = vrot.slane %v9618_v48, 1 }
  0x9b   : > { %8339 = vmatpush3.bf16.msra.mxu0 %v9344_v6  ;;  %8105 = vmatprep.mubr.msk.f32.mxu0 %vm323_vm0, %v9548_v31  ;;  %v1240_v6 = vrot.slane %v9321_v61, 2  ;;  %13235 = vst [vmem:[#allocation41_spill] sm:$0xff] %v9624_v12  ;;  %v9643_v5 = vsel %vm549_vm3, %v606_v56, %v608_v19  ;;  %v9649_v26 = vsel %vm549_vm3, %v610_v15, %v611_v37  ;;  %v1248_v19 = vrot.slane %v9354_v11, 2 }
  0x9c   : > { %8154 = vmatprep.subr.msk.mxu0 %vm698_vm1, %v7385_v36  ;;  %7862 = vmatprep.mubr.msk.f32.mxu1 %vm323_vm0, %v9570_v32  ;;  %v1245_v32 = vrot.slane %v9348_v9, 2  ;;  %13237 = vst [vmem:[#allocation43_spill] sm:$0xff] %v9643_v5  ;;  %13238 = vst [vmem:[#allocation44_spill] sm:$0xff] %v9649_v26  ;;  %v9658_v56 = vsel %vm1219_vm4, %v1241_v22, %v1243_v14 }
  0x9d   : > { %v9635_v52 = vsel %vm1219_vm4, %v1240_v6, %v1241_v22  ;;  %v616_v6 = vrot.slane %v9629_v50, 1  ;;  %13239 = vst [vmem:[#allocation45_spill] sm:$0xff] %v9658_v56  ;;  %v9675_v22 = vsel %vm549_vm3, %v611_v37, %v613_v57  ;;  %v9690_v37 = vsel %vm1219_vm4, %v1246_v2, %v1248_v19 }
  0x9e   : > { %8106 = vmatmul.mubr.msk.f32.gmra.mrb[2].mxu0 %vm323_vm0, %v9586_v59  ;;  %7863 = vmatmul.mubr.msk.f32.gmra.mrb[20].mxu1 %vm323_vm0, %v9606_v58  ;;  %13236 = vst [vmem:[#allocation42_spill] sm:$0xff] %v9635_v52  ;;  %v9653_v58 = vld [vmem:[#allocation2 + $0x148] sm:$0x3]  ;;  %v9668_v15 = vsel %vm1219_vm4, %v1245_v32, %v1246_v2  ;;  %13241 = vst [vmem:[#allocation47_spill] sm:$0xff] %v9675_v22  ;;  %v1253_v57 = vrot.slane %v9425_v49, 2  ;;  %v1256_v59 = vrot.slane %v9433_v54, 2 }
  0x9f   : > { %8108 = vmatprep.mubr.msk.f32.mxu0 %vm323_vm0, %v9596_v38  ;;  %8155 = vmatpush3.msk.msra.mxu0 %vm698_vm1, %v7385_v36  ;;  %v615_v36 = vrot.slane %v9627_v63, 1  ;;  %13240 = vst [vmem:[#allocation46_spill] sm:$0xff] %v9668_v15  ;;  %v618_v11 = vrot.slane %v9653_v58, 1  ;;  %13243 = vst [vmem:[#allocation49_spill] sm:$0xff] %v9690_v37  ;;  %v1255_v38 = vrot.slane %v9431_v53, 2 }
  0xa0   : > { %8341 = vmatprep.subr.bf16.mxu0 %v9609_v30  ;;  %7865 = vmatprep.mubr.msk.f32.mxu1 %vm323_vm0, %v9614_v7  ;;  %v9661_v7 = vld [vmem:[#allocation2 + $0x150] sm:$0xff] }
  0xa1   : > { %v9681_v14 = vsel %vm549_vm3, %v615_v36, %v616_v6  ;;  %v620_v32 = vrot.slane %v9661_v7, 1  ;;  %v9707_v2 = vsel %vm549_vm3, %v616_v6, %v618_v11  ;;  %v1258_v11 = vrot.slane %v9452_v1, 2 }
  0xa2   : > { %8109 = vmatmul.mubr.msk.f32.gmra.mrb[4].mxu0 %vm323_vm0, %v9624_v12  ;;  %7866 = vmatmul.mubr.msk.f32.gmra.mrb[22].mxu1 %vm323_vm0, %v9643_v5  ;;  %v1251_v12 = vrot.slane %v9368_v18, 2  ;;  %13242 = vst [vmem:[#allocation48_spill] sm:$0xff] %v9681_v14  ;;  %v621_v5 = vrot.slane %v9663_v0, 1  ;;  %13246 = vst [vmem:[#allocation52_spill] sm:$0xff] %v9707_v2 }
  0xa3   : > { %8111 = vmatprep.mubr.msk.f32.mxu0 %vm323_vm0, %v9635_v52  ;;  %7868 = vmatprep.mubr.msk.f32.mxu1 %vm323_vm0, %v9649_v26  ;;  %v9685_v52 = vld [vmem:[#allocation2 + $0x160] sm:$0x3]  ;;  %v9693_v26 = vld [vmem:[#allocation2 + $0x168] sm:$0xff] }
  0xa4   : > { %v9700_v36 = vsel %vm1219_vm4, %v1250_v60, %v1251_v12  ;;  %v623_v49 = vrot.slane %v9685_v52, 1  ;;  %v9713_v19 = vsel %vm549_vm3, %v620_v32, %v621_v5  ;;  %v625_v60 = vrot.slane %v9693_v26, 1 }
  0xa5   : > { %13245 = vst [vmem:[#allocation51_spill] sm:$0xff] %v9700_v36  ;;  %13247 = vst [vmem:[#allocation53_spill] sm:$0xff] %v9713_v19  ;;  %v9722_v6 = vsel %vm1219_vm4, %v1251_v12, %v1253_v57  ;;  %v9728_v32 = vsel %vm1219_vm4, %v1255_v38, %v1256_v59  ;;  %v9746_v38 = vsel %vm1219_vm4, %v1256_v59, %v1258_v11  ;;  %v1263_v57 = vrot.slane %v9475_v20, 2 }
  0xa6   : > { %8112 = vmatmul.mubr.msk.f32.gmra.mrb[6].mxu0 %vm323_vm0, %v9658_v56  ;;  %v9695_v56 = vld [vmem:[#allocation2 + $0x170] sm:$0xff]  ;;  %7869 = vmatmul.mubr.msk.f32.gmra.mrb[24].mxu1 %vm323_vm0, %v9675_v22  ;;  %v1268_v59 = vrot.slane %v9504_v33, 2  ;;  %v1271_v11 = vrot.slane %v9514_v42, 2 }
  0xa7   : > { %8114 = vmatprep.mubr.msk.f32.mxu0 %vm323_vm0, %v9668_v15  ;;  %13244 = vst [vmem:[#allocation50_spill] sm:$0xff] %v9695_v56  ;;  %7871 = vmatprep.mubr.msk.f32.mxu1 %vm323_vm0, %v9681_v14  ;;  %v626_v22 = vrot.slane %v9695_v56, 1  ;;  %v9717_v15 = vld [vmem:[#allocation2 + $0x178] sm:$0x3]  ;;  %v1260_v14 = vrot.slane %v9456_v3, 2 }
  0xa8   : > { %v628_v12 = vrot.slane %v9717_v15, 1 }
  0xa9   : > { %v9741_v1 = vsel %vm549_vm3, %v625_v60, %v626_v22 }
  0xaa   : > { %8115 = vmatmul.mubr.msk.f32.gmra.mrb[8].mxu0 %vm323_vm0, %v9690_v37  ;;  %7872 = vmatmul.mubr.msk.f32.gmra.mrb[26].mxu1 %vm323_vm0, %v9707_v2  ;;  %v1261_v37 = vrot.slane %v9458_v4, 2  ;;  %13249 = vst [vmem:[#allocation55_spill] sm:$0xff] %v9741_v1  ;;  %v9759_v60 = vsel %vm549_vm3, %v626_v22, %v628_v12  ;;  %v1270_v22 = vrot.slane %v9512_v40, 2  ;;  %v7241_v12 = vld [vmem:[%s13100_s1 + $0x40] sm:$0x1]  ;;  %v1281_v2 = vrot.slane %v9591_v43, 2 }
  0xab   : > { %8117 = vmatprep.mubr.msk.f32.mxu0 %vm323_vm0, %v9700_v36  ;;  %7874 = vmatprep.mubr.msk.f32.mxu1 %vm323_vm0, %v9713_v19  ;;  %v9735_v36 = vsel %vm549_vm3, %v621_v5, %v623_v49  ;;  %v1265_v49 = vrot.slane %v9487_v24, 2  ;;  %v1266_v19 = vrot.slane %v9489_v25, 2  ;;  %13250 = vst [vmem:[#allocation56_spill] sm:$0xff] %v9759_v60 }
  0xac   : > { %13248 = vst [vmem:[#allocation54_spill] sm:$0xff] %v9735_v36  ;;  %v9752_v5 = vsel %vm1219_vm4, %v1260_v14, %v1261_v37  ;;  %v9766_v20 = vsel %vm1219_vm4, %v1261_v37, %v1263_v57  ;;  %v1273_v37 = vrot.slane %v9533_v13, 2  ;;  %v7275_v57 = vld [vmem:[%s13100_s1 + $0x48] sm:$0xff]  ;;  %v1275_v13 = vrot.slane %v9541_v23, 2 }
  0xad   : > { %v9772_v14 = vsel %vm1219_vm4, %v1265_v49, %v1266_v19  ;;  %v9783_v33 = vsel %vm1219_vm4, %v1266_v19, %v1268_v59  ;;  %v7276_v49 = vld [vmem:[%s13100_s1 + $0x50] sm:$0xff]  ;;  %v9798_v19 = vsel %vm1219_vm4, %v1270_v22, %v1271_v11  ;;  %v1276_v59 = vrot.slane %v9543_v29, 2 }
  0xae   : > { %8118 = vmatmul.mubr.msk.f32.gmra.mrb[10].mxu0 %vm323_vm0, %v9722_v6  ;;  %7875 = vmatmul.mubr.msk.f32.gmra.mrb[28].mxu1 %vm323_vm0, %v9735_v36  ;;  %13251 = vst [vmem:[#allocation57_spill] sm:$0xff] %v9772_v14  ;;  %v9813_v22 = vsel %vm1219_vm4, %v1271_v11, %v1273_v37  ;;  %v1280_v36 = vrot.slane %v9589_v55, 2  ;;  %v1283_v11 = vrot.slane %v9618_v48, 2 }
  0xaf   : > { %8120 = vmatprep.mubr.msk.f32.mxu0 %vm323_vm0, %v9728_v32  ;;  %7877 = vmatprep.mubr.msk.f32.mxu1 %vm323_vm0, %v9741_v1  ;;  %v1278_v1 = vrot.slane %v9574_v21, 2 }
  0xb0   : > { %v9838_v37 = vsel %vm1219_vm4, %v1280_v36, %v1281_v2  ;;  %v9849_v48 = vsel %vm1219_vm4, %v1281_v2, %v1283_v11  ;;  %v1293_v2 = vrot.slane %v9685_v52, 2  ;;  %v1295_v11 = vrot.slane %v9693_v26, 2 }
  0xb1   : > { %v9832_v21 = vsel %vm1219_vm4, %v1276_v59, %v1278_v1  ;;  %13252 = vst [vmem:[#allocation58_spill] sm:$0xff] %v9849_v48  ;;  %v1288_v1 = vrot.slane %v9653_v58, 2 }
  0xb2   : > { %8121 = vmatmul.mubr.msk.f32.gmra.mrb[12].mxu0 %vm323_vm0, %v9746_v38  ;;  %7878 = vmatmul.mubr.msk.f32.gmra.mrb[30].mxu1 %vm323_vm0, %v9759_v60  ;;  %v9808_v60 = vpack.c.bf16 %v7276_v49, %v7275_v57  ;;  %v1286_v57 = vrot.slane %v9629_v50, 2  ;;  %v1290_v49 = vrot.slane %v9661_v7, 2 }
  0xb3   : > { %8123 = vmatprep.mubr.msk.f32.mxu0 %vm323_vm0, %v9752_v5  ;;  %7886 = vmatprep.mubr.msk.f32.mxu1 %vm323_vm0, %v9256_v27 }
  0xb4   : > { %v9866_v58 = vsel %vm1219_vm4, %v1286_v57, %v1288_v1 }
  0xb5   : > { %13254 = vst [vmem:[#allocation60_spill] sm:$0xff] %v9866_v58 }
  0xb6   : > { %8124 = vmatmul.mubr.msk.f32.gmra.mrb[14].mxu0 %vm323_vm0, %v9766_v20  ;;  %7887 = vmatmul.mubr.msk.f32.vlgmr.msra.gmra.mrb[0].mxu1 %vm323_vm0, %v9258_v28 }
  0xb7   : > { %8126 = vmatprep.mubr.msk.f32.mxu0 %vm323_vm0, %v9772_v14  ;;  %7889 = vmatprep.mubr.msk.f32.mxu1 %vm323_vm0, %v9277_v35  ;;  %v9880_v35 = vld [vmem:[#allocation2 + $0x188] sm:$0xff] }
  0xb8   : > { %8323 = vmatpush3.bf16.msra.mxu1 %v9601_v41  ;;  %v9819_v41 = vsel %vm1219_vm4, %v1275_v13, %v1276_v59  ;;  %v1291_v13 = vrot.slane %v9663_v0, 2 }
  0xb9   : > { %7938 = vmatprep.subr.msk.mxu1 %vm698_vm1, %v7241_v12 }
  0xba   : > { %8127 = vmatmul.mubr.msk.f32.gmra.mrb[16].mxu0 %vm323_vm0, %v9783_v33  ;;  %7890 = vmatmul.mubr.msk.f32.gmra.mrb[2].mxu1 %vm323_vm0, %v9281_v39  ;;  %v9872_v59 = vsel %vm1219_vm4, %v1290_v49, %v1291_v13  ;;  %v9878_v39 = vld [vmem:[#allocation2 + $0x180] sm:$0xff]  ;;  %v9887_v52 = vsel %vm1219_vm4, %v1291_v13, %v1293_v2 }
  0xbb   : > { %8129 = vmatprep.mubr.msk.f32.mxu0 %vm323_vm0, %v9798_v19  ;;  %7892 = vmatprep.mubr.msk.f32.mxu1 %vm323_vm0, %v9289_v44  ;;  %13255 = vst [vmem:[#allocation61_spill] sm:$0xff] %v9872_v59  ;;  %13256 = vst [vmem:[#allocation62_spill] sm:$0xff] %v9887_v52  ;;  %v2172_v49 = vrot.slane %v9878_v39, 2 }
  0xbc   : > { %7939 = vmatpush3.msk.msra.mxu1 %vm698_vm1, %v7241_v12  ;;  %v1285_v12 = vrot.slane %v9627_v63, 2 }
  0xbd   : > { %8325 = vmatprep.subr.bf16.mxu1 %v9808_v60 }
  0xbe   : > { %8130 = vmatmul.mubr.msk.f32.gmra.mrb[18].mxu0 %vm323_vm0, %v9813_v22  ;;  %7893 = vmatmul.mubr.msk.f32.gmra.mrb[4].mxu1 %vm323_vm0, %v9291_v45  ;;  %v9855_v36 = vsel %vm1219_vm4, %v1285_v12, %v1286_v57  ;;  %v1296_v12 = vrot.slane %v9695_v56, 2  ;;  %v1298_v57 = vrot.slane %v9717_v15, 2 }
  0xbf   : > { %8132 = vmatprep.mubr.msk.f32.mxu0 %vm323_vm0, %v9819_v41  ;;  %7895 = vmatprep.mubr.msk.f32.mxu1 %vm323_vm0, %v9293_v46  ;;  %13253 = vst [vmem:[#allocation59_spill] sm:$0xff] %v9855_v36 }
  0xc0   : > { %v9893_v1 = vsel %vm1219_vm4, %v1295_v11, %v1296_v12  ;;  %v9906_v15 = vsel %vm1219_vm4, %v1296_v12, %v1298_v57  ;;  %v7455_v12 = vld [vmem:[%s13100_s1 + $0xc0] sm:$0xff]  ;;  %v7456_v57 = vld [vmem:[%s13100_s1 + $0xc8] sm:$0xff] }
  0xc1   : > { %13257 = vst [vmem:[#allocation63_spill] sm:$0xff] %v9893_v1  ;;  %13258 = vst [vmem:[#allocation64_spill] sm:$0xff] %v9906_v15 }
  0xc2   : > { %8133 = vmatmul.mubr.msk.f32.gmra.mrb[20].mxu0 %vm323_vm0, %v9832_v21  ;;  %7896 = vmatmul.mubr.msk.f32.gmra.mrb[6].mxu1 %vm323_vm0, %v9300_v51 }
  0xc3   : > { %8135 = vmatprep.mubr.msk.f32.mxu0 %vm323_vm0, %v9838_v37  ;;  %7898 = vmatprep.mubr.msk.f32.mxu1 %vm323_vm0, %v9321_v61 }
  0xc6   : > { %8136 = vmatmul.mubr.msk.f32.gmra.mrb[22].mxu0 %vm323_vm0, %v9849_v48  ;;  %7899 = vmatmul.mubr.msk.f32.gmra.mrb[8].mxu1 %vm323_vm0, %v9323_v62  ;;  %v9897_v48 = vld [vmem:[#allocation2 + $0x190] sm:$0x3] }
  0xc7   : > { %8138 = vmatprep.mubr.msk.f32.mxu0 %vm323_vm0, %v9855_v36  ;;  %7901 = vmatprep.mubr.msk.f32.mxu1 %vm323_vm0, %v9348_v9  ;;  %v2173_v36 = vrot.slane %v9880_v35, 2  ;;  %v2175_v13 = vrot.slane %v9897_v48, 2 }
  0xc9   : > { %v9912_v2 = vsel %vm1219_vm4, %v2172_v49, %v2173_v36  ;;  %v9921_v11 = vsel %vm1219_vm4, %v2173_v36, %v2175_v13  ;;  %v7421_v36 = vld [vmem:[%s13100_s1 + $0xb8] sm:$0x1]  ;;  %v9952_v49 = vpack.c.bf16 %v7456_v57, %v7455_v12  ;;  %v1221_v13 = vrot.slane %v9258_v28, 2  ;;  %v13265_v57 = vld [vmem:[#allocation45_spill] sm:$0xff] }
  0xca   : > { %8139 = vmatmul.mubr.msk.f32.gmra.mrb[24].mxu0 %vm323_vm0, %v9866_v58  ;;  %7902 = vmatmul.mubr.msk.f32.gmra.mrb[10].mxu1 %vm323_vm0, %v9350_v10  ;;  %13259 = vst [vmem:[#allocation65_spill] sm:$0xff] %v9912_v2  ;;  %13260 = vst [vmem:[#allocation66_spill] sm:$0xff] %v9921_v11  ;;  %v7277_v28 = vld [vmem:[%s13100_s1 + $0x58] sm:$0x1] }
  0xcb   : > { %8141 = vmatprep.mubr.msk.f32.mxu0 %vm323_vm0, %v9872_v59  ;;  %7904 = vmatprep.mubr.msk.f32.mxu1 %vm323_vm0, %v9366_v17 }
  0xce   : > { %8142 = vmatmul.mubr.msk.f32.gmra.mrb[26].mxu0 %vm323_vm0, %v9887_v52  ;;  %7905 = vmatmul.mubr.msk.f32.gmra.mrb[12].mxu1 %vm323_vm0, %v9368_v18 }
  0xcf   : > { %8144 = vmatprep.mubr.msk.f32.mxu0 %vm323_vm0, %v9893_v1  ;;  %7907 = vmatprep.mubr.msk.f32.mxu1 %vm323_vm0, %v9431_v53 }
  0xd2   : > { %8145 = vmatmul.mubr.msk.f32.gmra.mrb[28].mxu0 %vm323_vm0, %v9906_v15  ;;  %7908 = vmatmul.mubr.msk.f32.gmra.mrb[14].mxu1 %vm323_vm0, %v9433_v54 }
  0xd3   : > { %8147 = vmatprep.mubr.msk.f32.mxu0 %vm323_vm0, %v9912_v2  ;;  %7910 = vmatprep.mubr.msk.f32.mxu1 %vm323_vm0, %v9456_v3  ;;  %v13270_v2 = vld [vmem:[#allocation21_spill] sm:$0xff] }
  0xd6   : > { %8148 = vmatmul.mubr.msk.f32.gmra.mrb[30].mxu0 %vm323_vm0, %v9921_v11  ;;  %7911 = vmatmul.mubr.msk.f32.gmra.mrb[16].mxu1 %vm323_vm0, %v9458_v4  ;;  %v7457_v11 = vld [vmem:[%s13100_s1 + $0xd0] sm:$0x1] }
  0xd7   : > { %8156 = vmatprep.mubr.msk.f32.mxu0 %vm323_vm0, %v9289_v44  ;;  %7913 = vmatprep.mubr.msk.f32.mxu1 %vm323_vm0, %v9487_v24 }
  0xda   : > { %8157 = vmatmul.mubr.msk.f32.vlgmr.msra.gmra.mrb[0].mxu0 %vm323_vm0, %v9291_v45  ;;  %7914 = vmatmul.mubr.msk.f32.gmra.mrb[18].mxu1 %vm323_vm0, %v9489_v25 }
  0xdb   : > { %8343 = vmatpush3.bf16.msra.mxu0 %v9609_v30  ;;  %8159 = vmatprep.mubr.msk.f32.mxu0 %vm323_vm0, %v9293_v46  ;;  %v1220_v30 = vrot.slane %v9256_v27, 2 }
  0xdc   : > { %8208 = vmatprep.subr.msk.mxu0 %vm698_vm1, %v7421_v36  ;;  %7916 = vmatprep.mubr.msk.f32.mxu1 %vm323_vm0, %v9512_v40 }
  0xdd   : > { %v1222_v12 = vsel %vm1219_vm4, %v1220_v30, %v1221_v13  ;;  %v13266_v30 = vld [vmem:[#allocation46_spill] sm:$0xff] }
  0xde   : > { %8160 = vmatmul.mubr.msk.f32.gmra.mrb[2].mxu0 %vm323_vm0, %v9300_v51  ;;  %7917 = vmatmul.mubr.msk.f32.gmra.mrb[20].mxu1 %vm323_vm0, %v9514_v42 }
  0xdf   : > { %8162 = vmatprep.mubr.msk.f32.mxu0 %vm323_vm0, %v9321_v61  ;;  %8209 = vmatpush3.msk.msra.mxu0 %vm698_vm1, %v7421_v36  ;;  %v1223_v36 = vrot.slane %v9275_v34, 2  ;;  %v13261_v34 = vld [vmem:[#allocation37_spill] sm:$0xff] }
  0xe0   : > { %8345 = vmatprep.subr.bf16.mxu0 %v9952_v49  ;;  %7919 = vmatprep.mubr.msk.f32.mxu1 %vm323_vm0, %v9541_v23 }
  0xe1   : > { %v1224_v27 = vsel %vm1219_vm4, %v1221_v13, %v1223_v36  ;;  %v13267_v13 = vld [vmem:[#allocation49_spill] sm:$0xff]  ;;  %v13268_v36 = vld [vmem:[#allocation51_spill] sm:$0xff] }
  0xe2   : > { %8163 = vmatmul.mubr.msk.f32.gmra.mrb[4].mxu0 %vm323_vm0, %v9323_v62  ;;  %7920 = vmatmul.mubr.msk.f32.gmra.mrb[22].mxu1 %vm323_vm0, %v9543_v29 }
  0xe3   : > { %8165 = vmatprep.mubr.msk.f32.mxu0 %vm323_vm0, %v9348_v9  ;;  %7922 = vmatprep.mubr.msk.f32.mxu1 %vm323_vm0, %v9589_v55 }
  0xe6   : > { %8166 = vmatmul.mubr.msk.f32.gmra.mrb[6].mxu0 %vm323_vm0, %v9350_v10  ;;  %7923 = vmatmul.mubr.msk.f32.gmra.mrb[24].mxu1 %vm323_vm0, %v9591_v43 }
  0xe7   : > { %8168 = vmatprep.mubr.msk.f32.mxu0 %vm323_vm0, %v9366_v17  ;;  %7925 = vmatprep.mubr.msk.f32.mxu1 %vm323_vm0, %v9627_v63 }
  0xea   : > { %8169 = vmatmul.mubr.msk.f32.gmra.mrb[8].mxu0 %vm323_vm0, %v9368_v18  ;;  %7926 = vmatmul.mubr.msk.f32.gmra.mrb[26].mxu1 %vm323_vm0, %v9629_v50 }
  0xeb   : > { %8171 = vmatprep.mubr.msk.f32.mxu0 %vm323_vm0, %v9431_v53  ;;  %7928 = vmatprep.mubr.msk.f32.mxu1 %vm323_vm0, %v9661_v7 }
  0xee   : > { %8172 = vmatmul.mubr.msk.f32.gmra.mrb[10].mxu0 %vm323_vm0, %v9433_v54  ;;  %7929 = vmatmul.mubr.msk.f32.gmra.mrb[28].mxu1 %vm323_vm0, %v9663_v0 }
  0xef   : > { %8174 = vmatprep.mubr.msk.f32.mxu0 %vm323_vm0, %v9456_v3  ;;  %7931 = vmatprep.mubr.msk.f32.mxu1 %vm323_vm0, %v9693_v26 }
  0xf2   : > { %8175 = vmatmul.mubr.msk.f32.gmra.mrb[12].mxu0 %vm323_vm0, %v9458_v4  ;;  %7932 = vmatmul.mubr.msk.f32.gmra.mrb[30].mxu1 %vm323_vm0, %v9695_v56 }
  0xf3   : > { %8177 = vmatprep.mubr.msk.f32.mxu0 %vm323_vm0, %v9487_v24  ;;  %7940 = vmatprep.mubr.msk.f32.mxu1 %vm323_vm0, %v1222_v12  ;;  %v10070_v12 = vld [vmem:[#allocation2 + $0x198] sm:$0xff] }
  0xf6   : > { %8178 = vmatmul.mubr.msk.f32.gmra.mrb[14].mxu0 %vm323_vm0, %v9489_v25  ;;  %7941 = vmatmul.mubr.msk.f32.vlgmr.msra.gmra.mrb[0].mxu1 %vm323_vm0, %v1224_v27  ;;  %v10078_v27 = vld [vmem:[#allocation2 + $0x1a0] sm:$0xff] }
  0xf7   : > { %8180 = vmatprep.mubr.msk.f32.mxu0 %vm323_vm0, %v9512_v40  ;;  %7943 = vmatprep.mubr.msk.f32.mxu1 %vm323_vm0, %v9519_v47  ;;  %v13262_v47 = vld [vmem:[#allocation38_spill] sm:$0xff] }
  0xf8   : > { %8327 = vmatpush3.bf16.msra.mxu1 %v9808_v60  ;;  %v13264_v60 = vld [vmem:[#allocation42_spill] sm:$0xff] }
  0xf9   : > { %7992 = vmatprep.subr.msk.mxu1 %vm698_vm1, %v7277_v28 }
  0xfa   : > { %8181 = vmatmul.mubr.msk.f32.gmra.mrb[16].mxu0 %vm323_vm0, %v9514_v42  ;;  %7944 = vmatmul.mubr.msk.f32.gmra.mrb[2].mxu1 %vm323_vm0, %v9538_v16  ;;  %v13263_v16 = vld [vmem:[#allocation41_spill] sm:$0xff] }
  0xfb   : > { %8183 = vmatprep.mubr.msk.f32.mxu0 %vm323_vm0, %v9541_v23  ;;  %7946 = vmatprep.mubr.msk.f32.mxu1 %vm323_vm0, %v9548_v31 }
  0xfc   : > { %7993 = vmatpush3.msk.msra.mxu1 %vm698_vm1, %v7277_v28  ;;  %v13269_v28 = vld [vmem:[#allocation20_spill] sm:$0xff] }
  0xfd   : > { %8348 = vmatprep.subr.bf16.mxu1 %v9175_v8 }
  0xfe   : > { %8184 = vmatmul.mubr.msk.f32.gmra.mrb[18].mxu0 %vm323_vm0, %v9543_v29  ;;  %7947 = vmatmul.mubr.msk.f32.gmra.mrb[4].mxu1 %vm323_vm0, %v13261_v34 }
  0xff   : > { %8186 = vmatprep.mubr.msk.f32.mxu0 %vm323_vm0, %v9589_v55  ;;  %7949 = vmatprep.mubr.msk.f32.mxu1 %vm323_vm0, %v13262_v47 }
 0x102   : > { %8187 = vmatmul.mubr.msk.f32.gmra.mrb[20].mxu0 %vm323_vm0, %v9591_v43  ;;  %7950 = vmatmul.mubr.msk.f32.gmra.mrb[6].mxu1 %vm323_vm0, %v13263_v16 }
 0x103   : > { %8189 = vmatprep.mubr.msk.f32.mxu0 %vm323_vm0, %v9627_v63  ;;  %7952 = vmatprep.mubr.msk.f32.mxu1 %vm323_vm0, %v13264_v60 }
 0x106   : > { %8190 = vmatmul.mubr.msk.f32.gmra.mrb[22].mxu0 %vm323_vm0, %v9629_v50  ;;  %7953 = vmatmul.mubr.msk.f32.gmra.mrb[8].mxu1 %vm323_vm0, %v13265_v57 }
 0x107   : > { %8192 = vmatprep.mubr.msk.f32.mxu0 %vm323_vm0, %v9661_v7  ;;  %7955 = vmatprep.mubr.msk.f32.mxu1 %vm323_vm0, %v13266_v30 }
 0x10a   : > { %8193 = vmatmul.mubr.msk.f32.gmra.mrb[24].mxu0 %vm323_vm0, %v9663_v0  ;;  %7956 = vmatmul.mubr.msk.f32.gmra.mrb[10].mxu1 %vm323_vm0, %v13267_v13 }
 0x10b   : > { %8195 = vmatprep.mubr.msk.f32.mxu0 %vm323_vm0, %v9693_v26  ;;  %7958 = vmatprep.mubr.msk.f32.mxu1 %vm323_vm0, %v13268_v36 }
 0x10e   : > { %8196 = vmatmul.mubr.msk.f32.gmra.mrb[26].mxu0 %vm323_vm0, %v9695_v56  ;;  %7959 = vmatmul.mubr.msk.f32.gmra.mrb[12].mxu1 %vm323_vm0, %v9722_v6  ;;  %v13271_v56 = vld [vmem:[#allocation22_spill] sm:$0xff] }
 0x10f   : > { %8198 = vmatprep.mubr.msk.f32.mxu0 %vm323_vm0, %v9878_v39  ;;  %7961 = vmatprep.mubr.msk.f32.mxu1 %vm323_vm0, %v9728_v32 }
 0x112   : > { %8199 = vmatmul.mubr.msk.f32.gmra.mrb[28].mxu0 %vm323_vm0, %v9880_v35  ;;  %7962 = vmatmul.mubr.msk.f32.gmra.mrb[14].mxu1 %vm323_vm0, %v9746_v38 }
 0x113   : > { %8201 = vmatprep.mubr.msk.f32.mxu0 %vm323_vm0, %v10070_v12  ;;  %7964 = vmatprep.mubr.msk.f32.mxu1 %vm323_vm0, %v9752_v5 }
 0x116   : > { %8202 = vmatmul.mubr.msk.f32.gmra.mrb[30].mxu0 %vm323_vm0, %v10078_v27  ;;  %7965 = vmatmul.mubr.msk.f32.gmra.mrb[16].mxu1 %vm323_vm0, %v9766_v20 }
 0x117   : > { %8210 = vmatprep.mubr.msk.f32.mxu0 %vm323_vm0, %v13269_v28  ;;  %7967 = vmatprep.mubr.msk.f32.mxu1 %vm323_vm0, %v9772_v14  ;;  %v13272_v28 = vld [vmem:[#allocation23_spill] sm:$0xff]  ;;  %v13273_v14 = vld [vmem:[#allocation24_spill] sm:$0xff] }
 0x11a   : > { %8211 = vmatmul.mubr.msk.f32.vlgmr.msra.gmra.mrb[0].mxu0 %vm323_vm0, %v13270_v2  ;;  %7968 = vmatmul.mubr.msk.f32.gmra.mrb[18].mxu1 %vm323_vm0, %v9783_v33  ;;  %v13275_v2 = vld [vmem:[#allocation26_spill] sm:$0xff] }
 0x11b   : > { %8347 = vmatpush3.bf16.msra.mxu0 %v9952_v49  ;;  %8213 = vmatprep.mubr.msk.f32.mxu0 %vm323_vm0, %v13271_v56  ;;  %v13274_v56 = vld [vmem:[#allocation25_spill] sm:$0xff]  ;;  %v13278_v49 = vld [vmem:[#allocation58_spill] sm:$0xff] }
 0x11c   : > { %8262 = vmatprep.subr.msk.mxu0 %vm698_vm1, %v7457_v11  ;;  %7970 = vmatprep.mubr.msk.f32.mxu1 %vm323_vm0, %v9798_v19 }
 0x11e   : > { %8214 = vmatmul.mubr.msk.f32.gmra.mrb[2].mxu0 %vm323_vm0, %v13272_v28  ;;  %7971 = vmatmul.mubr.msk.f32.gmra.mrb[20].mxu1 %vm323_vm0, %v9813_v22  ;;  %v13279_v28 = vld [vmem:[#allocation59_spill] sm:$0xff] }
 0x11f   : > { %8216 = vmatprep.mubr.msk.f32.mxu0 %vm323_vm0, %v13273_v14  ;;  %8263 = vmatpush3.msk.msra.mxu0 %vm698_vm1, %v7457_v11  ;;  %v13276_v14 = vld [vmem:[#allocation27_spill] sm:$0xff]  ;;  %v13277_v11 = vld [vmem:[#allocation28_spill] sm:$0xff] }
 0x120   : > { %7973 = vmatprep.mubr.msk.f32.mxu1 %vm323_vm0, %v9819_v41 }
 0x122   : > { %8217 = vmatmul.mubr.msk.f32.gmra.mrb[4].mxu0 %vm323_vm0, %v13274_v56  ;;  %7974 = vmatmul.mubr.msk.f32.gmra.mrb[22].mxu1 %vm323_vm0, %v9832_v21  ;;  %v13280_v56 = vld [vmem:[#allocation29_spill] sm:$0xff] }
 0x123   : > { %8219 = vmatprep.mubr.msk.f32.mxu0 %vm323_vm0, %v13275_v2  ;;  %7976 = vmatprep.mubr.msk.f32.mxu1 %vm323_vm0, %v9838_v37  ;;  %v13281_v2 = vld [vmem:[#allocation30_spill] sm:$0xff] }
 0x126   : > { %8220 = vmatmul.mubr.msk.f32.gmra.mrb[6].mxu0 %vm323_vm0, %v13276_v14  ;;  %7977 = vmatmul.mubr.msk.f32.gmra.mrb[24].mxu1 %vm323_vm0, %v13278_v49  ;;  %v13282_v14 = vld [vmem:[#allocation31_spill] sm:$0xff] }
 0x127   : > { %8222 = vmatprep.mubr.msk.f32.mxu0 %vm323_vm0, %v13277_v11  ;;  %7979 = vmatprep.mubr.msk.f32.mxu1 %vm323_vm0, %v13279_v28  ;;  %v13283_v11 = vld [vmem:[#allocation32_spill] sm:$0xff] }
 0x12a   : > { %8223 = vmatmul.mubr.msk.f32.gmra.mrb[8].mxu0 %vm323_vm0, %v13280_v56  ;;  %7980 = vmatmul.mubr.msk.f32.gmra.mrb[26].mxu1 %vm323_vm0, %v9866_v58  ;;  %v13284_v56 = vld [vmem:[#allocation33_spill] sm:$0xff]  ;;  %v10214_v58 = vld [vmem:[#allocation2 + $0x1a8] sm:$0x3] }
 0x12b   : > { %8225 = vmatprep.mubr.msk.f32.mxu0 %vm323_vm0, %v13281_v2  ;;  %7982 = vmatprep.mubr.msk.f32.mxu1 %vm323_vm0, %v9872_v59  ;;  %v13285_v2 = vld [vmem:[#allocation34_spill] sm:$0xff] }
 0x12c   : > { %v13286_v59 = vld [vmem:[#allocation18_spill] sm:$0xff] }
 0x12e   : > { %8226 = vmatmul.mubr.msk.f32.gmra.mrb[10].mxu0 %vm323_vm0, %v13282_v14  ;;  %7983 = vmatmul.mubr.msk.f32.gmra.mrb[28].mxu1 %vm323_vm0, %v9887_v52  ;;  %v13287_v14 = vld [vmem:[#allocation35_spill] sm:$0xff] }
 0x12f   : > { %8228 = vmatprep.mubr.msk.f32.mxu0 %vm323_vm0, %v13283_v11  ;;  %7985 = vmatprep.mubr.msk.f32.mxu1 %vm323_vm0, %v9893_v1  ;;  %v13288_v11 = vld [vmem:[#allocation36_spill] sm:$0xff]  ;;  %v13289_v52 = vld [vmem:[#allocation19_spill] sm:$0xff]  ;;  %v1902_v1 = vrot.slane %v9897_v48, 1 }
 0x132   : > { %8229 = vmatmul.mubr.msk.f32.gmra.mrb[12].mxu0 %vm323_vm0, %v13284_v56  ;;  %7986 = vmatmul.mubr.msk.f32.gmra.mrb[30].mxu1 %vm323_vm0, %v9906_v15  ;;  %v13290_v56 = vld [vmem:[#allocation39_spill] sm:$0xff]  ;;  %v13291_v15 = vld [vmem:[#allocation40_spill] sm:$0xff] }
 0x133   : > { %8231 = vmatprep.mubr.msk.f32.mxu0 %vm323_vm0, %v13285_v2  ;;  %7994 = vmatprep.mubr.msk.f32.mxu1 %vm323_vm0, %v13286_v59  ;;  %v8680_v59 = vld [vmem:[%s13100_s1 + $0x70] sm:$0x1] }
 0x136   : > { %8232 = vmatmul.mubr.msk.f32.gmra.mrb[14].mxu0 %vm323_vm0, %v13287_v14  ;;  %7995 = vmatmul.mubr.msk.f32.vlgmr.msra.gmra.mrb[0].mxu1 %vm323_vm0, %v13289_v52  ;;  %v13294_v52 = vld [vmem:[#allocation47_spill] sm:$0xff] }
 0x137   : > { %8234 = vmatprep.mubr.msk.f32.mxu0 %vm323_vm0, %v13288_v11  ;;  %7997 = vmatprep.mubr.msk.f32.mxu1 %vm323_vm0, %v9289_v44  ;;  %v13293_v44 = vld [vmem:[#allocation44_spill] sm:$0xff] }
 0x138   : > { %8350 = vmatpush3.bf16.msra.mxu1 %v9175_v8  ;;  %v13292_v8 = vld [vmem:[#allocation43_spill] sm:$0xff] }
 0x139   : > { %8349 = vmatprep.subr.msk.mxu1 %vm698_vm1, %v8680_v59 }
 0x13a   : > { %8235 = vmatmul.mubr.msk.f32.gmra.mrb[16].mxu0 %vm323_vm0, %v13290_v56  ;;  %7998 = vmatmul.mubr.msk.f32.gmra.mrb[2].mxu1 %vm323_vm0, %v9291_v45  ;;  %v13295_v45 = vld [vmem:[#allocation48_spill] sm:$0xff] }
 0x13b   : > { %8237 = vmatprep.mubr.msk.f32.mxu0 %vm323_vm0, %v13291_v15  ;;  %8000 = vmatprep.mubr.msk.f32.mxu1 %vm323_vm0, %v9293_v46  ;;  %v13296_v46 = vld [vmem:[#allocation52_spill] sm:$0xff] }
 0x13c   : > { %8351 = vmatpush3.msk.msra.mxu1 %vm698_vm1, %v8680_v59  ;;  %v13297_v59 = vld [vmem:[#allocation53_spill] sm:$0xff] }
 0x13e   : > { %8238 = vmatmul.mubr.msk.f32.gmra.mrb[18].mxu0 %vm323_vm0, %v13292_v8  ;;  %8001 = vmatmul.mubr.msk.f32.gmra.mrb[4].mxu1 %vm323_vm0, %v9300_v51  ;;  %v1899_v51 = vrot.slane %v9878_v39, 1 }
 0x13f   : > { %8240 = vmatprep.mubr.msk.f32.mxu0 %vm323_vm0, %v13293_v44  ;;  %8003 = vmatprep.mubr.msk.f32.mxu1 %vm323_vm0, %v9321_v61  ;;  %v1900_v61 = vrot.slane %v9880_v35, 1 }
 0x141   : > { %v10223_v48 = vsel %vm549_vm3, %v1900_v61, %v1902_v1 }
 0x142   : > { %8241 = vmatmul.mubr.msk.f32.gmra.mrb[20].mxu0 %vm323_vm0, %v13294_v52  ;;  %8004 = vmatmul.mubr.msk.f32.gmra.mrb[6].mxu1 %vm323_vm0, %v9323_v62  ;;  %v13298_v62 = vld [vmem:[#allocation54_spill] sm:$0xff] }
 0x143   : > { %8243 = vmatprep.mubr.msk.f32.mxu0 %vm323_vm0, %v13295_v45  ;;  %8006 = vmatprep.mubr.msk.f32.mxu1 %vm323_vm0, %v9348_v9  ;;  %v13299_v9 = vld [vmem:[#allocation55_spill] sm:$0xff] }
 0x146   : > { %8244 = vmatmul.mubr.msk.f32.gmra.mrb[22].mxu0 %vm323_vm0, %v13296_v46  ;;  %8007 = vmatmul.mubr.msk.f32.gmra.mrb[8].mxu1 %vm323_vm0, %v9350_v10  ;;  %v2717_v46 = vrot.slane %v10078_v27, 1  ;;  %v10212_v10 = vsel %vm549_vm3, %v1899_v51, %v1900_v61 }
 0x147   : > { %8246 = vmatprep.mubr.msk.f32.mxu0 %vm323_vm0, %v13297_v59  ;;  %8009 = vmatprep.mubr.msk.f32.mxu1 %vm323_vm0, %v9366_v17  ;;  %v2716_v59 = vrot.slane %v10070_v12, 1  ;;  %v13300_v17 = vld [vmem:[#allocation56_spill] sm:$0xff] }
 0x14a   : > { %8247 = vmatmul.mubr.msk.f32.gmra.mrb[24].mxu0 %vm323_vm0, %v13298_v62  ;;  %8010 = vmatmul.mubr.msk.f32.gmra.mrb[10].mxu1 %vm323_vm0, %v9368_v18  ;;  %v2718_v18 = vsel %vm549_vm3, %v2716_v59, %v2717_v46 }
 0x14b   : > { %8249 = vmatprep.mubr.msk.f32.mxu0 %vm323_vm0, %v13299_v9  ;;  %8012 = vmatprep.mubr.msk.f32.mxu1 %vm323_vm0, %v9431_v53  ;;  %v2719_v9 = vrot.slane %v10214_v58, 1 }
 0x14d   : > { %v2720_v53 = vsel %vm549_vm3, %v2717_v46, %v2719_v9 }
 0x14e   : > { %8250 = vmatmul.mubr.msk.f32.gmra.mrb[26].mxu0 %vm323_vm0, %v13300_v17  ;;  %8013 = vmatmul.mubr.msk.f32.gmra.mrb[12].mxu1 %vm323_vm0, %v9433_v54  ;;  %v13302_v54 = vld [vmem:[#allocation57_spill] sm:$0xff] }
 0x14f   : > { %8252 = vmatprep.mubr.msk.f32.mxu0 %vm323_vm0, %v10212_v10  ;;  %8015 = vmatprep.mubr.msk.f32.mxu1 %vm323_vm0, %v9456_v3  ;;  %v13307_v3 = vld [vmem:[#allocation62_spill] sm:$0xff] }
 0x152   : > { %8253 = vmatmul.mubr.msk.f32.gmra.mrb[28].mxu0 %vm323_vm0, %v10223_v48  ;;  %8016 = vmatmul.mubr.msk.f32.gmra.mrb[14].mxu1 %vm323_vm0, %v9458_v4  ;;  %v13308_v4 = vld [vmem:[#allocation63_spill] sm:$0xff] }
 0x153   : > { %8255 = vmatprep.mubr.msk.f32.mxu0 %vm323_vm0, %v2718_v18  ;;  %8018 = vmatprep.mubr.msk.f32.mxu1 %vm323_vm0, %v9487_v24  ;;  %v2989_v24 = vrot.slane %v10070_v12, 2 }
 0x156   : > { %8256 = vmatmul.mubr.msk.f32.gmra.mrb[30].mxu0 %vm323_vm0, %v2720_v53  ;;  %8019 = vmatmul.mubr.msk.f32.gmra.mrb[16].mxu1 %vm323_vm0, %v9489_v25  ;;  %v2990_v25 = vrot.slane %v10078_v27, 2 }
 0x157   : > { %8264 = vmatprep.mubr.msk.f32.mxu0 %vm323_vm0, %v9548_v31  ;;  %8021 = vmatprep.mubr.msk.f32.mxu1 %vm323_vm0, %v9512_v40  ;;  %v13309_v40 = vld [vmem:[#allocation55_spill] sm:$0xff] }
 0x158   : > { %v2991_v31 = vsel %vm1219_vm4, %v2989_v24, %v2990_v25 }
 0x15a   : > { %8265 = vmatmul.mubr.msk.f32.vlgmr.msra.gmra.mrb[0].mxu0 %vm323_vm0, %v13261_v34  ;;  %8022 = vmatmul.mubr.msk.f32.gmra.mrb[18].mxu1 %vm323_vm0, %v9514_v42  ;;  %v13310_v42 = vld [vmem:[#allocation64_spill] sm:$0xff] }
 0x15b   : > { %8267 = vmatprep.mubr.msk.f32.mxu0 %vm323_vm0, %v13262_v47  ;;  %8024 = vmatprep.mubr.msk.f32.mxu1 %vm323_vm0, %v9541_v23  ;;  %v13311_v23 = vld [vmem:[#allocation65_spill] sm:$0xff] }
 0x15e   : > { %8268 = vmatmul.mubr.msk.f32.gmra.mrb[2].mxu0 %vm323_vm0, %v13263_v16  ;;  %8025 = vmatmul.mubr.msk.f32.gmra.mrb[20].mxu1 %vm323_vm0, %v9543_v29  ;;  %v2992_v29 = vrot.slane %v10214_v58, 2 }
 0x15f   : > { %8270 = vmatprep.mubr.msk.f32.mxu0 %vm323_vm0, %v13264_v60  ;;  %8027 = vmatprep.mubr.msk.f32.mxu1 %vm323_vm0, %v9589_v55  ;;  %v13306_v55 = vld [vmem:[#allocation53_spill] sm:$0xff] }
 0x162   : > { %8271 = vmatmul.mubr.msk.f32.gmra.mrb[4].mxu0 %vm323_vm0, %v13265_v57  ;;  %8028 = vmatmul.mubr.msk.f32.gmra.mrb[22].mxu1 %vm323_vm0, %v9591_v43  ;;  %v13301_v43 = vld [vmem:[#allocation50_spill] sm:$0xff] }
 0x163   : > { %8273 = vmatprep.mubr.msk.f32.mxu0 %vm323_vm0, %v13266_v30  ;;  %8030 = vmatprep.mubr.msk.f32.mxu1 %vm323_vm0, %v9627_v63  ;;  %v2993_v63 = vsel %vm1219_vm4, %v2990_v25, %v2992_v29 }
 0x166   : > { %8274 = vmatmul.mubr.msk.f32.gmra.mrb[6].mxu0 %vm323_vm0, %v13267_v13  ;;  %8031 = vmatmul.mubr.msk.f32.gmra.mrb[24].mxu1 %vm323_vm0, %v9629_v50  ;;  %v13313_v50 = vmov 0.0  }
 0x167   : > { %8276 = vmatprep.mubr.msk.f32.mxu0 %vm323_vm0, %v13268_v36  ;;  %8033 = vmatprep.mubr.msk.f32.mxu1 %vm323_vm0, %v9661_v7  ;;  %v13312_v7 = vld [vmem:[#allocation66_spill] sm:$0xff]  ;;  %3398 = vst.msk [vmem:[#allocation3] sm:$0xff] %vm3397_vm5, %v13313_v50  ;;  %3399 = vst.msk [vmem:[#allocation3 + $0x8] sm:$0xff] %vm3397_vm5, %v13313_v50 }
 0x168   : > { %3402 = vst.msk [vmem:[#allocation3 + $0x18] sm:$0xff] %vm3397_vm5, %v13313_v50  ;;  %3403 = vst.msk [vmem:[#allocation3 + $0x20] sm:$0xff] %vm3397_vm5, %v13313_v50 }
 0x169   : > { %3405 = vst.msk [vmem:[#allocation3 + $0x30] sm:$0xff] %vm3397_vm5, %v13313_v50  ;;  %3406 = vst.msk [vmem:[#allocation3 + $0x38] sm:$0xff] %vm3397_vm5, %v13313_v50 }
 0x16a   : > { %8277 = vmatmul.mubr.msk.f32.gmra.mrb[8].mxu0 %vm323_vm0, %v9722_v6  ;;  %8034 = vmatmul.mubr.msk.f32.gmra.mrb[26].mxu1 %vm323_vm0, %v9663_v0  ;;  %v13305_v0 = vld [vmem:[#allocation52_spill] sm:$0xff]  ;;  %3408 = vst.msk [vmem:[#allocation3 + $0x48] sm:$0xff] %vm3397_vm5, %v13313_v50  ;;  %3409 = vst.msk [vmem:[#allocation3 + $0x50] sm:$0xff] %vm3397_vm5, %v13313_v50 }
 0x16b   : > { %8279 = vmatprep.mubr.msk.f32.mxu0 %vm323_vm0, %v9728_v32  ;;  %8036 = vmatprep.mubr.msk.f32.mxu1 %vm323_vm0, %v9693_v26  ;;  %v13185_v26 = vlaneseq  ;;  %3411 = vst.msk [vmem:[#allocation3 + $0x60] sm:$0xff] %vm3397_vm5, %v13313_v50  ;;  %3412 = vst.msk [vmem:[#allocation3 + $0x68] sm:$0xff] %vm3397_vm5, %v13313_v50 }
 0x16c   : > { %3414 = vst.msk [vmem:[#allocation3 + $0x78] sm:$0xff] %vm3397_vm5, %v13313_v50  ;;  %3415 = vst.msk [vmem:[#allocation3 + $0x80] sm:$0xff] %vm3397_vm5, %v13313_v50 }
 0x16d   : > { %3417 = vst.msk [vmem:[#allocation3 + $0x90] sm:$0xff] %vm3397_vm5, %v13313_v50  ;;  %3418 = vst.msk [vmem:[#allocation3 + $0x98] sm:$0xff] %vm3397_vm5, %v13313_v50  ;;  %v10442_v6 = vshrl.u32 %v13185_v26, 7 }
 0x16e   : > { %8280 = vmatmul.mubr.msk.f32.gmra.mrb[10].mxu0 %vm323_vm0, %v9746_v38  ;;  %8037 = vmatmul.mubr.msk.f32.gmra.mrb[28].mxu1 %vm323_vm0, %v13301_v43  ;;  %3420 = vst.msk [vmem:[#allocation3 + $0xa8] sm:$0xff] %vm3397_vm5, %v13313_v50  ;;  %3421 = vst.msk [vmem:[#allocation3 + $0xb0] sm:$0xff] %vm3397_vm5, %v13313_v50  ;;  %v3540_v38 = vld [vmem:[%s13102_s3] sm:$0x7] }
 0x16f   : > { %8282 = vmatprep.mubr.msk.f32.mxu0 %vm323_vm0, %v9752_v5  ;;  %8039 = vmatprep.mubr.msk.f32.mxu1 %vm323_vm0, %v9878_v39  ;;  %v13304_v39 = vld [vmem:[#allocation61_spill] sm:$0xff]  ;;  %3423 = vst.msk [vmem:[#allocation3 + $0xc0] sm:$0xff] %vm3397_vm5, %v13313_v50  ;;  %3424 = vst.msk [vmem:[#allocation3 + $0xc8] sm:$0xff] %vm3397_vm5, %v13313_v50  ;;  %v10445_v32 = vsub.s32 0, %v10442_v6  ;;  %v10500_v1 = vsub.s32 2, %v10442_v6 }
 0x170   : > { %3426 = vst.msk [vmem:[#allocation3 + $0xd8] sm:$0xff] %vm3397_vm5, %v13313_v50  ;;  %3427 = vst.msk [vmem:[#allocation3 + $0xe0] sm:$0xff] %vm3397_vm5, %v13313_v50 }
 0x171   : > { %3429 = vst.msk [vmem:[#allocation3 + $0xf0] sm:$0xff] %vm3397_vm5, %v13313_v50  ;;  %3430 = vst.msk [vmem:[#allocation3 + $0xf8] sm:$0xff] %vm3397_vm5, %v13313_v50  ;;  %v10451_v5 = vrot.slane %v3540_v38, %v10445_v32  ;;  %v10505_v16 = vrot.slane %v3540_v38, %v10500_v1 }
 0x172   : > { %8283 = vmatmul.mubr.msk.f32.gmra.mrb[12].mxu0 %vm323_vm0, %v9766_v20  ;;  %8040 = vmatmul.mubr.msk.f32.gmra.mrb[30].mxu1 %vm323_vm0, %v9880_v35  ;;  %v13303_v35 = vld [vmem:[#allocation60_spill] sm:$0xff]  ;;  %3432 = vst.msk [vmem:[#allocation3 + $0x108] sm:$0xff] %vm3397_vm5, %v13313_v50  ;;  %3433 = vst.msk [vmem:[#allocation3 + $0x110] sm:$0xff] %vm3397_vm5, %v13313_v50  ;;  %v3486_v20 = vld [vmem:[#allocation3] sm:$0xff] }
 0x173   : > { %8285 = vmatprep.mubr.msk.f32.mxu0 %vm323_vm0, %v13302_v54  ;;  %8072 = vmatprep.mubr.msk.f32.mxu1 %vm323_vm0, %v13285_v2  ;;  %3435 = vst.msk [vmem:[#allocation3 + $0x120] sm:$0xff] %vm3397_vm5, %v13313_v50  ;;  %3436 = vst.msk [vmem:[#allocation3 + $0x128] sm:$0xff] %vm3397_vm5, %v13313_v50  ;;  %v4101_v36 = vmul.f32 %v10505_v16, %v3486_v20 }
 0x174   : > { %3438 = vst.msk [vmem:[#allocation3 + $0x138] sm:$0xff] %vm3397_vm5, %v13313_v50  ;;  %3439 = vst.msk [vmem:[#allocation3 + $0x140] sm:$0xff] %vm3397_vm5, %v13313_v50 }
 0x175   : > { %3441 = vst.msk [vmem:[#allocation3 + $0x150] sm:$0xff] %vm3397_vm5, %v13313_v50  ;;  %3442 = vst.msk [vmem:[#allocation3 + $0x158] sm:$0xff] %vm3397_vm5, %v13313_v50  ;;  %v4150_v27 = vsel %vm4149_vm9, %v4101_v36, 0.0 }
 0x176   : > { %8286 = vmatmul.mubr.msk.f32.gmra.mrb[14].mxu0 %vm323_vm0, %v9783_v33  ;;  %8073 = vmatmul.mubr.msk.f32.vlgmr.msra.gmra.mrb[16].mxu1 %vm323_vm0, %v13287_v14  ;;  %3444 = vst.msk [vmem:[#allocation3 + $0x168] sm:$0xff] %vm3397_vm5, %v13313_v50  ;;  %3445 = vst.msk [vmem:[#allocation3 + $0x170] sm:$0xff] %vm3397_vm5, %v13313_v50  ;;  %v3547_v33 = vmul.f32 %v10451_v5, %v3486_v20  ;;  %v10520_v14 = vld [vmem:[%s13102_s3 + $0x8] sm:$0x7] }
 0x177   : > { %8288 = vmatprep.mubr.msk.f32.mxu0 %vm323_vm0, %v9798_v19  ;;  %8075 = vmatprep.mubr.msk.f32.mxu1 %vm323_vm0, %v13288_v11  ;;  %3447 = vst.msk [vmem:[#allocation3 + $0x180] sm:$0xff] %vm3397_vm5, %v13313_v50  ;;  %3448 = vst.msk [vmem:[#allocation3 + $0x188] sm:$0xff] %vm3397_vm5, %v13313_v50  ;;  %v10455_v19 = vsub.s32 1, %v10442_v6 }
 0x178   : > { %3450 = vst.msk [vmem:[#allocation3 + $0x198] sm:$0xff] %vm3397_vm5, %v13313_v50  ;;  %3451 = vst.msk [vmem:[#allocation3 + $0x1a0] sm:$0xff] %vm3397_vm5, %v13313_v50 }
 0x179   : > { %13314 = vst [vmem:[#allocation37_spill] sm:$0xff] %v10442_v6  ;;  %3404 = vst.msk [vmem:[#allocation3 + $0x28] sm:$0x3] %vm3400_vm6, %v13313_v50  ;;  %v10524_v11 = vrot.slane %v10520_v14, %v10455_v19 }
 0x17a   : > { %8289 = vmatmul.mubr.msk.f32.gmra.mrb[16].mxu0 %vm323_vm0, %v9813_v22  ;;  %8076 = vmatmul.mubr.msk.f32.gmra.mrb[18].mxu1 %vm323_vm0, %v13290_v56  ;;  %v3579_v22 = vsel %vm3397_vm5, %v3547_v33, 0.0  ;;  %3401 = vst.msk [vmem:[#allocation3 + $0x10] sm:$0x3] %vm3400_vm6, %v13313_v50  ;;  %3407 = vst.msk [vmem:[#allocation3 + $0x40] sm:$0x3] %vm3400_vm6, %v13313_v50  ;;  %v10528_v56 = vrot.slane %v10520_v14, %v10500_v1 }
 0x17b   : > { %8291 = vmatprep.mubr.msk.f32.mxu0 %vm323_vm0, %v9819_v41  ;;  %8078 = vmatprep.mubr.msk.f32.mxu1 %vm323_vm0, %v13291_v15  ;;  %v3487_v41 = vld [vmem:[#allocation3 + $0x8] sm:$0xff]  ;;  %3410 = vst.msk [vmem:[#allocation3 + $0x58] sm:$0x3] %vm3400_vm6, %v13313_v50  ;;  %3413 = vst.msk [vmem:[#allocation3 + $0x70] sm:$0x3] %vm3400_vm6, %v13313_v50 }
 0x17c   : > { %3580 = vadd.xlane.f32.xlu0 %v3579_v22  ;;  %3416 = vst.msk [vmem:[#allocation3 + $0x88] sm:$0x3] %vm3400_vm6, %v13313_v50  ;;  %3419 = vst.msk [vmem:[#allocation3 + $0xa0] sm:$0x3] %vm3400_vm6, %v13313_v50  ;;  %v4102_v12 = vmul.f32 %v10505_v16, %v3487_v41 }
 0x17d   : > { %3422 = vst.msk [vmem:[#allocation3 + $0xb8] sm:$0x3] %vm3400_vm6, %v13313_v50  ;;  %3425 = vst.msk [vmem:[#allocation3 + $0xd0] sm:$0x3] %vm3400_vm6, %v13313_v50 }
 0x17e   : > { %8292 = vmatmul.mubr.msk.f32.gmra.mrb[18].mxu0 %vm323_vm0, %v9832_v21  ;;  %8079 = vmatmul.mubr.msk.f32.gmra.mrb[20].mxu1 %vm323_vm0, %v13292_v8  ;;  %v10459_v21 = vrot.slane %v3540_v38, %v10455_v19  ;;  %3428 = vst.msk [vmem:[#allocation3 + $0xe8] sm:$0x3] %vm3400_vm6, %v13313_v50  ;;  %3431 = vst.msk [vmem:[#allocation3 + $0x100] sm:$0x3] %vm3400_vm6, %v13313_v50 }
 0x17f   : > { %8294 = vmatprep.mubr.msk.f32.mxu0 %vm323_vm0, %v9838_v37  ;;  %8081 = vmatprep.mubr.msk.f32.mxu1 %vm323_vm0, %v13293_v44  ;;  %v3548_v37 = vmul.f32 %v10451_v5, %v3487_v41  ;;  %3434 = vst.msk [vmem:[#allocation3 + $0x118] sm:$0x3] %vm3400_vm6, %v13313_v50  ;;  %3437 = vst.msk [vmem:[#allocation3 + $0x130] sm:$0x3] %vm3400_vm6, %v13313_v50 }
 0x180   : > { %3440 = vst.msk [vmem:[#allocation3 + $0x148] sm:$0x3] %vm3400_vm6, %v13313_v50  ;;  %3443 = vst.msk [vmem:[#allocation3 + $0x160] sm:$0x3] %vm3400_vm6, %v13313_v50  ;;  %v3711_v15 = vmul.f32 %v10459_v21, %v3486_v20  ;;  %v3712_v57 = vmul.f32 %v10459_v21, %v3487_v41 }
 0x181   : > { %3446 = vst.msk [vmem:[#allocation3 + $0x178] sm:$0x3] %vm3400_vm6, %v13313_v50  ;;  %3449 = vst.msk [vmem:[#allocation3 + $0x190] sm:$0x3] %vm3400_vm6, %v13313_v50  ;;  %v3582_v58 = vsel %vm3397_vm5, %v3548_v37, 0.0 }
 0x182   : > { %8295 = vmatmul.mubr.msk.f32.gmra.mrb[20].mxu0 %vm323_vm0, %v13278_v49  ;;  %8082 = vmatmul.mubr.msk.f32.gmra.mrb[22].mxu1 %vm323_vm0, %v13294_v52  ;;  %3452 = vst.msk [vmem:[#allocation3 + $0x1a8] sm:$0x3] %vm3400_vm6, %v13313_v50  ;;  %v3760_v34 = vsel %vm3759_vm7, %v3711_v15, 0.0  ;;  %v3488_v47 = vld [vmem:[#allocation3 + $0x10] sm:$0x3]  ;;  %v3763_v13 = vsel %vm3397_vm5, %v3712_v57, 0.0 }
 0x183   : > { %8297 = vmatprep.mubr.msk.f32.mxu0 %vm323_vm0, %v13279_v28  ;;  %8084 = vmatprep.mubr.msk.f32.mxu1 %vm323_vm0, %v13295_v45  ;;  %v3713_v60 = vmul.f32 %v10459_v21, %v3488_v47  ;;  %v4153_v49 = vsel %vm3397_vm5, %v4102_v12, 0.0  ;;  %v4103_v28 = vmul.f32 %v10505_v16, %v3488_v47  ;;  %13315 = vst [vmem:[#allocation38_spill] sm:$0xff] %v10528_v56  ;;  %v10560_v37 = vld [vmem:[%s13102_s3 + $0x4] sm:$0x7] }
 0x184   : > { %3583 = vadd.xlane.f32.xlu0 %v3582_v58  ;;  %3764 = vadd.xlane.f32.xlu1 %v3763_v13  ;;  %v10567_v13 = vrot.slane %v10560_v37, %v10455_v19 }
 0x185   : > { %v3767_v30 = vsel %vm3766_vm8, %v3713_v60, 0.0  ;;  %v4156_v2 = vsel %vm3400_vm6, %v4103_v28, 0.0 }
 0x186   : > { %8298 = vmatmul.mubr.msk.f32.gmra.mrb[22].mxu0 %vm323_vm0, %v13303_v35  ;;  %8085 = vmatmul.mubr.msk.f32.gmra.mrb[24].mxu1 %vm323_vm0, %v13305_v0  ;;  %v10549_v35 = vld [vmem:[%s13101_s2] ss:$0 sm:$0xff] }
 0x187   : > { %8300 = vmatprep.mubr.msk.f32.mxu0 %vm323_vm0, %v13304_v39  ;;  %8087 = vmatprep.mubr.msk.f32.mxu1 %vm323_vm0, %v13306_v55 }
 0x188   : > { %3761 = vadd.xlane.f32.xlu0 %v3760_v34  ;;  %4154 = vadd.xlane.f32.xlu1 %v4153_v49  ;;  %v10572_v49 = vrot.slane %v10560_v37, %v10500_v1 }
 0x18a   : > { %8301 = vmatmul.mubr.msk.f32.gmra.mrb[24].mxu0 %vm323_vm0, %v13307_v3  ;;  %8088 = vmatmul.mubr.msk.f32.gmra.mrb[26].mxu1 %vm323_vm0, %v13298_v62 }
 0x18b   : > { %8303 = vmatprep.mubr.msk.f32.mxu0 %vm323_vm0, %v13308_v4  ;;  %8090 = vmatprep.mubr.msk.f32.mxu1 %vm323_vm0, %v13309_v40 }
 0x18c   : > { %3768 = vadd.xlane.f32.xlu0 %v3767_v30 }
 0x18e   : > { %8304 = vmatmul.mubr.msk.f32.gmra.mrb[26].mxu0 %vm323_vm0, %v13310_v42  ;;  %8091 = vmatmul.mubr.msk.f32.gmra.mrb[28].mxu1 %vm323_vm0, %v13300_v17 }
 0x18f   : > { %8306 = vmatprep.mubr.msk.f32.mxu0 %vm323_vm0, %v13311_v23  ;;  %8093 = vmatprep.mubr.msk.f32.mxu1 %vm323_vm0, %v10212_v10 }
 0x190   : > { %4151 = vadd.xlane.f32.xlu0 %v4150_v27 }
 0x192   : > { %8307 = vmatmul.mubr.msk.f32.gmra.mrb[28].mxu0 %vm323_vm0, %v13312_v7  ;;  %8094 = vmatmul.mubr.msk.f32.gmra.mrb[30].mxu1 %vm323_vm0, %v10223_v48 }
 0x193   : > { %8309 = vmatprep.mubr.msk.f32.mxu0 %vm323_vm0, %v2991_v31 }
 0x194   : > { %4157 = vadd.xlane.f32.xlu0 %v4156_v2 }
 0x196   : > { %8310 = vmatmul.mubr.msk.f32.gmra.mrb[30].mxu0 %vm323_vm0, %v2993_v63 }
 0x209   : > { %v7996_v8 = vpop.f32.mrb[0].mxu1 }
 0x20a   : > { %v1707_v44 = vpop.f32.mrb[1].mxu1 }
 0x20d   : > { %v7999_v52 = vpop.f32.mrb[2].mxu1 }
 0x20e   : > { %v1717_v45 = vpop.f32.mrb[3].mxu1 }
 0x211   : > { %v8002_v46 = vpop.f32.mrb[4].mxu1 }
 0x212   : > { %v1727_v59 = vpop.f32.mrb[5].mxu1 }
 0x215   : > { %v8005_v51 = vpop.f32.mrb[6].mxu1 }
 0x216   : > { %v1737_v61 = vpop.f32.mrb[7].mxu1 }
 0x219   : > { %v10530_v62 = vpop.f32.mrb[8].mxu1 }
 0x21a   : > { %v10532_v9 = vpop.f32.mrb[9].mxu1 }
 0x21d   : > { %v10534_v10 = vpop.f32.mrb[10].mxu1 }
 0x21e   : > { %v10536_v17 = vpop.f32.mrb[11].mxu1 }
 0x221   : > { %v10538_v48 = vpop.f32.mrb[12].mxu1 }
 0x222   : > { %v10540_v18 = vpop.f32.mrb[13].mxu1 }
 0x225   : > { %v10542_v53 = vpop.f32.mrb[14].mxu1 }
 0x226   : > { %v10544_v43 = vpop.f32.mrb[15].mxu1 }
 0x22d   : > { %v8266_v54 = vpop.f32.mrb[0].mxu0 }
 0x22e   : > { %v8352_v39 = vadd.f32 %v8266_v54, %v7996_v8  ;;  %v3071_v0 = vpop.f32.mrb[1].mxu0 }
 0x22f   : > { %v8353_v55 = vadd.f32 %v3071_v0, %v1707_v44 }
 0x230   : > { %v3270_v3 = vadd.f32 %v8352_v39, %v10549_v35 }
 0x231   : > { %v3269_v4 = vadd.f32 %v8353_v55, %v10549_v35  ;;  %v8269_v24 = vpop.f32.mrb[2].mxu0 }
 0x232   : > { %vm3302_vm10 = vcmp.ge.f32.partialorder %v3270_v3, 0.0  ;;  %v3334_v25 = vmul.f32 0.1, %v3270_v3  ;;  %v8354_v40 = vadd.f32 %v8269_v24, %v7999_v52  ;;  %v3081_v42 = vpop.f32.mrb[3].mxu0 }
 0x233   : > { %vm3301_vm11 = vcmp.ge.f32.partialorder %v3269_v4, 0.0  ;;  %v3333_v23 = vmul.f32 0.1, %v3269_v4  ;;  %v8355_v29 = vadd.f32 %v3081_v42, %v1717_v45 }
 0x234   : > { %v3366_v31 = vsel %vm3302_vm10, %v3270_v3, %v3334_v25  ;;  %v3272_v7 = vadd.f32 %v8354_v40, %v10549_v35 }
 0x235   : > { %3455 = vst.msk [vmem:[#allocation3 + $0x21] sm:$0xff] %vm3397_vm5, %v3366_v31  ;;  %v3365_v63 = vsel %vm3301_vm11, %v3269_v4, %v3333_v23  ;;  %v3271_v38 = vadd.f32 %v8355_v29, %v10549_v35  ;;  %v8272_v20 = vpop.f32.mrb[4].mxu0 }
 0x236   : > { %3454 = vst.msk [vmem:[#allocation3 + $0x19] sm:$0xff] %vm3397_vm5, %v3365_v63  ;;  %vm3304_vm12 = vcmp.ge.f32.partialorder %v3272_v7, 0.0  ;;  %v3336_v33 = vmul.f32 0.1, %v3272_v7  ;;  %v8356_v22 = vadd.f32 %v8272_v20, %v8002_v46  ;;  %v3091_v41 = vpop.f32.mrb[5].mxu0 }
 0x237   : > { %vm3303_vm13 = vcmp.ge.f32.partialorder %v3271_v38, 0.0  ;;  %v3335_v58 = vmul.f32 0.1, %v3271_v38  ;;  %v8357_v15 = vadd.f32 %v3091_v41, %v1727_v59 }
 0x238   : > { %v3368_v34 = vsel %vm3304_vm12, %v3272_v7, %v3336_v33  ;;  %v3274_v47 = vadd.f32 %v8356_v22, %v10549_v35 }
 0x239   : > { %3457 = vst.msk [vmem:[#allocation3 + $0x39] sm:$0xff] %vm3397_vm5, %v3368_v34  ;;  %v3367_v60 = vsel %vm3303_vm13, %v3271_v38, %v3335_v58  ;;  %v3273_v57 = vadd.f32 %v8357_v15, %v10549_v35  ;;  %v8275_v30 = vpop.f32.mrb[6].mxu0 }
 0x23a   : > { %3456 = vst.msk [vmem:[#allocation3 + $0x31] sm:$0xff] %vm3397_vm5, %v3367_v60  ;;  %vm3306_vm14 = vcmp.ge.f32.partialorder %v3274_v47, 0.0  ;;  %v3338_v36 = vmul.f32 0.1, %v3274_v47  ;;  %v8358_v12 = vadd.f32 %v8275_v30, %v8005_v51  ;;  %v3101_v27 = vpop.f32.mrb[7].mxu0 }
 0x23b   : > { %vm3305_vm15 = vcmp.ge.f32.partialorder %v3273_v57, 0.0  ;;  %v3337_v28 = vmul.f32 0.1, %v3273_v57  ;;  %v8359_v2 = vadd.f32 %v3101_v27, %v1737_v61 }
 0x23c   : > { %v3370_v8 = vsel %vm3306_vm14, %v3274_v47, %v3338_v36  ;;  %v3276_v44 = vadd.f32 %v8358_v12, %v10549_v35  ;;  %v3491_v52 = vld [vmem:[#allocation3 + $0x28] sm:$0x3] }
 0x23d   : > { %3459 = vst.msk [vmem:[#allocation3 + $0x51] sm:$0xff] %vm3397_vm5, %v3370_v8  ;;  %v3369_v19 = vsel %vm3305_vm15, %v3273_v57, %v3337_v28  ;;  %v3275_v45 = vadd.f32 %v8359_v2, %v10549_v35  ;;  %v8278_v46 = vpop.f32.mrb[8].mxu0  ;;  %v4656_v59 = vmul.f32 %v10567_v13, %v3491_v52  ;;  %v3716_v51 = vmul.f32 %v10459_v21, %v3491_v52  ;;  %v10584_v4 = vld [vmem:[#allocation3 + $0x20] sm:$0xff] }
 0x23e   : > { %3458 = vst.msk [vmem:[#allocation3 + $0x49] sm:$0xff] %vm3397_vm5, %v3369_v19  ;;  %vm3308_vm0 = vcmp.ge.f32.partialorder %v3276_v44, 0.0  ;;  %v3340_v1 = vmul.f32 0.1, %v3276_v44  ;;  %v8360_v61 = vadd.f32 %v8278_v46, %v10530_v62  ;;  %v3111_v54 = vpop.f32.mrb[9].mxu0  ;;  %v5044_v39 = vmul.f32 %v10572_v49, %v3491_v52 }
 0x23f   : > { %vm3307_vm1 = vcmp.ge.f32.partialorder %v3275_v45, 0.0  ;;  %v3339_v0 = vmul.f32 0.1, %v3275_v45  ;;  %v8361_v55 = vadd.f32 %v3111_v54, %v10532_v9  ;;  %v4708_v3 = vsel %vm3766_vm8, %v4656_v59, 0.0  ;;  %v10591_v9 = vld [vmem:[#allocation3 + $0x18] sm:$0xff] }
 0x240   : > { %v3372_v24 = vsel %vm3308_vm0, %v3276_v44, %v3340_v1  ;;  %v3278_v25 = vadd.f32 %v8360_v61, %v10549_v35  ;;  %4709 = vadd.xlane.f32.xlu0 %v4708_v3  ;;  %v3776_v40 = vsel %vm3766_vm8, %v3716_v51, 0.0  ;;  %v4106_v29 = vmul.f32 %v10505_v16, %v3491_v52 }
 0x241   : > { %3461 = vst.msk [vmem:[#allocation3 + $0x69] sm:$0xff] %vm3397_vm5, %v3372_v24  ;;  %v3371_v62 = vsel %vm3307_vm1, %v3275_v45, %v3339_v0  ;;  %v3277_v42 = vadd.f32 %v8361_v55, %v10549_v35  ;;  %3777 = vadd.xlane.f32.xlu1 %v3776_v40  ;;  %v8281_v23 = vpop.f32.mrb[10].mxu0  ;;  %v3715_v38 = vmul.f32 %v10459_v21, %v10584_v4  ;;  %v5096_v22 = vsel %vm3400_vm6, %v5044_v39, 0.0 }
 0x242   : > { %3460 = vst.msk [vmem:[#allocation3 + $0x61] sm:$0xff] %vm3397_vm5, %v3371_v62  ;;  %vm3310_vm2 = vcmp.ge.f32.partialorder %v3278_v25, 0.0  ;;  %v3342_v31 = vmul.f32 0.1, %v3278_v25  ;;  %v8362_v7 = vadd.f32 %v8281_v23, %v10534_v10  ;;  %v3121_v63 = vpop.f32.mrb[11].mxu0  ;;  %v4165_v15 = vsel %vm3400_vm6, %v4106_v29, 0.0 }
 0x243   : > { %vm3309_vm10 = vcmp.ge.f32.partialorder %v3277_v42, 0.0  ;;  %v3341_v20 = vmul.f32 0.1, %v3277_v42  ;;  %v8363_v33 = vadd.f32 %v3121_v63, %v10536_v17  ;;  %v3549_v34 = vmul.f32 %v10451_v5, %v10591_v9 }
 0x244   : > { %v3374_v41 = vsel %vm3310_vm2, %v3278_v25, %v3342_v31  ;;  %v3280_v58 = vadd.f32 %v8362_v7, %v10549_v35  ;;  %5097 = vadd.xlane.f32.xlu0 %v5096_v22  ;;  %v10607_v17 = vrot.slane %v10560_v37, %v10445_v32  ;;  %v3773_v12 = vsel %vm3397_vm5, %v3715_v38, 0.0 }
 0x245   : > { %3463 = vst.msk [vmem:[#allocation3 + $0x81] sm:$0xff] %vm3397_vm5, %v3374_v41  ;;  %v3373_v10 = vsel %vm3309_vm10, %v3277_v42, %v3341_v20  ;;  %v3279_v47 = vadd.f32 %v8363_v33, %v10549_v35  ;;  %4166 = vadd.xlane.f32.xlu1 %v4165_v15  ;;  %v8284_v60 = vpop.f32.mrb[12].mxu0  ;;  %v4105_v2 = vmul.f32 %v10505_v16, %v10584_v4  ;;  %v3585_v44 = vsel %vm3397_vm5, %v3549_v34, 0.0 }
 0x246   : > { %3462 = vst.msk [vmem:[#allocation3 + $0x79] sm:$0xff] %vm3397_vm5, %v3373_v10  ;;  %vm3312_vm11 = vcmp.ge.f32.partialorder %v3280_v58, 0.0  ;;  %v3344_v57 = vmul.f32 0.1, %v3280_v58  ;;  %v8364_v30 = vadd.f32 %v8284_v60, %v10538_v48  ;;  %v3131_v36 = vpop.f32.mrb[13].mxu0  ;;  %v3550_v52 = vmul.f32 %v10451_v5, %v10584_v4 }
 0x247   : > { %vm3311_vm12 = vcmp.ge.f32.partialorder %v3279_v47, 0.0  ;;  %v3343_v27 = vmul.f32 0.1, %v3279_v47  ;;  %v8365_v28 = vadd.f32 %v3131_v36, %v10540_v18  ;;  %v4490_v51 = vmul.f32 %v10607_v17, %v10591_v9 }
 0x248   : > { %v3376_v8 = vsel %vm3312_vm11, %v3280_v58, %v3344_v57  ;;  %v3282_v37 = vadd.f32 %v8364_v30, %v10549_v35  ;;  %3774 = vadd.xlane.f32.xlu0 %v3773_v12  ;;  %v4162_v54 = vsel %vm3397_vm5, %v4105_v2, 0.0  ;;  %v3588_v3 = vsel %vm3397_vm5, %v3550_v52, 0.0 }
 0x249   : > { %3465 = vst.msk [vmem:[#allocation3 + $0x99] sm:$0xff] %vm3397_vm5, %v3376_v8  ;;  %v3375_v48 = vsel %vm3311_vm12, %v3279_v47, %v3343_v27  ;;  %v3281_v19 = vadd.f32 %v8365_v28, %v10549_v35  ;;  %3586 = vadd.xlane.f32.xlu1 %v3585_v44  ;;  %v8287_v45 = vpop.f32.mrb[14].mxu0  ;;  %v8074_v39 = vpop.f32.mrb[16].mxu1  ;;  %v4522_v29 = vsel %vm3397_vm5, %v4490_v51, 0.0  ;;  %v4654_v38 = vmul.f32 %v10567_v13, %v10591_v9 }
 0x24a   : > { %3464 = vst.msk [vmem:[#allocation3 + $0x91] sm:$0xff] %vm3397_vm5, %v3375_v48  ;;  %vm3314_vm13 = vcmp.ge.f32.partialorder %v3282_v37, 0.0  ;;  %v3346_v18 = vmul.f32 0.1, %v3282_v37  ;;  %v8366_v46 = vadd.f32 %v8287_v45, %v10542_v53  ;;  %v3141_v59 = vpop.f32.mrb[15].mxu0  ;;  %v2061_v24 = vpop.f32.mrb[17].mxu1  ;;  %v3714_v53 = vmul.f32 %v10459_v21, %v10591_v9 }
 0x24b   : > { %vm3313_vm14 = vcmp.ge.f32.partialorder %v3281_v19, 0.0  ;;  %v3345_v1 = vmul.f32 0.1, %v3281_v19  ;;  %v8367_v61 = vadd.f32 %v3141_v59, %v10544_v43  ;;  %v4104_v58 = vmul.f32 %v10505_v16, %v10591_v9  ;;  %v10651_v48 = vld [vmem:[#allocation3 + $0x40] sm:$0x3] }
 0x24c   : > { %v3378_v0 = vsel %vm3314_vm13, %v3282_v37, %v3346_v18  ;;  %v3284_v55 = vadd.f32 %v8366_v46, %v10549_v35  ;;  %4163 = vadd.xlane.f32.xlu0 %v4162_v54  ;;  %v3770_v22 = vsel %vm3759_vm7, %v3714_v53, 0.0  ;;  %v5042_v30 = vmul.f32 %v10572_v49, %v10591_v9 }
 0x24d   : > { %3467 = vst.msk [vmem:[#allocation3 + $0xb1] sm:$0xff] %vm3397_vm5, %v3378_v0  ;;  %v3377_v25 = vsel %vm3313_vm14, %v3281_v19, %v3345_v1  ;;  %v3283_v40 = vadd.f32 %v8367_v61, %v10549_v35  ;;  %3589 = vadd.xlane.f32.xlu1 %v3588_v3  ;;  %v8290_v43 = vpop.f32.mrb[16].mxu0  ;;  %v8077_v63 = vpop.f32.mrb[18].mxu1  ;;  %v4702_v27 = vsel %vm3759_vm7, %v4654_v38, 0.0  ;;  %v4159_v37 = vsel %vm4149_vm9, %v4104_v58, 0.0 }
 0x24e   : > { %3466 = vst.msk [vmem:[#allocation3 + $0xa9] sm:$0xff] %vm3397_vm5, %v3377_v25  ;;  %vm3316_vm15 = vcmp.ge.f32.partialorder %v3284_v55, 0.0  ;;  %v3348_v62 = vmul.f32 0.1, %v3284_v55  ;;  %v8368_v42 = vadd.f32 %v8290_v43, %v8074_v39  ;;  %v3151_v23 = vpop.f32.mrb[17].mxu0  ;;  %v2071_v41 = vpop.f32.mrb[19].mxu1  ;;  %v4491_v52 = vmul.f32 %v10607_v17, %v10584_v4 }
 0x24f   : > { %vm3315_vm0 = vcmp.ge.f32.partialorder %v3283_v40, 0.0  ;;  %v3347_v31 = vmul.f32 0.1, %v3283_v40  ;;  %v8369_v7 = vadd.f32 %v3151_v23, %v2061_v24  ;;  %v5090_v51 = vsel %vm4149_vm9, %v5042_v30, 0.0 }
 0x250   : > { %v3380_v20 = vsel %vm3316_vm15, %v3284_v55, %v3348_v62  ;;  %v3286_v33 = vadd.f32 %v8368_v42, %v10549_v35  ;;  %4523 = vadd.xlane.f32.xlu0 %v4522_v29  ;;  %v3719_v39 = vmul.f32 %v10459_v21, %v10651_v48  ;;  %v4525_v3 = vsel %vm3397_vm5, %v4491_v52, 0.0 }
 0x251   : > { %3469 = vst.msk [vmem:[#allocation3 + $0xc9] sm:$0xff] %vm3397_vm5, %v3380_v20  ;;  %v3379_v15 = vsel %vm3315_vm0, %v3283_v40, %v3347_v31  ;;  %v3285_v34 = vadd.f32 %v8369_v7, %v10549_v35  ;;  %3771 = vadd.xlane.f32.xlu1 %v3770_v22  ;;  %v8293_v10 = vpop.f32.mrb[18].mxu0  ;;  %v8080_v28 = vpop.f32.mrb[20].mxu1  ;;  %v4655_v53 = vmul.f32 %v10567_v13, %v10584_v4  ;;  %v10669_v20 = vld [vmem:[#allocation3 + $0x30] sm:$0xff] }
 0x252   : > { %3468 = vst.msk [vmem:[#allocation3 + $0xc1] sm:$0xff] %vm3397_vm5, %v3379_v15  ;;  %vm3318_vm1 = vcmp.ge.f32.partialorder %v3286_v33, 0.0  ;;  %v3350_v47 = vmul.f32 0.1, %v3286_v33  ;;  %v8370_v60 = vadd.f32 %v8293_v10, %v8077_v63  ;;  %v3161_v57 = vpop.f32.mrb[19].mxu0  ;;  %v2081_v44 = vpop.f32.mrb[21].mxu1  ;;  %v4109_v29 = vmul.f32 %v10505_v16, %v10651_v48 }
 0x253   : > { %vm3317_vm2 = vcmp.ge.f32.partialorder %v3285_v34, 0.0  ;;  %v3349_v36 = vmul.f32 0.1, %v3285_v34  ;;  %v8371_v12 = vadd.f32 %v3161_v57, %v2071_v41  ;;  %v3785_v63 = vsel %vm3766_vm8, %v3719_v39, 0.0 }
 0x254   : > { %v3382_v2 = vsel %vm3318_vm1, %v3286_v33, %v3350_v47  ;;  %v3288_v8 = vadd.f32 %v8370_v60, %v10549_v35  ;;  %4703 = vadd.xlane.f32.xlu0 %v4702_v27  ;;  %v4705_v41 = vsel %vm3397_vm5, %v4655_v53, 0.0  ;;  %v5043_v15 = vmul.f32 %v10572_v49, %v10584_v4 }
 0x255   : > { %3471 = vst.msk [vmem:[#allocation3 + $0xe1] sm:$0xff] %vm3397_vm5, %v3382_v2  ;;  %v3381_v9 = vsel %vm3317_vm2, %v3285_v34, %v3349_v36  ;;  %v3287_v19 = vadd.f32 %v8371_v12, %v10549_v35  ;;  %4160 = vadd.xlane.f32.xlu1 %v4159_v37  ;;  %v8296_v45 = vpop.f32.mrb[20].mxu0  ;;  %v8083_v54 = vpop.f32.mrb[22].mxu1  ;;  %v3551_v36 = vmul.f32 %v10451_v5, %v10669_v20  ;;  %v4174_v4 = vsel %vm3400_vm6, %v4109_v29, 0.0 }
 0x256   : > { %3470 = vst.msk [vmem:[#allocation3 + $0xd9] sm:$0xff] %vm3397_vm5, %v3381_v9  ;;  %vm3320_vm10 = vcmp.ge.f32.partialorder %v3288_v8, 0.0  ;;  %v3352_v18 = vmul.f32 0.1, %v3288_v8  ;;  %v8372_v46 = vadd.f32 %v8296_v45, %v8080_v28  ;;  %v3171_v59 = vpop.f32.mrb[21].mxu0  ;;  %v2091_v24 = vpop.f32.mrb[23].mxu1  ;;  %v4659_v52 = vmul.f32 %v10567_v13, %v10651_v48 }
 0x257   : > { %vm3319_vm11 = vcmp.ge.f32.partialorder %v3287_v19, 0.0  ;;  %v3351_v1 = vmul.f32 0.1, %v3287_v19  ;;  %v8373_v61 = vadd.f32 %v3171_v59, %v2081_v44  ;;  %v5093_v37 = vsel %vm3397_vm5, %v5043_v15, 0.0 }
 0x258   : > { %v3384_v0 = vsel %vm3320_vm10, %v3288_v8, %v3352_v18  ;;  %v3290_v55 = vadd.f32 %v8372_v46, %v10549_v35  ;;  %5091 = vadd.xlane.f32.xlu0 %v5090_v51  ;;  %v3591_v51 = vsel %vm3397_vm5, %v3551_v36, 0.0  ;;  %v3717_v39 = vmul.f32 %v10459_v21, %v10669_v20 }
 0x259   : > { %3473 = vst.msk [vmem:[#allocation3 + $0xf9] sm:$0xff] %vm3397_vm5, %v3384_v0  ;;  %v3383_v25 = vsel %vm3319_vm11, %v3287_v19, %v3351_v1  ;;  %v3289_v40 = vadd.f32 %v8373_v61, %v10549_v35  ;;  %4526 = vadd.xlane.f32.xlu1 %v4525_v3  ;;  %v8299_v43 = vpop.f32.mrb[22].mxu0  ;;  %v8086_v38 = vpop.f32.mrb[24].mxu1  ;;  %v4717_v3 = vsel %vm3766_vm8, %v4659_v52, 0.0  ;;  %v5047_v53 = vmul.f32 %v10572_v49, %v10651_v48 }
 0x25a   : > { %3472 = vst.msk [vmem:[#allocation3 + $0xf1] sm:$0xff] %vm3397_vm5, %v3383_v25  ;;  %vm3322_vm12 = vcmp.ge.f32.partialorder %v3290_v55, 0.0  ;;  %v3354_v62 = vmul.f32 0.1, %v3290_v55  ;;  %v8374_v42 = vadd.f32 %v8299_v43, %v8083_v54  ;;  %v3181_v23 = vpop.f32.mrb[23].mxu0  ;;  %v2101_v58 = vpop.f32.mrb[25].mxu1 }
 0x25b   : > { %vm3321_vm13 = vcmp.ge.f32.partialorder %v3289_v40, 0.0  ;;  %v3353_v31 = vmul.f32 0.1, %v3289_v40  ;;  %v8375_v7 = vadd.f32 %v3181_v23, %v2091_v24 }
 0x25c   : > { %v3386_v33 = vsel %vm3322_vm12, %v3290_v55, %v3354_v62  ;;  %v3292_v22 = vadd.f32 %v8374_v42, %v10549_v35  ;;  %3786 = vadd.xlane.f32.xlu0 %v3785_v63  ;;  %v10697_v62 = vld [vmem:[#allocation3 + $0x38] sm:$0xff]  ;;  %v3779_v63 = vsel %vm3759_vm7, %v3717_v39, 0.0 }
 0x25d   : > { %3475 = vst.msk [vmem:[#allocation3 + $0x111] sm:$0xff] %vm3397_vm5, %v3386_v33  ;;  %v3385_v34 = vsel %vm3321_vm13, %v3289_v40, %v3353_v31  ;;  %v3291_v10 = vadd.f32 %v8375_v7, %v10549_v35  ;;  %4706 = vadd.xlane.f32.xlu1 %v4705_v41  ;;  %v8302_v47 = vpop.f32.mrb[24].mxu0  ;;  %v8089_v28 = vpop.f32.mrb[26].mxu1  ;;  %v4107_v31 = vmul.f32 %v10505_v16, %v10669_v20  ;;  %v5105_v41 = vsel %vm3400_vm6, %v5047_v53, 0.0 }
 0x25e   : > { %3474 = vst.msk [vmem:[#allocation3 + $0x109] sm:$0xff] %vm3397_vm5, %v3385_v34  ;;  %vm3324_vm14 = vcmp.ge.f32.partialorder %v3292_v22, 0.0  ;;  %v3356_v60 = vmul.f32 0.1, %v3292_v22  ;;  %v8376_v57 = vadd.f32 %v8302_v47, %v8086_v38  ;;  %v3191_v30 = vpop.f32.mrb[25].mxu0  ;;  %v2111_v44 = vpop.f32.mrb[27].mxu1  ;;  %v3552_v15 = vmul.f32 %v10451_v5, %v10697_v62 }
 0x25f   : > { %vm3323_vm15 = vcmp.ge.f32.partialorder %v3291_v10, 0.0  ;;  %v3355_v12 = vmul.f32 0.1, %v3291_v10  ;;  %v8377_v27 = vadd.f32 %v3191_v30, %v2101_v58  ;;  %v4168_v36 = vsel %vm4149_vm9, %v4107_v31, 0.0 }
 0x260   : > { %v3388_v2 = vsel %vm3324_vm14, %v3292_v22, %v3356_v60  ;;  %v3294_v8 = vadd.f32 %v8376_v57, %v10549_v35  ;;  %4175 = vadd.xlane.f32.xlu0 %v4174_v4  ;;  %v4492_v4 = vmul.f32 %v10607_v17, %v10669_v20  ;;  %v4657_v53 = vmul.f32 %v10567_v13, %v10669_v20 }
 0x261   : > { %3477 = vst.msk [vmem:[#allocation3 + $0x129] sm:$0xff] %vm3397_vm5, %v3388_v2  ;;  %v3387_v9 = vsel %vm3323_vm15, %v3291_v10, %v3355_v12  ;;  %v3293_v19 = vadd.f32 %v8377_v27, %v10549_v35  ;;  %5094 = vadd.xlane.f32.xlu1 %v5093_v37  ;;  %v8305_v45 = vpop.f32.mrb[26].mxu0  ;;  %v8092_v54 = vpop.f32.mrb[28].mxu1  ;;  %v3718_v37 = vmul.f32 %v10459_v21, %v10697_v62  ;;  %vm6644_vm15 = vcmask 1042434  }
 0x262   : > { %3476 = vst.msk [vmem:[#allocation3 + $0x121] sm:$0xff] %vm3397_vm5, %v3387_v9  ;;  %vm3326_vm0 = vcmp.ge.f32.partialorder %v3294_v8, 0.0  ;;  %v3358_v18 = vmul.f32 0.1, %v3294_v8  ;;  %v8378_v46 = vadd.f32 %v8305_v45, %v8089_v28  ;;  %v3201_v59 = vpop.f32.mrb[27].mxu0  ;;  %v2121_v24 = vpop.f32.mrb[29].mxu1 }
 0x263   : > { %vm3325_vm1 = vcmp.ge.f32.partialorder %v3293_v19, 0.0  ;;  %v3357_v1 = vmul.f32 0.1, %v3293_v19  ;;  %v8379_v61 = vadd.f32 %v3201_v59, %v2111_v44  ;;  %v4528_v45 = vsel %vm3397_vm5, %v4492_v4, 0.0 }
 0x264   : > { %v3390_v0 = vsel %vm3326_vm0, %v3294_v8, %v3358_v18  ;;  %v3296_v55 = vadd.f32 %v8378_v46, %v10549_v35  ;;  %3592 = vadd.xlane.f32.xlu0 %v3591_v51  ;;  %v3594_v8 = vsel %vm3397_vm5, %v3552_v15, 0.0  ;;  %v4658_v18 = vmul.f32 %v10567_v13, %v10697_v62 }
 0x265   : > { %3479 = vst.msk [vmem:[#allocation3 + $0x141] sm:$0xff] %vm3397_vm5, %v3390_v0  ;;  %v3389_v25 = vsel %vm3325_vm1, %v3293_v19, %v3357_v1  ;;  %v3295_v40 = vadd.f32 %v8379_v61, %v10549_v35  ;;  %4718 = vadd.xlane.f32.xlu1 %v4717_v3  ;;  %v8308_v43 = vpop.f32.mrb[28].mxu0  ;;  %v8095_v38 = vpop.f32.mrb[30].mxu1  ;;  %v3782_v59 = vsel %vm3397_vm5, %v3718_v37, 0.0  ;;  %v4108_v51 = vmul.f32 %v10505_v16, %v10697_v62 }
 0x266   : > { %3478 = vst.msk [vmem:[#allocation3 + $0x139] sm:$0xff] %vm3397_vm5, %v3389_v25  ;;  %vm3328_vm2 = vcmp.ge.f32.partialorder %v3296_v55, 0.0  ;;  %v3360_v42 = vmul.f32 0.1, %v3296_v55  ;;  %v8380_v23 = vadd.f32 %v8308_v43, %v8092_v54  ;;  %v3211_v29 = vpop.f32.mrb[29].mxu0  ;;  %v2131_v58 = vpop.f32.mrb[31].mxu1  ;;  %v5046_v61 = vmul.f32 %v10572_v49, %v10697_v62 }
 0x267   : > { %vm3327_vm10 = vcmp.ge.f32.partialorder %v3295_v40, 0.0  ;;  %v3359_v48 = vmul.f32 0.1, %v3295_v40  ;;  %v8381_v7 = vadd.f32 %v3211_v29, %v2121_v24  ;;  %v4714_v1 = vsel %vm3397_vm5, %v4658_v18, 0.0  ;;  %v3500_v18 = vld [vmem:[#allocation3 + $0x70] sm:$0x3] }
 0x268   : > { %v3392_v33 = vsel %vm3328_vm2, %v3296_v55, %v3360_v42  ;;  %v3298_v22 = vadd.f32 %v8380_v23, %v10549_v35  ;;  %3780 = vadd.xlane.f32.xlu0 %v3779_v63  ;;  %v10733_v54 = vrot.slane %v10520_v14, %v10445_v32  ;;  %v4171_v39 = vsel %vm3397_vm5, %v4108_v51, 0.0  ;;  %v3497_v32 = vld [vmem:[#allocation3 + $0x58] sm:$0x3] }
 0x269   : > { %3481 = vst.msk [vmem:[#allocation3 + $0x159] sm:$0xff] %vm3397_vm5, %v3392_v33  ;;  %v3391_v34 = vsel %vm3327_vm10, %v3295_v40, %v3359_v48  ;;  %v3297_v10 = vadd.f32 %v8381_v7, %v10549_v35  ;;  %5106 = vadd.xlane.f32.xlu1 %v5105_v41  ;;  %v8311_v47 = vpop.f32.mrb[30].mxu0  ;;  %v4493_v0 = vmul.f32 %v10607_v17, %v10697_v62  ;;  %v5102_v55 = vsel %vm3397_vm5, %v5046_v61, 0.0  ;;  %v3495_v48 = vld [vmem:[#allocation3 + $0x48] sm:$0xff]  ;;  %v3496_v33 = vld [vmem:[#allocation3 + $0x50] sm:$0xff] }
 0x26a   : > { %3480 = vst.msk [vmem:[#allocation3 + $0x151] sm:$0xff] %vm3397_vm5, %v3391_v34  ;;  %vm3330_vm11 = vcmp.ge.f32.partialorder %v3298_v22, 0.0  ;;  %v3362_v60 = vmul.f32 0.1, %v3298_v22  ;;  %v8382_v57 = vadd.f32 %v8311_v47, %v8095_v38  ;;  %v3221_v30 = vpop.f32.mrb[31].mxu0  ;;  %v5430_v3 = vmul.f32 %v10733_v54, %v10669_v20 }
 0x26b   : > { %vm3329_vm12 = vcmp.ge.f32.partialorder %v3297_v10, 0.0  ;;  %v3361_v12 = vmul.f32 0.1, %v3297_v10  ;;  %v8383_v27 = vadd.f32 %v3221_v30, %v2131_v58  ;;  %v4531_v24 = vsel %vm3397_vm5, %v4493_v0, 0.0 }
 0x26c   : > { %v3394_v28 = vsel %vm3330_vm11, %v3298_v22, %v3362_v60  ;;  %v3300_v2 = vadd.f32 %v8382_v57, %v10549_v35  ;;  %4169 = vadd.xlane.f32.xlu0 %v4168_v36  ;;  %v5462_v14 = vsel %vm3397_vm5, %v5430_v3, 0.0  ;;  %v4662_v25 = vmul.f32 %v10567_v13, %v3497_v32 }
 0x26d   : > { %3483 = vst.msk [vmem:[#allocation3 + $0x171] sm:$0xff] %vm3397_vm5, %v3394_v28  ;;  %v3393_v44 = vsel %vm3329_vm12, %v3297_v10, %v3361_v12  ;;  %v3299_v52 = vadd.f32 %v8383_v27, %v10549_v35  ;;  %3595 = vadd.xlane.f32.xlu1 %v3594_v8  ;;  %v4711_v40 = vsel %vm3759_vm7, %v4657_v53, 0.0  ;;  %v5045_v43 = vmul.f32 %v10572_v49, %v10669_v20 }
 0x26e   : > { %3482 = vst.msk [vmem:[#allocation3 + $0x169] sm:$0xff] %vm3397_vm5, %v3393_v44  ;;  %vm3332_vm13 = vcmp.ge.f32.partialorder %v3300_v2, 0.0  ;;  %v3364_v9 = vmul.f32 0.1, %v3300_v2  ;;  %v4726_v42 = vsel %vm3766_vm8, %v4662_v25, 0.0  ;;  %v5050_v23 = vmul.f32 %v10572_v49, %v3497_v32 }
 0x26f   : > { %vm3331_vm14 = vcmp.ge.f32.partialorder %v3299_v52, 0.0  ;;  %v3363_v19 = vmul.f32 0.1, %v3299_v52  ;;  %v5099_v29 = vsel %vm4149_vm9, %v5045_v43, 0.0  ;;  %v5431_v31 = vmul.f32 %v10733_v54, %v10697_v62 }
 0x270   : > { %v3396_v46 = vsel %vm3332_vm13, %v3300_v2, %v3364_v9  ;;  %4529 = vadd.xlane.f32.xlu0 %v4528_v45  ;;  %v5114_v7 = vsel %vm3400_vm6, %v5050_v23, 0.0  ;;  %v3553_v63 = vmul.f32 %v10451_v5, %v3495_v48  ;;  %v3722_v20 = vmul.f32 %v10459_v21, %v3497_v32  ;;  %v3499_v23 = vld [vmem:[#allocation3 + $0x68] sm:$0xff] }
 0x271   : > { %3485 = vst.msk [vmem:[#allocation3 + $0x189] sm:$0xff] %vm3397_vm5, %v3396_v46  ;;  %v3395_v35 = vsel %vm3331_vm14, %v3299_v52, %v3363_v19  ;;  %3783 = vadd.xlane.f32.xlu1 %v3782_v59  ;;  %v5465_v38 = vsel %vm3397_vm5, %v5431_v31, 0.0  ;;  %v3721_v41 = vmul.f32 %v10459_v21, %v3496_v33  ;;  %v4112_v62 = vmul.f32 %v10505_v16, %v3497_v32 }
 0x272   : > { %3484 = vst.msk [vmem:[#allocation3 + $0x181] sm:$0xff] %vm3397_vm5, %v3395_v35  ;;  %v3597_v22 = vsel %vm3397_vm5, %v3553_v63, 0.0  ;;  %v3794_v58 = vsel %vm3766_vm8, %v3722_v20, 0.0  ;;  %v4111_v34 = vmul.f32 %v10505_v16, %v3496_v33  ;;  %v3554_v47 = vmul.f32 %v10451_v5, %v3496_v33 }
 0x273   : > { %v3791_v15 = vsel %vm3397_vm5, %v3721_v41, 0.0  ;;  %v4183_v10 = vsel %vm3400_vm6, %v4112_v62, 0.0  ;;  %v4494_v57 = vmul.f32 %v10607_v17, %v3495_v48  ;;  %v3720_v36 = vmul.f32 %v10459_v21, %v3495_v48 }
 0x274   : > { %4715 = vadd.xlane.f32.xlu0 %v4714_v1  ;;  %v4180_v60 = vsel %vm3397_vm5, %v4111_v34, 0.0  ;;  %v3600_v30 = vsel %vm3397_vm5, %v3554_v47, 0.0  ;;  %v4660_v27 = vmul.f32 %v10567_v13, %v3495_v48  ;;  %v4110_v28 = vmul.f32 %v10505_v16, %v3495_v48 }
 0x275   : > { %4172 = vadd.xlane.f32.xlu1 %v4171_v39  ;;  %v4534_v12 = vsel %vm3397_vm5, %v4494_v57, 0.0  ;;  %v3788_v4 = vsel %vm3759_vm7, %v3720_v36, 0.0  ;;  %v5048_v8 = vmul.f32 %v10572_v49, %v3495_v48  ;;  %v4495_v44 = vmul.f32 %v10607_v17, %v3496_v33 }
 0x276   : > { %v4720_v2 = vsel %vm3759_vm7, %v4660_v27, 0.0  ;;  %v4177_v37 = vsel %vm4149_vm9, %v4110_v28, 0.0  ;;  %v5432_v9 = vmul.f32 %v10733_v54, %v3495_v48  ;;  %v4661_v45 = vmul.f32 %v10567_v13, %v3496_v33  ;;  %v3503_v28 = vld [vmem:[#allocation3 + $0x88] sm:$0x3] }
 0x277   : > { %v5108_v52 = vsel %vm4149_vm9, %v5048_v8, 0.0  ;;  %v4537_v19 = vsel %vm3397_vm5, %v4495_v44, 0.0  ;;  %v3725_v59 = vmul.f32 %v10459_v21, %v3500_v18  ;;  %v5049_v35 = vmul.f32 %v10572_v49, %v3496_v33  ;;  %v10830_v44 = vpop.xlane.xlu1 %3764 }
 0x278   : > { %5103 = vadd.xlane.f32.xlu0 %v5102_v55  ;;  %v5468_v46 = vsel %vm3397_vm5, %v5432_v9, 0.0  ;;  %v4723_v51 = vsel %vm3397_vm5, %v4661_v45, 0.0  ;;  %v4115_v61 = vmul.f32 %v10505_v16, %v3500_v18  ;;  %v5433_v0 = vmul.f32 %v10733_v54, %v3496_v33  ;;  %v3498_v55 = vld [vmem:[#allocation3 + $0x60] sm:$0xff] }
 0x279   : > { %4532 = vadd.xlane.f32.xlu1 %v4531_v24  ;;  %v3803_v1 = vsel %vm3766_vm8, %v3725_v59, 0.0  ;;  %v5111_v39 = vsel %vm3397_vm5, %v5049_v35, 0.0  ;;  %v3555_v24 = vmul.f32 %v10451_v5, %v3498_v55  ;;  %v4665_v32 = vmul.f32 %v10567_v13, %v3500_v18  ;;  %v10838_v59 = vld [vmem:[#allocation3 + $0x78] sm:$0xff] }
 0x27a   : > { %v4192_v3 = vsel %vm3400_vm6, %v4115_v61, 0.0  ;;  %v5471_v53 = vsel %vm3397_vm5, %v5433_v0, 0.0  ;;  %v3723_v25 = vmul.f32 %v10459_v21, %v3498_v55  ;;  %v4113_v31 = vmul.f32 %v10505_v16, %v3498_v55 }
 0x27b   : > { %v4735_v43 = vsel %vm3766_vm8, %v4665_v32, 0.0  ;;  %v4496_v20 = vmul.f32 %v10607_v17, %v3498_v55  ;;  %v4664_v62 = vmul.f32 %v10567_v13, %v3499_v23  ;;  %v4114_v34 = vmul.f32 %v10505_v16, %v3499_v23  ;;  %v10842_v35 = vpop.xlane.xlu1 %4154 }
 0x27c   : > { %5463 = vadd.xlane.f32.xlu0 %v5462_v14  ;;  %v3603_v14 = vsel %vm3397_vm5, %v3555_v24, 0.0  ;;  %v5052_v47 = vmul.f32 %v10572_v49, %v3499_v23  ;;  %v4497_v57 = vmul.f32 %v10607_v17, %v3499_v23  ;;  %v5051_v9 = vmul.f32 %v10572_v49, %v3498_v55 }
 0x27d   : > { %4712 = vadd.xlane.f32.xlu1 %v4711_v40  ;;  %v10796_v40 = vpop.xlane.xlu0 %3580  ;;  %v4540_v41 = vsel %vm3397_vm5, %v4496_v20, 0.0  ;;  %v5056_v45 = vmul.f32 %v10572_v49, %v3503_v28  ;;  %v3557_v61 = vmul.f32 %v10451_v5, %v10838_v59  ;;  %v3728_v0 = vmul.f32 %v10459_v21, %v3503_v28 }
 0x27e   : > { %v5120_v36 = vsel %vm3397_vm5, %v5052_v47, 0.0  ;;  %v4543_v27 = vsel %vm3397_vm5, %v4497_v57, 0.0  ;;  %vm6646_vm0 = vcmask 1043459   ;;  %vm6648_vm1 = vcmask 1044484  }
 0x27f   : > { %vm6650_vm2 = vcmask 1045509   ;;  %vm6652_vm10 = vcmask 1046534   ;;  %vm6654_vm11 = vcmask 1047559   ;;  %vm6665_vm12 = vcmask 130048  }
 0x280   : > { %4727 = vadd.xlane.f32.xlu0 %v4726_v42  ;;  %v5053_v42 = vmul.f32 %v10572_v49, %v3500_v18  ;;  %v5117_v18 = vsel %vm4149_vm9, %v5051_v9, 0.0  ;;  %vm6836_vm13 = vcmask 138248  }
 0x281   : > { %5100 = vadd.xlane.f32.xlu1 %v5099_v29  ;;  %v3797_v29 = vsel %vm3759_vm7, %v3723_v25, 0.0  ;;  %v10804_v63 = vpop.xlane.xlu0 %3583  ;;  %v4118_v25 = vmul.f32 %v10505_v16, %v3503_v28 }
 0x282   : > { %v5123_v48 = vsel %vm3400_vm6, %v5053_v42, 0.0 }
 0x284   : > { %5115 = vadd.xlane.f32.xlu0 %v5114_v7  ;;  %v3556_v7 = vmul.f32 %v10451_v5, %v3499_v23 }
 0x285   : > { %5466 = vadd.xlane.f32.xlu1 %v5465_v38  ;;  %v4186_v38 = vsel %vm4149_vm9, %v4113_v31, 0.0  ;;  %v4201_v31 = vsel %vm3400_vm6, %v4118_v25, 0.0 }
 0x286   : > { %v3606_v33 = vsel %vm3397_vm5, %v3556_v7, 0.0 }
 0x288   : > { %3598 = vadd.xlane.f32.xlu0 %v3597_v22  ;;  %v3724_v22 = vmul.f32 %v10459_v21, %v3499_v23 }
 0x289   : > { %3795 = vadd.xlane.f32.xlu1 %v3794_v58  ;;  %v10811_v58 = vpop.xlane.xlu0 %3761 }
 0x28a   : > { %v3953_v9 = vrot.slane %v10811_v58, 1 }
 0x28c   : > { %3792 = vadd.xlane.f32.xlu0 %v3791_v15  ;;  %v3800_v15 = vsel %vm3397_vm5, %v3724_v22, 0.0 }
 0x28d   : > { %4184 = vadd.xlane.f32.xlu1 %v4183_v10  ;;  %v4732_v10 = vsel %vm3397_vm5, %v4664_v62, 0.0 }
 0x290   : > { %4181 = vadd.xlane.f32.xlu0 %v4180_v60  ;;  %v4189_v60 = vsel %vm3397_vm5, %v4114_v34, 0.0  ;;  %v3726_v34 = vmul.f32 %v10459_v21, %v10838_v59 }
 0x291   : > { %3601 = vadd.xlane.f32.xlu1 %v3600_v30  ;;  %v10820_v30 = vpop.xlane.xlu0 %3768 }
 0x294   : > { %4535 = vadd.xlane.f32.xlu0 %v4534_v12  ;;  %v5434_v12 = vmul.f32 %v10733_v54, %v3498_v55 }
 0x295   : > { %3789 = vadd.xlane.f32.xlu1 %v3788_v4  ;;  %v4663_v4 = vmul.f32 %v10567_v13, %v3498_v55  ;;  %v10849_v55 = vld [vmem:[#allocation3 + $0x80] sm:$0xff] }
 0x296   : > { %v5474_v8 = vsel %vm3397_vm5, %v5434_v12, 0.0  ;;  %v3727_v32 = vmul.f32 %v10459_v21, %v10849_v55 }
 0x298   : > { %4721 = vadd.xlane.f32.xlu0 %v4720_v2  ;;  %v10826_v2 = vpop.xlane.xlu0 %4151 }
 0x299   : > { %4178 = vadd.xlane.f32.xlu1 %v4177_v37  ;;  %v4668_v37 = vmul.f32 %v10567_v13, %v3503_v28  ;;  %v4116_v28 = vmul.f32 %v10505_v16, %v10838_v59 }
 0x29c   : > { %5109 = vadd.xlane.f32.xlu0 %v5108_v52  ;;  %v4729_v52 = vsel %vm3759_vm7, %v4663_v4, 0.0  ;;  %v3806_v4 = vsel %vm3759_vm7, %v3726_v34, 0.0 }
 0x29d   : > { %4538 = vadd.xlane.f32.xlu1 %v4537_v19  ;;  %v4744_v19 = vsel %vm3766_vm8, %v4668_v37, 0.0 }
 0x2a0   : > { %5469 = vadd.xlane.f32.xlu0 %v5468_v46  ;;  %v5435_v46 = vmul.f32 %v10733_v54, %v3499_v23  ;;  %v3809_v23 = vsel %vm3397_vm5, %v3727_v32, 0.0  ;;  %v4343_v32 = vrot.slane %v10842_v35, 2 }
 0x2a1   : > { %4724 = vadd.xlane.f32.xlu1 %v4723_v51  ;;  %v10840_v51 = vpop.xlane.xlu0 %4157 }
 0x2a4   : > { %3804 = vadd.xlane.f32.xlu0 %v3803_v1  ;;  %v5132_v1 = vsel %vm3400_vm6, %v5056_v45, 0.0  ;;  %v3954_v45 = vrot.slane %v10830_v44, 1 }
 0x2a5   : > { %5112 = vadd.xlane.f32.xlu1 %v5111_v39  ;;  %v5477_v39 = vsel %vm3397_vm5, %v5435_v46, 0.0 }
 0x2a6   : > { %v3955_v44 = vsel %vm549_vm3, %v3953_v9, %v3954_v45 }
 0x2a8   : > { %4193 = vadd.xlane.f32.xlu0 %v4192_v3 }
 0x2a9   : > { %5472 = vadd.xlane.f32.xlu1 %v5471_v53  ;;  %v3609_v53 = vsel %vm3397_vm5, %v3557_v61, 0.0  ;;  %v5054_v61 = vmul.f32 %v10572_v49, %v10838_v59 }
 0x2ac   : > { %3604 = vadd.xlane.f32.xlu0 %v3603_v14  ;;  %v3812_v14 = vsel %vm3766_vm8, %v3728_v0, 0.0  ;;  %v4499_v0 = vmul.f32 %v10607_v17, %v10849_v55 }
 0x2ad   : > { %4736 = vadd.xlane.f32.xlu1 %v4735_v43 }
 0x2b0   : > { %3798 = vadd.xlane.f32.xlu0 %v3797_v29  ;;  %v4117_v29 = vmul.f32 %v10505_v16, %v10849_v55 }
 0x2b1   : > { %5124 = vadd.xlane.f32.xlu1 %v5123_v48  ;;  %v3558_v48 = vmul.f32 %v10451_v5, %v10849_v55 }
 0x2b2   : > { %v4198_v22 = vsel %vm3397_vm5, %v4117_v29, 0.0  ;;  %v5126_v29 = vsel %vm4149_vm9, %v5054_v61, 0.0 }
 0x2b3   : > { %v3612_v62 = vsel %vm3397_vm5, %v3558_v48, 0.0  ;;  %v4549_v48 = vsel %vm3397_vm5, %v4499_v0, 0.0 }
 0x2b4   : > { %4187 = vadd.xlane.f32.xlu0 %v4186_v38 }
 0x2b5   : > { %3607 = vadd.xlane.f32.xlu1 %v3606_v33 }
 0x2b8   : > { %4541 = vadd.xlane.f32.xlu0 %v4540_v41  ;;  %v4498_v41 = vmul.f32 %v10607_v17, %v10838_v59 }
 0x2b9   : > { %3801 = vadd.xlane.f32.xlu1 %v3800_v15 }
 0x2ba   : > { %v4546_v12 = vsel %vm3397_vm5, %v4498_v41, 0.0 }
 0x2bc   : > { %4733 = vadd.xlane.f32.xlu0 %v4732_v10 }
 0x2bd   : > { %4190 = vadd.xlane.f32.xlu1 %v4189_v60 }
 0x2c0   : > { %5121 = vadd.xlane.f32.xlu0 %v5120_v36 }
 0x2c1   : > { %4544 = vadd.xlane.f32.xlu1 %v4543_v27  ;;  %v4666_v27 = vmul.f32 %v10567_v13, %v10838_v59 }
 0x2c4   : > { %5475 = vadd.xlane.f32.xlu0 %v5474_v8 }
 0x2c5   : > { %4730 = vadd.xlane.f32.xlu1 %v4729_v52 }
 0x2c8   : > { %4745 = vadd.xlane.f32.xlu0 %v4744_v19  ;;  %v3956_v19 = vrot.slane %v10820_v30, 1 }
 0x2c9   : > { %5118 = vadd.xlane.f32.xlu1 %v5117_v18 }
 0x2cc   : > { %5133 = vadd.xlane.f32.xlu0 %v5132_v1  ;;  %v4738_v1 = vsel %vm3759_vm7, %v4666_v27, 0.0 }
 0x2cd   : > { %5478 = vadd.xlane.f32.xlu1 %v5477_v39  ;;  %v10851_v3 = vpop.xlane.xlu0 %4709  ;;  %v4195_v39 = vsel %vm4149_vm9, %v4116_v28, 0.0  ;;  %v10920_v28 = vld [vmem:[#allocation3 + $0x90] sm:$0xff] }
 0x2ce   : > { %v3778_v24 = vpop.xlane.xlu1 %3777  ;;  %v3559_v61 = vmul.f32 %v10451_v5, %v10920_v28 }
 0x2cf   : > { %v3961_v38 = vrot.slane %v3778_v24, 1  ;;  %v4342_v24 = vrot.slane %v10826_v2, 2  ;;  %v5436_v2 = vmul.f32 %v10733_v54, %v10838_v59 }
 0x2d0   : > { %3610 = vadd.xlane.f32.xlu0 %v3609_v53  ;;  %v3957_v53 = vsel %vm549_vm3, %v3954_v45, %v3956_v19  ;;  %v5437_v45 = vmul.f32 %v10733_v54, %v10849_v55 }
 0x2d1   : > { %3813 = vadd.xlane.f32.xlu1 %v3812_v14  ;;  %v10858_v43 = vpop.xlane.xlu0 %5097  ;;  %v4344_v59 = vsel %vm1219_vm4, %v4342_v24, %v4343_v32 }
 0x2d2   : > { %v4167_v42 = vpop.xlane.xlu1 %4166  ;;  %v5285_v0 = vrot.slane %v10858_v43, 2  ;;  %v3615_v43 = vsel %vm3397_vm5, %v3559_v61, 0.0 }
 0x2d3   : > { %v4350_v47 = vrot.slane %v4167_v42, 2  ;;  %v4345_v42 = vrot.slane %v10840_v51, 2  ;;  %v4066_v51 = vadd.f32 %v3957_v53, %v10804_v63 }
 0x2d4   : > { %3810 = vadd.xlane.f32.xlu0 %v3809_v23 }
 0x2d5   : > { %4202 = vadd.xlane.f32.xlu1 %v4201_v31  ;;  %v3775_v7 = vpop.xlane.xlu0 %3774  ;;  %v3506_v31 = vld [vmem:[#allocation3 + $0xa0] sm:$0x3] }
 0x2d6   : > { %v3959_v20 = vrot.slane %v3775_v7, 1  ;;  %v3587_v33 = vpop.xlane.xlu1 %3586  ;;  %v4667_v7 = vmul.f32 %v10567_v13, %v10849_v55 }
 0x2d8   : > { %4199 = vadd.xlane.f32.xlu0 %v4198_v22  ;;  %v3962_v15 = vsel %vm549_vm3, %v3959_v20, %v3961_v38  ;;  %v3731_v22 = vmul.f32 %v10459_v21, %v3506_v31  ;;  %v4741_v34 = vsel %vm3397_vm5, %v4667_v7, 0.0 }
 0x2d9   : > { %3613 = vadd.xlane.f32.xlu1 %v3612_v62  ;;  %v4164_v10 = vpop.xlane.xlu0 %4163  ;;  %v4346_v62 = vsel %vm1219_vm4, %v4343_v32, %v4345_v42 }
 0x2da   : > { %v4348_v60 = vrot.slane %v4164_v10, 2  ;;  %v3590_v57 = vpop.xlane.xlu1 %3589  ;;  %v5055_v10 = vmul.f32 %v10572_v49, %v10849_v55  ;;  %v5483_v55 = vsel %vm3397_vm5, %v5437_v45, 0.0 }
 0x2db   : > { %v4068_v36 = vadd.f32 %v3962_v15, %v3590_v57  ;;  %v5480_v15 = vsel %vm3397_vm5, %v5436_v2, 0.0  ;;  %v3821_v57 = vsel %vm3766_vm8, %v3731_v22, 0.0 }
 0x2dc   : > { %4547 = vadd.xlane.f32.xlu0 %v4546_v12  ;;  %v4351_v8 = vsel %vm1219_vm4, %v4348_v60, %v4350_v47  ;;  %v4455_v47 = vadd.f32 %v4346_v62, %v4066_v51  ;;  %v5129_v19 = vsel %vm3397_vm5, %v5055_v10, 0.0  ;;  %v4119_v51 = vmul.f32 %v10505_v16, %v10920_v28 }
 0x2dd   : > { %3807 = vadd.xlane.f32.xlu1 %v3806_v4  ;;  %v4524_v37 = vpop.xlane.xlu0 %4523  ;;  %v10880_v52 = vadd.f32 %v4351_v8, %v4068_v36  ;;  %v4897_v36 = vrot.slane %v10851_v3, 1  ;;  %v4121_v4 = vmul.f32 %v10505_v16, %v3506_v31 }
 0x2de   : > { %v3772_v18 = vpop.xlane.xlu1 %3771 }
 0x2df   : > { %v3958_v46 = vrot.slane %v3772_v18, 1 }
 0x2e0   : > { %4739 = vadd.xlane.f32.xlu0 %v4738_v1 }
 0x2e1   : > { %v3960_v58 = vsel %vm549_vm3, %v3958_v46, %v3959_v20  ;;  %4196 = vadd.xlane.f32.xlu1 %v4195_v39  ;;  %v4704_v30 = vpop.xlane.xlu0 %4703  ;;  %v4065_v20 = vadd.f32 %v3955_v44, %v10796_v40  ;;  %v4671_v44 = vmul.f32 %v10567_v13, %v3506_v31 }
 0x2e2   : > { %v4161_v14 = vpop.xlane.xlu1 %4160  ;;  %v4067_v25 = vadd.f32 %v3960_v58, %v3587_v33  ;;  %v4894_v12 = vrot.slane %v4704_v30, 1  ;;  %v4210_v30 = vsel %vm3400_vm6, %v4121_v4, 0.0 }
 0x2e3   : > { %v4347_v23 = vrot.slane %v4161_v14, 2  ;;  %v4454_v63 = vadd.f32 %v4344_v59, %v4065_v20  ;;  %v4753_v2 = vsel %vm3766_vm8, %v4671_v44, 0.0 }
 0x2e4   : > { %5127 = vadd.xlane.f32.xlu0 %v5126_v29  ;;  %v3729_v29 = vmul.f32 %v10459_v21, %v10920_v28 }
 0x2e5   : > { %4550 = vadd.xlane.f32.xlu1 %v4549_v48  ;;  %v5092_v38 = vpop.xlane.xlu0 %5091  ;;  %v4349_v35 = vsel %vm1219_vm4, %v4347_v23, %v4348_v60  ;;  %v4618_v8 = vadd.f32 %v4524_v37, %v4454_v63  ;;  %v5059_v48 = vmul.f32 %v10572_v49, %v3506_v31  ;;  %v4204_v31 = vsel %vm4149_vm9, %v4119_v51, 0.0 }
 0x2e6   : > { %v4527_v33 = vpop.xlane.xlu1 %4526  ;;  %v10907_v41 = vadd.f32 %v4349_v35, %v4067_v25  ;;  %v5282_v24 = vrot.slane %v5092_v38, 2  ;;  %v10946_v38 = vld [vmem:[#allocation3 + $0x98] sm:$0xff]  ;;  %v3815_v20 = vsel %vm3759_vm7, %v3729_v29, 0.0 }
 0x2e7   : > { %v4619_v9 = vadd.f32 %v4527_v33, %v4455_v47  ;;  %v5141_v33 = vsel %vm3400_vm6, %v5059_v48, 0.0  ;;  %v3560_v22 = vmul.f32 %v10451_v5, %v10946_v38  ;;  %v3730_v10 = vmul.f32 %v10459_v21, %v10946_v38 }
 0x2e8   : > { %5481 = vadd.xlane.f32.xlu0 %v5480_v15  ;;  %v4500_v15 = vmul.f32 %v10607_v17, %v10920_v28  ;;  %v4501_v44 = vmul.f32 %v10607_v17, %v10946_v38 }
 0x2e9   : > { %4742 = vadd.xlane.f32.xlu1 %v4741_v34  ;;  %v10915_v40 = vpop.xlane.xlu0 %3786  ;;  %v3618_v34 = vsel %vm3397_vm5, %v3560_v22, 0.0 }
 0x2ea   : > { %v4707_v60 = vpop.xlane.xlu1 %4706  ;;  %v4552_v4 = vsel %vm3397_vm5, %v4500_v15, 0.0  ;;  %v4555_v51 = vsel %vm3397_vm5, %v4501_v44, 0.0 }
 0x2eb   : > { %v4895_v27 = vrot.slane %v4707_v60, 1 }
 0x2ec   : > { %3822 = vadd.xlane.f32.xlu0 %v3821_v57  ;;  %v4670_v57 = vmul.f32 %v10567_v13, %v10946_v38 }
 0x2ed   : > { %v4896_v18 = vsel %vm549_vm3, %v4894_v12, %v4895_v27  ;;  %v4898_v46 = vsel %vm549_vm3, %v4895_v27, %v4897_v36  ;;  %5130 = vadd.xlane.f32.xlu1 %v5129_v19  ;;  %v10927_v3 = vpop.xlane.xlu0 %4175  ;;  %v3966_v36 = vrot.slane %v10915_v40, 1 }
 0x2ee   : > { %v5095_v1 = vpop.xlane.xlu1 %5094  ;;  %v5006_v39 = vadd.f32 %v4896_v18, %v4618_v8  ;;  %v5007_v37 = vadd.f32 %v4898_v46, %v4619_v9  ;;  %v3818_v8 = vsel %vm3397_vm5, %v3730_v10, 0.0  ;;  %v4120_v9 = vmul.f32 %v10505_v16, %v10946_v38 }
 0x2ef   : > { %v5283_v58 = vrot.slane %v5095_v1, 2  ;;  %v5058_v18 = vmul.f32 %v10572_v49, %v10946_v38 }
 0x2f0   : > { %4211 = vadd.xlane.f32.xlu0 %v4210_v30  ;;  %v4207_v30 = vsel %vm3397_vm5, %v4120_v9, 0.0 }
 0x2f1   : > { %5484 = vadd.xlane.f32.xlu1 %v5483_v55  ;;  %v3593_v53 = vpop.xlane.xlu0 %3592  ;;  %v5284_v32 = vsel %vm1219_vm4, %v5282_v24, %v5283_v58  ;;  %v5286_v14 = vsel %vm1219_vm4, %v5283_v58, %v5285_v0  ;;  %v4750_v58 = vsel %vm3397_vm5, %v4670_v57, 0.0  ;;  %v5057_v57 = vmul.f32 %v10572_v49, %v10920_v28 }
 0x2f2   : > { %v4719_v25 = vpop.xlane.xlu1 %4718  ;;  %v10937_v42 = vadd.f32 %v5284_v32, %v5006_v39  ;;  %v10939_v23 = vadd.f32 %v5286_v14, %v5007_v37  ;;  %v4355_v37 = vrot.slane %v10927_v3, 2 }
 0x2f3   : > { %v4902_v40 = vrot.slane %v4719_v25, 1 }
 0x2f4   : > { %3616 = vadd.xlane.f32.xlu0 %v3615_v43 }
 0x2f5   : > { %4754 = vadd.xlane.f32.xlu1 %v4753_v2  ;;  %v3781_v7 = vpop.xlane.xlu0 %3780 }
 0x2f6   : > { %v5107_v35 = vpop.xlane.xlu1 %5106  ;;  %v3963_v12 = vrot.slane %v3781_v7, 1  ;;  %v5138_v7 = vsel %vm3397_vm5, %v5058_v18, 0.0 }
 0x2f7   : > { %v5290_v25 = vrot.slane %v5107_v35, 2  ;;  %v3509_v35 = vld [vmem:[#allocation3 + $0xb8] sm:$0x3] }
 0x2f8   : > { %3816 = vadd.xlane.f32.xlu0 %v3815_v20  ;;  %v5438_v20 = vmul.f32 %v10733_v54, %v10920_v28  ;;  %v4674_v10 = vmul.f32 %v10567_v13, %v3509_v35  ;;  %v5062_v9 = vmul.f32 %v10572_v49, %v3509_v35 }
 0x2f9   : > { %5142 = vadd.xlane.f32.xlu1 %v5141_v33  ;;  %v4170_v59 = vpop.xlane.xlu0 %4169  ;;  %v4669_v33 = vmul.f32 %v10567_v13, %v10920_v28 }
 0x2fa   : > { %v3596_v62 = vpop.xlane.xlu1 %3595  ;;  %v4352_v0 = vrot.slane %v4170_v59, 2 }
 0x2fc   : > { %4205 = vadd.xlane.f32.xlu0 %v4204_v31 }
 0x2fd   : > { %3619 = vadd.xlane.f32.xlu1 %v3618_v34  ;;  %v4530_v63 = vpop.xlane.xlu0 %4529  ;;  %v5486_v34 = vsel %vm3397_vm5, %v5438_v20, 0.0 }
 0x2fe   : > { %v3784_v47 = vpop.xlane.xlu1 %3783  ;;  %v4620_v60 = vadd.f32 %v4530_v63, %v10907_v41 }
 0x2ff   : > { %v3964_v27 = vrot.slane %v3784_v47, 1  ;;  %v4747_v47 = vsel %vm3759_vm7, %v4669_v33, 0.0 }
 0x300   : > { %4553 = vadd.xlane.f32.xlu0 %v4552_v4 }
 0x301   : > { %v3965_v19 = vsel %vm549_vm3, %v3963_v12, %v3964_v27  ;;  %v3967_v45 = vsel %vm549_vm3, %v3964_v27, %v3966_v36  ;;  %3819 = vadd.xlane.f32.xlu1 %v3818_v8  ;;  %v4716_v41 = vpop.xlane.xlu0 %4715  ;;  %v4762_v8 = vsel %vm3766_vm8, %v4674_v10, 0.0 }
 0x302   : > { %v4173_v46 = vpop.xlane.xlu1 %4172  ;;  %v4900_v1 = vrot.slane %v4716_v41, 1  ;;  %v4069_v61 = vadd.f32 %v3965_v19, %v3593_v53  ;;  %v4070_v39 = vadd.f32 %v3967_v45, %v3596_v62  ;;  %v5135_v19 = vsel %vm4149_vm9, %v5057_v57, 0.0  ;;  %v3507_v41 = vld [vmem:[#allocation3 + $0xa8] sm:$0xff] }
 0x303   : > { %v4353_v24 = vrot.slane %v4173_v46, 2  ;;  %v5439_v45 = vmul.f32 %v10733_v54, %v10946_v38  ;;  %v3734_v38 = vmul.f32 %v10459_v21, %v3509_v35 }
 0x304   : > { %4751 = vadd.xlane.f32.xlu0 %v4750_v58  ;;  %v4903_v55 = vsel %vm549_vm3, %v4900_v1, %v4902_v40 }
 0x305   : > { %4208 = vadd.xlane.f32.xlu1 %v4207_v30  ;;  %v5104_v32 = vpop.xlane.xlu0 %5103  ;;  %v4354_v14 = vsel %vm1219_vm4, %v4352_v0, %v4353_v24  ;;  %v4356_v53 = vsel %vm1219_vm4, %v4353_v24, %v4355_v37  ;;  %v11022_v37 = vld [vmem:[#allocation3 + $0xb0] sm:$0xff]  ;;  %v3830_v30 = vsel %vm3766_vm8, %v3734_v38, 0.0 }
 0x306   : > { %v4533_v3 = vpop.xlane.xlu1 %4532  ;;  %v5288_v43 = vrot.slane %v5104_v32, 2  ;;  %v10980_v29 = vadd.f32 %v4354_v14, %v4069_v61  ;;  %v10982_v2 = vadd.f32 %v4356_v53, %v4070_v39  ;;  %v3561_v61 = vmul.f32 %v10451_v5, %v3507_v41 }
 0x307   : > { %v4621_v48 = vadd.f32 %v4533_v3, %v10880_v52  ;;  %v5489_v39 = vsel %vm3397_vm5, %v5439_v45, 0.0  ;;  %v4123_v3 = vmul.f32 %v10505_v16, %v11022_v37  ;;  %v4503_v38 = vmul.f32 %v10607_v17, %v11022_v37 }
 0x308   : > { %5139 = vadd.xlane.f32.xlu0 %v5138_v7  ;;  %v5291_v22 = vsel %vm1219_vm4, %v5288_v43, %v5290_v25  ;;  %v3621_v58 = vsel %vm3397_vm5, %v3561_v61, 0.0  ;;  %v3562_v7 = vmul.f32 %v10451_v5, %v11022_v37 }
 0x309   : > { %v5009_v59 = vadd.f32 %v4903_v55, %v4621_v48  ;;  %4556 = vadd.xlane.f32.xlu1 %v4555_v51  ;;  %v5464_v62 = vpop.xlane.xlu0 %5463  ;;  %v4124_v55 = vmul.f32 %v10505_v16, %v3509_v35 }
 0x30a   : > { %v4713_v31 = vpop.xlane.xlu1 %4712  ;;  %v10993_v52 = vadd.f32 %v5464_v62, %v10937_v42  ;;  %v4502_v62 = vmul.f32 %v10607_v17, %v3507_v41 }
 0x30b   : > { %v4899_v15 = vrot.slane %v4713_v31, 1  ;;  %v10997_v63 = vadd.f32 %v5291_v22, %v5009_v59  ;;  %v4216_v59 = vsel %vm3397_vm5, %v4123_v3, 0.0  ;;  %v3624_v31 = vsel %vm3397_vm5, %v3562_v7, 0.0 }
 0x30c   : > { %13316 = vst [vmem:[#allocation41_spill] sm:$0xff] %v10993_v52  ;;  %5487 = vadd.xlane.f32.xlu0 %v5486_v34 }
 0x30d   : > { %v4901_v36 = vsel %vm549_vm3, %v4899_v15, %v4900_v1  ;;  %4748 = vadd.xlane.f32.xlu1 %v4747_v47  ;;  %v11003_v12 = vpop.xlane.xlu0 %4727  ;;  %v5150_v1 = vsel %vm3400_vm6, %v5062_v9, 0.0  ;;  %v3732_v15 = vmul.f32 %v10459_v21, %v3507_v41  ;;  %v4122_v9 = vmul.f32 %v10505_v16, %v3507_v41 }
 0x30e   : > { %v5101_v42 = vpop.xlane.xlu1 %5100  ;;  %v5008_v27 = vadd.f32 %v4901_v36, %v4620_v60 }
 0x30f   : > { %v5287_v4 = vrot.slane %v5101_v42, 2 }
 0x310   : > { %4763 = vadd.xlane.f32.xlu0 %v4762_v8  ;;  %v3824_v8 = vsel %vm3759_vm7, %v3732_v15, 0.0 }
 0x311   : > { %5136 = vadd.xlane.f32.xlu1 %v5135_v19  ;;  %v11010_v28 = vpop.xlane.xlu0 %5115  ;;  %v5289_v18 = vsel %vm1219_vm4, %v5287_v4, %v5288_v43  ;;  %v4219_v43 = vsel %vm3400_vm6, %v4124_v55, 0.0  ;;  %v4672_v4 = vmul.f32 %v10567_v13, %v3507_v41 }
 0x312   : > { %v5467_v40 = vpop.xlane.xlu1 %5466  ;;  %v11013_v46 = vadd.f32 %v5289_v18, %v5008_v27  ;;  %v4558_v27 = vsel %vm3397_vm5, %v4502_v62, 0.0 }
 0x313   : > { %v11016_v60 = vadd.f32 %v5467_v40, %v10939_v23  ;;  %v3733_v23 = vmul.f32 %v10459_v21, %v11022_v37  ;;  %v4756_v61 = vsel %vm3759_vm7, %v4672_v4, 0.0 }
 0x314   : > { %5151 = vadd.xlane.f32.xlu0 %v5150_v1 }
 0x315   : > { %13317 = vst [vmem:[#allocation42_spill] sm:$0xff] %v11016_v60  ;;  %5490 = vadd.xlane.f32.xlu1 %v5489_v39  ;;  %v3599_v0 = vpop.xlane.xlu0 %3598  ;;  %v3827_v25 = vsel %vm3397_vm5, %v3733_v23, 0.0  ;;  %v4213_v39 = vsel %vm4149_vm9, %v4122_v9, 0.0 }
 0x316   : > { %v3796_v24 = vpop.xlane.xlu1 %3795 }
 0x317   : > { %v3971_v32 = vrot.slane %v3796_v24, 1  ;;  %v3512_v24 = vld [vmem:[#allocation3 + $0xd0] sm:$0x3] }
 0x318   : > { %3622 = vadd.xlane.f32.xlu0 %v3621_v58 }
 0x319   : > { %3831 = vadd.xlane.f32.xlu1 %v3830_v30  ;;  %v3793_v44 = vpop.xlane.xlu0 %3792 }
 0x31a   : > { %v4185_v14 = vpop.xlane.xlu1 %4184  ;;  %v3969_v53 = vrot.slane %v3793_v44, 1 }
 0x31b   : > { %v4360_v51 = vrot.slane %v4185_v14, 2  ;;  %v4673_v14 = vmul.f32 %v10567_v13, %v11022_v37 }
 0x31c   : > { %3828 = vadd.xlane.f32.xlu0 %v3827_v25  ;;  %v3972_v48 = vsel %vm549_vm3, %v3969_v53, %v3971_v32  ;;  %v4561_v32 = vsel %vm3397_vm5, %v4503_v38, 0.0 }
 0x31d   : > { %4220 = vadd.xlane.f32.xlu1 %v4219_v43  ;;  %v4182_v20 = vpop.xlane.xlu0 %4181  ;;  %v4127_v43 = vmul.f32 %v10505_v16, %v3512_v24 }
 0x31e   : > { %v3602_v33 = vpop.xlane.xlu1 %3601  ;;  %v4358_v35 = vrot.slane %v4182_v20, 2 }
 0x31f   : > { %v4072_v22 = vadd.f32 %v3972_v48, %v3602_v33  ;;  %v4759_v33 = vsel %vm3397_vm5, %v4673_v14, 0.0 }
 0x320   : > { %4217 = vadd.xlane.f32.xlu0 %v4216_v59  ;;  %v4361_v34 = vsel %vm1219_vm4, %v4358_v35, %v4360_v51  ;;  %v11069_v51 = vld [vmem:[#allocation3 + $0xc0] sm:$0xff] }
 0x321   : > { %3625 = vadd.xlane.f32.xlu1 %v3624_v31  ;;  %v4536_v10 = vpop.xlane.xlu0 %4535  ;;  %v11041_v47 = vadd.f32 %v4361_v34, %v4072_v22  ;;  %v3563_v62 = vmul.f32 %v10451_v5, %v11069_v51  ;;  %v5295_v34 = vrot.slane %v11010_v28, 2 }
 0x322   : > { %v3790_v57 = vpop.xlane.xlu1 %3789  ;;  %v4622_v36 = vadd.f32 %v4536_v10, %v10980_v29  ;;  %v5060_v29 = vmul.f32 %v10572_v49, %v3507_v41  ;;  %v3737_v41 = vmul.f32 %v10459_v21, %v3512_v24 }
 0x323   : > { %v3968_v42 = vrot.slane %v3790_v57, 1 }
 0x324   : > { %4559 = vadd.xlane.f32.xlu0 %v4558_v27  ;;  %v5144_v44 = vsel %vm4149_vm9, %v5060_v29, 0.0  ;;  %v3839_v20 = vsel %vm3766_vm8, %v3737_v41, 0.0  ;;  %v4677_v27 = vmul.f32 %v10567_v13, %v3512_v24  ;;  %v4504_v41 = vmul.f32 %v10607_v17, %v11069_v51 }
 0x325   : > { %v3970_v19 = vsel %vm549_vm3, %v3968_v42, %v3969_v53  ;;  %3825 = vadd.xlane.f32.xlu1 %v3824_v8  ;;  %v4722_v45 = vpop.xlane.xlu0 %4721  ;;  %v4228_v42 = vsel %vm3400_vm6, %v4127_v43, 0.0 }
 0x326   : > { %v4179_v18 = vpop.xlane.xlu1 %4178  ;;  %v4071_v40 = vadd.f32 %v3970_v19, %v3599_v0  ;;  %v4904_v48 = vrot.slane %v4722_v45, 1  ;;  %v4564_v43 = vsel %vm3397_vm5, %v4504_v41, 0.0 }
 0x327   : > { %v4357_v1 = vrot.slane %v4179_v18, 2  ;;  %v3627_v18 = vsel %vm3397_vm5, %v3563_v62, 0.0 }
 0x328   : > { %4757 = vadd.xlane.f32.xlu0 %v4756_v61  ;;  %v5065_v61 = vmul.f32 %v10572_v49, %v3512_v24 }
 0x329   : > { %4214 = vadd.xlane.f32.xlu1 %v4213_v39  ;;  %v5110_v58 = vpop.xlane.xlu0 %5109  ;;  %v4359_v23 = vsel %vm1219_vm4, %v4357_v1, %v4358_v35  ;;  %v5061_v35 = vmul.f32 %v10572_v49, %v11022_v37  ;;  %v4771_v1 = vsel %vm3766_vm8, %v4677_v27, 0.0  ;;  %v3511_v39 = vld [vmem:[#allocation3 + $0xc8] sm:$0xff] }
 0x32a   : > { %v4539_v30 = vpop.xlane.xlu1 %4538  ;;  %v11055_v55 = vadd.f32 %v4359_v23, %v4071_v40  ;;  %v5292_v10 = vrot.slane %v5110_v58, 2  ;;  %v3735_v40 = vmul.f32 %v10459_v21, %v11069_v51  ;;  %v5159_v23 = vsel %vm3400_vm6, %v5065_v61, 0.0 }
 0x32b   : > { %v4623_v0 = vadd.f32 %v4539_v30, %v10982_v2  ;;  %v4907_v2 = vrot.slane %v11003_v12, 1  ;;  %v5147_v37 = vsel %vm3397_vm5, %v5061_v35, 0.0  ;;  %v3564_v30 = vmul.f32 %v10451_v5, %v3511_v39 }
 0x32c   : > { %5145 = vadd.xlane.f32.xlu0 %v5144_v44  ;;  %v3833_v58 = vsel %vm3759_vm7, %v3735_v40, 0.0  ;;  %v3736_v14 = vmul.f32 %v10459_v21, %v3511_v39 }
 0x32d   : > { %4562 = vadd.xlane.f32.xlu1 %v4561_v32  ;;  %v5470_v53 = vpop.xlane.xlu0 %5469  ;;  %v3630_v32 = vsel %vm3397_vm5, %v3564_v30, 0.0 }
 0x32e   : > { %v4725_v25 = vpop.xlane.xlu1 %4724  ;;  %v11064_v3 = vadd.f32 %v5470_v53, %v11013_v46 }
 0x32f   : > { %v4905_v7 = vrot.slane %v4725_v25, 1 }
 0x330   : > { %13318 = vst [vmem:[#allocation45_spill] sm:$0xff] %v11064_v3  ;;  %3840 = vadd.xlane.f32.xlu0 %v3839_v20 }
 0x331   : > { %v4906_v22 = vsel %vm549_vm3, %v4904_v48, %v4905_v7  ;;  %v4908_v46 = vsel %vm549_vm3, %v4905_v7, %v4907_v2  ;;  %4760 = vadd.xlane.f32.xlu1 %v4759_v33  ;;  %v11076_v59 = vpop.xlane.xlu0 %3804  ;;  %v4676_v2 = vmul.f32 %v10567_v13, %v3511_v39  ;;  %v3836_v48 = vsel %vm3397_vm5, %v3736_v14, 0.0 }
 0x332   : > { %v5113_v12 = vpop.xlane.xlu1 %5112  ;;  %v5010_v31 = vadd.f32 %v4906_v22, %v4622_v36  ;;  %v5011_v15 = vadd.f32 %v4908_v46, %v4623_v0  ;;  %v4126_v7 = vmul.f32 %v10505_v16, %v3511_v39  ;;  %v5064_v33 = vmul.f32 %v10572_v49, %v3511_v39 }
 0x333   : > { %v5293_v57 = vrot.slane %v5113_v12, 2  ;;  %v3976_v46 = vrot.slane %v11076_v59, 1 }
 0x334   : > { %4229 = vadd.xlane.f32.xlu0 %v4228_v42 }
 0x335   : > { %5148 = vadd.xlane.f32.xlu1 %v5147_v37  ;;  %v11084_v4 = vpop.xlane.xlu0 %4193  ;;  %v5294_v8 = vsel %vm1219_vm4, %v5292_v10, %v5293_v57  ;;  %v5296_v9 = vsel %vm1219_vm4, %v5293_v57, %v5295_v34  ;;  %v4505_v34 = vmul.f32 %v10607_v17, %v3511_v39  ;;  %v3515_v10 = vld [vmem:[#allocation3 + $0xe8] sm:$0x3] }
 0x336   : > { %v5473_v36 = vpop.xlane.xlu1 %5472  ;;  %v11088_v19 = vadd.f32 %v5294_v8, %v5010_v31  ;;  %v11090_v28 = vadd.f32 %v5296_v9, %v5011_v15  ;;  %v4768_v31 = vsel %vm3397_vm5, %v4676_v2, 0.0  ;;  %v4225_v15 = vsel %vm3397_vm5, %v4126_v7, 0.0  ;;  %v11144_v2 = vld [vmem:[#allocation3 + $0xd8] sm:$0xff] }
 0x337   : > { %v11093_v45 = vadd.f32 %v5473_v36, %v10997_v63  ;;  %v4125_v63 = vmul.f32 %v10505_v16, %v11069_v51  ;;  %v4680_v61 = vmul.f32 %v10567_v13, %v3515_v10  ;;  %v4567_v39 = vsel %vm3397_vm5, %v4505_v34, 0.0 }
 0x338   : > { %3628 = vadd.xlane.f32.xlu0 %v3627_v18  ;;  %v4365_v18 = vrot.slane %v11084_v4, 2 }
 0x339   : > { %13319 = vst [vmem:[#allocation46_spill] sm:$0xff] %v11093_v45  ;;  %4772 = vadd.xlane.f32.xlu1 %v4771_v1  ;;  %v3605_v29 = vpop.xlane.xlu0 %3604  ;;  %v4222_v24 = vsel %vm4149_vm9, %v4125_v63, 0.0  ;;  %v4675_v63 = vmul.f32 %v10567_v13, %v11069_v51  ;;  %v4780_v14 = vsel %vm3766_vm8, %v4680_v61, 0.0 }
 0x33a   : > { %v4737_v38 = vpop.xlane.xlu1 %4736 }
 0x33b   : > { %v4912_v27 = vrot.slane %v4737_v38, 1 }
 0x33c   : > { %3834 = vadd.xlane.f32.xlu0 %v3833_v58 }
 0x33d   : > { %5160 = vadd.xlane.f32.xlu1 %v5159_v23  ;;  %v3799_v0 = vpop.xlane.xlu0 %3798 }
 0x33e   : > { %v11105_v44 = vpop.xlane.xlu1 %5124  ;;  %v3973_v12 = vrot.slane %v3799_v0, 1 }
 0x33f   : > { %v5300_v4 = vrot.slane %v11105_v44, 2 }
 0x340   : > { %4223 = vadd.xlane.f32.xlu0 %v4222_v24 }
 0x341   : > { %3631 = vadd.xlane.f32.xlu1 %v3630_v32  ;;  %v4188_v53 = vpop.xlane.xlu0 %4187 }
 0x342   : > { %v3608_v25 = vpop.xlane.xlu1 %3607  ;;  %v4362_v40 = vrot.slane %v4188_v53, 2  ;;  %v5068_v53 = vmul.f32 %v10572_v49, %v3515_v10 }
 0x344   : > { %4565 = vadd.xlane.f32.xlu0 %v4564_v43  ;;  %v5063_v43 = vmul.f32 %v10572_v49, %v11069_v51 }
 0x345   : > { %3837 = vadd.xlane.f32.xlu1 %v3836_v48  ;;  %v4542_v20 = vpop.xlane.xlu0 %4541 }
 0x346   : > { %v3802_v35 = vpop.xlane.xlu1 %3801  ;;  %v4624_v22 = vadd.f32 %v4542_v20, %v11055_v55  ;;  %v5156_v55 = vsel %vm3397_vm5, %v5064_v33, 0.0  ;;  %v5153_v51 = vsel %vm4149_vm9, %v5063_v43, 0.0  ;;  %v4128_v43 = vmul.f32 %v10505_v16, %v11144_v2 }
 0x347   : > { %v3974_v62 = vrot.slane %v3802_v35, 1  ;;  %v5168_v35 = vsel %vm3400_vm6, %v5068_v53, 0.0 }
 0x348   : > { %4769 = vadd.xlane.f32.xlu0 %v4768_v31  ;;  %v11157_v31 = vld [vmem:[#allocation3 + $0xe0] sm:$0xff] }
 0x349   : > { %v3975_v57 = vsel %vm549_vm3, %v3973_v12, %v3974_v62  ;;  %v3977_v42 = vsel %vm549_vm3, %v3974_v62, %v3976_v46  ;;  %4226 = vadd.xlane.f32.xlu1 %v4225_v15  ;;  %v4734_v37 = vpop.xlane.xlu0 %4733  ;;  %v3565_v46 = vmul.f32 %v10451_v5, %v11144_v2  ;;  %v3740_v62 = vmul.f32 %v10459_v21, %v3515_v10 }
 0x34a   : > { %v4191_v59 = vpop.xlane.xlu1 %4190  ;;  %v4910_v8 = vrot.slane %v4734_v37, 1  ;;  %v4073_v9 = vadd.f32 %v3975_v57, %v3605_v29  ;;  %v4074_v36 = vadd.f32 %v3977_v42, %v3608_v25  ;;  %v4765_v25 = vsel %vm3759_vm7, %v4675_v63, 0.0 }
 0x34b   : > { %v4363_v1 = vrot.slane %v4191_v59, 2  ;;  %v3633_v37 = vsel %vm3397_vm5, %v3565_v46, 0.0  ;;  %v4130_v59 = vmul.f32 %v10505_v16, %v3515_v10  ;;  %v3566_v10 = vmul.f32 %v10451_v5, %v11157_v31 }
 0x34c   : > { %5157 = vadd.xlane.f32.xlu0 %v5156_v55  ;;  %v4913_v58 = vsel %vm549_vm3, %v4910_v8, %v4912_v27  ;;  %v3739_v55 = vmul.f32 %v10459_v21, %v11157_v31  ;;  %v3848_v27 = vsel %vm3766_vm8, %v3740_v62, 0.0  ;;  %v5066_v46 = vmul.f32 %v10572_v49, %v11144_v2 }
 0x34d   : > { %4568 = vadd.xlane.f32.xlu1 %v4567_v39  ;;  %v5122_v38 = vpop.xlane.xlu0 %5121  ;;  %v4364_v23 = vsel %vm1219_vm4, %v4362_v40, %v4363_v1  ;;  %v4366_v29 = vsel %vm1219_vm4, %v4363_v1, %v4365_v18  ;;  %v4129_v1 = vmul.f32 %v10505_v16, %v11157_v31  ;;  %v4237_v61 = vsel %vm3400_vm6, %v4130_v59, 0.0 }
 0x34e   : > { %v4545_v30 = vpop.xlane.xlu1 %4544  ;;  %v5298_v0 = vrot.slane %v5122_v38, 2  ;;  %v11134_v24 = vadd.f32 %v4364_v23, %v4073_v9  ;;  %v11136_v41 = vadd.f32 %v4366_v29, %v4074_v36  ;;  %v3845_v40 = vsel %vm3397_vm5, %v3739_v55, 0.0 }
 0x34f   : > { %v4625_v32 = vadd.f32 %v4545_v30, %v11041_v47  ;;  %v4234_v63 = vsel %vm3397_vm5, %v4129_v1, 0.0  ;;  %v3636_v38 = vsel %vm3397_vm5, %v3566_v10, 0.0  ;;  %v3738_v23 = vmul.f32 %v10459_v21, %v11144_v2 }
 0x350   : > { %4781 = vadd.xlane.f32.xlu0 %v4780_v14  ;;  %v5301_v44 = vsel %vm1219_vm4, %v5298_v0, %v5300_v4  ;;  %v4678_v14 = vmul.f32 %v10567_v13, %v11144_v2  ;;  %v4507_v62 = vmul.f32 %v10607_v17, %v11157_v31  ;;  %v5162_v59 = vsel %vm4149_vm9, %v5066_v46, 0.0 }
 0x351   : > { %v5013_v48 = vadd.f32 %v4913_v58, %v4625_v32  ;;  %4766 = vadd.xlane.f32.xlu1 %v4765_v25  ;;  %v5476_v7 = vpop.xlane.xlu0 %5475  ;;  %v3842_v53 = vsel %vm3759_vm7, %v3738_v23, 0.0  ;;  %v11215_v23 = vld [vmem:[#allocation3 + $0xf0] sm:$0xff] }
 0x352   : > { %v4731_v20 = vpop.xlane.xlu1 %4730  ;;  %v11148_v47 = vadd.f32 %v5476_v7, %v11088_v19 }
 0x353   : > { %v4909_v33 = vrot.slane %v4731_v20, 1  ;;  %v11153_v12 = vadd.f32 %v5301_v44, %v5013_v48 }
 0x354   : > { %13320 = vst [vmem:[#allocation49_spill] sm:$0xff] %v11148_v47  ;;  %5169 = vadd.xlane.f32.xlu0 %v5168_v35  ;;  %v4774_v35 = vsel %vm3759_vm7, %v4678_v14, 0.0  ;;  %v3567_v14 = vmul.f32 %v10451_v5, %v11215_v23  ;;  %v11609_v47 = vld [vmem:[#allocation3 + $0x170] sm:$0xff] }
 0x355   : > { %v4911_v15 = vsel %vm549_vm3, %v4909_v33, %v4910_v8  ;;  %5154 = vadd.xlane.f32.xlu1 %v5153_v51  ;;  %v11160_v19 = vpop.xlane.xlu0 %4745  ;;  %v4231_v51 = vsel %vm4149_vm9, %v4128_v43, 0.0 }
 0x356   : > { %v5119_v34 = vpop.xlane.xlu1 %5118  ;;  %v5012_v57 = vadd.f32 %v4911_v15, %v4624_v22  ;;  %v3518_v15 = vld [vmem:[#allocation3 + $0x100] sm:$0x3] }
 0x357   : > { %v5297_v42 = vrot.slane %v5119_v34, 2  ;;  %v5071_v46 = vmul.f32 %v10572_v49, %v3518_v15 }
 0x358   : > { %3634 = vadd.xlane.f32.xlu0 %v3633_v37 }
 0x359   : > { %3849 = vadd.xlane.f32.xlu1 %v3848_v27  ;;  %v11167_v9 = vpop.xlane.xlu0 %5133  ;;  %v5299_v8 = vsel %vm1219_vm4, %v5297_v42, %v5298_v0 }
 0x35a   : > { %v5479_v36 = vpop.xlane.xlu1 %5478  ;;  %v11170_v18 = vadd.f32 %v5299_v8, %v5012_v57  ;;  %v4573_v8 = vsel %vm3397_vm5, %v4507_v62, 0.0 }
 0x35b   : > { %v11173_v22 = vadd.f32 %v5479_v36, %v11090_v28  ;;  %v4506_v28 = vmul.f32 %v10607_v17, %v11144_v2  ;;  %v3743_v2 = vmul.f32 %v10459_v21, %v3518_v15  ;;  %v4679_v36 = vmul.f32 %v10567_v13, %v11157_v31 }
 0x35c   : > { %3846 = vadd.xlane.f32.xlu0 %v3845_v40 }
 0x35d   : > { %13321 = vst [vmem:[#allocation51_spill] sm:$0xff] %v11173_v22  ;;  %4238 = vadd.xlane.f32.xlu1 %v4237_v61  ;;  %v3611_v39 = vpop.xlane.xlu0 %3610  ;;  %v4570_v32 = vsel %vm3397_vm5, %v4506_v28, 0.0  ;;  %v4777_v28 = vsel %vm3397_vm5, %v4679_v36, 0.0  ;;  %v5177_v36 = vsel %vm3400_vm6, %v5071_v46, 0.0 }
 0x35e   : > { %v3814_v58 = vpop.xlane.xlu1 %3813 }
 0x35f   : > { %v3981_v4 = vrot.slane %v3814_v58, 1 }
 0x360   : > { %4235 = vadd.xlane.f32.xlu0 %v4234_v63  ;;  %v4133_v63 = vmul.f32 %v10505_v16, %v3518_v15 }
 0x361   : > { %3637 = vadd.xlane.f32.xlu1 %v3636_v38  ;;  %v3811_v29 = vpop.xlane.xlu0 %3810  ;;  %v5067_v38 = vmul.f32 %v10572_v49, %v11157_v31  ;;  %v4683_v31 = vmul.f32 %v10567_v13, %v3518_v15  ;;  %v4131_v15 = vmul.f32 %v10505_v16, %v11215_v23 }
 0x362   : > { %v4203_v30 = vpop.xlane.xlu1 %4202  ;;  %v3979_v0 = vrot.slane %v3811_v29, 1 }
 0x363   : > { %v4370_v48 = vrot.slane %v4203_v30, 2 }
 0x364   : > { %4571 = vadd.xlane.f32.xlu0 %v4570_v32  ;;  %v3982_v25 = vsel %vm549_vm3, %v3979_v0, %v3981_v4  ;;  %v4246_v32 = vsel %vm3400_vm6, %v4133_v63, 0.0  ;;  %v4240_v63 = vsel %vm4149_vm9, %v4131_v15, 0.0 }
 0x365   : > { %3843 = vadd.xlane.f32.xlu1 %v3842_v53  ;;  %v4200_v44 = vpop.xlane.xlu0 %4199  ;;  %v5165_v53 = vsel %vm3397_vm5, %v5067_v38, 0.0 }
 0x366   : > { %v3614_v7 = vpop.xlane.xlu1 %3613  ;;  %v4368_v20 = vrot.slane %v4200_v44, 2 }
 0x367   : > { %v4076_v33 = vadd.f32 %v3982_v25, %v3614_v7 }
 0x368   : > { %4775 = vadd.xlane.f32.xlu0 %v4774_v35  ;;  %v4371_v34 = vsel %vm1219_vm4, %v4368_v20, %v4370_v48  ;;  %v3741_v48 = vmul.f32 %v10459_v21, %v11215_v23  ;;  %v4789_v35 = vsel %vm3766_vm8, %v4683_v31, 0.0 }
 0x369   : > { %4232 = vadd.xlane.f32.xlu1 %v4231_v51  ;;  %v4548_v57 = vpop.xlane.xlu0 %4547  ;;  %v11201_v42 = vadd.f32 %v4371_v34, %v4076_v33  ;;  %v3639_v33 = vsel %vm3397_vm5, %v3567_v14, 0.0  ;;  %v3517_v34 = vld [vmem:[#allocation3 + $0xf8] sm:$0xff] }
 0x36a   : > { %v3808_v37 = vpop.xlane.xlu1 %3807  ;;  %v4626_v55 = vadd.f32 %v4548_v57, %v11134_v24  ;;  %v3857_v24 = vsel %vm3766_vm8, %v3743_v2, 0.0  ;;  %v4132_v14 = vmul.f32 %v10505_v16, %v3517_v34 }
 0x36b   : > { %v3978_v27 = vrot.slane %v3808_v37, 1 }
 0x36c   : > { %5163 = vadd.xlane.f32.xlu0 %v5162_v59  ;;  %v5305_v59 = vrot.slane %v11167_v9, 2 }
 0x36d   : > { %v3980_v40 = vsel %vm549_vm3, %v3978_v27, %v3979_v0  ;;  %4574 = vadd.xlane.f32.xlu1 %v4573_v8  ;;  %v4740_v1 = vpop.xlane.xlu0 %4739 }
 0x36e   : > { %v4197_v61 = vpop.xlane.xlu1 %4196  ;;  %v4075_v10 = vadd.f32 %v3980_v40, %v3611_v39  ;;  %v4914_v7 = vrot.slane %v4740_v1, 1  ;;  %v3568_v40 = vmul.f32 %v10451_v5, %v3517_v34 }
 0x36f   : > { %v4367_v58 = vrot.slane %v4197_v61, 2 }
 0x370   : > { %3858 = vadd.xlane.f32.xlu0 %v3857_v24  ;;  %v3642_v38 = vsel %vm3397_vm5, %v3568_v40, 0.0  ;;  %v5069_v40 = vmul.f32 %v10572_v49, %v11215_v23 }
 0x371   : > { %4778 = vadd.xlane.f32.xlu1 %v4777_v28  ;;  %v5128_v29 = vpop.xlane.xlu0 %5127  ;;  %v4369_v4 = vsel %vm1219_vm4, %v4367_v58, %v4368_v20  ;;  %v4508_v28 = vmul.f32 %v10607_v17, %v11215_v23 }
 0x372   : > { %v4551_v30 = vpop.xlane.xlu1 %4550  ;;  %v11218_v0 = vadd.f32 %v4369_v4, %v4075_v10  ;;  %v5302_v2 = vrot.slane %v5128_v29, 2  ;;  %v3742_v29 = vmul.f32 %v10459_v21, %v3517_v34 }
 0x373   : > { %v4627_v39 = vadd.f32 %v4551_v30, %v11136_v41  ;;  %v4917_v41 = vrot.slane %v11160_v19, 1  ;;  %v3851_v19 = vsel %vm3759_vm7, %v3741_v48, 0.0  ;;  %v4243_v48 = vsel %vm3397_vm5, %v4132_v14, 0.0 }
 0x374   : > { %4247 = vadd.xlane.f32.xlu0 %v4246_v32  ;;  %v4682_v32 = vmul.f32 %v10567_v13, %v3517_v34  ;;  %v5171_v14 = vsel %vm4149_vm9, %v5069_v40, 0.0 }
 0x375   : > { %5166 = vadd.xlane.f32.xlu1 %v5165_v53  ;;  %v5482_v25 = vpop.xlane.xlu0 %5481 }
 0x376   : > { %v4743_v43 = vpop.xlane.xlu1 %4742  ;;  %v11227_v44 = vadd.f32 %v5482_v25, %v11170_v18  ;;  %v4786_v25 = vsel %vm3397_vm5, %v4682_v32, 0.0 }
 0x377   : > { %v4915_v20 = vrot.slane %v4743_v43, 1  ;;  %v5070_v43 = vmul.f32 %v10572_v49, %v3517_v34 }
 0x378   : > { %13322 = vst [vmem:[#allocation20_spill] sm:$0xff] %v11227_v44  ;;  %3640 = vadd.xlane.f32.xlu0 %v3639_v33 }
 0x379   : > { %v4916_v51 = vsel %vm549_vm3, %v4914_v7, %v4915_v20  ;;  %v4918_v62 = vsel %vm549_vm3, %v4915_v20, %v4917_v41  ;;  %4790 = vadd.xlane.f32.xlu1 %v4789_v35  ;;  %v11237_v18 = vpop.xlane.xlu0 %3822  ;;  %v4509_v41 = vmul.f32 %v10607_v17, %v3517_v34  ;;  %v3521_v7 = vld [vmem:[#allocation3 + $0x118] sm:$0x3]  ;;  %v5174_v35 = vsel %vm3397_vm5, %v5070_v43, 0.0  ;;  %v11296_v43 = vld [vmem:[#allocation3 + $0x110] sm:$0xff] }
 0x37a   : > { %v5131_v57 = vpop.xlane.xlu1 %5130  ;;  %v5014_v37 = vadd.f32 %v4916_v51, %v4626_v55  ;;  %v5015_v27 = vadd.f32 %v4918_v62, %v4627_v39  ;;  %v4576_v39 = vsel %vm3397_vm5, %v4508_v28, 0.0  ;;  %v4686_v46 = vmul.f32 %v10567_v13, %v3521_v7 }
 0x37b   : > { %v5303_v8 = vrot.slane %v5131_v57, 2  ;;  %v4579_v51 = vsel %vm3397_vm5, %v4509_v41, 0.0  ;;  %v4681_v62 = vmul.f32 %v10567_v13, %v11215_v23  ;;  %v5074_v34 = vmul.f32 %v10572_v49, %v3521_v7 }
 0x37c   : > { %3852 = vadd.xlane.f32.xlu0 %v3851_v19  ;;  %v4798_v15 = vsel %vm3766_vm8, %v4686_v46, 0.0  ;;  %v3745_v46 = vmul.f32 %v10459_v21, %v11296_v43 }
 0x37d   : > { %5178 = vadd.xlane.f32.xlu1 %v5177_v36  ;;  %v11245_v1 = vpop.xlane.xlu0 %4211  ;;  %v5304_v61 = vsel %vm1219_vm4, %v5302_v2, %v5303_v8  ;;  %v5306_v55 = vsel %vm1219_vm4, %v5303_v8, %v5305_v59  ;;  %v3986_v59 = vrot.slane %v11237_v18, 1  ;;  %v4783_v36 = vsel %vm3759_vm7, %v4681_v62, 0.0 }
 0x37e   : > { %v5485_v10 = vpop.xlane.xlu1 %5484  ;;  %v11249_v58 = vadd.f32 %v5304_v61, %v5014_v37  ;;  %v11251_v9 = vadd.f32 %v5306_v55, %v5015_v27  ;;  %v11280_v27 = vld [vmem:[#allocation3 + $0x108] sm:$0xff]  ;;  %v5186_v23 = vsel %vm3400_vm6, %v5074_v34, 0.0  ;;  %v4136_v62 = vmul.f32 %v10505_v16, %v3521_v7 }
 0x37f   : > { %v11254_v24 = vadd.f32 %v5485_v10, %v11153_v12  ;;  %v3854_v12 = vsel %vm3397_vm5, %v3742_v29, 0.0  ;;  %v3569_v10 = vmul.f32 %v10451_v5, %v11280_v27 }
 0x380   : > { %4241 = vadd.xlane.f32.xlu0 %v4240_v63 }
 0x381   : > { %13323 = vst [vmem:[#allocation21_spill] sm:$0xff] %v11254_v24  ;;  %3643 = vadd.xlane.f32.xlu1 %v3642_v38  ;;  %v3617_v4 = vpop.xlane.xlu0 %3616 }
 0x382   : > { %v4755_v30 = vpop.xlane.xlu1 %4754 }
 0x383   : > { %v4922_v18 = vrot.slane %v4755_v30, 1 }
 0x384   : > { %4577 = vadd.xlane.f32.xlu0 %v4576_v39  ;;  %v4375_v39 = vrot.slane %v11245_v1, 2 }
 0x385   : > { %3855 = vadd.xlane.f32.xlu1 %v3854_v12  ;;  %v3817_v53 = vpop.xlane.xlu0 %3816 }
 0x386   : > { %v11265_v31 = vpop.xlane.xlu1 %5142  ;;  %v3983_v2 = vrot.slane %v3817_v53, 1 }
 0x388   : > { %4787 = vadd.xlane.f32.xlu0 %v4786_v25  ;;  %v3746_v25 = vmul.f32 %v10459_v21, %v3521_v7  ;;  %v3570_v7 = vmul.f32 %v10451_v5, %v11296_v43 }
 0x389   : > { %4244 = vadd.xlane.f32.xlu1 %v4243_v48  ;;  %v4206_v20 = vpop.xlane.xlu0 %4205 }
 0x38a   : > { %v3620_v33 = vpop.xlane.xlu1 %3619  ;;  %v4372_v32 = vrot.slane %v4206_v20, 2 }
 0x38c   : > { %5175 = vadd.xlane.f32.xlu0 %v5174_v35  ;;  %v3645_v35 = vsel %vm3397_vm5, %v3569_v10, 0.0  ;;  %v3744_v10 = vmul.f32 %v10459_v21, %v11280_v27 }
 0x38d   : > { %4580 = vadd.xlane.f32.xlu1 %v4579_v51  ;;  %v4554_v57 = vpop.xlane.xlu0 %4553  ;;  %v3866_v51 = vsel %vm3766_vm8, %v3746_v25, 0.0  ;;  %v4511_v25 = vmul.f32 %v10607_v17, %v11296_v43 }
 0x38e   : > { %v3820_v19 = vpop.xlane.xlu1 %3819  ;;  %v11277_v37 = vadd.f32 %v4554_v57, %v11218_v0 }
 0x38f   : > { %v3984_v8 = vrot.slane %v3820_v19, 1 }
 0x390   : > { %4799 = vadd.xlane.f32.xlu0 %v4798_v15  ;;  %v4255_v15 = vsel %vm3400_vm6, %v4136_v62, 0.0  ;;  %v4585_v62 = vsel %vm3397_vm5, %v4511_v25, 0.0 }
 0x391   : > { %v3985_v61 = vsel %vm549_vm3, %v3983_v2, %v3984_v8  ;;  %v3987_v0 = vsel %vm549_vm3, %v3984_v8, %v3986_v59  ;;  %4784 = vadd.xlane.f32.xlu1 %v4783_v36  ;;  %v4752_v55 = vpop.xlane.xlu0 %4751  ;;  %v4135_v8 = vmul.f32 %v10505_v16, %v11296_v43 }
 0x392   : > { %v4209_v63 = vpop.xlane.xlu1 %4208  ;;  %v4920_v28 = vrot.slane %v4752_v55, 1  ;;  %v4077_v38 = vadd.f32 %v3985_v61, %v3617_v4  ;;  %v4078_v29 = vadd.f32 %v3987_v0, %v3620_v33  ;;  %v4510_v0 = vmul.f32 %v10607_v17, %v11280_v27 }
 0x393   : > { %v4373_v12 = vrot.slane %v4209_v63, 2  ;;  %v4252_v61 = vsel %vm3397_vm5, %v4135_v8, 0.0  ;;  %v3648_v55 = vsel %vm3397_vm5, %v3570_v7, 0.0 }
 0x394   : > { %5187 = vadd.xlane.f32.xlu0 %v5186_v23  ;;  %v4923_v53 = vsel %vm549_vm3, %v4920_v28, %v4922_v18 }
 0x395   : > { %5172 = vadd.xlane.f32.xlu1 %v5171_v14  ;;  %v11298_v30 = vpop.xlane.xlu0 %5139  ;;  %v4374_v4 = vsel %vm1219_vm4, %v4372_v32, %v4373_v12  ;;  %v4376_v1 = vsel %vm1219_vm4, %v4373_v12, %v4375_v39  ;;  %v3860_v39 = vsel %vm3759_vm7, %v3744_v10, 0.0  ;;  %v4134_v32 = vmul.f32 %v10505_v16, %v11280_v27  ;;  %v11364_v10 = vld [vmem:[#allocation3 + $0x120] sm:$0xff] }
 0x396   : > { %v4557_v48 = vpop.xlane.xlu1 %4556  ;;  %v11302_v41 = vadd.f32 %v4374_v4, %v4077_v38  ;;  %v11304_v20 = vadd.f32 %v4376_v1, %v4078_v29  ;;  %v4582_v38 = vsel %vm3397_vm5, %v4510_v0, 0.0  ;;  %v4684_v29 = vmul.f32 %v10567_v13, %v11280_v27  ;;  %v3524_v4 = vld [vmem:[#allocation3 + $0x130] sm:$0x3] }
 0x397   : > { %v4629_v33 = vadd.f32 %v4557_v48, %v11201_v42  ;;  %v3863_v42 = vsel %vm3397_vm5, %v3745_v46, 0.0 }
 0x398   : > { %3646 = vadd.xlane.f32.xlu0 %v3645_v35  ;;  %v4792_v14 = vsel %vm3759_vm7, %v4684_v29, 0.0 }
 0x399   : > { %v11312_v57 = vadd.f32 %v4923_v53, %v4629_v33  ;;  %3867 = vadd.xlane.f32.xlu1 %v3866_v51  ;;  %v5488_v19 = vpop.xlane.xlu0 %5487  ;;  %v4249_v53 = vsel %vm4149_vm9, %v4134_v32, 0.0  ;;  %v3749_v51 = vmul.f32 %v10459_v21, %v3524_v4 }
 0x39a   : > { %v4749_v34 = vpop.xlane.xlu1 %4748  ;;  %v11315_v59 = vadd.f32 %v5488_v19, %v11249_v58  ;;  %v4685_v19 = vmul.f32 %v10567_v13, %v11296_v43 }
 0x39b   : > { %v4919_v2 = vrot.slane %v4749_v34, 1  ;;  %v3875_v7 = vsel %vm3766_vm8, %v3749_v51, 0.0  ;;  %v3747_v51 = vmul.f32 %v10459_v21, %v11364_v10 }
 0x39c   : > { %13324 = vst [vmem:[#allocation22_spill] sm:$0xff] %v11315_v59  ;;  %3864 = vadd.xlane.f32.xlu0 %v3863_v42  ;;  %v4795_v0 = vsel %vm3397_vm5, %v4685_v19, 0.0 }
 0x39d   : > { %v11324_v36 = vsel %vm549_vm3, %v4919_v2, %v4920_v28  ;;  %4256 = vadd.xlane.f32.xlu1 %v4255_v15  ;;  %v11326_v40 = vpop.xlane.xlu0 %4763 }
 0x39e   : > { %v11328_v58 = vpop.xlane.xlu1 %5136 }
 0x3a0   : > { %4253 = vadd.xlane.f32.xlu0 %v4252_v61  ;;  %v4139_v61 = vmul.f32 %v10505_v16, %v3524_v4 }
 0x3a1   : > { %3649 = vadd.xlane.f32.xlu1 %v3648_v55  ;;  %v11336_v18 = vpop.xlane.xlu0 %5151  ;;  %v5073_v55 = vmul.f32 %v10572_v49, %v11296_v43 }
 0x3a2   : > { %v5491_v63 = vpop.xlane.xlu1 %5490 }
 0x3a3   : > { %v11339_v28 = vadd.f32 %v5491_v63, %v11251_v9  ;;  %v5072_v9 = vmul.f32 %v10572_v49, %v11280_v27  ;;  %v5183_v43 = vsel %vm3397_vm5, %v5073_v55, 0.0 }
 0x3a4   : > { %4583 = vadd.xlane.f32.xlu0 %v4582_v38 }
 0x3a5   : > { %13325 = vst [vmem:[#allocation23_spill] sm:$0xff] %v11339_v28  ;;  %3861 = vadd.xlane.f32.xlu1 %v3860_v39  ;;  %v3623_v12 = vpop.xlane.xlu0 %3622  ;;  %v5180_v46 = vsel %vm4149_vm9, %v5072_v9, 0.0  ;;  %v3571_v9 = vmul.f32 %v10451_v5, %v11364_v10 }
 0x3a6   : > { %v3832_v23 = vpop.xlane.xlu1 %3831 }
 0x3a7   : > { %v3991_v48 = vrot.slane %v3832_v23, 1 }
 0x3a8   : > { %4793 = vadd.xlane.f32.xlu0 %v4792_v14  ;;  %v4264_v14 = vsel %vm3400_vm6, %v4139_v61, 0.0 }
 0x3a9   : > { %4250 = vadd.xlane.f32.xlu1 %v4249_v53  ;;  %v3829_v1 = vpop.xlane.xlu0 %3828  ;;  %v4689_v53 = vmul.f32 %v10567_v13, %v3524_v4 }
 0x3aa   : > { %v4221_v33 = vpop.xlane.xlu1 %4220  ;;  %v3989_v35 = vrot.slane %v3829_v1, 1 }
 0x3ab   : > { %v4380_v2 = vrot.slane %v4221_v33, 2 }
 0x3ac   : > { %5181 = vadd.xlane.f32.xlu0 %v5180_v46  ;;  %v3992_v27 = vsel %vm549_vm3, %v3989_v35, %v3991_v48 }
 0x3ad   : > { %4586 = vadd.xlane.f32.xlu1 %v4585_v62  ;;  %v4218_v34 = vpop.xlane.xlu0 %4217  ;;  %v4807_v62 = vsel %vm3766_vm8, %v4689_v53, 0.0 }
 0x3ae   : > { %v3626_v42 = vpop.xlane.xlu1 %3625  ;;  %v4378_v8 = vrot.slane %v4218_v34, 2  ;;  %v11385_v34 = vld [vmem:[#allocation3 + $0x128] sm:$0xff] }
 0x3af   : > { %v4080_v15 = vadd.f32 %v3992_v27, %v3626_v42  ;;  %v5077_v27 = vmul.f32 %v10572_v49, %v3524_v4  ;;  %v3572_v4 = vmul.f32 %v10451_v5, %v11385_v34 }
 0x3b0   : > { %3876 = vadd.xlane.f32.xlu0 %v3875_v7  ;;  %v4381_v63 = vsel %vm1219_vm4, %v4378_v8, %v4380_v2  ;;  %v4137_v7 = vmul.f32 %v10505_v16, %v11364_v10 }
 0x3b1   : > { %4796 = vadd.xlane.f32.xlu1 %v4795_v0  ;;  %v4560_v38 = vpop.xlane.xlu0 %4559  ;;  %v11367_v29 = vadd.f32 %v4381_v63, %v4080_v15  ;;  %v3869_v15 = vsel %vm3759_vm7, %v3747_v51, 0.0  ;;  %v5195_v61 = vsel %vm3400_vm6, %v5077_v27, 0.0 }
 0x3b2   : > { %v3826_v39 = vpop.xlane.xlu1 %3825  ;;  %v11370_v32 = vadd.f32 %v4560_v38, %v11302_v41  ;;  %v3651_v41 = vsel %vm3397_vm5, %v3571_v9, 0.0 }
 0x3b3   : > { %v3988_v23 = vrot.slane %v3826_v39, 1  ;;  %v4258_v39 = vsel %vm4149_vm9, %v4137_v7, 0.0 }
 0x3b4   : > { %4265 = vadd.xlane.f32.xlu0 %v4264_v14  ;;  %v3748_v14 = vmul.f32 %v10459_v21, %v11385_v34 }
 0x3b5   : > { %v3990_v25 = vsel %vm549_vm3, %v3988_v23, %v3989_v35  ;;  %5184 = vadd.xlane.f32.xlu1 %v5183_v43  ;;  %v4758_v1 = vpop.xlane.xlu0 %4757  ;;  %v3654_v23 = vsel %vm3397_vm5, %v3572_v4, 0.0 }
 0x3b6   : > { %v4215_v48 = vpop.xlane.xlu1 %4214  ;;  %v4079_v33 = vadd.f32 %v3990_v25, %v3623_v12  ;;  %v4924_v63 = vrot.slane %v4758_v1, 1  ;;  %v4688_v1 = vmul.f32 %v10567_v13, %v11385_v34 }
 0x3b7   : > { %v4377_v46 = vrot.slane %v4215_v48, 2  ;;  %v3872_v48 = vsel %vm3397_vm5, %v3748_v14, 0.0 }
 0x3b8   : > { %3652 = vadd.xlane.f32.xlu0 %v3651_v41  ;;  %v4804_v51 = vsel %vm3397_vm5, %v4688_v1, 0.0 }
 0x3b9   : > { %4808 = vadd.xlane.f32.xlu1 %v4807_v62  ;;  %v11383_v19 = vpop.xlane.xlu0 %5145  ;;  %v4379_v35 = vsel %vm1219_vm4, %v4377_v46, %v4378_v8  ;;  %v4512_v8 = vmul.f32 %v10607_v17, %v11364_v10  ;;  %v5076_v62 = vmul.f32 %v10572_v49, %v11385_v34 }
 0x3ba   : > { %v4563_v2 = vpop.xlane.xlu1 %4562  ;;  %v4468_v12 = vadd.f32 %v4379_v35, %v4079_v33  ;;  %v4138_v33 = vmul.f32 %v10505_v16, %v11385_v34  ;;  %v4513_v35 = vmul.f32 %v10607_v17, %v11385_v34 }
 0x3bb   : > { %v11389_v42 = vadd.f32 %v4563_v2, %v11304_v20  ;;  %v4927_v20 = vrot.slane %v11326_v40, 1  ;;  %v4588_v25 = vsel %vm3397_vm5, %v4512_v8, 0.0  ;;  %v3527_v2 = vld [vmem:[#allocation3 + $0x148] sm:$0x3]  ;;  %v4687_v8 = vmul.f32 %v10567_v13, %v11364_v10 }
 0x3bc   : > { %3870 = vadd.xlane.f32.xlu0 %v3869_v15  ;;  %v4261_v27 = vsel %vm3397_vm5, %v4138_v33, 0.0  ;;  %v4692_v4 = vmul.f32 %v10567_v13, %v3527_v2 }
 0x3bd   : > { %5196 = vadd.xlane.f32.xlu1 %v5195_v61  ;;  %v3841_v0 = vpop.xlane.xlu0 %3840  ;;  %v5192_v61 = vsel %vm3397_vm5, %v5076_v62, 0.0  ;;  %v4801_v14 = vsel %vm3759_vm7, %v4687_v8, 0.0  ;;  %v11444_v62 = vld [vmem:[#allocation3 + $0x140] sm:$0xff]  ;;  %v3752_v8 = vmul.f32 %v10459_v21, %v3527_v2 }
 0x3be   : > { %v4761_v55 = vpop.xlane.xlu1 %4760 }
 0x3bf   : > { %v4925_v38 = vrot.slane %v4761_v55, 1  ;;  %v4591_v55 = vsel %vm3397_vm5, %v4513_v35, 0.0 }
 0x3c0   : > { %4259 = vadd.xlane.f32.xlu0 %v4258_v39  ;;  %v5080_v39 = vmul.f32 %v10572_v49, %v3527_v2 }
 0x3c1   : > { %v11405_v9 = vsel %vm549_vm3, %v4924_v63, %v4925_v38  ;;  %v11408_v43 = vsel %vm549_vm3, %v4925_v38, %v4927_v20  ;;  %3655 = vadd.xlane.f32.xlu1 %v3654_v23  ;;  %v11410_v53 = vpop.xlane.xlu0 %4229  ;;  %v4816_v38 = vsel %vm3766_vm8, %v4692_v4, 0.0  ;;  %v11435_v23 = vld [vmem:[#allocation3 + $0x138] sm:$0xff] }
 0x3c2   : > { %v11412_v40 = vpop.xlane.xlu1 %5148  ;;  %v5204_v4 = vsel %vm3400_vm6, %v5080_v39, 0.0  ;;  %v4385_v39 = vrot.slane %v11410_v53, 2  ;;  %v5018_v22 = vadd.f32 %v11405_v9, %v11370_v32 }
 0x3c3   : > { %v5313_v44 = vrot.slane %v11412_v40, 2  ;;  %v5019_v40 = vadd.f32 %v11408_v43, %v11389_v42 }
 0x3c4   : > { %4589 = vadd.xlane.f32.xlu0 %v4588_v25  ;;  %v5075_v25 = vmul.f32 %v10572_v49, %v11364_v10 }
 0x3c5   : > { %3873 = vadd.xlane.f32.xlu1 %v3872_v48  ;;  %v3629_v46 = vpop.xlane.xlu0 %3628 }
 0x3c6   : > { %v4773_v41 = vpop.xlane.xlu1 %4772 }
 0x3c7   : > { %v4932_v26 = vrot.slane %v4773_v41, 1 }
 0x3c8   : > { %4805 = vadd.xlane.f32.xlu0 %v4804_v51  ;;  %v3573_v51 = vmul.f32 %v10451_v5, %v11435_v23 }
 0x3c9   : > { %4262 = vadd.xlane.f32.xlu1 %v4261_v27  ;;  %v3835_v15 = vpop.xlane.xlu0 %3834  ;;  %v3996_v27 = vrot.slane %v3841_v0, 1 }
 0x3ca   : > { %v11426_v7 = vpop.xlane.xlu1 %5160  ;;  %v3993_v35 = vrot.slane %v3835_v15, 1  ;;  %v3657_v50 = vsel %vm3397_vm5, %v3573_v51, 0.0 }
 0x3cc   : > { %5193 = vadd.xlane.f32.xlu0 %v5192_v61 }
 0x3cd   : > { %4592 = vadd.xlane.f32.xlu1 %v4591_v55  ;;  %v4224_v20 = vpop.xlane.xlu0 %4223  ;;  %v5189_v55 = vsel %vm4149_vm9, %v5075_v25, 0.0 }
 0x3ce   : > { %v3632_v63 = vpop.xlane.xlu1 %3631  ;;  %v4382_v25 = vrot.slane %v4224_v20, 2 }
 0x3d0   : > { %4817 = vadd.xlane.f32.xlu0 %v4816_v38 }
 0x3d1   : > { %4802 = vadd.xlane.f32.xlu1 %v4801_v14  ;;  %v4566_v1 = vpop.xlane.xlu0 %4565 }
 0x3d2   : > { %v3838_v48 = vpop.xlane.xlu1 %3837  ;;  %v11440_v33 = vadd.f32 %v4566_v1, %v4468_v12  ;;  %v3751_v1 = vmul.f32 %v10459_v21, %v11444_v62 }
 0x3d3   : > { %v3994_v61 = vrot.slane %v3838_v48, 1 }
 0x3d4   : > { %5205 = vadd.xlane.f32.xlu0 %v5204_v4 }
 0x3d5   : > { %v3995_v38 = vsel %vm549_vm3, %v3993_v35, %v3994_v61  ;;  %v3997_v12 = vsel %vm549_vm3, %v3994_v61, %v3996_v27  ;;  %5190 = vadd.xlane.f32.xlu1 %v5189_v55  ;;  %v4770_v14 = vpop.xlane.xlu0 %4769  ;;  %v3884_v35 = vsel %vm3766_vm8, %v3752_v8, 0.0  ;;  %v4142_v61 = vmul.f32 %v10505_v16, %v3527_v2 }
 0x3d6   : > { %v4227_v0 = vpop.xlane.xlu1 %4226  ;;  %v4930_v15 = vrot.slane %v4770_v14, 1  ;;  %v4081_v48 = vadd.f32 %v3995_v38, %v3629_v46  ;;  %v4082_v6 = vadd.f32 %v3997_v12, %v3632_v63  ;;  %v3574_v8 = vmul.f32 %v10451_v5, %v11444_v62 }
 0x3d7   : > { %v4383_v4 = vrot.slane %v4227_v0, 2  ;;  %v4273_v2 = vsel %vm3400_vm6, %v4142_v61, 0.0  ;;  %v5308_v61 = vrot.slane %v11298_v30, 2  ;;  %v4515_v30 = vmul.f32 %v10607_v17, %v11444_v62 }
 0x3d8   : > { %3658 = vadd.xlane.f32.xlu0 %v3657_v50  ;;  %v4933_v27 = vsel %vm549_vm3, %v4930_v15, %v4932_v26  ;;  %v3881_v50 = vsel %vm3397_vm5, %v3751_v1, 0.0  ;;  %v4141_v26 = vmul.f32 %v10505_v16, %v11444_v62  ;;  %v4514_v1 = vmul.f32 %v10607_v17, %v11435_v23 }
 0x3d9   : > { %3885 = vadd.xlane.f32.xlu1 %v3884_v35  ;;  %v11458_v55 = vpop.xlane.xlu0 %5157  ;;  %v4384_v41 = vsel %vm1219_vm4, %v4382_v25, %v4383_v4  ;;  %v4386_v46 = vsel %vm1219_vm4, %v4383_v4, %v4385_v39  ;;  %v3660_v0 = vsel %vm3397_vm5, %v3574_v8, 0.0  ;;  %v3530_v8 = vld [vmem:[#allocation3 + $0x160] sm:$0x3] }
 0x3da   : > { %v4569_v63 = vpop.xlane.xlu1 %4568  ;;  %v11462_v53 = vadd.f32 %v4384_v41, %v4081_v48  ;;  %v11464_v20 = vadd.f32 %v4386_v46, %v4082_v6  ;;  %v3750_v48 = vmul.f32 %v10459_v21, %v11435_v23  ;;  %v4594_v35 = vsel %vm3397_vm5, %v4514_v1, 0.0 }
 0x3db   : > { %v4633_v51 = vadd.f32 %v4569_v63, %v11367_v29  ;;  %v4270_v29 = vsel %vm3397_vm5, %v4141_v26, 0.0  ;;  %v4140_v46 = vmul.f32 %v10505_v16, %v11435_v23  ;;  %v5310_v63 = vrot.slane %v11265_v31, 2 }
 0x3dc   : > { %3882 = vadd.xlane.f32.xlu0 %v3881_v50  ;;  %v3878_v41 = vsel %vm3759_vm7, %v3750_v48, 0.0  ;;  %v5078_v26 = vmul.f32 %v10572_v49, %v11435_v23 }
 0x3dd   : > { %v11473_v38 = vadd.f32 %v4933_v27, %v4633_v51  ;;  %4274 = vadd.xlane.f32.xlu1 %v4273_v2  ;;  %v11475_v12 = vpop.xlane.xlu0 %4781  ;;  %v4690_v27 = vmul.f32 %v10567_v13, %v11435_v23  ;;  %v4267_v2 = vsel %vm4149_vm9, %v4140_v46, 0.0  ;;  %v4597_v46 = vsel %vm3397_vm5, %v4515_v30, 0.0 }
 0x3de   : > { %v4767_v6 = vpop.xlane.xlu1 %4766 }
 0x3df   : > { %v4929_v14 = vrot.slane %v4767_v6, 1  ;;  %v4810_v50 = vsel %vm3759_vm7, %v4690_v27, 0.0  ;;  %v5311_v6 = vsel %vm1219_vm4, %v5308_v61, %v5310_v63  ;;  %v3755_v27 = vmul.f32 %v10459_v21, %v3530_v8 }
 0x3e0   : > { %4271 = vadd.xlane.f32.xlu0 %v4270_v29  ;;  %v5307_v29 = vrot.slane %v11328_v58, 2  ;;  %v11507_v48 = vadd.f32 %v5311_v6, %v11312_v57  ;;  %v4691_v58 = vmul.f32 %v10567_v13, %v11444_v62 }
 0x3e1   : > { %v11484_v39 = vsel %vm549_vm3, %v4929_v14, %v4930_v15  ;;  %3661 = vadd.xlane.f32.xlu1 %v3660_v0  ;;  %v11486_v25 = vpop.xlane.xlu0 %5169 }
 0x3e2   : > { %v11488_v4 = vpop.xlane.xlu1 %5154  ;;  %13326 = vst [vmem:[#allocation24_spill] sm:$0xff] %v11507_v48  ;;  %v4813_v30 = vsel %vm3397_vm5, %v4691_v58, 0.0 }
 0x3e4   : > { %4595 = vadd.xlane.f32.xlu0 %v4594_v35  ;;  %v5198_v35 = vsel %vm4149_vm9, %v5078_v26, 0.0  ;;  %v5309_v26 = vsel %vm1219_vm4, %v5307_v29, %v5308_v61 }
 0x3e5   : > { %3879 = vadd.xlane.f32.xlu1 %v3878_v41  ;;  %v3635_v15 = vpop.xlane.xlu0 %3634  ;;  %v5016_v41 = vadd.f32 %v11324_v36, %v11277_v37  ;;  %v4145_v37 = vmul.f32 %v10505_v16, %v3530_v8 }
 0x3e6   : > { %v3850_v51 = vpop.xlane.xlu1 %3849 }
 0x3e7   : > { %v4001_v31 = vrot.slane %v3850_v51, 1  ;;  %v11520_v36 = vadd.f32 %v5309_v26, %v5016_v41 }
 0x3e8   : > { %4811 = vadd.xlane.f32.xlu0 %v4810_v50 }
 0x3e9   : > { %4268 = vadd.xlane.f32.xlu1 %v4267_v2  ;;  %v3847_v14 = vpop.xlane.xlu0 %3846  ;;  %13327 = vst [vmem:[#allocation25_spill] sm:$0xff] %v11520_v36 }
 0x3ea   : > { %v4239_v1 = vpop.xlane.xlu1 %4238  ;;  %v3999_v0 = vrot.slane %v3847_v14, 1  ;;  %v3893_v14 = vsel %vm3766_vm8, %v3755_v27, 0.0 }
 0x3eb   : > { %v4390_v50 = vrot.slane %v4239_v1, 2 }
 0x3ec   : > { %5199 = vadd.xlane.f32.xlu0 %v5198_v35  ;;  %v4002_v63 = vsel %vm549_vm3, %v3999_v0, %v4001_v31  ;;  %v5079_v31 = vmul.f32 %v10572_v49, %v11444_v62  ;;  %v11525_v35 = vld [vmem:[#allocation3 + $0x150] sm:$0xff] }
 0x3ed   : > { %4598 = vadd.xlane.f32.xlu1 %v4597_v46  ;;  %v4236_v51 = vpop.xlane.xlu0 %4235  ;;  %v3575_v58 = vmul.f32 %v10451_v5, %v11525_v35  ;;  %v4693_v59 = vmul.f32 %v10567_v13, %v11525_v35 }
 0x3ee   : > { %v3638_v57 = vpop.xlane.xlu1 %3637  ;;  %v4388_v2 = vrot.slane %v4236_v51, 2  ;;  %v5201_v51 = vsel %vm3397_vm5, %v5079_v31, 0.0  ;;  %v5083_v31 = vmul.f32 %v10572_v49, %v3530_v8 }
 0x3ef   : > { %v4084_v6 = vadd.f32 %v4002_v63, %v3638_v57  ;;  %v4282_v63 = vsel %vm3400_vm6, %v4145_v37, 0.0  ;;  %v4695_v57 = vmul.f32 %v10567_v13, %v3530_v8  ;;  %v3753_v37 = vmul.f32 %v10459_v21, %v11525_v35 }
 0x3f0   : > { %3894 = vadd.xlane.f32.xlu0 %v3893_v14  ;;  %v4391_v1 = vsel %vm1219_vm4, %v4388_v2, %v4390_v50  ;;  %v5213_v8 = vsel %vm3400_vm6, %v5083_v31, 0.0  ;;  %v4819_v24 = vsel %vm3759_vm7, %v4693_v59, 0.0  ;;  %v5315_v59 = vrot.slane %v11336_v18, 2 }
 0x3f1   : > { %4814 = vadd.xlane.f32.xlu1 %v4813_v30  ;;  %v4572_v46 = vpop.xlane.xlu0 %4571  ;;  %v11528_v61 = vadd.f32 %v4391_v1, %v4084_v6  ;;  %v4825_v1 = vsel %vm3766_vm8, %v4695_v57, 0.0  ;;  %v3757_v18 = vmul.f32 %v10459_v21, %v11609_v47 }
 0x3f2   : > { %v3844_v29 = vpop.xlane.xlu1 %3843  ;;  %v11531_v27 = vadd.f32 %v4572_v46, %v11462_v53  ;;  %v3663_v53 = vsel %vm3397_vm5, %v3575_v58, 0.0  ;;  %v3887_v58 = vsel %vm3759_vm7, %v3753_v37, 0.0  ;;  %v5316_v42 = vsel %vm1219_vm4, %v5313_v44, %v5315_v59 }
 0x3f3   : > { %v3998_v41 = vrot.slane %v3844_v29, 1  ;;  %v11546_v29 = vld [vmem:[#allocation3 + $0x158] sm:$0xff] }
 0x3f4   : > { %4283 = vadd.xlane.f32.xlu0 %v4282_v63  ;;  %v3576_v57 = vmul.f32 %v10451_v5, %v11546_v29 }
 0x3f5   : > { %v4000_v50 = vsel %vm549_vm3, %v3998_v41, %v3999_v0  ;;  %5202 = vadd.xlane.f32.xlu1 %v5201_v51  ;;  %v4776_v26 = vpop.xlane.xlu0 %4775  ;;  %v4143_v51 = vmul.f32 %v10505_v16, %v11525_v35 }
 0x3f6   : > { %v4233_v6 = vpop.xlane.xlu1 %4232  ;;  %v4083_v14 = vadd.f32 %v4000_v50, %v3635_v15  ;;  %v3666_v37 = vsel %vm3397_vm5, %v3576_v57, 0.0 }
 0x3f7   : > { %v4387_v30 = vrot.slane %v4233_v6, 2  ;;  %v4516_v6 = vmul.f32 %v10607_v17, %v11525_v35 }
 0x3f8   : > { %3664 = vadd.xlane.f32.xlu0 %v3663_v53  ;;  %v4276_v53 = vsel %vm4149_vm9, %v4143_v51, 0.0 }
 0x3f9   : > { %4826 = vadd.xlane.f32.xlu1 %v4825_v1  ;;  %v11544_v46 = vpop.xlane.xlu0 %5163  ;;  %v4389_v0 = vsel %vm1219_vm4, %v4387_v30, %v4388_v2  ;;  %v3754_v1 = vmul.f32 %v10459_v21, %v11546_v29 }
 0x3fa   : > { %v4575_v41 = vpop.xlane.xlu1 %4574  ;;  %v11549_v15 = vadd.f32 %v4389_v0, %v4083_v14  ;;  %v4934_v14 = vrot.slane %v4776_v26, 1  ;;  %v4600_v26 = vsel %vm3397_vm5, %v4516_v6, 0.0 }
 0x3fb   : > { %v11552_v63 = vadd.f32 %v4575_v41, %v11464_v20  ;;  %v4937_v20 = vrot.slane %v11475_v12, 1  ;;  %v3890_v51 = vsel %vm3397_vm5, %v3754_v1, 0.0 }
 0x3fc   : > { %3888 = vadd.xlane.f32.xlu0 %v3887_v58  ;;  %v4694_v58 = vmul.f32 %v10567_v13, %v11546_v29 }
 0x3fd   : > { %5214 = vadd.xlane.f32.xlu1 %v5213_v8  ;;  %v11560_v50 = vpop.xlane.xlu0 %3858  ;;  %v4144_v8 = vmul.f32 %v10505_v16, %v11546_v29 }
 0x3fe   : > { %v4779_v2 = vpop.xlane.xlu1 %4778  ;;  %v4006_v3 = vrot.slane %v11560_v50, 1 }
 0x3ff   : > { %v4935_v30 = vrot.slane %v4779_v2, 1  ;;  %v4279_v6 = vsel %vm3397_vm5, %v4144_v8, 0.0 }
 0x400   : > { %4277 = vadd.xlane.f32.xlu0 %v4276_v53  ;;  %v3533_v53 = vld [vmem:[#allocation3 + $0x178] sm:$0x3] }
 0x401   : > { %v11570_v31 = vsel %vm549_vm3, %v4934_v14, %v4935_v30  ;;  %v11573_v0 = vsel %vm549_vm3, %v4935_v30, %v4937_v20  ;;  %3667 = vadd.xlane.f32.xlu1 %v3666_v37  ;;  %v11575_v41 = vpop.xlane.xlu0 %4247  ;;  %v4822_v20 = vsel %vm3397_vm5, %v4694_v58, 0.0  ;;  %v5082_v14 = vmul.f32 %v10572_v49, %v11546_v29 }
 0x402   : > { %v11577_v12 = vpop.xlane.xlu1 %5166  ;;  %v4517_v30 = vmul.f32 %v10607_v17, %v11546_v29  ;;  %v5086_v28 = vmul.f32 %v10572_v49, %v3533_v53 }
 0x404   : > { %4601 = vadd.xlane.f32.xlu0 %v4600_v26  ;;  %v5210_v26 = vsel %vm3397_vm5, %v5082_v14, 0.0  ;;  %v4603_v58 = vsel %vm3397_vm5, %v4517_v30, 0.0  ;;  %v5081_v14 = vmul.f32 %v10572_v49, %v11525_v35  ;;  %v11606_v30 = vld [vmem:[#allocation3 + $0x168] sm:$0xff] }
 0x405   : > { %3891 = vadd.xlane.f32.xlu1 %v3890_v51  ;;  %v3641_v57 = vpop.xlane.xlu0 %3640  ;;  %v4698_v51 = vmul.f32 %v10567_v13, %v3533_v53  ;;  %v3577_v32 = vmul.f32 %v10451_v5, %v11606_v30 }
 0x406   : > { %v11585_v2 = vpop.xlane.xlu1 %4790  ;;  %v5207_v9 = vsel %vm4149_vm9, %v5081_v14, 0.0 }
 0x407   : > { %v4942_v14 = vrot.slane %v11585_v2, 1 }
 0x408   : > { %4823 = vadd.xlane.f32.xlu0 %v4822_v20 }
 0x409   : > { %4280 = vadd.xlane.f32.xlu1 %v4279_v6  ;;  %v3853_v37 = vpop.xlane.xlu0 %3852  ;;  %v4834_v6 = vsel %vm3766_vm8, %v4698_v51, 0.0  ;;  %v5312_v51 = vrot.slane %v11383_v19, 2 }
 0x40a   : > { %v11593_v1 = vpop.xlane.xlu1 %5178  ;;  %v4003_v60 = vrot.slane %v3853_v37, 1  ;;  %v11633_v37 = vadd.f32 %v5316_v42, %v5019_v40 }
 0x40b   : > { %v5314_v19 = vsel %vm1219_vm4, %v5312_v51, %v5313_v44  ;;  %v4395_v51 = vrot.slane %v11575_v41, 2 }
 0x40c   : > { %5211 = vadd.xlane.f32.xlu0 %v5210_v26  ;;  %v11631_v50 = vadd.f32 %v5314_v19, %v5018_v22  ;;  %13329 = vst [vmem:[#allocation27_spill] sm:$0xff] %v11633_v37  ;;  %v4148_v22 = vmul.f32 %v10505_v16, %v3533_v53 }
 0x40d   : > { %4604 = vadd.xlane.f32.xlu1 %v4603_v58  ;;  %v4242_v8 = vpop.xlane.xlu0 %4241  ;;  %v3758_v58 = vmul.f32 %v10459_v21, %v3533_v53 }
 0x40e   : > { %v3644_v20 = vpop.xlane.xlu1 %3643  ;;  %13328 = vst [vmem:[#allocation26_spill] sm:$0xff] %v11631_v50  ;;  %v4392_v36 = vrot.slane %v4242_v8, 2  ;;  %v4291_v53 = vsel %vm3400_vm6, %v4148_v22, 0.0 }
 0x410   : > { %4835 = vadd.xlane.f32.xlu0 %v4834_v6 }
 0x411   : > { %4820 = vadd.xlane.f32.xlu1 %v4819_v24  ;;  %v4578_v26 = vpop.xlane.xlu0 %4577  ;;  %v5222_v24 = vsel %vm3400_vm6, %v5086_v28, 0.0 }
 0x412   : > { %v3856_v6 = vpop.xlane.xlu1 %3855  ;;  %v11618_v45 = vadd.f32 %v4578_v26, %v11549_v15 }
 0x413   : > { %v4004_v52 = vrot.slane %v3856_v6, 1 }
 0x414   : > { %5223 = vadd.xlane.f32.xlu0 %v5222_v24 }
 0x415   : > { %v4005_v43 = vsel %vm549_vm3, %v4003_v60, %v4004_v52  ;;  %v4007_v28 = vsel %vm549_vm3, %v4004_v52, %v4006_v3  ;;  %5208 = vadd.xlane.f32.xlu1 %v5207_v9  ;;  %v4788_v15 = vpop.xlane.xlu0 %4787  ;;  %v3669_v60 = vsel %vm3397_vm5, %v3577_v32, 0.0  ;;  %v3902_v52 = vsel %vm3766_vm8, %v3758_v58, 0.0 }
 0x416   : > { %v4245_v26 = vpop.xlane.xlu1 %4244  ;;  %v4940_v6 = vrot.slane %v4788_v15, 1  ;;  %v4085_v24 = vadd.f32 %v4005_v43, %v3641_v57  ;;  %v4086_v48 = vadd.f32 %v4007_v28, %v3644_v20  ;;  %v3899_v58 = vsel %vm3397_vm5, %v3757_v18, 0.0 }
 0x417   : > { %v4393_v44 = vrot.slane %v4245_v26, 2  ;;  %v4147_v32 = vmul.f32 %v10505_v16, %v11609_v47  ;;  %v4518_v18 = vmul.f32 %v10607_v17, %v11606_v30  ;;  %v3756_v28 = vmul.f32 %v10459_v21, %v11606_v30 }
 0x418   : > { %3670 = vadd.xlane.f32.xlu0 %v3669_v60  ;;  %v4943_v3 = vsel %vm549_vm3, %v4940_v6, %v4942_v14 }
 0x419   : > { %3903 = vadd.xlane.f32.xlu1 %v3902_v52  ;;  %v11641_v40 = vpop.xlane.xlu0 %5175  ;;  %v4394_v2 = vsel %vm1219_vm4, %v4392_v36, %v4393_v44  ;;  %v4396_v57 = vsel %vm1219_vm4, %v4393_v44, %v4395_v51  ;;  %v3578_v36 = vmul.f32 %v10451_v5, %v11609_v47  ;;  %v4606_v26 = vsel %vm3397_vm5, %v4518_v18, 0.0 }
 0x41a   : > { %v4581_v20 = vpop.xlane.xlu1 %4580  ;;  %v11645_v41 = vadd.f32 %v4394_v2, %v4085_v24  ;;  %v11647_v8 = vadd.f32 %v4396_v57, %v4086_v48  ;;  %v4696_v24 = vmul.f32 %v10567_v13, %v11606_v30  ;;  %v3896_v51 = vsel %vm3759_vm7, %v3756_v28, 0.0  ;;  %v11686_v57 = vld [vmem:[#allocation3 + $0x180] sm:$0xff] }
 0x41b   : > { %v4637_v59 = vadd.f32 %v4581_v20, %v11528_v61  ;;  %v4288_v61 = vsel %vm3397_vm5, %v4147_v32, 0.0  ;;  %v3672_v43 = vsel %vm3397_vm5, %v3578_v36, 0.0  ;;  %v4146_v44 = vmul.f32 %v10505_v16, %v11606_v30 }
 0x41c   : > { %3900 = vadd.xlane.f32.xlu0 %v3899_v58  ;;  %v4828_v60 = vsel %vm3759_vm7, %v4696_v24, 0.0  ;;  %v5084_v52 = vmul.f32 %v10572_v49, %v11606_v30  ;;  %v4519_v2 = vmul.f32 %v10607_v17, %v11609_v47  ;;  %v5320_v20 = vrot.slane %v11426_v7, 2 }
 0x41d   : > { %v11656_v9 = vadd.f32 %v4943_v3, %v4637_v59  ;;  %4292 = vadd.xlane.f32.xlu1 %v4291_v53  ;;  %v11658_v19 = vpop.xlane.xlu0 %4799  ;;  %v5318_v3 = vrot.slane %v11458_v55, 2  ;;  %v4285_v22 = vsel %vm4149_vm9, %v4146_v44, 0.0  ;;  %v4520_v55 = vmul.f32 %v10607_v17, %v11686_v57 }
 0x41e   : > { %v4785_v48 = vpop.xlane.xlu1 %4784  ;;  %v5216_v53 = vsel %vm4149_vm9, %v5084_v52, 0.0  ;;  %v4609_v36 = vsel %vm3397_vm5, %v4519_v2, 0.0 }
 0x41f   : > { %v4939_v42 = vrot.slane %v4785_v48, 1  ;;  %v5321_v7 = vsel %vm1219_vm4, %v5318_v3, %v5320_v20  ;;  %v4612_v44 = vsel %vm3397_vm5, %v4520_v55, 0.0 }
 0x420   : > { %4289 = vadd.xlane.f32.xlu0 %v4288_v61  ;;  %v11696_v61 = vld [vmem:[#allocation3 + $0x188] sm:$0xff]  ;;  %v11700_v24 = vadd.f32 %v5321_v7, %v11473_v38  ;;  %v11710_v38 = vld [vmem:[#allocation3 + $0x190] sm:$0x3] }
 0x421   : > { %v11667_v5 = vsel %vm549_vm3, %v4939_v42, %v4940_v6  ;;  %3673 = vadd.xlane.f32.xlu1 %v3672_v43  ;;  %v11669_v15 = vpop.xlane.xlu0 %5187  ;;  %v4697_v42 = vmul.f32 %v10567_v13, %v11609_v47  ;;  %13331 = vst [vmem:[#allocation58_spill] sm:$0xff] %v11710_v38 }
 0x422   : > { %v11671_v14 = vpop.xlane.xlu1 %5172  ;;  %13330 = vst [vmem:[#allocation28_spill] sm:$0xff] %v11700_v24  ;;  %v11815_v24 = vld [vmem:[#allocation3 + $0xf8] sm:$0xff] }
 0x423   : > { %v4831_v52 = vsel %vm3397_vm5, %v4697_v42, 0.0  ;;  %v4701_v42 = vmul.f32 %v10567_v13, %v11710_v38  ;;  %v5447_v37 = vmul.f32 %v11815_v24, %v10733_v54 }
 0x424   : > { %4607 = vadd.xlane.f32.xlu0 %v4606_v26 }
 0x425   : > { %3897 = vadd.xlane.f32.xlu1 %v3896_v51  ;;  %v3647_v21 = vpop.xlane.xlu0 %3646 }
 0x426   : > { %v3868_v6 = vpop.xlane.xlu1 %3867 }
 0x427   : > { %v4011_v59 = vrot.slane %v3868_v6, 1  ;;  %v4700_v6 = vmul.f32 %v10567_v13, %v11696_v61 }
 0x428   : > { %4829 = vadd.xlane.f32.xlu0 %v4828_v60  ;;  %v5317_v60 = vrot.slane %v11488_v4, 2 }
 0x429   : > { %4286 = vadd.xlane.f32.xlu1 %v4285_v22  ;;  %v3865_v16 = vpop.xlane.xlu0 %3864  ;;  %v5085_v22 = vmul.f32 %v10572_v49, %v11609_v47  ;;  %v4840_v55 = vsel %vm3397_vm5, %v4700_v6, 0.0 }
 0x42a   : > { %v4257_v58 = vpop.xlane.xlu1 %4256  ;;  %v4009_v32 = vrot.slane %v3865_v16, 1  ;;  %v5319_v7 = vsel %vm1219_vm4, %v5317_v60, %v5318_v3  ;;  %v5089_v3 = vmul.f32 %v10572_v49, %v11710_v38 }
 0x42b   : > { %v4400_v43 = vrot.slane %v4257_v58, 2 }
 0x42c   : > { %5217 = vadd.xlane.f32.xlu0 %v5216_v53  ;;  %v4012_v48 = vsel %vm549_vm3, %v4009_v32, %v4011_v59  ;;  %v5020_v59 = vadd.f32 %v11484_v39, %v11440_v33 }
 0x42d   : > { %4610 = vadd.xlane.f32.xlu1 %v4609_v36  ;;  %v4254_v18 = vpop.xlane.xlu0 %4253  ;;  %v5088_v36 = vmul.f32 %v10572_v49, %v11696_v61 }
 0x42e   : > { %v3650_v28 = vpop.xlane.xlu1 %3649  ;;  %v4398_v26 = vrot.slane %v4254_v18, 2 }
 0x42f   : > { %v4088_v51 = vadd.f32 %v4012_v48, %v3650_v28  ;;  %v5219_v48 = vsel %vm3397_vm5, %v5085_v22, 0.0 }
 0x430   : > { %4613 = vadd.xlane.f32.xlu0 %v4612_v44  ;;  %v4401_v2 = vsel %vm1219_vm4, %v4398_v26, %v4400_v43  ;;  %v11730_v44 = vld [vmem:[#allocation3 + $0xa8] sm:$0xff] }
 0x431   : > { %4832 = vadd.xlane.f32.xlu1 %v4831_v52  ;;  %v4584_v16 = vpop.xlane.xlu0 %4583  ;;  %v11712_v20 = vadd.f32 %v4401_v2, %v4088_v51  ;;  %v5228_v51 = vsel %vm3397_vm5, %v5088_v36, 0.0  ;;  %v5440_v6 = vmul.f32 %v11730_v44, %v10733_v54  ;;  %v4843_v52 = vsel %vm3766_vm8, %v4701_v42, 0.0 }
 0x432   : > { %v3862_v58 = vpop.xlane.xlu1 %3861  ;;  %v11717_v4 = vadd.f32 %v4584_v16, %v11645_v41  ;;  %v11727_v41 = vadd.f32 %v5319_v7, %v5020_v59  ;;  %v11746_v59 = vld [vmem:[#allocation3 + $0xc0] sm:$0xff]  ;;  %v4947_v42 = vrot.slane %v11658_v19, 1 }
 0x433   : > { %v4008_v53 = vrot.slane %v3862_v58, 1  ;;  %v5492_v16 = vsel %vm3397_vm5, %v5440_v6, 0.0  ;;  %v5442_v58 = vmul.f32 %v11746_v59, %v10733_v54 }
 0x434   : > { %4841 = vadd.xlane.f32.xlu0 %v4840_v55  ;;  %13332 = vst [vmem:[#allocation59_spill] sm:$0xff] %v11727_v41  ;;  %v4521_v55 = vmul.f32 %v10607_v17, %v11696_v61  ;;  %v4699_v17 = vmul.f32 %v10567_v13, %v11686_v57 }
 0x435   : > { %v4010_v33 = vsel %vm549_vm3, %v4008_v53, %v4009_v32  ;;  %5220 = vadd.xlane.f32.xlu1 %v5219_v48  ;;  %v4794_v39 = vpop.xlane.xlu0 %4793  ;;  %v5231_v53 = vsel %vm3400_vm6, %v5089_v3, 0.0  ;;  %v11755_v48 = vld [vmem:[#allocation3 + $0xd8] sm:$0xff] }
 0x436   : > { %v4251_v18 = vpop.xlane.xlu1 %4250  ;;  %v4087_v43 = vadd.f32 %v4010_v33, %v3647_v21  ;;  %v4944_v7 = vrot.slane %v4794_v39, 1  ;;  %v4837_v13 = vsel %vm3759_vm7, %v4699_v17, 0.0  ;;  %v11800_v17 = vld [vmem:[#allocation3 + $0xc8] sm:$0xff] }
 0x437   : > { %v4397_v28 = vrot.slane %v4251_v18, 2  ;;  %v5498_v18 = vsel %vm3397_vm5, %v5442_v58, 0.0 }
 0x438   : > { %5229 = vadd.xlane.f32.xlu0 %v5228_v51 }
 0x439   : > { %4844 = vadd.xlane.f32.xlu1 %v4843_v52  ;;  %v11737_v32 = vpop.xlane.xlu0 %5181  ;;  %v4399_v60 = vsel %vm1219_vm4, %v4397_v28, %v4398_v26  ;;  %v11775_v52 = vld [vmem:[#allocation3 + $0xf0] sm:$0xff] }
 0x43a   : > { %v4587_v21 = vpop.xlane.xlu1 %4586  ;;  %v11740_v22 = vadd.f32 %v4399_v60, %v4087_v43  ;;  %v4615_v43 = vsel %vm3397_vm5, %v4521_v55, 0.0  ;;  %v5446_v3 = vmul.f32 %v11775_v52, %v10733_v54  ;;  %v5087_v60 = vmul.f32 %v10572_v49, %v11686_v57 }
 0x43b   : > { %v11743_v2 = vadd.f32 %v4587_v21, %v11647_v8  ;;  %v5444_v8 = vmul.f32 %v11755_v48, %v10733_v54 }
 0x43c   : > { %5493 = vadd.xlane.f32.xlu0 %v5492_v16  ;;  %v5510_v58 = vsel %vm3397_vm5, %v5446_v3, 0.0 }
 0x43d   : > { %5232 = vadd.xlane.f32.xlu1 %v5231_v53  ;;  %v11753_v26 = vpop.xlane.xlu0 %3876  ;;  %v5504_v39 = vsel %vm3397_vm5, %v5444_v8, 0.0  ;;  %v11785_v53 = vld [vmem:[#allocation3 + $0x108] sm:$0xff]  ;;  %v11790_v8 = vld [vmem:[#allocation3 + $0xb0] sm:$0xff] }
 0x43e   : > { %v4797_v36 = vpop.xlane.xlu1 %4796  ;;  %v5448_v55 = vmul.f32 %v11785_v53, %v10733_v54  ;;  %v4016_v41 = vrot.slane %v11753_v26, 1 }
 0x43f   : > { %v4945_v33 = vrot.slane %v4797_v36, 1  ;;  %v5225_v36 = vsel %vm4149_vm9, %v5087_v60, 0.0  ;;  %v11804_v60 = vld [vmem:[#allocation3 + $0xe0] sm:$0xff] }
 0x440   : > { %5499 = vadd.xlane.f32.xlu0 %v5498_v18  ;;  %v5450_v18 = vmul.f32 %v10733_v54, %v11364_v10  ;;  %v5452_v10 = vmul.f32 %v10733_v54, %v11435_v23  ;;  %v5023_v23 = vadd.f32 %v11573_v0, %v11552_v63 }
 0x441   : > { %v11765_v28 = vsel %vm549_vm3, %v4944_v7, %v4945_v33  ;;  %v11768_v51 = vsel %vm549_vm3, %v4945_v33, %v4947_v42  ;;  %4616 = vadd.xlane.f32.xlu1 %v4615_v43  ;;  %v11770_v6 = vpop.xlane.xlu0 %4265  ;;  %v5441_v42 = vmul.f32 %v11790_v8, %v10733_v54  ;;  %v5516_v33 = vsel %vm3397_vm5, %v5448_v55, 0.0 }
 0x442   : > { %v11772_v19 = vpop.xlane.xlu1 %5184  ;;  %v5522_v55 = vsel %vm3397_vm5, %v5450_v18, 0.0  ;;  %v5022_v18 = vadd.f32 %v11570_v31, %v11531_v27  ;;  %v5528_v38 = vsel %vm3397_vm5, %v5452_v10, 0.0 }
 0x443   : > { %v5495_v43 = vsel %vm3397_vm5, %v5441_v42, 0.0 }
 0x444   : > { %5505 = vadd.xlane.f32.xlu0 %v5504_v39  ;;  %v5443_v39 = vmul.f32 %v11800_v17, %v10733_v54 }
 0x445   : > { %4838 = vadd.xlane.f32.xlu1 %v4837_v13  ;;  %v3653_v21 = vpop.xlane.xlu0 %3652 }
 0x446   : > { %v11782_v16 = vpop.xlane.xlu1 %4808  ;;  %v5501_v42 = vsel %vm3397_vm5, %v5443_v39, 0.0  ;;  %v5322_v39 = vrot.slane %v11544_v46, 2 }
 0x448   : > { %5511 = vadd.xlane.f32.xlu0 %v5510_v58  ;;  %v5445_v58 = vmul.f32 %v11804_v60, %v10733_v54 }
 0x449   : > { %5226 = vadd.xlane.f32.xlu1 %v5225_v36  ;;  %v3871_v49 = vpop.xlane.xlu0 %3870  ;;  %v5323_v36 = vrot.slane %v11577_v12, 2  ;;  %v5325_v12 = vrot.slane %v11486_v25, 2  ;;  %v5456_v25 = vmul.f32 %v10733_v54, %v11606_v30 }
 0x44a   : > { %v11794_v7 = vpop.xlane.xlu1 %5196  ;;  %v4013_v50 = vrot.slane %v3871_v49, 1 }
 0x44b   : > { %v5324_v46 = vsel %vm1219_vm4, %v5322_v39, %v5323_v36  ;;  %v5326_v63 = vsel %vm1219_vm4, %v5323_v36, %v5325_v12  ;;  %v4405_v36 = vrot.slane %v11770_v6, 2  ;;  %v11859_v39 = vld [vmem:[#allocation3 + $0x198] sm:$0xff] }
 0x44c   : > { %5517 = vadd.xlane.f32.xlu0 %v5516_v33  ;;  %v5454_v33 = vmul.f32 %v10733_v54, %v11525_v35  ;;  %v11838_v26 = vadd.f32 %v5324_v46, %v5022_v18  ;;  %v11840_v49 = vadd.f32 %v5326_v63, %v5023_v23  ;;  %v11847_v18 = vld [vmem:[#allocation3 + $0x110] sm:$0xff]  ;;  %v5328_v23 = vrot.slane %v11641_v40, 2 }
 0x44d   : > { %5496 = vadd.xlane.f32.xlu1 %v5495_v43  ;;  %v4260_v3 = vpop.xlane.xlu0 %4259  ;;  %v5333_v40 = vrot.slane %v11772_v19, 2  ;;  %v5024_v46 = vadd.f32 %v11667_v5, %v11618_v45 }
 0x44e   : > { %v3656_v13 = vpop.xlane.xlu1 %3655  ;;  %v5534_v27 = vsel %vm3397_vm5, %v5454_v33, 0.0  ;;  %v4402_v12 = vrot.slane %v4260_v3, 2 }
 0x450   : > { %5523 = vadd.xlane.f32.xlu0 %v5522_v55 }
 0x451   : > { %5502 = vadd.xlane.f32.xlu1 %v5501_v42  ;;  %v4590_v43 = vpop.xlane.xlu0 %4589  ;;  %v5507_v42 = vsel %vm3397_vm5, %v5445_v58, 0.0 }
 0x452   : > { %v3874_v55 = vpop.xlane.xlu1 %3873  ;;  %v11826_v35 = vadd.f32 %v4590_v43, %v11740_v22  ;;  %v5327_v43 = vrot.slane %v11671_v14, 2 }
 0x453   : > { %v4014_v56 = vrot.slane %v3874_v55, 1 }
 0x454   : > { %5529 = vadd.xlane.f32.xlu0 %v5528_v38  ;;  %v4952_v38 = vrot.slane %v11782_v16, 1  ;;  %v5449_v16 = vmul.f32 %v11847_v18, %v10733_v54  ;;  %v5329_v63 = vsel %vm1219_vm4, %v5327_v43, %v5328_v23  ;;  %v5453_v43 = vmul.f32 %v10733_v54, %v11444_v62 }
 0x455   : > { %v4015_v31 = vsel %vm549_vm3, %v4013_v50, %v4014_v56  ;;  %v4017_v0 = vsel %vm549_vm3, %v4014_v56, %v4016_v41  ;;  %5508 = vadd.xlane.f32.xlu1 %v5507_v42  ;;  %v4806_v22 = vpop.xlane.xlu0 %4805  ;;  %v5513_v56 = vsel %vm3397_vm5, %v5447_v37, 0.0  ;;  %v5540_v37 = vsel %vm3397_vm5, %v5456_v25, 0.0 }
 0x456   : > { %v4263_v58 = vpop.xlane.xlu1 %4262  ;;  %v4950_v10 = vrot.slane %v4806_v22, 1  ;;  %v4089_v33 = vadd.f32 %v4015_v31, %v3653_v21  ;;  %v4090_v30 = vadd.f32 %v4017_v0, %v3656_v13  ;;  %v5458_v13 = vmul.f32 %v10733_v54, %v11686_v57 }
 0x457   : > { %v4403_v50 = vrot.slane %v4263_v58, 2  ;;  %v5519_v25 = vsel %vm3397_vm5, %v5449_v16, 0.0  ;;  %v5451_v31 = vmul.f32 %v10733_v54, %v11385_v34  ;;  %v5332_v0 = vrot.slane %v11737_v32, 2  ;;  %v11898_v16 = vld [vmem:[#allocation3 + $0x30] sm:$0xff] }
 0x458   : > { %5535 = vadd.xlane.f32.xlu0 %v5534_v27  ;;  %v4953_v41 = vsel %vm549_vm3, %v4950_v10, %v4952_v38  ;;  %v11880_v58 = vadd.f32 %v5329_v63, %v5024_v46  ;;  %v11913_v63 = vld [vmem:[#allocation3 + $0x40] sm:$0x3] }
 0x459   : > { %5514 = vadd.xlane.f32.xlu1 %v5513_v56  ;;  %v11852_v21 = vpop.xlane.xlu0 %5193  ;;  %v4404_v14 = vsel %vm1219_vm4, %v4402_v12, %v4403_v50  ;;  %v4406_v6 = vsel %vm1219_vm4, %v4403_v50, %v4405_v36  ;;  %v5334_v34 = vsel %vm1219_vm4, %v5332_v0, %v5333_v40  ;;  %v5525_v32 = vsel %vm3397_vm5, %v5451_v31, 0.0 }
 0x45a   : > { %v4593_v3 = vpop.xlane.xlu1 %4592  ;;  %v11861_v55 = vadd.f32 %v4404_v14, %v4089_v33  ;;  %v11863_v42 = vadd.f32 %v4406_v6, %v4090_v30  ;;  %v5546_v33 = vsel %vm3397_vm5, %v5458_v13, 0.0  ;;  %v5026_v30 = vadd.f32 %v11765_v28, %v11717_v4 }
 0x45b   : > { %v4641_v27 = vadd.f32 %v4593_v3, %v11712_v20  ;;  %v5460_v20 = vmul.f32 %v10733_v54, %v11859_v39  ;;  %v5338_v28 = vrot.slane %v11852_v21, 2  ;;  %v5594_v14 = vmul.f32 %v11898_v16, %v10524_v11 }
 0x45c   : > { %5541 = vadd.xlane.f32.xlu0 %v5540_v37  ;;  %v11895_v56 = vadd.f32 %v5334_v34, %v5026_v30  ;;  %v5455_v6 = vmul.f32 %v10733_v54, %v11546_v29  ;;  %v5457_v29 = vmul.f32 %v10733_v54, %v11609_v47  ;;  %v11926_v34 = vld [vmem:[#allocation3 + $0x50] sm:$0xff]  ;;  %v11930_v47 = vld [vmem:[#allocation3 + $0x1a0] sm:$0xff] }
 0x45d   : > { %v11874_v22 = vadd.f32 %v4953_v41, %v4641_v27  ;;  %5520 = vadd.xlane.f32.xlu1 %v5519_v25  ;;  %v11876_v38 = vpop.xlane.xlu0 %4817  ;;  %v5552_v50 = vsel %vm3397_vm5, %v5460_v20, 0.0  ;;  %v5330_v27 = vrot.slane %v11593_v1, 2  ;;  %v5642_v46 = vsel %vm3759_vm7, %v5594_v14, 0.0  ;;  %13333 = vst [vmem:[#allocation29_spill] sm:$0xff] %v11930_v47 }
 0x45e   : > { %v4803_v45 = vpop.xlane.xlu1 %4802  ;;  %v5537_v25 = vsel %vm3397_vm5, %v5455_v6, 0.0 }
 0x45f   : > { %v4949_v5 = vrot.slane %v4803_v45, 1  ;;  %v5331_v0 = vsel %vm1219_vm4, %v5328_v23, %v5330_v27 }
 0x460   : > { %5547 = vadd.xlane.f32.xlu0 %v5546_v33  ;;  %v5335_v33 = vrot.slane %v11669_v15, 2  ;;  %v5027_v15 = vadd.f32 %v11768_v51, %v11743_v2 }
 0x461   : > { %v4951_v36 = vsel %vm549_vm3, %v4949_v5, %v4950_v10  ;;  %5526 = vadd.xlane.f32.xlu1 %v5525_v32  ;;  %v11892_v12 = vpop.xlane.xlu0 %5205  ;;  %v5531_v10 = vsel %vm3397_vm5, %v5453_v43, 0.0  ;;  %v11922_v5 = vadd.f32 %v5331_v0, %v11656_v9  ;;  %v5598_v32 = vmul.f32 %v11926_v34, %v10524_v11 }
 0x462   : > { %v5191_v4 = vpop.xlane.xlu1 %5190  ;;  %v5028_v62 = vadd.f32 %v4951_v36, %v11826_v35  ;;  %v5596_v35 = vmul.f32 %v11913_v63, %v10524_v11  ;;  %v5543_v43 = vsel %vm3397_vm5, %v5457_v29, 0.0  ;;  %v5459_v9 = vmul.f32 %v10733_v54, %v11696_v61 }
 0x463   : > { %v5337_v41 = vrot.slane %v5191_v4, 2  ;;  %v5654_v2 = vsel %vm3397_vm5, %v5598_v32, 0.0 }
 0x464   : > { %5553 = vadd.xlane.f32.xlu0 %v5552_v50  ;;  %v5648_v30 = vsel %vm3766_vm8, %v5596_v35, 0.0  ;;  %v5336_v50 = vsel %vm1219_vm4, %v5333_v40, %v5335_v33  ;;  %v5549_v19 = vsel %vm3397_vm5, %v5459_v9, 0.0  ;;  %v11966_v33 = vld [vmem:[#allocation3 + $0x38] sm:$0xff]  ;;  %v11973_v9 = vld [vmem:[#allocation3 + $0x80] sm:$0xff] }
 0x465   : > { %5532 = vadd.xlane.f32.xlu1 %v5531_v10  ;;  %v11906_v3 = vpop.xlane.xlu0 %3658  ;;  %v5339_v37 = vsel %vm1219_vm4, %v5337_v41, %v5338_v28  ;;  %v11943_v10 = vld [vmem:[#allocation3 + $0x60] sm:$0xff]  ;;  %v11949_v51 = vadd.f32 %v5336_v50, %v5027_v15  ;;  %v11978_v50 = vld [vmem:[#allocation3 + $0x48] sm:$0xff] }
 0x466   : > { %v3886_v21 = vpop.xlane.xlu1 %3885  ;;  %v11909_v13 = vadd.f32 %v5339_v37, %v5028_v62  ;;  %v5461_v62 = vmul.f32 %v10733_v54, %v11930_v47  ;;  %v5600_v6 = vmul.f32 %v11943_v10, %v10524_v11  ;;  %v5340_v37 = vrot.slane %v11794_v7, 2 }
 0x467   : > { %v4021_v20 = vrot.slane %v3886_v21, 1 }
 0x468   : > { %5643 = vadd.xlane.f32.xlu0 %v5642_v46  ;;  %v5341_v46 = vsel %vm1219_vm4, %v5338_v28, %v5340_v37  ;;  %v5555_v7 = vsel %vm3397_vm5, %v5461_v62, 0.0  ;;  %v5660_v0 = vsel %vm3759_vm7, %v5600_v6, 0.0  ;;  %v5595_v28 = vmul.f32 %v11966_v33, %v10524_v11 }
 0x469   : > { %5538 = vadd.xlane.f32.xlu1 %v5537_v25  ;;  %v3883_v31 = vpop.xlane.xlu0 %3882  ;;  %v11959_v29 = vadd.f32 %v5341_v46, %v11874_v22 }
 0x46a   : > { %v4275_v45 = vpop.xlane.xlu1 %4274  ;;  %v4019_v1 = vrot.slane %v3883_v31, 1  ;;  %v5645_v15 = vsel %vm3397_vm5, %v5595_v28, 0.0 }
 0x46b   : > { %v4410_v4 = vrot.slane %v4275_v45, 2 }
 0x46c   : > { %5649 = vadd.xlane.f32.xlu0 %v5648_v30  ;;  %v4022_v23 = vsel %vm549_vm3, %v4019_v1, %v4021_v20  ;;  %v11962_v20 = vld [vmem:[#allocation3 + $0x70] sm:$0x3] }
 0x46d   : > { %5544 = vadd.xlane.f32.xlu1 %v5543_v43  ;;  %v4272_v36 = vpop.xlane.xlu0 %4271  ;;  %v5602_v45 = vmul.f32 %v11962_v20, %v10524_v11 }
 0x46e   : > { %v3662_v41 = vpop.xlane.xlu1 %3661  ;;  %v4408_v14 = vrot.slane %v4272_v36, 2  ;;  %v5604_v36 = vmul.f32 %v11973_v9, %v10524_v11 }
 0x46f   : > { %v4092_v21 = vadd.f32 %v4022_v23, %v3662_v41  ;;  %v5666_v23 = vsel %vm3766_vm8, %v5602_v45, 0.0 }
 0x470   : > { %5655 = vadd.xlane.f32.xlu0 %v5654_v2  ;;  %v4411_v40 = vsel %vm1219_vm4, %v4408_v14, %v4410_v4  ;;  %v5672_v37 = vsel %vm3397_vm5, %v5604_v36, 0.0 }
 0x471   : > { %5550 = vadd.xlane.f32.xlu1 %v5549_v19  ;;  %v4596_v27 = vpop.xlane.xlu0 %4595  ;;  %v11953_v54 = vadd.f32 %v4411_v40, %v4092_v21  ;;  %v11987_v21 = vld [vmem:[#allocation3 + $0x90] sm:$0xff]  ;;  %v11992_v40 = vld [vmem:[#allocation3 + $0x58] sm:$0x3] }
 0x472   : > { %v3880_v35 = vpop.xlane.xlu1 %3879  ;;  %v4642_v25 = vadd.f32 %v4596_v27, %v11861_v55  ;;  %v5606_v2 = vmul.f32 %v11987_v21, %v10524_v11 }
 0x473   : > { %v4018_v31 = vrot.slane %v3880_v35, 1 }
 0x474   : > { %5661 = vadd.xlane.f32.xlu0 %v5660_v0  ;;  %v5678_v45 = vsel %vm3759_vm7, %v5606_v2, 0.0 }
 0x475   : > { %v4020_v55 = vsel %vm549_vm3, %v4018_v31, %v4019_v1  ;;  %5556 = vadd.xlane.f32.xlu1 %v5555_v7  ;;  %v4812_v30 = vpop.xlane.xlu0 %4811  ;;  %v5597_v1 = vmul.f32 %v11978_v50, %v10524_v11  ;;  %v4957_v7 = vrot.slane %v11876_v38, 1 }
 0x476   : > { %v4269_v22 = vpop.xlane.xlu1 %4268  ;;  %v4091_v32 = vadd.f32 %v4020_v55, %v11906_v3  ;;  %v4954_v31 = vrot.slane %v4812_v30, 1  ;;  %v12005_v55 = vld [vmem:[#allocation3 + $0x68] sm:$0xff]  ;;  %v5610_v30 = vmul.f32 %v11790_v8, %v10524_v11 }
 0x477   : > { %v4407_v43 = vrot.slane %v4269_v22, 2  ;;  %v5651_v19 = vsel %vm3759_vm7, %v5597_v1, 0.0  ;;  %v5601_v22 = vmul.f32 %v12005_v55, %v10524_v11  ;;  %v5345_v1 = vrot.slane %v11892_v12, 2 }
 0x478   : > { %5667 = vadd.xlane.f32.xlu0 %v5666_v23 }
 0x479   : > { %5646 = vadd.xlane.f32.xlu1 %v5645_v15  ;;  %v5200_v4 = vpop.xlane.xlu0 %5199  ;;  %v4409_v3 = vsel %vm1219_vm4, %v4407_v43, %v4408_v14  ;;  %v5599_v14 = vmul.f32 %v11992_v40, %v10524_v11  ;;  %v5663_v2 = vsel %vm3397_vm5, %v5601_v22, 0.0 }
 0x47a   : > { %v4599_v41 = vpop.xlane.xlu1 %4598  ;;  %v11983_v62 = vadd.f32 %v4409_v3, %v4091_v32  ;;  %v5342_v3 = vrot.slane %v5200_v4, 2 }
 0x47b   : > { %v4643_v6 = vadd.f32 %v4599_v41, %v11863_v42  ;;  %v11998_v42 = vld [vmem:[#allocation3 + $0xa0] sm:$0x3]  ;;  %v5657_v28 = vsel %vm3766_vm8, %v5599_v14, 0.0 }
 0x47c   : > { %5673 = vadd.xlane.f32.xlu0 %v5672_v37  ;;  %v5608_v35 = vmul.f32 %v11998_v42, %v10524_v11 }
 0x47d   : > { %5652 = vadd.xlane.f32.xlu1 %v5651_v19  ;;  %v11996_v27 = vpop.xlane.xlu0 %3894  ;;  %v12018_v19 = vld [vmem:[#allocation3 + $0x78] sm:$0xff] }
 0x47e   : > { %v4815_v46 = vpop.xlane.xlu1 %4814  ;;  %v5684_v37 = vsel %vm3766_vm8, %v5608_v35, 0.0  ;;  %v5603_v14 = vmul.f32 %v12018_v19, %v10524_v11  ;;  %v5690_v35 = vsel %vm3397_vm5, %v5610_v30, 0.0  ;;  %v12044_v30 = vld [vmem:[#allocation3 + $0x98] sm:$0xff] }
 0x47f   : > { %v4955_v0 = vrot.slane %v4815_v46, 1  ;;  %13335 = vst [vmem:[#allocation31_spill] sm:$0xff] %v12044_v30 }
 0x480   : > { %5679 = vadd.xlane.f32.xlu0 %v5678_v45 }
 0x481   : > { %v4956_v32 = vsel %vm549_vm3, %v4954_v31, %v4955_v0  ;;  %v4958_v43 = vsel %vm549_vm3, %v4955_v0, %v4957_v7  ;;  %5658 = vadd.xlane.f32.xlu1 %v5657_v28  ;;  %v12011_v23 = vpop.xlane.xlu0 %4283  ;;  %v5612_v7 = vmul.f32 %v11746_v59, %v10524_v11  ;;  %v5669_v31 = vsel %vm3759_vm7, %v5603_v14, 0.0  ;;  %v12032_v0 = vld [vmem:[#allocation3 + $0x88] sm:$0x3] }
 0x482   : > { %v5203_v38 = vpop.xlane.xlu1 %5202  ;;  %v5030_v36 = vadd.f32 %v4956_v32, %v4642_v25  ;;  %v5031_v15 = vadd.f32 %v4958_v43, %v4643_v6  ;;  %v5605_v45 = vmul.f32 %v12032_v0, %v10524_v11  ;;  %v12039_v43 = vld [vmem:[#allocation3 + $0xd0] sm:$0x3] }
 0x483   : > { %v5343_v41 = vrot.slane %v5203_v38, 2  ;;  %v5696_v32 = vsel %vm3759_vm7, %v5612_v7, 0.0  ;;  %13334 = vst [vmem:[#allocation30_spill] sm:$0xff] %v12039_v43  ;;  %v5614_v38 = vmul.f32 %v12039_v43, %v10524_v11  ;;  %v4026_v7 = vrot.slane %v11996_v27, 1  ;;  %v12068_v43 = vld [vmem:[#allocation3 + $0x100] sm:$0x3] }
 0x484   : > { %5685 = vadd.xlane.f32.xlu0 %v5684_v37  ;;  %v5675_v59 = vsel %vm3766_vm8, %v5605_v45, 0.0 }
 0x485   : > { %5664 = vadd.xlane.f32.xlu1 %v5663_v2  ;;  %v3665_v46 = vpop.xlane.xlu0 %3664  ;;  %v5344_v8 = vsel %vm1219_vm4, %v5342_v3, %v5343_v41  ;;  %v5346_v25 = vsel %vm1219_vm4, %v5343_v41, %v5345_v1  ;;  %v5702_v3 = vsel %vm3766_vm8, %v5614_v38, 0.0  ;;  %v5616_v41 = vmul.f32 %v11804_v60, %v10524_v11  ;;  %v12060_v38 = vld [vmem:[#allocation3 + $0xb8] sm:$0x3] }
 0x486   : > { %v4827_v6 = vpop.xlane.xlu1 %4826  ;;  %v12024_v12 = vadd.f32 %v5344_v8, %v5030_v36  ;;  %v12026_v4 = vadd.f32 %v5346_v25, %v5031_v15  ;;  %v5607_v36 = vmul.f32 %v12044_v30, %v10524_v11  ;;  %v5609_v2 = vmul.f32 %v11730_v44, %v10524_v11  ;;  %13336 = vst [vmem:[#allocation32_spill] sm:$0xff] %v12060_v38  ;;  %v12158_v30 = vld [vmem:[#allocation3 + $0x138] sm:$0xff] }
 0x487   : > { %v5618_v8 = vmul.f32 %v11775_v52, %v10524_v11  ;;  %v5708_v60 = vsel %vm3397_vm5, %v5616_v41, 0.0  ;;  %v5611_v44 = vmul.f32 %v12060_v38, %v10524_v11  ;;  %13341 = vst [vmem:[#allocation36_spill] sm:$0xff] %v12158_v30 }
 0x488   : > { %5691 = vadd.xlane.f32.xlu0 %v5690_v35  ;;  %v5681_v37 = vsel %vm3397_vm5, %v5607_v36, 0.0 }
 0x489   : > { %5670 = vadd.xlane.f32.xlu1 %v5669_v31  ;;  %v3889_v28 = vpop.xlane.xlu0 %3888  ;;  %v5714_v27 = vsel %vm3759_vm7, %v5618_v8, 0.0 }
 0x48a   : > { %v12036_v22 = vpop.xlane.xlu1 %5214  ;;  %v4023_v31 = vrot.slane %v3889_v28, 1  ;;  %v4962_v28 = vrot.slane %v4827_v6, 1  ;;  %v5613_v6 = vmul.f32 %v11800_v17, %v10524_v11  ;;  %v5622_v17 = vmul.f32 %v11847_v18, %v10524_v11 }
 0x48c   : > { %5697 = vadd.xlane.f32.xlu0 %v5696_v32  ;;  %v5687_v32 = vsel %vm3759_vm7, %v5609_v2, 0.0  ;;  %v4415_v2 = vrot.slane %v12011_v23, 2 }
 0x48d   : > { %5676 = vadd.xlane.f32.xlu1 %v5675_v59  ;;  %v4278_v15 = vpop.xlane.xlu0 %4277 }
 0x48e   : > { %v3668_v1 = vpop.xlane.xlu1 %3667 }
 0x490   : > { %5703 = vadd.xlane.f32.xlu0 %v5702_v3 }
 0x491   : > { %5682 = vadd.xlane.f32.xlu1 %v5681_v37  ;;  %v4602_v14 = vpop.xlane.xlu0 %4601 }
 0x492   : > { %v3892_v25 = vpop.xlane.xlu1 %3891  ;;  %v4644_v35 = vadd.f32 %v4602_v14, %v11983_v62 }
 0x493   : > { %v4024_v45 = vrot.slane %v3892_v25, 1  ;;  %v4412_v25 = vrot.slane %v4278_v15, 2  ;;  %v5350_v15 = vrot.slane %v12036_v22, 2 }
 0x494   : > { %5709 = vadd.xlane.f32.xlu0 %v5708_v60 }
 0x495   : > { %v4025_v59 = vsel %vm549_vm3, %v4023_v31, %v4024_v45  ;;  %v4027_v36 = vsel %vm549_vm3, %v4024_v45, %v4026_v7  ;;  %5688 = vadd.xlane.f32.xlu1 %v5687_v32  ;;  %v4824_v62 = vpop.xlane.xlu0 %4823  ;;  %v5620_v31 = vmul.f32 %v12068_v43, %v10524_v11  ;;  %v5693_v7 = vsel %vm3766_vm8, %v5611_v44, 0.0 }
 0x496   : > { %v4281_v3 = vpop.xlane.xlu1 %4280  ;;  %v4960_v37 = vrot.slane %v4824_v62, 1  ;;  %v4093_v41 = vadd.f32 %v4025_v59, %v3665_v46  ;;  %v4094_v14 = vadd.f32 %v4027_v36, %v3668_v1 }
 0x497   : > { %v4413_v60 = vrot.slane %v4281_v3, 2  ;;  %v5720_v62 = vsel %vm3766_vm8, %v5620_v31, 0.0 }
 0x498   : > { %5715 = vadd.xlane.f32.xlu0 %v5714_v27  ;;  %v4963_v45 = vsel %vm549_vm3, %v4960_v37, %v4962_v28  ;;  %v5699_v27 = vsel %vm3397_vm5, %v5613_v6, 0.0  ;;  %v5615_v28 = vmul.f32 %v11755_v48, %v10524_v11  ;;  %v12101_v48 = vld [vmem:[#allocation3 + $0xe8] sm:$0x3] }
 0x499   : > { %5694 = vadd.xlane.f32.xlu1 %v5693_v7  ;;  %v5212_v46 = vpop.xlane.xlu0 %5211  ;;  %v4414_v1 = vsel %vm1219_vm4, %v4412_v25, %v4413_v60  ;;  %v4416_v23 = vsel %vm1219_vm4, %v4413_v60, %v4415_v2  ;;  %v12094_v25 = vld [vmem:[#allocation3 + $0x120] sm:$0xff]  ;;  %13337 = vst [vmem:[#allocation33_spill] sm:$0xff] %v12101_v48 }
 0x49a   : > { %v4605_v8 = vpop.xlane.xlu1 %4604  ;;  %v5348_v32 = vrot.slane %v5212_v46, 2  ;;  %v12079_v59 = vadd.f32 %v4414_v1, %v4093_v41  ;;  %v12081_v36 = vadd.f32 %v4416_v23, %v4094_v14  ;;  %v5624_v60 = vmul.f32 %v12094_v25, %v10524_v11 }
 0x49b   : > { %v4645_v44 = vadd.f32 %v4605_v8, %v11953_v54  ;;  %v5726_v54 = vsel %vm3397_vm5, %v5622_v17, 0.0  ;;  %v5705_v7 = vsel %vm3759_vm7, %v5615_v28, 0.0 }
 0x49c   : > { %5721 = vadd.xlane.f32.xlu0 %v5720_v62  ;;  %v5351_v22 = vsel %vm1219_vm4, %v5348_v32, %v5350_v15  ;;  %v5732_v8 = vsel %vm3759_vm7, %v5624_v60, 0.0  ;;  %v5621_v60 = vmul.f32 %v11785_v53, %v10524_v11 }
 0x49d   : > { %v5033_v3 = vadd.f32 %v4963_v45, %v4645_v44  ;;  %5700 = vadd.xlane.f32.xlu1 %v5699_v27  ;;  %v12091_v41 = vpop.xlane.xlu0 %4835  ;;  %v5617_v45 = vmul.f32 %v12101_v48, %v10524_v11  ;;  %v12109_v44 = vld [vmem:[#allocation3 + $0x130] sm:$0x3]  ;;  %v5619_v27 = vmul.f32 %v11815_v24, %v10524_v11 }
 0x49e   : > { %v4821_v14 = vpop.xlane.xlu1 %4820  ;;  %v5626_v62 = vmul.f32 %v12109_v44, %v10524_v11 }
 0x49f   : > { %v4959_v2 = vrot.slane %v4821_v14, 1  ;;  %v12098_v31 = vadd.f32 %v5351_v22, %v5033_v3  ;;  %v5711_v17 = vsel %vm3766_vm8, %v5617_v45, 0.0  ;;  %v12120_v14 = vld [vmem:[#allocation3 + $0x140] sm:$0xff] }
 0x4a0   : > { %5727 = vadd.xlane.f32.xlu0 %v5726_v54  ;;  %v5738_v3 = vsel %vm3766_vm8, %v5626_v62, 0.0  ;;  %v5717_v54 = vsel %vm3397_vm5, %v5619_v27, 0.0 }
 0x4a1   : > { %v4961_v6 = vsel %vm549_vm3, %v4959_v2, %v4960_v37  ;;  %5706 = vadd.xlane.f32.xlu1 %v5705_v7  ;;  %v12106_v46 = vpop.xlane.xlu0 %5223  ;;  %v5628_v2 = vmul.f32 %v12120_v14, %v10524_v11 }
 0x4a2   : > { %v5209_v1 = vpop.xlane.xlu1 %5208  ;;  %v5032_v23 = vadd.f32 %v4961_v6, %v4644_v35 }
 0x4a3   : > { %v5347_v15 = vrot.slane %v5209_v1, 2  ;;  %v5744_v1 = vsel %vm3397_vm5, %v5628_v2, 0.0 }
 0x4a4   : > { %5733 = vadd.xlane.f32.xlu0 %v5732_v8  ;;  %v5723_v8 = vsel %vm3759_vm7, %v5621_v60, 0.0 }
 0x4a5   : > { %5712 = vadd.xlane.f32.xlu1 %v5711_v17  ;;  %v3671_v37 = vpop.xlane.xlu0 %3670  ;;  %v5349_v28 = vsel %vm1219_vm4, %v5347_v15, %v5348_v32  ;;  %v12134_v17 = vld [vmem:[#allocation3 + $0x118] sm:$0x3] }
 0x4a6   : > { %v3904_v22 = vpop.xlane.xlu1 %3903  ;;  %v12117_v35 = vadd.f32 %v5349_v28, %v5032_v23  ;;  %v12128_v23 = vld [vmem:[#allocation3 + $0x150] sm:$0xff]  ;;  %v5623_v53 = vmul.f32 %v12134_v17, %v10524_v11 }
 0x4a7   : > { %v4031_v45 = vrot.slane %v3904_v22, 1  ;;  %13338 = vst [vmem:[#allocation34_spill] sm:$0xff] %v12128_v23  ;;  %v5630_v15 = vmul.f32 %v12128_v23, %v10524_v11  ;;  %v12153_v23 = vld [vmem:[#allocation3 + $0x170] sm:$0xff] }
 0x4a8   : > { %5739 = vadd.xlane.f32.xlu0 %v5738_v3  ;;  %13340 = vst [vmem:[#allocation35_spill] sm:$0xff] %v12153_v23 }
 0x4a9   : > { %5718 = vadd.xlane.f32.xlu1 %v5717_v54  ;;  %v3901_v7 = vpop.xlane.xlu0 %3900  ;;  %v5750_v54 = vsel %vm3759_vm7, %v5630_v15, 0.0 }
 0x4aa   : > { %v4293_v32 = vpop.xlane.xlu1 %4292  ;;  %v4029_v6 = vrot.slane %v3901_v7, 1  ;;  %v12139_v7 = vld [vmem:[#allocation3 + $0x160] sm:$0x3] }
 0x4ab   : > { %v4420_v28 = vrot.slane %v4293_v32, 2  ;;  %13339 = vst [vmem:[#allocation18_spill] sm:$0xff] %v12139_v7  ;;  %v5632_v60 = vmul.f32 %v12139_v7, %v10524_v11 }
 0x4ac   : > { %5745 = vadd.xlane.f32.xlu0 %v5744_v1  ;;  %v4032_v62 = vsel %vm549_vm3, %v4029_v6, %v4031_v45  ;;  %v5729_v45 = vsel %vm3766_vm8, %v5623_v53, 0.0  ;;  %v12144_v1 = vld [vmem:[#allocation3 + $0x128] sm:$0xff]  ;;  %v5634_v53 = vmul.f32 %v12153_v23, %v10524_v11 }
 0x4ad   : > { %5724 = vadd.xlane.f32.xlu1 %v5723_v8  ;;  %v4290_v27 = vpop.xlane.xlu0 %4289  ;;  %v5625_v8 = vmul.f32 %v12144_v1, %v10524_v11  ;;  %v5756_v7 = vsel %vm3766_vm8, %v5632_v60, 0.0 }
 0x4ae   : > { %v3674_v22 = vpop.xlane.xlu1 %3673  ;;  %v4418_v3 = vrot.slane %v4290_v27, 2 }
 0x4af   : > { %v4096_v2 = vadd.f32 %v4032_v62, %v3674_v22 }
 0x4b0   : > { %5751 = vadd.xlane.f32.xlu0 %v5750_v54  ;;  %v4421_v32 = vsel %vm1219_vm4, %v4418_v3, %v4420_v28  ;;  %v5735_v54 = vsel %vm3397_vm5, %v5625_v8, 0.0  ;;  %v5627_v28 = vmul.f32 %v12158_v30, %v10524_v11 }
 0x4b1   : > { %5730 = vadd.xlane.f32.xlu1 %v5729_v45  ;;  %v4608_v27 = vpop.xlane.xlu0 %4607  ;;  %v12149_v62 = vadd.f32 %v4421_v32, %v4096_v2 }
 0x4b2   : > { %v3898_v15 = vpop.xlane.xlu1 %3897  ;;  %v4646_v22 = vadd.f32 %v4608_v27, %v12079_v59  ;;  %v5762_v27 = vsel %vm3397_vm5, %v5634_v53, 0.0  ;;  %v5741_v8 = vsel %vm3759_vm7, %v5627_v28, 0.0 }
 0x4b3   : > { %v4028_v48 = vrot.slane %v3898_v15, 1  ;;  %v5636_v15 = vmul.f32 %v10524_v11, %v11686_v57 }
 0x4b4   : > { %5757 = vadd.xlane.f32.xlu0 %v5756_v7  ;;  %v12167_v7 = vld [vmem:[#allocation3 + $0x148] sm:$0x3] }
 0x4b5   : > { %v4030_v2 = vsel %vm549_vm3, %v4028_v48, %v4029_v6  ;;  %5736 = vadd.xlane.f32.xlu1 %v5735_v54  ;;  %v4830_v59 = vpop.xlane.xlu0 %4829  ;;  %13342 = vst [vmem:[#allocation19_spill] sm:$0xff] %v12167_v7  ;;  %v5629_v23 = vmul.f32 %v12167_v7, %v10524_v11  ;;  %v5768_v53 = vsel %vm3759_vm7, %v5636_v15, 0.0  ;;  %v13345_v7 = vld [vmem:[#allocation38_spill] sm:$0xff] }
 0x4b6   : > { %v4287_v45 = vpop.xlane.xlu1 %4286  ;;  %v4095_v32 = vadd.f32 %v4030_v2, %v3671_v37  ;;  %v4964_v15 = vrot.slane %v4830_v59, 1  ;;  %v5982_v30 = vmul.f32 %v11898_v16, %v13345_v7 }
 0x4b7   : > { %v4417_v60 = vrot.slane %v4287_v45, 2  ;;  %v13343_v45 = vld [vmem:[#allocation58_spill] sm:$0xff]  ;;  %v5747_v28 = vsel %vm3766_vm8, %v5629_v23, 0.0 }
 0x4b8   : > { %5763 = vadd.xlane.f32.xlu0 %v5762_v27  ;;  %v5638_v57 = vmul.f32 %v10524_v11, %v13343_v45  ;;  %v12177_v27 = vld [vmem:[#allocation3 + $0x158] sm:$0xff] }
 0x4b9   : > { %5742 = vadd.xlane.f32.xlu1 %v5741_v8  ;;  %v5218_v48 = vpop.xlane.xlu0 %5217  ;;  %v4419_v6 = vsel %vm1219_vm4, %v4417_v60, %v4418_v3  ;;  %v5631_v8 = vmul.f32 %v12177_v27, %v10524_v11  ;;  %v5640_v3 = vmul.f32 %v10524_v11, %v11930_v47  ;;  %v4967_v60 = vrot.slane %v12091_v41, 1 }
 0x4ba   : > { %v4611_v54 = vpop.xlane.xlu1 %4610  ;;  %v4484_v37 = vadd.f32 %v4419_v6, %v4095_v32  ;;  %v5774_v23 = vsel %vm3766_vm8, %v5638_v57, 0.0 }
 0x4bb   : > { %v4647_v2 = vadd.f32 %v4611_v54, %v12081_v36  ;;  %v5753_v54 = vsel %vm3397_vm5, %v5631_v8, 0.0  ;;  %v5780_v41 = vsel %vm3397_vm5, %v5640_v3, 0.0  ;;  %v5355_v8 = vrot.slane %v12106_v46, 2 }
 0x4bc   : > { %5769 = vadd.xlane.f32.xlu0 %v5768_v53  ;;  %v12188_v53 = vld [vmem:[#allocation3 + $0x168] sm:$0xff] }
 0x4bd   : > { %5748 = vadd.xlane.f32.xlu1 %v5747_v28  ;;  %v4614_v38 = vpop.xlane.xlu0 %4613  ;;  %13344 = vst [vmem:[#allocation39_spill] sm:$0xff] %v12188_v53  ;;  %v5633_v45 = vmul.f32 %v12188_v53, %v10524_v11 }
 0x4be   : > { %v4833_v32 = vpop.xlane.xlu1 %4832  ;;  %v12183_v36 = vadd.f32 %v4614_v38, %v4484_v37 }
 0x4bf   : > { %v4965_v6 = vrot.slane %v4833_v32, 1  ;;  %v5352_v32 = vrot.slane %v5218_v48, 2  ;;  %v5759_v53 = vsel %vm3759_vm7, %v5633_v45, 0.0  ;;  %v5984_v45 = vmul.f32 %v11913_v63, %v13345_v7 }
 0x4c0   : > { %5775 = vadd.xlane.f32.xlu0 %v5774_v23 }
 0x4c1   : > { %v4966_v28 = vsel %vm549_vm3, %v4964_v15, %v4965_v6  ;;  %v4968_v47 = vsel %vm549_vm3, %v4965_v6, %v4967_v60  ;;  %5754 = vadd.xlane.f32.xlu1 %v5753_v54  ;;  %v12194_v38 = vpop.xlane.xlu0 %4841  ;;  %v12201_v15 = vld [vmem:[#allocation3 + $0x178] sm:$0x3]  ;;  %v6030_v54 = vsel %vm4149_vm9, %v5982_v30, 0.0  ;;  %v5639_v30 = vmul.f32 %v10524_v11, %v11859_v39 }
 0x4c2   : > { %v5221_v59 = vpop.xlane.xlu1 %5220  ;;  %v5034_v37 = vadd.f32 %v4966_v28, %v4646_v22  ;;  %v5035_v57 = vadd.f32 %v4968_v47, %v4647_v2  ;;  %v5635_v60 = vmul.f32 %v12201_v15, %v10524_v11  ;;  %v4970_v16 = vrot.slane %v12194_v38, 1 }
 0x4c3   : > { %v5353_v23 = vrot.slane %v5221_v59, 2  ;;  %v5637_v28 = vmul.f32 %v10524_v11, %v11696_v61  ;;  %v12230_v61 = vld [vmem:[#allocation3 + $0x1a8] sm:$0x3] }
 0x4c4   : > { %5781 = vadd.xlane.f32.xlu0 %v5780_v41 }
 0x4c5   : > { %5760 = vadd.xlane.f32.xlu1 %v5759_v53  ;;  %v12205_v3 = vpop.xlane.xlu0 %5229  ;;  %v5354_v47 = vsel %vm1219_vm4, %v5352_v32, %v5353_v23  ;;  %v5356_v46 = vsel %vm1219_vm4, %v5353_v23, %v5355_v8  ;;  %v5765_v53 = vsel %vm3766_vm8, %v5635_v60, 0.0  ;;  %v6036_v32 = vsel %vm3400_vm6, %v5984_v45, 0.0 }
 0x4c6   : > { %v4845_v22 = vpop.xlane.xlu1 %4844  ;;  %v12209_v48 = vadd.f32 %v5354_v47, %v5034_v37  ;;  %v12211_v2 = vadd.f32 %v5356_v46, %v5035_v57  ;;  %v13346_v57 = vld [vmem:[#allocation25_spill] sm:$0xff]  ;;  %v5358_v38 = vrot.slane %v12205_v3, 2  ;;  %v5986_v23 = vmul.f32 %v11926_v34, %v13345_v7 }
 0x4c7   : > { %v4972_v6 = vrot.slane %v4845_v22, 1  ;;  %v5771_v60 = vsel %vm3397_vm5, %v5637_v28, 0.0  ;;  %v5777_v3 = vsel %vm3759_vm7, %v5639_v30, 0.0  ;;  %vm6505_vm7 = vcmask 130112  }
 0x4c8   : > { %6031 = vadd.xlane.f32.xlu0 %v6030_v54  ;;  %v5641_v54 = vmul.f32 %v10524_v11, %v12230_v61  ;;  %v6042_v45 = vsel %vm3397_vm5, %v5986_v23, 0.0 }
 0x4c9   : > { %5766 = vadd.xlane.f32.xlu1 %v5765_v53  ;;  %v5494_v41 = vpop.xlane.xlu0 %5493  ;;  %v4973_v59 = vsel %vm549_vm3, %v4970_v16, %v4972_v6  ;;  %v13348_v6 = vld [vmem:[#allocation26_spill] sm:$0xff]  ;;  %v5988_v53 = vmul.f32 %v11943_v10, %v13345_v7  ;;  %v5983_v10 = vmul.f32 %v11966_v33, %v13345_v7  ;;  %v5985_v33 = vmul.f32 %v11978_v50, %v13345_v7 }
 0x4ca   : > { %v5233_v37 = vpop.xlane.xlu1 %5232  ;;  %v12222_v8 = vadd.f32 %v5494_v41, %v13346_v57  ;;  %v13350_v57 = vld [vmem:[#allocation59_spill] sm:$0xff]  ;;  %v5783_v30 = vsel %vm3766_vm8, %v5641_v54, 0.0  ;;  %vm6683_vm8 = vcmask 138312  }
 0x4cb   : > { %v5360_v63 = vrot.slane %v5233_v37, 2  ;;  %v6048_v11 = vsel %vm4149_vm9, %v5988_v53, 0.0  ;;  %v13352_v53 = vld [vmem:[#allocation24_spill] sm:$0xff]  ;;  %v6039_v50 = vsel %vm4149_vm9, %v5985_v33, 0.0 }
 0x4cc   : > { %13347 = vst [vmem:[#allocation40_spill] sm:$0xff] %v12222_v8  ;;  %6037 = vadd.xlane.f32.xlu0 %v6036_v32 }
 0x4cd   : > { %5772 = vadd.xlane.f32.xlu1 %v5771_v60  ;;  %v5500_v47 = vpop.xlane.xlu0 %5499  ;;  %v5361_v46 = vsel %vm1219_vm4, %v5358_v38, %v5360_v63 }
 0x4ce   : > { %v4617_v22 = vpop.xlane.xlu1 %4616  ;;  %v12235_v39 = vadd.f32 %v5500_v47, %v13348_v6 }
 0x4cf   : > { %v4649_v34 = vadd.f32 %v4617_v22, %v12149_v62  ;;  %v5990_v62 = vmul.f32 %v11962_v20, %v13345_v7  ;;  %v5992_v20 = vmul.f32 %v11973_v9, %v13345_v7 }
 0x4d0   : > { %13349 = vst [vmem:[#allocation43_spill] sm:$0xff] %v12235_v39  ;;  %6043 = vadd.xlane.f32.xlu0 %v6042_v45 }
 0x4d1   : > { %v5037_v28 = vadd.f32 %v4973_v59, %v4649_v34  ;;  %5778 = vadd.xlane.f32.xlu1 %v5777_v3  ;;  %v5506_v41 = vpop.xlane.xlu0 %5505  ;;  %v6054_v54 = vsel %vm3400_vm6, %v5990_v62, 0.0  ;;  %v6060_v9 = vsel %vm3397_vm5, %v5992_v20, 0.0 }
 0x4d2   : > { %v4839_v37 = vpop.xlane.xlu1 %4838  ;;  %v12245_v63 = vadd.f32 %v5506_v41, %v13350_v57  ;;  %v6006_v41 = vmul.f32 %v11775_v52, %v13345_v7  ;;  %v6008_v52 = vmul.f32 %v12068_v43, %v13345_v7  ;;  %v6010_v43 = vmul.f32 %v11847_v18, %v13345_v7 }
 0x4d3   : > { %v4969_v32 = vrot.slane %v4839_v37, 1  ;;  %v12251_v23 = vadd.f32 %v5361_v46, %v5037_v28  ;;  %v6033_v46 = vsel %vm3397_vm5, %v5983_v10, 0.0  ;;  %v6012_v18 = vmul.f32 %v12094_v25, %v13345_v7 }
 0x4d4   : > { %13351 = vst [vmem:[#allocation44_spill] sm:$0xff] %v12245_v63  ;;  %6049 = vadd.xlane.f32.xlu0 %v6048_v11  ;;  %v6102_v11 = vsel %vm4149_vm9, %v6006_v41, 0.0  ;;  %v6114_v33 = vsel %vm3397_vm5, %v6010_v43, 0.0  ;;  %v6014_v25 = vmul.f32 %v12109_v44, %v13345_v7  ;;  %v6016_v44 = vmul.f32 %v12120_v14, %v13345_v7 }
 0x4d5   : > { %v4971_v59 = vsel %vm549_vm3, %v4969_v32, %v4970_v16  ;;  %5784 = vadd.xlane.f32.xlu1 %v5783_v30  ;;  %v5512_v60 = vpop.xlane.xlu0 %5511  ;;  %v13354_v30 = vld [vmem:[#allocation27_spill] sm:$0xff]  ;;  %v5994_v14 = vmul.f32 %v11987_v21, %v13345_v7  ;;  %v6013_v43 = vmul.f32 %v12144_v1, %v13345_v7 }
 0x4d6   : > { %v5227_v47 = vpop.xlane.xlu1 %5226  ;;  %v12257_v22 = vadd.f32 %v5512_v60, %v11838_v26  ;;  %v5036_v6 = vadd.f32 %v4971_v59, %v12183_v36  ;;  %v13356_v60 = vld [vmem:[#allocation28_spill] sm:$0xff] }
 0x4d7   : > { %v5357_v3 = vrot.slane %v5227_v47, 2 }
 0x4d8   : > { %6055 = vadd.xlane.f32.xlu0 %v6054_v54 }
 0x4d9   : > { %6034 = vadd.xlane.f32.xlu1 %v6033_v46  ;;  %v5518_v16 = vpop.xlane.xlu0 %5517  ;;  %v5359_v34 = vsel %vm1219_vm4, %v5357_v3, %v5358_v38  ;;  %v5987_v38 = vmul.f32 %v11992_v40, %v13345_v7  ;;  %v5989_v40 = vmul.f32 %v12005_v55, %v13345_v7  ;;  %v5991_v55 = vmul.f32 %v12018_v19, %v13345_v7 }
 0x4da   : > { %v5497_v26 = vpop.xlane.xlu1 %5496  ;;  %v12268_v45 = vadd.f32 %v5518_v16, %v11880_v58  ;;  %v12270_v36 = vadd.f32 %v5359_v34, %v5036_v6  ;;  %v6108_v6 = vsel %vm3400_vm6, %v6008_v52, 0.0  ;;  %v5993_v19 = vmul.f32 %v12032_v0, %v13345_v7 }
 0x4db   : > { %v12273_v28 = vadd.f32 %v5497_v26, %v13352_v53  ;;  %v6045_v62 = vsel %vm3400_vm6, %v5987_v38, 0.0  ;;  %v6051_v3 = vsel %vm3397_vm5, %v5989_v40, 0.0  ;;  %v6057_v16 = vsel %vm4149_vm9, %v5991_v55, 0.0 }
 0x4dc   : > { %6061 = vadd.xlane.f32.xlu0 %v6060_v9  ;;  %v6120_v53 = vsel %vm4149_vm9, %v6012_v18, 0.0  ;;  %v6063_v9 = vsel %vm3400_vm6, %v5993_v19, 0.0  ;;  %v6007_v0 = vmul.f32 %v11815_v24, %v13345_v7  ;;  %v6126_v38 = vsel %vm3400_vm6, %v6014_v25, 0.0  ;;  %v8723_v24 = vld [vmem:[#allocation3 + $0x108] sm:$0xff] }
 0x4dd   : > { %13353 = vst [vmem:[#allocation47_spill] sm:$0xff] %v12273_v28  ;;  %6040 = vadd.xlane.f32.xlu1 %v6039_v50  ;;  %v5524_v37 = vpop.xlane.xlu0 %5523  ;;  %v6132_v52 = vsel %vm3397_vm5, %v6016_v44, 0.0  ;;  %v6011_v40 = vmul.f32 %v12134_v17, %v13345_v7  ;;  %v8724_v19 = vld [vmem:[#allocation3 + $0xa8] sm:$0xff] }
 0x4de   : > { %v5503_v58 = vpop.xlane.xlu1 %5502  ;;  %v12282_v57 = vadd.f32 %v5524_v37, %v11895_v56  ;;  %v8888_v37 = vmov 0  }
 0x4df   : > { %v12285_v32 = vadd.f32 %v5503_v58, %v13354_v30  ;;  %8679 = vset.pattern.permute.xlu1 %v8888_v37  ;;  %8678 = vset.pattern.permute.xlu0 %v8888_v37  ;;  %v6105_v58 = vsel %vm3397_vm5, %v6007_v0, 0.0  ;;  %v6009_v30 = vmul.f32 %v8723_v24, %v13345_v7  ;;  %v6117_v21 = vsel %vm3400_vm6, %v6011_v40, 0.0 }
 0x4e0   : > { %6103 = vadd.xlane.f32.xlu0 %v6102_v11 }
 0x4e1   : > { %13355 = vst [vmem:[#allocation48_spill] sm:$0xff] %v12285_v32  ;;  %6046 = vadd.xlane.f32.xlu1 %v6045_v62  ;;  %v5530_v10 = vpop.xlane.xlu0 %5529  ;;  %v6111_v62 = vsel %vm4149_vm9, %v6009_v30, 0.0  ;;  %v13362_v30 = vld [vmem:[#allocation35_spill] sm:$0xff] }
 0x4e2   : > { %v5509_v59 = vpop.xlane.xlu1 %5508  ;;  %v12294_v56 = vadd.f32 %v5530_v10, %v11909_v13 }
 0x4e3   : > { %v12297_v47 = vadd.f32 %v5509_v59, %v13356_v60 }
 0x4e4   : > { %6109 = vadd.xlane.f32.xlu0 %v6108_v6  ;;  %v5996_v6 = vmul.f32 %v11998_v42, %v13345_v7  ;;  %v6123_v42 = vsel %vm3397_vm5, %v6013_v43, 0.0 }
 0x4e5   : > { %13357 = vst [vmem:[#allocation54_spill] sm:$0xff] %v12297_v47  ;;  %6052 = vadd.xlane.f32.xlu1 %v6051_v3  ;;  %v5536_v54 = vpop.xlane.xlu0 %5535 }
 0x4e6   : > { %v5515_v20 = vpop.xlane.xlu1 %5514  ;;  %v12306_v13 = vadd.f32 %v5536_v54, %v12024_v12  ;;  %v6019_v54 = vmul.f32 %v12177_v27, %v13345_v7 }
 0x4e7   : > { %v12309_v46 = vadd.f32 %v5515_v20, %v11840_v49  ;;  %v13358_v20 = vld [vmem:[#allocation36_spill] sm:$0xff] }
 0x4e8   : > { %6115 = vadd.xlane.f32.xlu0 %v6114_v33  ;;  %v6015_v33 = vmul.f32 %v13358_v20, %v13345_v7 }
 0x4e9   : > { %6058 = vadd.xlane.f32.xlu1 %v6057_v16  ;;  %v5542_v34 = vpop.xlane.xlu0 %5541 }
 0x4ea   : > { %v5521_v26 = vpop.xlane.xlu1 %5520  ;;  %v12318_v12 = vadd.f32 %v5542_v34, %v12117_v35  ;;  %v5997_v34 = vmul.f32 %v8724_v19, %v13345_v7  ;;  %v6129_v27 = vsel %vm4149_vm9, %v6015_v33, 0.0  ;;  %v13365_v33 = vld [vmem:[#allocation30_spill] sm:$0xff]  ;;  %v8726_v19 = vld [vmem:[#allocation3 + $0xb0] sm:$0xff] }
 0x4eb   : > { %v12321_v49 = vadd.f32 %v5521_v26, %v11922_v5  ;;  %v13359_v26 = vld [vmem:[#allocation19_spill] sm:$0xff] }
 0x4ec   : > { %6121 = vadd.xlane.f32.xlu0 %v6120_v53  ;;  %v6017_v53 = vmul.f32 %v13359_v26, %v13345_v7  ;;  %v6075_v0 = vsel %vm4149_vm9, %v5997_v34, 0.0  ;;  %v5998_v34 = vmul.f32 %v8726_v19, %v13345_v7 }
 0x4ed   : > { %6064 = vadd.xlane.f32.xlu1 %v6063_v9  ;;  %v5548_v41 = vpop.xlane.xlu0 %5547 }
 0x4ee   : > { %v5527_v50 = vpop.xlane.xlu1 %5526  ;;  %v12330_v35 = vadd.f32 %v5548_v41, %v12209_v48 }
 0x4ef   : > { %v12333_v5 = vadd.f32 %v5527_v50, %v11949_v51  ;;  %v6135_v50 = vsel %vm3400_vm6, %v6017_v53, 0.0 }
 0x4f0   : > { %6127 = vadd.xlane.f32.xlu0 %v6126_v38  ;;  %v13361_v38 = vld [vmem:[#allocation31_spill] sm:$0xff] }
 0x4f1   : > { %6106 = vadd.xlane.f32.xlu1 %v6105_v58  ;;  %v12340_v48 = vpop.xlane.xlu0 %5553  ;;  %v5995_v44 = vmul.f32 %v13361_v38, %v13345_v7 }
 0x4f2   : > { %v5533_v11 = vpop.xlane.xlu1 %5532 }
 0x4f3   : > { %v12343_v51 = vadd.f32 %v5533_v11, %v11959_v29  ;;  %v6066_v29 = vsel %vm4149_vm9, %v5994_v14, 0.0  ;;  %v6022_v11 = vmul.f32 %v13362_v30, %v13345_v7  ;;  %v13363_v14 = vld [vmem:[#allocation34_spill] sm:$0xff] }
 0x4f4   : > { %6133 = vadd.xlane.f32.xlu0 %v6132_v52  ;;  %v6069_v52 = vsel %vm3397_vm5, %v5995_v44, 0.0 }
 0x4f5   : > { %6112 = vadd.xlane.f32.xlu1 %v6111_v62  ;;  %v12351_v10 = vpop.xlane.xlu0 %5643  ;;  %v6018_v62 = vmul.f32 %v13363_v14, %v13345_v7 }
 0x4f6   : > { %v5539_v59 = vpop.xlane.xlu1 %5538 }
 0x4f7   : > { %v12354_v60 = vadd.f32 %v5539_v59, %v12026_v4  ;;  %v6072_v4 = vsel %vm3400_vm6, %v5996_v6, 0.0  ;;  %v8725_v6 = vld [vmem:[#allocation3 + $0xc0] sm:$0xff]  ;;  %v6138_v43 = vsel %vm4149_vm9, %v6018_v62, 0.0  ;;  %v6023_v62 = vmul.f32 %v12201_v15, %v13345_v7 }
 0x4f8   : > { %6067 = vadd.xlane.f32.xlu0 %v6066_v29  ;;  %v6150_v29 = vsel %vm3397_vm5, %v6022_v11, 0.0  ;;  %v8728_v11 = vld [vmem:[#allocation3 + $0xd8] sm:$0xff]  ;;  %v13371_v15 = vld [vmem:[#allocation29_spill] sm:$0xff] }
 0x4f9   : > { %6118 = vadd.xlane.f32.xlu1 %v6117_v21  ;;  %v12362_v17 = vpop.xlane.xlu0 %5649  ;;  %v6000_v21 = vmul.f32 %v8725_v6, %v13345_v7 }
 0x4fa   : > { %v5545_v3 = vpop.xlane.xlu1 %5544 }
 0x4fb   : > { %v12365_v55 = vadd.f32 %v5545_v3, %v12098_v31  ;;  %v6141_v31 = vsel %vm3397_vm5, %v6019_v54, 0.0  ;;  %v13364_v3 = vld [vmem:[#allocation18_spill] sm:$0xff]  ;;  %v6084_v20 = vsel %vm4149_vm9, %v6000_v21, 0.0 }
 0x4fc   : > { %6073 = vadd.xlane.f32.xlu0 %v6072_v4  ;;  %v6020_v4 = vmul.f32 %v13364_v3, %v13345_v7 }
 0x4fd   : > { %6124 = vadd.xlane.f32.xlu1 %v6123_v42  ;;  %v12373_v1 = vpop.xlane.xlu0 %5655 }
 0x4fe   : > { %v5551_v18 = vpop.xlane.xlu1 %5550 }
 0x4ff   : > { %v12376_v16 = vadd.f32 %v5551_v18, %v12211_v2  ;;  %v13360_v2 = vld [vmem:[#allocation32_spill] sm:$0xff]  ;;  %v6002_v18 = vmul.f32 %v13365_v33, %v13345_v7 }
 0x500   : > { %6142 = vadd.xlane.f32.xlu0 %v6141_v31  ;;  %v5999_v41 = vmul.f32 %v13360_v2, %v13345_v7  ;;  %v6144_v31 = vsel %vm3400_vm6, %v6020_v4, 0.0  ;;  %v6153_v4 = vsel %vm3400_vm6, %v6023_v62, 0.0 }
 0x501   : > { %6130 = vadd.xlane.f32.xlu1 %v6129_v27  ;;  %v12383_v25 = vpop.xlane.xlu0 %5661  ;;  %v6090_v53 = vsel %vm3400_vm6, %v6002_v18, 0.0 }
 0x502   : > { %v12385_v9 = vpop.xlane.xlu1 %5556  ;;  %v6081_v24 = vsel %vm3400_vm6, %v5999_v41, 0.0  ;;  %v6078_v41 = vsel %vm3397_vm5, %v5998_v34, 0.0 }
 0x504   : > { %6076 = vadd.xlane.f32.xlu0 %v6075_v0  ;;  %v8727_v0 = vld [vmem:[#allocation3 + $0x188] sm:$0xff] }
 0x505   : > { %6136 = vadd.xlane.f32.xlu1 %v6135_v50  ;;  %v12393_v37 = vpop.xlane.xlu0 %5667  ;;  %v6025_v2 = vmul.f32 %v8727_v0, %v13345_v7  ;;  %v13366_v50 = vld [vmem:[#allocation39_spill] sm:$0xff]  ;;  %v8730_v0 = vld [vmem:[#allocation3 + $0x180] sm:$0xff] }
 0x506   : > { %v12395_v58 = vpop.xlane.xlu1 %5646  ;;  %v6021_v38 = vmul.f32 %v13366_v50, %v13345_v7 }
 0x507   : > { %v6159_v30 = vsel %vm3397_vm5, %v6025_v2, 0.0  ;;  %v6024_v2 = vmul.f32 %v8730_v0, %v13345_v7 }
 0x508   : > { %6082 = vadd.xlane.f32.xlu0 %v6081_v24  ;;  %v6147_v14 = vsel %vm4149_vm9, %v6021_v38, 0.0 }
 0x509   : > { %6070 = vadd.xlane.f32.xlu1 %v6069_v52  ;;  %v12403_v40 = vpop.xlane.xlu0 %5673  ;;  %v6003_v52 = vmul.f32 %v8728_v11, %v13345_v7  ;;  %v8731_v11 = vld [vmem:[#allocation3 + $0x190] sm:$0x3] }
 0x50a   : > { %v12405_v59 = vpop.xlane.xlu1 %5652 }
 0x50b   : > { %v6093_v21 = vsel %vm4149_vm9, %v6003_v52, 0.0  ;;  %v6026_v52 = vmul.f32 %v8731_v11, %v13345_v7 }
 0x50c   : > { %6151 = vadd.xlane.f32.xlu0 %v6150_v29 }
 0x50d   : > { %6139 = vadd.xlane.f32.xlu1 %v6138_v43  ;;  %v12412_v54 = vpop.xlane.xlu0 %5679  ;;  %v13369_v43 = vld [vmem:[#allocation33_spill] sm:$0xff] }
 0x50e   : > { %v12414_v42 = vpop.xlane.xlu1 %5658  ;;  %v6005_v3 = vmul.f32 %v13369_v43, %v13345_v7  ;;  %v8732_v43 = vld [vmem:[#allocation3 + $0xe0] sm:$0xff] }
 0x510   : > { %6085 = vadd.xlane.f32.xlu0 %v6084_v20  ;;  %v8729_v20 = vld [vmem:[#allocation3 + $0xc8] sm:$0xff]  ;;  %v6099_v34 = vsel %vm3400_vm6, %v6005_v3, 0.0  ;;  %v6004_v3 = vmul.f32 %v8732_v43, %v13345_v7 }
 0x511   : > { %6145 = vadd.xlane.f32.xlu1 %v6144_v31  ;;  %v12421_v27 = vpop.xlane.xlu0 %5685  ;;  %v6001_v33 = vmul.f32 %v8729_v20, %v13345_v7  ;;  %v6028_v31 = vmul.f32 %v13345_v7, %v13371_v15 }
 0x512   : > { %v12423_v26 = vpop.xlane.xlu1 %5664 }
 0x513   : > { %v6168_v50 = vsel %vm3397_vm5, %v6028_v31, 0.0  ;;  %v6096_v31 = vsel %vm3397_vm5, %v6004_v3, 0.0 }
 0x514   : > { %6091 = vadd.xlane.f32.xlu0 %v6090_v53  ;;  %v6087_v53 = vsel %vm3397_vm5, %v6001_v33, 0.0  ;;  %v8733_v33 = vld [vmem:[#allocation3 + $0x198] sm:$0xff]  ;;  %vm6668_vm5 = vcmask 146432  }
 0x515   : > { %6079 = vadd.xlane.f32.xlu1 %v6078_v41  ;;  %v12430_v44 = vpop.xlane.xlu0 %5691  ;;  %v6027_v15 = vmul.f32 %v8733_v33, %v13345_v7 }
 0x516   : > { %13367 = vst [vmem:[#allocation56_spill] sm:$0xff] %v12430_v44  ;;  %v12432_v24 = vpop.xlane.xlu1 %5670 }
 0x517   : > { %v6165_v0 = vsel %vm4149_vm9, %v6027_v15, 0.0 }
 0x518   : > { %6160 = vadd.xlane.f32.xlu0 %v6159_v30  ;;  %v6156_v30 = vsel %vm4149_vm9, %v6024_v2, 0.0  ;;  %v6029_v2 = vmul.f32 %v13345_v7, %v12230_v61  ;;  %vm6642_vm9 = vcmask 1041409  }
 0x519   : > { %6148 = vadd.xlane.f32.xlu1 %v6147_v14  ;;  %v12439_v29 = vpop.xlane.xlu0 %5697 }
 0x51a   : > { %13368 = vst [vmem:[#allocation50_spill] sm:$0xff] %v12439_v29  ;;  %v12441_v6 = vpop.xlane.xlu1 %5676  ;;  %v6171_v11 = vsel %vm3400_vm6, %v6029_v2, 0.0 }
 0x51c   : > { %6094 = vadd.xlane.f32.xlu0 %v6093_v21  ;;  %v6162_v21 = vsel %vm3400_vm6, %v6026_v52, 0.0  ;;  %vm6671_vm6 = vcmask 140288  }
 0x51d   : > { %6154 = vadd.xlane.f32.xlu1 %v6153_v4  ;;  %v12448_v18 = vpop.xlane.xlu0 %5703 }
 0x51e   : > { %13370 = vst [vmem:[#allocation57_spill] sm:$0xff] %v12448_v18  ;;  %v12452_v19 = vpop.xlane.xlu1 %5682 }
 0x520   : > { %6100 = vadd.xlane.f32.xlu0 %v6099_v34 }
 0x521   : > { %6088 = vadd.xlane.f32.xlu1 %v6087_v53  ;;  %v12457_v41 = vpop.xlane.xlu0 %5709 }
 0x522   : > { %13372 = vst [vmem:[#allocation60_spill] sm:$0xff] %v12457_v41  ;;  %v12460_v38 = vpop.xlane.xlu1 %5688 }
 0x523   : > { %13373 = vst [vmem:[#allocation61_spill] sm:$0xff] %v12460_v38 }
 0x524   : > { %6169 = vadd.xlane.f32.xlu0 %v6168_v50 }
 0x525   : > { %6157 = vadd.xlane.f32.xlu1 %v6156_v30  ;;  %v12464_v14 = vpop.xlane.xlu0 %5715 }
 0x526   : > { %v12466_v62 = vpop.xlane.xlu1 %5694 }
 0x527   : > { %13374 = vst [vmem:[#allocation52_spill] sm:$0xff] %v12466_v62 }
 0x529   : > { %6163 = vadd.xlane.f32.xlu1 %v6162_v21  ;;  %v12470_v4 = vpop.xlane.xlu0 %5721 }
 0x52a   : > { %v12472_v20 = vpop.xlane.xlu1 %5700 }
 0x52b   : > { %13375 = vst [vmem:[#allocation53_spill] sm:$0xff] %v12472_v20 }
 0x52d   : > { %6097 = vadd.xlane.f32.xlu1 %v6096_v31  ;;  %v12476_v34 = vpop.xlane.xlu0 %5727 }
 0x52e   : > { %v12478_v53 = vpop.xlane.xlu1 %5706 }
 0x52f   : > { %13376 = vst [vmem:[#allocation62_spill] sm:$0xff] %v12478_v53 }
 0x531   : > { %6166 = vadd.xlane.f32.xlu1 %v6165_v0  ;;  %v12483_v50 = vpop.xlane.xlu0 %5733 }
 0x532   : > { %v12485_v30 = vpop.xlane.xlu1 %5712 }
 0x533   : > { %13377 = vst [vmem:[#allocation63_spill] sm:$0xff] %v12485_v30 }
 0x535   : > { %6172 = vadd.xlane.f32.xlu1 %v6171_v11  ;;  %v12488_v52 = vpop.xlane.xlu0 %5739 }
 0x536   : > { %v12490_v21 = vpop.xlane.xlu1 %5718 }
 0x539   : > { %v12492_v43 = vpop.xlane.xlu0 %5745 }
 0x53a   : > { %v12494_v3 = vpop.xlane.xlu1 %5724 }
 0x53d   : > { %v5752_v33 = vpop.xlane.xlu0 %5751 }
 0x53e   : > { %v12496_v15 = vpop.xlane.xlu1 %5730  ;;  %v5894_v41 = vrot.slane %v5752_v33, 1 }
 0x541   : > { %v5758_v7 = vpop.xlane.xlu0 %5757 }
 0x542   : > { %v12498_v61 = vpop.xlane.xlu1 %5736  ;;  %v5897_v30 = vrot.slane %v5758_v7, 1 }
 0x545   : > { %v5764_v31 = vpop.xlane.xlu0 %5763 }
 0x546   : > { %v12500_v0 = vpop.xlane.xlu1 %5742  ;;  %v5900_v28 = vrot.slane %v5764_v31, 1 }
 0x549   : > { %v5770_v47 = vpop.xlane.xlu0 %5769 }
 0x54a   : > { %v12502_v2 = vpop.xlane.xlu1 %5748 }
 0x54d   : > { %v5776_v11 = vpop.xlane.xlu0 %5775 }
 0x54e   : > { %v5755_v63 = vpop.xlane.xlu1 %5754 }
 0x54f   : > { %v5895_v53 = vrot.slane %v5755_v63, 1 }
 0x551   : > { %v5896_v32 = vsel %vm549_vm3, %v5894_v41, %v5895_v53  ;;  %v5898_v39 = vsel %vm549_vm3, %v5895_v53, %v5897_v30  ;;  %v5782_v18 = vpop.xlane.xlu0 %5781 }
 0x552   : > { %v12507_v29 = vadd.f32 %v5896_v32, %v12306_v13  ;;  %v12510_v20 = vadd.f32 %v5898_v39, %v12354_v60  ;;  %v5761_v8 = vpop.xlane.xlu1 %5760  ;;  %v5904_v39 = vrot.slane %v5770_v47, 1  ;;  %v5907_v60 = vrot.slane %v5776_v11, 1 }
 0x553   : > { %v5899_v38 = vrot.slane %v5761_v8, 1  ;;  %v5910_v31 = vrot.slane %v5782_v18, 1  ;;  %v5835_v47 = vrot.slane %v12395_v58, 1 }
 0x554   : > { %13378 = vst [vmem:[#allocation55_spill] sm:$0xff] %v12507_v29 }
 0x555   : > { %v5901_v44 = vsel %vm549_vm3, %v5899_v38, %v5900_v28  ;;  %v6032_v62 = vpop.xlane.xlu0 %6031 }
 0x556   : > { %v12514_v33 = vadd.f32 %v5901_v44, %v12318_v12  ;;  %v5767_v63 = vpop.xlane.xlu1 %5766 }
 0x557   : > { %v5902_v41 = vrot.slane %v5767_v63, 1 }
 0x559   : > { %v5903_v53 = vsel %vm549_vm3, %v5900_v28, %v5902_v41  ;;  %v6038_v30 = vpop.xlane.xlu0 %6037 }
 0x55a   : > { %v12518_v32 = vadd.f32 %v5903_v53, %v12365_v55  ;;  %v5773_v13 = vpop.xlane.xlu1 %5772  ;;  %v5588_v55 = vadd.f32 %v12340_v48, %v12270_v36  ;;  %v5839_v48 = vrot.slane %v12405_v59, 1 }
 0x55b   : > { %v5905_v7 = vrot.slane %v5773_v13, 1  ;;  %v5837_v13 = vrot.slane %v12362_v17, 1  ;;  %v6225_v17 = vrot.slane %v6038_v30, 2 }
 0x55d   : > { %v5906_v8 = vsel %vm549_vm3, %v5904_v39, %v5905_v7  ;;  %v5908_v38 = vsel %vm549_vm3, %v5905_v7, %v5907_v60  ;;  %v6044_v29 = vpop.xlane.xlu0 %6043  ;;  %v5589_v39 = vadd.f32 %v12385_v9, %v12251_v23  ;;  %v5838_v36 = vsel %vm549_vm3, %v5835_v47, %v5837_v13  ;;  %v13380_v23 = vld [vmem:[#allocation42_spill] sm:$0xff] }
 0x55e   : > { %v12523_v12 = vadd.f32 %v5906_v8, %v12330_v35  ;;  %v12526_v44 = vadd.f32 %v5908_v38, %v12376_v16  ;;  %v5779_v28 = vpop.xlane.xlu1 %5778  ;;  %v5834_v35 = vrot.slane %v12351_v10, 1  ;;  %v5840_v10 = vrot.slane %v12373_v1, 1 }
 0x55f   : > { %v5909_v63 = vrot.slane %v5779_v28, 1  ;;  %v6222_v28 = vrot.slane %v6032_v62, 2  ;;  %v5947_v9 = vadd.f32 %v5838_v36, %v13380_v23  ;;  %v6228_v62 = vrot.slane %v6044_v29, 2 }
 0x560   : > { %v5836_v60 = vsel %vm549_vm3, %v5834_v35, %v5835_v47  ;;  %v5842_v47 = vrot.slane %v12414_v42, 1  ;;  %v5845_v36 = vrot.slane %v12423_v26, 1 }
 0x561   : > { %v5911_v18 = vsel %vm549_vm3, %v5909_v63, %v5910_v31  ;;  %v12532_v11 = vpop.xlane.xlu0 %6049 }
 0x562   : > { %v12534_v41 = vadd.f32 %v5911_v18, %v5588_v55  ;;  %v5785_v53 = vpop.xlane.xlu1 %5784  ;;  %v13379_v55 = vld [vmem:[#allocation41_spill] sm:$0xff] }
 0x563   : > { %v5912_v16 = vrot.slane %v5785_v53, 1  ;;  %v5946_v18 = vadd.f32 %v5836_v60, %v13379_v55  ;;  %v5841_v53 = vsel %vm549_vm3, %v5839_v48, %v5840_v10  ;;  %v5843_v60 = vsel %vm549_vm3, %v5840_v10, %v5842_v47  ;;  %v13382_v55 = vld [vmem:[#allocation46_spill] sm:$0xff] }
 0x565   : > { %v5913_v58 = vsel %vm549_vm3, %v5910_v31, %v5912_v16  ;;  %v6056_v7 = vpop.xlane.xlu0 %6055 }
 0x566   : > { %v12544_v8 = vadd.f32 %v5913_v58, %v5589_v39  ;;  %v6035_v38 = vpop.xlane.xlu1 %6034  ;;  %v13381_v39 = vld [vmem:[#allocation45_spill] sm:$0xff]  ;;  %v6235_v47 = vrot.slane %v6056_v7, 2  ;;  %v5874_v7 = vrot.slane %v12464_v14, 1 }
 0x567   : > { %v6223_v63 = vrot.slane %v6035_v38, 2  ;;  %v5948_v58 = vadd.f32 %v5841_v53, %v13381_v39 }
 0x569   : > { %v6224_v59 = vsel %vm1219_vm4, %v6222_v28, %v6223_v63  ;;  %v6226_v31 = vsel %vm1219_vm4, %v6223_v63, %v6225_v17  ;;  %v12553_v35 = vpop.xlane.xlu0 %6061  ;;  %v5847_v17 = vrot.slane %v12393_v37, 1 }
 0x56a   : > { %v6334_v13 = vadd.f32 %v6224_v59, %v5946_v18  ;;  %v6335_v16 = vadd.f32 %v6226_v31, %v5947_v9  ;;  %v6041_v1 = vpop.xlane.xlu1 %6040  ;;  %v5949_v18 = vadd.f32 %v5843_v60, %v13382_v55  ;;  %v13383_v31 = vld [vmem:[#allocation51_spill] sm:$0xff] }
 0x56b   : > { %v6227_v30 = vrot.slane %v6041_v1, 2  ;;  %v5848_v29 = vsel %vm549_vm3, %v5845_v36, %v5847_v17 }
 0x56c   : > { %6399 = vperm.xlu0 %8678, %v6334_v13   ;;  %6402 = vperm.xlu1 %8679, %v6335_v16   ;;  %v5951_v13 = vadd.f32 %v5848_v29, %v13383_v31  ;;  %v5880_v31 = vrot.slane %v12476_v34, 1 }
 0x56d   : > { %v6229_v42 = vsel %vm1219_vm4, %v6227_v30, %v6228_v62  ;;  %v6104_v48 = vpop.xlane.xlu0 %6103 }
 0x56e   : > { %v6336_v38 = vadd.f32 %v6229_v42, %v5948_v58  ;;  %v6047_v28 = vpop.xlane.xlu1 %6046  ;;  %v6262_v17 = vrot.slane %v6104_v48, 2 }
 0x56f   : > { %v6230_v63 = vrot.slane %v6047_v28, 2  ;;  %v5877_v28 = vrot.slane %v12470_v4, 1 }
 0x570   : > { %6405 = vperm.xlu1 %8679, %v6336_v38  }
 0x571   : > { %v6231_v23 = vsel %vm1219_vm4, %v6228_v62, %v6230_v63  ;;  %v6110_v10 = vpop.xlane.xlu0 %6109  ;;  %v5875_v62 = vrot.slane %v12490_v21, 1  ;;  %v5879_v21 = vrot.slane %v12494_v3, 1  ;;  %v5885_v3 = vrot.slane %v12498_v61, 1 }
 0x572   : > { %v6337_v9 = vadd.f32 %v6231_v23, %v5949_v18  ;;  %v12565_v53 = vpop.xlane.xlu1 %6052  ;;  %v6265_v29 = vrot.slane %v6110_v10, 2 }
 0x573   : > { %v6233_v59 = vrot.slane %v12565_v53, 2  ;;  %v5876_v60 = vsel %vm549_vm3, %v5874_v7, %v5875_v62  ;;  %v5878_v18 = vsel %vm549_vm3, %v5875_v62, %v5877_v28  ;;  %v5852_v28 = vrot.slane %v12441_v6, 1 }
 0x574   : > { %6408 = vperm.xlu1 %8679, %v6337_v9   ;;  %v5962_v55 = vadd.f32 %v5876_v60, %v12257_v22  ;;  %v5963_v48 = vadd.f32 %v5878_v18, %v12309_v46  ;;  %v5881_v22 = vsel %vm549_vm3, %v5879_v21, %v5880_v31  ;;  %v5887_v60 = vrot.slane %v12488_v52, 1 }
 0x575   : > { %v6236_v37 = vsel %vm1219_vm4, %v6233_v59, %v6235_v47  ;;  %v6116_v16 = vpop.xlane.xlu0 %6115  ;;  %v5964_v46 = vadd.f32 %v5881_v22, %v12268_v45  ;;  %v13385_v22 = vld [vmem:[#allocation21_spill] sm:$0xff] }
 0x576   : > { %v6339_v1 = vadd.f32 %v6236_v37, %v5951_v13  ;;  %v12572_v30 = vpop.xlane.xlu1 %6058  ;;  %v5882_v37 = vrot.slane %v12496_v15, 1  ;;  %v6268_v10 = vrot.slane %v6116_v16, 2  ;;  %v5888_v15 = vsel %vm549_vm3, %v5885_v3, %v5887_v60 }
 0x577   : > { %v5844_v16 = vrot.slane %v12383_v25, 1  ;;  %v5967_v25 = vadd.f32 %v5888_v15, %v12333_v5 }
 0x578   : > { %6414 = vperm.xlu0 %8678, %v6339_v1  }
 0x579   : > { %v12575_v39 = vpop.xlane.xlu0 %6121  ;;  %v5846_v45 = vsel %vm549_vm3, %v5844_v16, %v5845_v36 }
 0x57a   : > { %v12577_v58 = vpop.xlane.xlu1 %6064  ;;  %v6272_v53 = vrot.slane %v12575_v39, 2 }
 0x57b   : > { %v6240_v18 = vrot.slane %v12577_v58, 2  ;;  %v6238_v58 = vrot.slane %v12553_v35, 2  ;;  %v5849_v35 = vrot.slane %v12432_v24, 1  ;;  %v6237_v24 = vrot.slane %v12572_v30, 2 }
 0x57d   : > { %v6128_v42 = vpop.xlane.xlu0 %6127 }
 0x57e   : > { %v6107_v38 = vpop.xlane.xlu1 %6106  ;;  %v6275_v21 = vrot.slane %v6128_v42, 2 }
 0x57f   : > { %v6263_v63 = vrot.slane %v6107_v38, 2 }
 0x581   : > { %v6264_v23 = vsel %vm1219_vm4, %v6262_v17, %v6263_v63  ;;  %v12586_v9 = vpop.xlane.xlu0 %6133  ;;  %v6266_v13 = vsel %vm1219_vm4, %v6263_v63, %v6265_v29  ;;  %v5883_v17 = vsel %vm549_vm3, %v5880_v31, %v5882_v37  ;;  %v5850_v63 = vrot.slane %v12403_v40, 1 }
 0x582   : > { %v6350_v14 = vadd.f32 %v6264_v23, %v5962_v55  ;;  %v6113_v47 = vpop.xlane.xlu1 %6112  ;;  %v6351_v62 = vadd.f32 %v6266_v13, %v5963_v48  ;;  %v5892_v40 = vrot.slane %v12502_v2, 1  ;;  %v6241_v2 = vsel %vm1219_vm4, %v6238_v58, %v6240_v18 }
 0x583   : > { %v6267_v4 = vrot.slane %v6113_v47, 2  ;;  %v5853_v23 = vsel %vm549_vm3, %v5850_v63, %v5852_v28  ;;  %v6232_v47 = vrot.slane %v12532_v11, 2  ;;  %v13384_v11 = vld [vmem:[#allocation49_spill] sm:$0xff]  ;;  %v5851_v39 = vsel %vm549_vm3, %v5849_v35, %v5850_v63 }
 0x584   : > { %6447 = vperm.xlu1 %8679, %v6350_v14   ;;  %v5965_v14 = vadd.f32 %v5883_v17, %v12321_v49  ;;  %v5890_v49 = vrot.slane %v12492_v43, 1  ;;  %v5950_v48 = vadd.f32 %v5846_v45, %v13384_v11  ;;  %v5953_v37 = vadd.f32 %v5853_v23, %v13385_v22 }
 0x585   : > { %v12594_v1 = vpop.xlane.xlu0 %6067  ;;  %v6269_v34 = vsel %vm1219_vm4, %v6267_v4, %v6268_v10  ;;  %v5884_v4 = vrot.slane %v12483_v50, 1  ;;  %v6234_v5 = vsel %vm1219_vm4, %v6232_v47, %v6233_v59  ;;  %v5857_v59 = vrot.slane %v12421_v27, 1 }
 0x586   : > { %v6119_v7 = vpop.xlane.xlu1 %6118  ;;  %v6352_v55 = vadd.f32 %v6269_v34, %v5964_v46  ;;  %v5893_v43 = vsel %vm549_vm3, %v5890_v49, %v5892_v40  ;;  %v6341_v60 = vadd.f32 %v6241_v2, %v5953_v37  ;;  %v5889_v17 = vrot.slane %v12500_v0, 1 }
 0x587   : > { %v6270_v38 = vrot.slane %v6119_v7, 2  ;;  %v5886_v50 = vsel %vm549_vm3, %v5884_v4, %v5885_v3  ;;  %v6338_v7 = vadd.f32 %v6234_v5, %v5950_v48  ;;  %v5969_v46 = vadd.f32 %v5893_v43, %v12343_v51  ;;  %v13389_v4 = vld [vmem:[#allocation56_spill] sm:$0xff] }
 0x588   : > { %6450 = vperm.xlu1 %8679, %v6351_v62   ;;  %v5966_v3 = vadd.f32 %v5886_v50, %v12282_v57  ;;  %v5891_v0 = vsel %vm549_vm3, %v5889_v17, %v5890_v49  ;;  %v5854_v47 = vrot.slane %v12412_v54, 1  ;;  %v5860_v49 = vrot.slane %v13389_v4, 1  ;;  %v13391_v50 = vld [vmem:[#allocation61_spill] sm:$0xff]  ;;  %v13399_v4 = vld [vmem:[#allocation48_spill] sm:$0xff] }
 0x589   : > { %v12602_v61 = vpop.xlane.xlu0 %6073  ;;  %v6271_v6 = vsel %vm1219_vm4, %v6268_v10, %v6270_v38  ;;  %v5855_v10 = vrot.slane %v12452_v19, 1  ;;  %v6278_v38 = vrot.slane %v12586_v9, 2 }
 0x58a   : > { %v6125_v52 = vpop.xlane.xlu1 %6124  ;;  %v6353_v26 = vadd.f32 %v6271_v6, %v5965_v14  ;;  %v6245_v57 = vrot.slane %v12602_v61, 2 }
 0x58b   : > { %v6273_v29 = vrot.slane %v6125_v52, 2  ;;  %v5858_v27 = vsel %vm549_vm3, %v5855_v10, %v5857_v59  ;;  %v6239_v52 = vsel %vm1219_vm4, %v6237_v24, %v6238_v58  ;;  %v5968_v58 = vadd.f32 %v5891_v0, %v12294_v56  ;;  %v13390_v56 = vld [vmem:[#allocation22_spill] sm:$0xff]  ;;  %v13392_v24 = vld [vmem:[#allocation47_spill] sm:$0xff] }
 0x58c   : > { %6453 = vperm.xlu1 %8679, %v6352_v55  }
 0x58d   : > { %v6276_v42 = vsel %vm1219_vm4, %v6273_v29, %v6275_v21  ;;  %v12618_v31 = vpop.xlane.xlu0 %6142  ;;  %v6274_v28 = vsel %vm1219_vm4, %v6272_v53, %v6273_v29  ;;  %v13386_v21 = vld [vmem:[#allocation20_spill] sm:$0xff]  ;;  %v13387_v29 = vld [vmem:[#allocation23_spill] sm:$0xff] }
 0x58e   : > { %v6355_v13 = vadd.f32 %v6276_v42, %v5967_v25  ;;  %v6131_v36 = vpop.xlane.xlu1 %6130  ;;  %v6354_v16 = vadd.f32 %v6274_v28, %v5966_v3  ;;  %v5952_v6 = vadd.f32 %v5851_v39, %v13386_v21  ;;  %v5955_v63 = vadd.f32 %v5858_v27, %v13387_v29  ;;  %v13393_v39 = vld [vmem:[#allocation55_spill] sm:$0xff]  ;;  %v13397_v29 = vld [vmem:[#allocation57_spill] sm:$0xff] }
 0x58f   : > { %v6277_v18 = vrot.slane %v6131_v36, 2  ;;  %v5856_v42 = vsel %vm549_vm3, %v5854_v47, %v5855_v10  ;;  %v6242_v36 = vrot.slane %v12594_v1, 2  ;;  %v6283_v48 = vrot.slane %v12618_v31, 2 }
 0x590   : > { %6456 = vperm.xlu1 %8679, %v6353_v26   ;;  %6462 = vperm.xlu0 %8678, %v6355_v13   ;;  %v6340_v14 = vadd.f32 %v6239_v52, %v5952_v6  ;;  %v13388_v26 = vld [vmem:[#allocation52_spill] sm:$0xff]  ;;  %v5954_v37 = vadd.f32 %v5856_v42, %v13390_v56  ;;  %v5859_v10 = vrot.slane %v13391_v50, 1 }
 0x591   : > { %v12633_v62 = vpop.xlane.xlu0 %6076  ;;  %v6279_v61 = vsel %vm1219_vm4, %v6277_v18, %v6278_v38  ;;  %v5862_v13 = vrot.slane %v13388_v26, 1 }
 0x592   : > { %v6137_v34 = vpop.xlane.xlu1 %6136  ;;  %v6356_v5 = vadd.f32 %v6279_v61, %v5968_v58  ;;  %v6247_v3 = vrot.slane %v12633_v62, 2  ;;  %v13396_v62 = vld [vmem:[#allocation50_spill] sm:$0xff] }
 0x593   : > { %v6280_v19 = vrot.slane %v6137_v34, 2  ;;  %v5863_v43 = vsel %vm549_vm3, %v5860_v49, %v5862_v13  ;;  %v5864_v6 = vrot.slane %v13396_v62, 1  ;;  %v13398_v13 = vld [vmem:[#allocation43_spill] sm:$0xff] }
 0x594   : > { %6411 = vperm.xlu1 %8679, %v6338_v7   ;;  %6420 = vperm.xlu0 %8678, %v6341_v60  }
 0x595   : > { %v6281_v15 = vsel %vm1219_vm4, %v6278_v38, %v6280_v19  ;;  %v6083_v30 = vpop.xlane.xlu0 %6082  ;;  %v5957_v38 = vadd.f32 %v5863_v43, %v13392_v24  ;;  %v5861_v19 = vsel %vm549_vm3, %v5859_v10, %v5860_v49 }
 0x596   : > { %v6357_v9 = vadd.f32 %v6281_v15, %v5969_v46  ;;  %v6071_v55 = vpop.xlane.xlu1 %6070  ;;  %v6250_v60 = vrot.slane %v6083_v30, 2 }
 0x597   : > { %v6243_v51 = vrot.slane %v6071_v55, 2  ;;  %v13395_v55 = vld [vmem:[#allocation53_spill] sm:$0xff] }
 0x598   : > { %6459 = vperm.xlu1 %8679, %v6354_v16   ;;  %6468 = vperm.xlu0 %8678, %v6357_v9   ;;  %v13394_v16 = vld [vmem:[#allocation40_spill] sm:$0xff]  ;;  %v5865_v52 = vrot.slane %v13395_v55, 1 }
 0x599   : > { %v6246_v45 = vsel %vm1219_vm4, %v6243_v51, %v6245_v57  ;;  %v6152_v23 = vpop.xlane.xlu0 %6151  ;;  %v6244_v54 = vsel %vm1219_vm4, %v6242_v36, %v6243_v51  ;;  %v5956_v9 = vadd.f32 %v5861_v19, %v13394_v16 }
 0x59a   : > { %v6343_v25 = vadd.f32 %v6246_v45, %v5955_v63  ;;  %v6140_v40 = vpop.xlane.xlu1 %6139  ;;  %v6342_v53 = vadd.f32 %v6244_v54, %v5954_v37  ;;  %v6288_v57 = vrot.slane %v6152_v23, 2  ;;  %v5867_v63 = vrot.slane %v13397_v29, 1  ;;  %v13401_v37 = vld [vmem:[#allocation63_spill] sm:$0xff] }
 0x59b   : > { %v6282_v35 = vrot.slane %v6140_v40, 2  ;;  %v5872_v50 = vrot.slane %v13401_v37, 1 }
 0x59c   : > { %6417 = vperm.xlu1 %8679, %v6340_v14   ;;  %6426 = vperm.xlu0 %8678, %v6343_v25   ;;  %v5866_v14 = vsel %vm549_vm3, %v5864_v6, %v5865_v52  ;;  %v5868_v25 = vsel %vm549_vm3, %v5865_v52, %v5867_v63 }
 0x59d   : > { %v6086_v11 = vpop.xlane.xlu0 %6085  ;;  %v6284_v31 = vsel %vm1219_vm4, %v6282_v35, %v6283_v48  ;;  %v5958_v36 = vadd.f32 %v5866_v14, %v13398_v13  ;;  %v5959_v49 = vadd.f32 %v5868_v25, %v13399_v4 }
 0x59e   : > { %v6146_v2 = vpop.xlane.xlu1 %6145  ;;  %v6358_v27 = vadd.f32 %v6284_v31, %v13393_v39  ;;  %v6252_v58 = vrot.slane %v6086_v11, 2  ;;  %v13400_v11 = vld [vmem:[#allocation62_spill] sm:$0xff] }
 0x59f   : > { %v6285_v22 = vrot.slane %v6146_v2, 2  ;;  %v5869_v56 = vrot.slane %v13400_v11, 1 }
 0x5a0   : > { %6465 = vperm.xlu1 %8679, %v6356_v5  }
 0x5a1   : > { %v6286_v1 = vsel %vm1219_vm4, %v6283_v48, %v6285_v22  ;;  %v6092_v28 = vpop.xlane.xlu0 %6091 }
 0x5a2   : > { %v6359_v59 = vadd.f32 %v6286_v1, %v12510_v20  ;;  %v6080_v7 = vpop.xlane.xlu1 %6079  ;;  %v6255_v42 = vrot.slane %v6092_v28, 2 }
 0x5a3   : > { %v6248_v34 = vrot.slane %v6080_v7, 2 }
 0x5a4   : > { %6423 = vperm.xlu1 %8679, %v6342_v53   ;;  %6474 = vperm.xlu0 %8678, %v6359_v59   ;;  %v13402_v59 = vld [vmem:[#allocation60_spill] sm:$0xff] }
 0x5a5   : > { %v6251_v46 = vsel %vm1219_vm4, %v6248_v34, %v6250_v60  ;;  %v6249_v15 = vsel %vm1219_vm4, %v6247_v3, %v6248_v34  ;;  %v6161_v51 = vpop.xlane.xlu0 %6160  ;;  %v5870_v7 = vrot.slane %v13402_v59, 1 }
 0x5a6   : > { %v6345_v17 = vadd.f32 %v6251_v46, %v5957_v38  ;;  %v6149_v20 = vpop.xlane.xlu1 %6148  ;;  %v6344_v18 = vadd.f32 %v6249_v15, %v5956_v9  ;;  %v6293_v22 = vrot.slane %v6161_v51, 2 }
 0x5a7   : > { %v6287_v30 = vrot.slane %v6149_v20, 2  ;;  %v5871_v31 = vsel %vm549_vm3, %v5869_v56, %v5870_v7  ;;  %v5873_v34 = vsel %vm549_vm3, %v5870_v7, %v5872_v50 }
 0x5a8   : > { %6471 = vperm.xlu1 %8679, %v6358_v27   ;;  %6432 = vperm.xlu0 %8678, %v6345_v17   ;;  %v13403_v27 = vld [vmem:[#allocation44_spill] sm:$0xff]  ;;  %v13404_v17 = vld [vmem:[#allocation54_spill] sm:$0xff] }
 0x5a9   : > { %v6289_v0 = vsel %vm1219_vm4, %v6287_v30, %v6288_v57  ;;  %v6095_v5 = vpop.xlane.xlu0 %6094  ;;  %v5961_v20 = vadd.f32 %v5873_v34, %v13404_v17 }
 0x5aa   : > { %v6155_v21 = vpop.xlane.xlu1 %6154  ;;  %v6360_v47 = vadd.f32 %v6289_v0, %v12514_v33  ;;  %v6257_v3 = vrot.slane %v6095_v5, 2 }
 0x5ab   : > { %v6290_v45 = vrot.slane %v6155_v21, 2 }
 0x5ac   : > { %6429 = vperm.xlu1 %8679, %v6344_v18   ;;  %v13405_v18 = vmov 0.0  }
 0x5ad   : > { %v6291_v40 = vsel %vm1219_vm4, %v6288_v57, %v6290_v45  ;;  %v6101_v43 = vpop.xlane.xlu0 %6100  ;;  %6669 = vst.msk [vmem:[#allocation4] sm:$0xff] %vm6668_vm5, %v13405_v18  ;;  %6670 = vst.msk [vmem:[#allocation4 + $0x8] sm:$0xff] %vm6668_vm5, %v13405_v18 }
 0x5ae   : > { %v6361_v23 = vadd.f32 %v6291_v40, %v12518_v32  ;;  %v6089_v61 = vpop.xlane.xlu1 %6088  ;;  %v6260_v46 = vrot.slane %v6101_v43, 2  ;;  %6672 = vst.msk [vmem:[#allocation4 + $0x10] sm:$0x3] %vm6671_vm6, %v13405_v18 }
 0x5af   : > { %v6253_v26 = vrot.slane %v6089_v61, 2 }
 0x5b0   : > { %6480 = vperm.xlu0 %8678, %v6361_v23   ;;  %6477 = vperm.xlu1 %8679, %v6360_v47  }
 0x5b1   : > { %v6254_v2 = vsel %vm1219_vm4, %v6252_v58, %v6253_v26  ;;  %v6256_v48 = vsel %vm1219_vm4, %v6253_v26, %v6255_v42  ;;  %v6170_v19 = vpop.xlane.xlu0 %6169 }
 0x5b2   : > { %v6346_v54 = vadd.f32 %v6254_v2, %v5958_v36  ;;  %v6347_v35 = vadd.f32 %v6256_v48, %v5959_v49  ;;  %v6158_v33 = vpop.xlane.xlu1 %6157  ;;  %v6298_v16 = vrot.slane %v6170_v19, 2  ;;  %v13406_v36 = vlaneseq }
 0x5b3   : > { %v6292_v32 = vrot.slane %v6158_v33, 2  ;;  %v13407_v33 = vld [vmem:[#allocation37_spill] sm:$0xff] }
 0x5b4   : > { %6435 = vperm.xlu1 %8679, %v6346_v54   ;;  %6438 = vperm.xlu0 %8678, %v6347_v35   ;;  %v6495_v4 = vand.u32 127, %v13406_v36 }
 0x5b5   : > { %v6294_v10 = vsel %vm1219_vm4, %v6292_v32, %v6293_v22 }
 0x5b6   : > { %v6362_v1 = vadd.f32 %v6294_v10, %v12523_v12  ;;  %v6164_v53 = vpop.xlane.xlu1 %6163  ;;  %v5960_v12 = vadd.f32 %v5871_v31, %v13403_v27  ;;  %v6500_v5 = vadd.s32 4294967288, %v6495_v4  ;;  %v6678_v2 = vadd.s32 4294967287, %v6495_v4 }
 0x5b7   : > { %v6295_v60 = vrot.slane %v6164_v53, 2  ;;  %v6673_v48 = vadd.s32 4294967295, %v6495_v4  ;;  %v12734_v11 = vsub.s32 %v6495_v4, %v13407_v33 }
 0x5b8   : > { %6483 = vperm.xlu1 %8679, %v6362_v1   ;;  %v12731_v32 = vsub.s32 %v6678_v2, %v13407_v33 }
 0x5b9   : > { %v6296_v24 = vsel %vm1219_vm4, %v6293_v22, %v6295_v60  ;;  %v12728_v22 = vsub.s32 %v6500_v5, %v13407_v33  ;;  %v12737_v56 = vsub.s32 %v6673_v48, %v13407_v33 }
 0x5ba   : > { %v6363_v38 = vadd.f32 %v6296_v24, %v12526_v44  ;;  %v6098_v28 = vpop.xlane.xlu1 %6097 }
 0x5bb   : > { %v6258_v39 = vrot.slane %v6098_v28, 2 }
 0x5bc   : > { %6486 = vperm.xlu0 %8678, %v6363_v38  }
 0x5bd   : > { %v6259_v15 = vsel %vm1219_vm4, %v6257_v3, %v6258_v39  ;;  %v6261_v30 = vsel %vm1219_vm4, %v6258_v39, %v6260_v46 }
 0x5be   : > { %v6348_v9 = vadd.f32 %v6259_v15, %v5960_v12  ;;  %v6349_v55 = vadd.f32 %v6261_v30, %v5961_v20  ;;  %v6167_v52 = vpop.xlane.xlu1 %6166 }
 0x5bf   : > { %v6297_v57 = vrot.slane %v6167_v52, 2 }
 0x5c0   : > { %6441 = vperm.xlu1 %8679, %v6348_v9   ;;  %6444 = vperm.xlu0 %8678, %v6349_v55  }
 0x5c1   : > { %v6299_v44 = vsel %vm1219_vm4, %v6297_v57, %v6298_v16 }
 0x5c2   : > { %v6364_v51 = vadd.f32 %v6299_v44, %v12534_v41  ;;  %v6173_v21 = vpop.xlane.xlu1 %6172 }
 0x5c3   : > { %v6300_v62 = vrot.slane %v6173_v21, 2 }
 0x5c4   : > { %6489 = vperm.xlu1 %8679, %v6364_v51  }
 0x5c5   : > { %v6301_v6 = vsel %vm1219_vm4, %v6298_v16, %v6300_v62 }
 0x5c6   : > { %v6365_v29 = vadd.f32 %v6301_v6, %v12544_v8 }
 0x5c8   : > { %6492 = vperm.xlu0 %8678, %v6365_v29  }
 0x5eb   : > { %v6403_v63 = vpop.permute.xlu1 %6402  ;;  %v6400_v40 = vpop.permute.xlu0 %6399 }
 0x5ec   : > { %v6504_v1 = vrot.slane %v6403_v63, %v12728_v22  ;;  %v6682_v53 = vrot.slane %v6403_v63, %v12731_v32  ;;  %v6499_v59 = vrot.slane %v6400_v40, %v12734_v11  ;;  %v6677_v7 = vrot.slane %v6400_v40, %v12737_v56 }
 0x5ee   : > { %v6506_v46 = vsel %vm6505_vm7, %v6504_v1, %v6499_v59  ;;  %v6684_v39 = vsel %vm6683_vm8, %v6682_v53, %v6677_v7 }
 0x5ef   : > { %v6406_v0 = vpop.permute.xlu1 %6405 }
 0x5f0   : > { %v6510_v31 = vrot.slane %v6406_v0, %v12734_v11  ;;  %v6688_v34 = vrot.slane %v6406_v0, %v12737_v56 }
 0x5f3   : > { %v6409_v45 = vpop.permute.xlu1 %6408 }
 0x5f4   : > { %v6514_v10 = vrot.slane %v6409_v45, %v12728_v22  ;;  %v6692_v43 = vrot.slane %v6409_v45, %v12731_v32 }
 0x5f6   : > { %v6515_v38 = vsel %vm6505_vm7, %v6514_v10, %v6510_v31  ;;  %v6693_v28 = vsel %vm6683_vm8, %v6692_v43, %v6688_v34 }
 0x5f7   : > { %v6415_v41 = vpop.permute.xlu0 %6414  ;;  %v6643_v9 = vsel %vm6642_vm9, %v6515_v38, %v6506_v46  ;;  %v6820_v55 = vsel %vm6642_vm9, %v6693_v28, %v6684_v39 }
 0x5f8   : > { %v6523_v52 = vrot.slane %v6415_v41, %v12728_v22  ;;  %v6701_v57 = vrot.slane %v6415_v41, %v12731_v32 }
 0x603   : > { %v6448_v14 = vpop.permute.xlu1 %6447 }
 0x604   : > { %v6573_v20 = vrot.slane %v6448_v14, %v12734_v11  ;;  %v6751_v15 = vrot.slane %v6448_v14, %v12737_v56 }
 0x607   : > { %v6451_v25 = vpop.permute.xlu1 %6450 }
 0x608   : > { %v6577_v19 = vrot.slane %v6451_v25, %v12728_v22  ;;  %v6755_v3 = vrot.slane %v6451_v25, %v12731_v32 }
 0x60a   : > { %v12778_v18 = vsel %vm6505_vm7, %v6577_v19, %v6573_v20  ;;  %v12781_v51 = vsel %vm6683_vm8, %v6755_v3, %v6751_v15 }
 0x60b   : > { %v12706_v47 = vpop.permute.xlu1 %6453 }
 0x60c   : > { %v6582_v21 = vrot.slane %v12706_v47, %v12734_v11  ;;  %v6760_v62 = vrot.slane %v12706_v47, %v12737_v56 }
 0x60f   : > { %v12708_v23 = vpop.permute.xlu1 %6456  ;;  %v12710_v61 = vpop.permute.xlu0 %6462 }
 0x610   : > { %v6586_v30 = vrot.slane %v12708_v23, %v12728_v22  ;;  %v6764_v16 = vrot.slane %v12708_v23, %v12731_v32  ;;  %v6595_v25 = vrot.slane %v12710_v61, %v12728_v22  ;;  %v6773_v40 = vrot.slane %v12710_v61, %v12731_v32 }
 0x612   : > { %v12794_v45 = vsel %vm6505_vm7, %v6586_v30, %v6582_v21  ;;  %v12797_v14 = vsel %vm6683_vm8, %v6764_v16, %v6760_v62 }
 0x613   : > { %v6412_v58 = vpop.permute.xlu1 %6411  ;;  %v12712_v42 = vpop.permute.xlu0 %6420 }
 0x614   : > { %v6519_v27 = vrot.slane %v6412_v58, %v12734_v11  ;;  %v6697_v12 = vrot.slane %v6412_v58, %v12737_v56  ;;  %v6532_v47 = vrot.slane %v12712_v42, %v12728_v22  ;;  %v6710_v41 = vrot.slane %v12712_v42, %v12731_v32 }
 0x616   : > { %v6524_v6 = vsel %vm6505_vm7, %v6523_v52, %v6519_v27  ;;  %v6702_v29 = vsel %vm6683_vm8, %v6701_v57, %v6697_v12 }
 0x617   : > { %v12714_v26 = vpop.permute.xlu1 %6459  ;;  %v12718_v13 = vpop.permute.xlu0 %6468  ;;  %v6645_v36 = vsel %vm6644_vm15, %v6524_v6, %v6643_v9  ;;  %v6821_v4 = vsel %vm6644_vm15, %v6702_v29, %v6820_v55 }
 0x618   : > { %v6591_v63 = vrot.slane %v12714_v26, %v12734_v11  ;;  %v6769_v0 = vrot.slane %v12714_v26, %v12737_v56  ;;  %v6782_v48 = vrot.slane %v12718_v13, %v12731_v32 }
 0x61a   : > { %v12818_v2 = vsel %vm6505_vm7, %v6595_v25, %v6591_v63  ;;  %v12821_v42 = vsel %vm6683_vm8, %v6773_v40, %v6769_v0 }
 0x61b   : > { %v12716_v8 = vpop.permute.xlu1 %6417  ;;  %v12723_v54 = vpop.permute.xlu0 %6426 }
 0x61c   : > { %v6528_v23 = vrot.slane %v12716_v8, %v12734_v11  ;;  %v6706_v58 = vrot.slane %v12716_v8, %v12737_v56  ;;  %v6604_v8 = vrot.slane %v12718_v13, %v12728_v22  ;;  %v6541_v10 = vrot.slane %v12723_v54, %v12728_v22 }
 0x61e   : > { %v6533_v53 = vsel %vm6505_vm7, %v6532_v47, %v6528_v23  ;;  %v6711_v59 = vsel %vm6683_vm8, %v6710_v41, %v6706_v58 }
 0x61f   : > { %v12721_v49 = vpop.permute.xlu1 %6465  ;;  %v6647_v39 = vsel %vm6646_vm0, %v6533_v53, %v6645_v36  ;;  %v6822_v27 = vsel %vm6646_vm0, %v6711_v59, %v6821_v4 }
 0x620   : > { %v6600_v13 = vrot.slane %v12721_v49, %v12734_v11  ;;  %v6778_v7 = vrot.slane %v12721_v49, %v12737_v56 }
 0x622   : > { %v6783_v15 = vsel %vm6683_vm8, %v6782_v48, %v6778_v7 }
 0x623   : > { %v12725_v35 = vpop.permute.xlu1 %6423  ;;  %v12739_v37 = vpop.permute.xlu0 %6474 }
 0x624   : > { %v6537_v61 = vrot.slane %v12725_v35, %v12734_v11  ;;  %v6715_v5 = vrot.slane %v12725_v35, %v12737_v56  ;;  %v6719_v35 = vrot.slane %v12723_v54, %v12731_v32  ;;  %v6613_v30 = vrot.slane %v12739_v37, %v12728_v22 }
 0x625   : > { %v6791_v16 = vrot.slane %v12739_v37, %v12731_v32 }
 0x626   : > { %v6542_v54 = vsel %vm6505_vm7, %v6541_v10, %v6537_v61  ;;  %v6720_v31 = vsel %vm6683_vm8, %v6719_v35, %v6715_v5 }
 0x627   : > { %v12741_v50 = vpop.permute.xlu1 %6471  ;;  %v12753_v24 = vpop.permute.xlu0 %6432  ;;  %v6649_v9 = vsel %vm6648_vm1, %v6542_v54, %v6647_v39  ;;  %v6823_v55 = vsel %vm6648_vm1, %v6720_v31, %v6822_v27 }
 0x628   : > { %v6728_v34 = vrot.slane %v12753_v24, %v12731_v32  ;;  %v6609_v52 = vrot.slane %v12741_v50, %v12734_v11  ;;  %v6787_v57 = vrot.slane %v12741_v50, %v12737_v56 }
 0x62a   : > { %v6614_v10 = vsel %vm6505_vm7, %v6613_v30, %v6609_v52  ;;  %v6792_v35 = vsel %vm6683_vm8, %v6791_v16, %v6787_v57  ;;  %v6877_v52 = vstv %s7494_s21 }
 0x62b   : > { %v12749_v60 = vpop.permute.xlu1 %6429 }
 0x62c   : > { %v6546_v43 = vrot.slane %v12749_v60, %v12734_v11  ;;  %v6724_v1 = vrot.slane %v12749_v60, %v12737_v56  ;;  %v6550_v60 = vrot.slane %v12753_v24, %v12728_v22  ;;  %v6605_v24 = vsel %vm6505_vm7, %v6604_v8, %v6600_v13 }
 0x62e   : > { %v6551_v12 = vsel %vm6505_vm7, %v6550_v60, %v6546_v43  ;;  %v6729_v20 = vsel %vm6683_vm8, %v6728_v34, %v6724_v1 }
 0x62f   : > { %v12763_v17 = vpop.permute.xlu1 %6477  ;;  %v12775_v44 = vpop.permute.xlu0 %6480  ;;  %v6651_v21 = vsel %vm6650_vm2, %v6551_v12, %v6649_v9  ;;  %v6824_v62 = vsel %vm6650_vm2, %v6729_v20, %v6823_v55  ;;  %v6863_v20 = vstv %s12915_s9  ;;  %v6915_v9 = vstv %s7496_s22  ;;  %s13000_s9 = scalar_lea.hbm %s13105_s6, %s7509_s17  ;;  %s7007_s22 = scalar_lea.sflag [#allocation8], %s9065_s25 }
 0x630   : > { %v6618_v50 = vrot.slane %v12763_v17, %v12734_v11  ;;  %v6796_v41 = vrot.slane %v12763_v17, %v12737_v56  ;;  %v6622_v23 = vrot.slane %v12775_v44, %v12728_v22  ;;  %v6800_v58 = vrot.slane %v12775_v44, %v12731_v32 }
 0x631   : > { %v6656_v44 = vsel %vm6642_vm9, %v12794_v45, %v12778_v18 }
 0x632   : > { %v6657_v43 = vsel %vm6644_vm15, %v12818_v2, %v6656_v44  ;;  %v6623_v59 = vsel %vm6505_vm7, %v6622_v23, %v6618_v50  ;;  %v6801_v13 = vsel %vm6683_vm8, %v6800_v58, %v6796_v41 }
 0x633   : > { %v6436_v26 = vpop.permute.xlu1 %6435  ;;  %v6439_v33 = vpop.permute.xlu0 %6438  ;;  %v6658_v1 = vsel %vm6646_vm0, %v6605_v24, %v6657_v43  ;;  %v6894_v24 = vstv %s7495_s16  ;;  %s7025_s16 = sshll.u32 %s12904_s30, 4  ;;  %s13004_s16 = int_to_ptr.vmem [resolvable:$true] %s7025_s16 }
 0x634   : > { %v6555_v38 = vrot.slane %v6436_v26, %v12734_v11  ;;  %v6733_v28 = vrot.slane %v6436_v26, %v12737_v56  ;;  %v6559_v19 = vrot.slane %v6439_v33, %v12728_v22  ;;  %v6737_v49 = vrot.slane %v6439_v33, %v12731_v32  ;;  %s8779_s21 = scalar_lea.vmem %s13004_s16, 256 }
 0x635   : > { %v6827_v33 = vsel %vm6642_vm9, %v12797_v14, %v12781_v51  ;;  %v6659_v2 = vsel %vm6648_vm1, %v6614_v10, %v6658_v1  ;;  %p8780_p5 = scmp.ne.s32.totalorder %s13004_s16, %s8779_s21 }
 0x636   : > { %v6560_v6 = vsel %vm6505_vm7, %v6559_v19, %v6555_v38  ;;  %v6738_v29 = vsel %vm6683_vm8, %v6737_v49, %v6733_v28  ;;  %v6828_v18 = vsel %vm6644_vm15, %v12821_v42, %v6827_v33  ;;  %v6660_v19 = vsel %vm6650_vm2, %v6623_v59, %v6659_v2 }
 0x637   : > { %v6484_v3 = vpop.permute.xlu1 %6483  ;;  %v6653_v26 = vsel %vm6652_vm10, %v6560_v6, %v6651_v21  ;;  %v6825_v36 = vsel %vm6652_vm10, %v6738_v29, %v6824_v62  ;;  %v6829_v53 = vsel %vm6646_vm0, %v6783_v15, %v6828_v18  ;;  %v6953_v29 = vstv %s7498_s10  ;;  %p8781_p8 = pnand %p8780_p5, %p13408_p12  ;;  %s8891_s10 = smov [#allocation11]  }
 0x638   : > { %v6627_v51 = vrot.slane %v6484_v3, %v12734_v11  ;;  %v6805_v45 = vrot.slane %v6484_v3, %v12737_v56  ;;  %v6830_v42 = vsel %vm6648_vm1, %v6792_v35, %v6829_v53  ;;  %v6849_v3 = vstv %s12884_s23 }
 0x639   : > { %v6831_v49 = vsel %vm6650_vm2, %v6801_v13, %v6830_v42  ;;  %v6936_v33 = vstv %s7497_s13  ;;  %p8782_p9 = pneg %p8781_p8 }
 0x63b   : > { %v6487_v46 = vpop.permute.xlu0 %6486 }
 0x63c   : > { %v6631_v5 = vrot.slane %v6487_v46, %v12728_v22  ;;  %v6809_v17 = vrot.slane %v6487_v46, %v12731_v32 }
 0x63e   : > { %v6632_v7 = vsel %vm6505_vm7, %v6631_v5, %v6627_v51  ;;  %v6810_v54 = vsel %vm6683_vm8, %v6809_v17, %v6805_v45 }
 0x63f   : > { %v6442_v37 = vpop.permute.xlu1 %6441  ;;  %v6445_v63 = vpop.permute.xlu0 %6444  ;;  %v6661_v46 = vsel %vm6652_vm10, %v6632_v7, %v6660_v19  ;;  %v6832_v39 = vsel %vm6652_vm10, %v6810_v54, %v6831_v49 }
 0x640   : > { %v6564_v0 = vrot.slane %v6442_v37, %v12734_v11  ;;  %v6742_v25 = vrot.slane %v6442_v37, %v12737_v56  ;;  %v6568_v40 = vrot.slane %v6445_v63, %v12728_v22  ;;  %v6746_v47 = vrot.slane %v6445_v63, %v12731_v32 }
 0x642   : > { %v6569_v4 = vsel %vm6505_vm7, %v6568_v40, %v6564_v0  ;;  %v6747_v61 = vsel %vm6683_vm8, %v6746_v47, %v6742_v25  ;;  %v6974_v47 = vstv %s7499_s24  ;;  %s8783_s24 = sshll.u32 %s8891_s10, 4  ;;  %s8784_s24 = int_to_ptr.vmem [resolvable:$false] %s8783_s24 }
 0x643   : > { %v6655_v8 = vsel %vm6654_vm11, %v6569_v4, %v6653_v26  ;;  %v6826_v48 = vsel %vm6654_vm11, %v6747_v61, %v6825_v36  ;;  %v6490_v14 = vpop.permute.xlu1 %6489  ;;  %s8785_s13 = scalar_lea.vmem %s8784_s24, 512  ;;  %p8786_p10 = scmp.lt.s32.totalorder %s13004_s16, %s8784_s24 }
 0x644   : > { %6666 = vst.msk [vmem:[%s12904_s30] sm:$0xff] %vm6665_vm12, %v6655_v8  ;;  %v6636_v60 = vrot.slane %v6490_v14, %v12734_v11  ;;  %v6814_v34 = vrot.slane %v6490_v14, %v12737_v56  ;;  %p8787_p1 = scmp.lt.s32.totalorder %s8785_s13, %s8779_s21 }
 0x645   : > { %6837 = vst.msk [vmem:[#allocation4 + $0x1] sm:$0xff] %vm6836_vm13, %v6826_v48 }
 0x646   : > { %p8788_p4 = por %p8787_p1, %p8786_p10 }
 0x647   : > { %v6493_v31 = vpop.permute.xlu0 %6492 }
 0x648   : > { %v6640_v38 = vrot.slane %v6493_v31, %v12728_v22  ;;  %v6818_v28 = vrot.slane %v6493_v31, %v12731_v32  ;;  %p8789_p11 = pnand %p8788_p4, %p8782_p9 }
 0x64a   : > { %v6641_v27 = vsel %vm6505_vm7, %v6640_v38, %v6636_v60  ;;  %v6819_v11 = vsel %vm6683_vm8, %v6818_v28, %v6814_v34 }
 0x64b   : > { %v6662_v56 = vsel %vm6654_vm11, %v6641_v27, %v6661_v46  ;;  %v6833_v22 = vsel %vm6654_vm11, %v6819_v11, %v6832_v39 }
 0x64c   : > { %v12938_v12 = vld [vmem:[#allocation4] sm:$0xff]  ;;  %6667 = vst.msk [vmem:[%s12904_s30 + $0x8] sm:$0xff] %vm6665_vm12, %v6662_v56 }
 0x64d   : > { %6838 = vst.msk [vmem:[#allocation4 + $0x9] sm:$0xff] %vm6836_vm13, %v6833_v22  ;;  %v6850_v32 = vmul.f32 %v6849_v3, %v12938_v12  ;;  %v6864_v15 = vmul.f32 %v6863_v20, %v12938_v12  ;;  %v6895_v30 = vmul.f32 %v6894_v24, %v12938_v12  ;;  %v6916_v0 = vmul.f32 %v6915_v9, %v12938_v12 }
 0x64e   : > { %v6878_v25 = vmul.f32 %v6877_v52, %v12938_v12  ;;  %v6954_v26 = vmul.f32 %v6953_v29, %v12938_v12  ;;  %v6975_v61 = vmul.f32 %v6974_v47, %v12938_v12  ;;  %v6937_v43 = vmul.f32 %v6936_v33, %v12938_v12 }
 0x64f   : > { %6854 = vrot.lane.b32.xlu1 %v6850_v32, %s8889_s18  ;;  %v6901_v37 = vrot.slane %v6895_v30, 1  ;;  %v6922_v4 = vrot.slane %v6916_v0, 1 }
 0x650   : > { %v6884_v5 = vrot.slane %v6878_v25, 1  ;;  %v6960_v53 = vrot.slane %v6954_v26, 2  ;;  %v6943_v13 = vrot.slane %v6937_v43, 2  ;;  %v6981_v49 = vrot.slane %v6975_v61, 2 }
 0x653   : > { %6868 = vrot.lane.b32.xlu1 %v6864_v15, %s8890_s12 }
 0x654   : > { %v12949_v16 = vld [vmem:[#allocation4 + $0x8] sm:$0xff]  ;;  %v6841_v55 = vld [vmem:[#allocation4 + $0x10] sm:$0x3] }
 0x655   : > { %v6851_v57 = vmul.f32 %v6849_v3, %v12949_v16  ;;  %v6896_v21 = vmul.f32 %v6894_v24, %v12949_v16  ;;  %v6917_v62 = vmul.f32 %v6915_v9, %v12949_v16  ;;  %v6897_v6 = vmul.f32 %v6894_v24, %v6841_v55 }
 0x656   : > { %v6955_v40 = vmul.f32 %v6953_v29, %v12949_v16  ;;  %v6865_v41 = vmul.f32 %v6863_v20, %v12949_v16  ;;  %v6918_v36 = vmul.f32 %v6915_v9, %v6841_v55  ;;  %v6879_v17 = vmul.f32 %v6877_v52, %v12949_v16 }
 0x657   : > { %6856 = vrot.lane.b32.xlu0 %v6851_v57, %s8889_s18  ;;  %v6902_v63 = vrot.slane %v6896_v21, 1  ;;  %v6923_v23 = vrot.slane %v6917_v62, 1  ;;  %v6904_v58 = vrot.slane %v6897_v6, 1  ;;  %v12966_v48 = vmul.f32 %v6974_v47, %v12949_v16 }
 0x658   : > { %v6961_v8 = vrot.slane %v6955_v40, 2  ;;  %v6880_v44 = vmul.f32 %v6877_v52, %v6841_v55  ;;  %v6885_v35 = vrot.slane %v6879_v17, 1  ;;  %v6938_v18 = vmul.f32 %v6936_v33, %v12949_v16 }
 0x659   : > { %v6903_v50 = vsel %vm549_vm3, %v6901_v37, %v6902_v63  ;;  %v6924_v10 = vsel %vm549_vm3, %v6922_v4, %v6923_v23  ;;  %v6905_v51 = vsel %vm549_vm3, %v6902_v63, %v6904_v58  ;;  %v6925_v45 = vrot.slane %v6918_v36, 1 }
 0x65a   : > { %6906 = vrot.lane.b32.xlu1 %v6903_v50, %s8889_s18  ;;  %v6956_v14 = vmul.f32 %v6953_v29, %v6841_v55  ;;  %v6887_v1 = vrot.slane %v6880_v44, 1  ;;  %v12975_v59 = vsel %vm549_vm3, %v6884_v5, %v6885_v35  ;;  %v6944_v2 = vrot.slane %v6938_v18, 2 }
 0x65b   : > { %6870 = vrot.lane.b32.xlu0 %v6865_v41, %s8890_s12  ;;  %v6939_v7 = vmul.f32 %v6936_v33, %v6841_v55  ;;  %v6962_v54 = vsel %vm1219_vm4, %v6960_v53, %v6961_v8  ;;  %v6982_v31 = vrot.slane %v12966_v48, 2  ;;  %v6926_v34 = vsel %vm549_vm3, %v6923_v23, %v6925_v45 }
 0x65c   : > { %v12978_v42 = vsel %vm549_vm3, %v6885_v35, %v6887_v1  ;;  %v12983_v60 = vsel %vm1219_vm4, %v6943_v13, %v6944_v2  ;;  %v6963_v38 = vrot.slane %v6956_v14, 2  ;;  %v6977_v28 = vmul.f32 %v6974_v47, %v6841_v55 }
 0x65d   : > { %v6946_v19 = vrot.slane %v6939_v7, 2  ;;  %v6983_v46 = vsel %vm1219_vm4, %v6981_v49, %v6982_v31 }
 0x65e   : > { %6927 = vrot.lane.b32.xlu1 %v6924_v10, %s8890_s12  ;;  %v6964_v39 = vsel %vm1219_vm4, %v6961_v8, %v6963_v38  ;;  %v6984_v27 = vrot.slane %v6977_v28, 2 }
 0x65f   : > { %6908 = vrot.lane.b32.xlu0 %v6905_v51, %s8889_s18  ;;  %v12989_v3 = vsel %vm1219_vm4, %v6944_v2, %v6946_v19 }
 0x662   : > { %6965 = vrot.lane.b32.xlu1 %v6962_v54, %s8889_s18 }
 0x663   : > { %6929 = vrot.lane.b32.xlu0 %v6926_v34, %s8890_s12 }
 0x666   : > { %6986 = vrot.lane.b32.xlu1 %v6983_v46, %s8890_s12 }
 0x667   : > { %6967 = vrot.lane.b32.xlu0 %v6964_v39, %s8889_s18 }
 0x668   : > { %8792 = shalt.err (!%p8789_p11)
}
 0x669   : > { %s8793_s30 = scalar_lea.hbm %s13000_s9, 256  ;;  %s8797_s23 = scalar_lea.hbm %s13105_s6, 512 }
 0x66a   : > { %p8794_p0 = scmp.ne.s32.totalorder %s13000_s9, %s8793_s30  ;;  %p8798_p6 = scmp.lt.u32.totalorder %s13000_s9, %s13105_s6 }
 0x66b   : > { %p8799_p3 = scmp.lt.u32.totalorder %s8797_s23, %s8793_s30  ;;  %p8801_p5 = scmp.lt.u32.totalorder %s8793_s30, %s13000_s9 }
 0x66c   : > { %p8795_p2 = pnand %p8794_p0, %p13408_p12 }
 0x66d   : > { %p8800_p13 = por %p8799_p3, %p8798_p6 }
 0x66e   : > { %p8796_p7 = pneg %p8795_p2 }
 0x66f   : > { %p8802_p8 = por %p8801_p5, %p8800_p13 }
 0x671   : > { %p8803_p9 = pnand %p8802_p8, %p8796_p7 }
 0x673   : > { %8806 = shalt.err (!%p8803_p9)
}
 0x674   : > { %s8892_s21 = smov 128   ;;  %s8893_s13 = smov 8   ;;  %v6985_v11 = vsel %vm1219_vm4, %v6982_v31, %v6984_v27 }
 0x675   : > { %8614 = dma.vmem_to_hbm [thread:$0]  (%p13408_p12), %s13004_s16, 256, %s13000_s9, %s7007_s22, %s8892_s21, %s8892_s21, %s8893_s13  }
 0x676   : > { %6988 = vrot.lane.b32.xlu0 %v6985_v11, %s8890_s12  ;;  %s6842_s30 = sld [smem:[#allocation10]]  ;;  %s322_s9 = scalar_lea.vmem [#allocation12], %s7168_s20 }
 0x677   : > { %s6994_s12 = sld [smem:[#allocation5]]  ;;  %s7041_s16 = sshll.u32 %s322_s9, 4  ;;  %s13051_s16 = int_to_ptr.vmem [resolvable:$true] %s7041_s16 }
 0x678   : > { %s13049_s19 = scalar_lea.hbm %s13106_s7, %s7509_s17  ;;  %s7012_s20 = scalar_lea.sflag [#allocation13], %s9065_s25 }
 0x679   : > { %s8807_s23 = scalar_lea.vmem %s13051_s16, 256  ;;  %s8894_s5 = smov [#allocation12]  }
 0x67a   : > { %p8808_p10 = scmp.ne.s32.totalorder %s13051_s16, %s8807_s23  ;;  %s8811_s10 = sshll.u32 %s8894_s5, 4  ;;  %s8812_s10 = int_to_ptr.vmem [resolvable:$false] %s8811_s10 }
 0x67b   : > { %s8813_s24 = scalar_lea.vmem %s8812_s10, 512  ;;  %p8814_p11 = scmp.lt.s32.totalorder %s13051_s16, %s8812_s10 }
 0x67c   : > { %v6843_v56 = vstv %s6842_s30  ;;  %p8809_p1 = pnand %p8808_p10, %p13408_p12  ;;  %p8815_p0 = scmp.lt.s32.totalorder %s8813_s24, %s8807_s23 }
 0x67d   : > { %v6844_v32 = vmul.f32 %v6843_v56, %v12938_v12  ;;  %v6845_v55 = vmul.f32 %v6843_v56, %v12949_v16  ;;  %v6995_v16 = vstv %s6994_s12 }
 0x67e   : > { %p8810_p4 = pneg %p8809_p1  ;;  %p8816_p2 = por %p8815_p0, %p8814_p11 }
 0x680   : > { %p8817_p7 = pnand %p8816_p2, %p8810_p4 }
 0x6c1   : > { %v6855_v22 = vpop.permute.xlu1 %6854 }
 0x6c2   : > { %v6860_v20 = vadd.f32 %v6855_v22, %v6844_v32 }
 0x6c5   : > { %v6869_v24 = vpop.permute.xlu1 %6868 }
 0x6c6   : > { %v6874_v15 = vadd.f32 %v6869_v24, %v6860_v20 }
 0x6c8   : > { %v6891_v30 = vadd.f32 %v12975_v59, %v6874_v15 }
 0x6c9   : > { %v6857_v9 = vpop.permute.xlu0 %6856 }
 0x6ca   : > { %v6861_v52 = vadd.f32 %v6857_v9, %v6845_v55 }
 0x6cc   : > { %v6907_v57 = vpop.permute.xlu1 %6906 }
 0x6cd   : > { %v6871_v21 = vpop.permute.xlu0 %6870  ;;  %v6912_v6 = vadd.f32 %v6907_v57, %v6891_v30 }
 0x6ce   : > { %v6875_v62 = vadd.f32 %v6871_v21, %v6861_v52 }
 0x6d0   : > { %v6928_v29 = vpop.permute.xlu1 %6927  ;;  %v6892_v37 = vadd.f32 %v12978_v42, %v6875_v62 }
 0x6d1   : > { %v6933_v63 = vadd.f32 %v6928_v29, %v6912_v6  ;;  %v6909_v0 = vpop.permute.xlu0 %6908 }
 0x6d2   : > { %v6913_v25 = vadd.f32 %v6909_v0, %v6892_v37 }
 0x6d3   : > { %v6950_v12 = vadd.f32 %v12983_v60, %v6933_v63 }
 0x6d4   : > { %v6966_v40 = vpop.permute.xlu1 %6965 }
 0x6d5   : > { %v6930_v47 = vpop.permute.xlu0 %6929  ;;  %v6971_v41 = vadd.f32 %v6966_v40, %v6950_v12 }
 0x6d6   : > { %v6934_v50 = vadd.f32 %v6930_v47, %v6913_v25 }
 0x6d8   : > { %v6987_v23 = vpop.permute.xlu1 %6986  ;;  %v6951_v58 = vadd.f32 %v12989_v3, %v6934_v50 }
 0x6d9   : > { %v6992_v26 = vadd.f32 %v6987_v23, %v6971_v41  ;;  %v6968_v36 = vpop.permute.xlu0 %6967 }
 0x6da   : > { %v6972_v61 = vadd.f32 %v6968_v36, %v6951_v58 }
 0x6db   : > { %v6996_v4 = vadd.f32 %v6995_v16, %v6992_v26 }
 0x6dd   : > { %vm6998_vm3 = vcmp.ge.f32.partialorder %v6996_v4, 0.0  ;;  %v7000_v5 = vmul.f32 0.1, %v6996_v4 }
 0x6df   : > { %v7002_v48 = vsel %vm6998_vm3, %v6996_v4, %v7000_v5 }
 0x6e0   : > { %7004 = vst.msk [vmem:[%s322_s9] sm:$0xff] %vm6665_vm12, %v7002_v48 }
 0x6e8   : > { %v6989_v17 = vpop.permute.xlu0 %6988 }
 0x6e9   : > { %v6993_v8 = vadd.f32 %v6989_v17, %v6972_v61 }
 0x6eb   : > { %v6997_v44 = vadd.f32 %v6995_v16, %v6993_v8 }
 0x6ed   : > { %vm6999_vm4 = vcmp.ge.f32.partialorder %v6997_v44, 0.0  ;;  %v7001_v33 = vmul.f32 0.1, %v6997_v44 }
 0x6ef   : > { %v7003_v10 = vsel %vm6999_vm4, %v6997_v44, %v7001_v33 }
 0x6f0   : > { %7005 = vst.msk [vmem:[%s322_s9 + $0x8] sm:$0xff] %vm6665_vm12, %v7003_v10 }
 0x6f1   : > { %8820 = shalt.err (!%p8817_p7)
}
 0x6f2   : > { %s8821_s17 = scalar_lea.hbm %s13049_s19, 256  ;;  %s8825_s9 = scalar_lea.hbm %s13106_s7, 512 }
 0x6f3   : > { %p8822_p6 = scmp.ne.s32.totalorder %s13049_s19, %s8821_s17  ;;  %p8826_p5 = scmp.lt.u32.totalorder %s13049_s19, %s13106_s7 }
 0x6f4   : > { %p8827_p8 = scmp.lt.u32.totalorder %s8825_s9, %s8821_s17  ;;  %p8829_p10 = scmp.lt.u32.totalorder %s8821_s17, %s13049_s19 }
 0x6f5   : > { %p8823_p3 = pnand %p8822_p6, %p13408_p12 }
 0x6f6   : > { %p8828_p9 = por %p8827_p8, %p8826_p5 }
 0x6f7   : > { %p8824_p13 = pneg %p8823_p3 }
 0x6f8   : > { %p8830_p1 = por %p8829_p10, %p8828_p9 }
 0x6fa   : > { %p8831_p4 = pnand %p8830_p1, %p8824_p13 }
 0x6fc   : > { %8834 = shalt.err (!%p8831_p4)
}
 0x6fd   : > { %8615 = dma.vmem_to_hbm [thread:$0]  (%p13408_p12), %s13051_s16, 256, %s13049_s19, %s7012_s20, %s8892_s21, %s8892_s21, %s8893_s13  }
 0x6fe PF: > { %s7056_s23 = sand.u32 1, %s8869_s26   ;;  %p13409_p11 = scmp.ne.s32.totalorder %s13205_s15, 0 }
 0x6ff   : > { %p13410_p0 = scmp.ge.s32.totalorder %s8881_s29, 2  ;;  %s7057_s5 = scalar_lea.sflag [#allocation8], %s7056_s23 }
 0x701   : > { %p8627_p2 = pnand %p13410_p0, %p13409_p11 }
 0x703   : > { %8860 = dma.done.wait (!%p8627_p2), %s7057_s5, 256  }
 0x704   : > { %8862 = vsyncadd (!%p8627_p2), %s7057_s5, 4294967040  ;;  %s7066_s14 = scalar_lea.sflag [#allocation13], %s7056_s23 }
 0x705   : > { %8864 = dma.done.wait (!%p8627_p2), %s7066_s14, 256  }
 0x706   : > { %8866 = vsyncadd (!%p8627_p2), %s7066_s14, 4294967040  ;;  %p26_p12 = scmp.ge.s32.totalorder %s8963_s8, 4   ;;  %s13411_s26 = smov %s8873_s27 }
 0x707   : > { %s13412_s27 = smov %s8877_s28  ;;  %s13413_s28 = smov %s8975_s11 }
 0x708   : > { %s13414_s29 = smov %s8963_s8  ;;  %28 = sbr.rel (!%p26_p12) target bundleno = 10 (0xa), region = 121 }
 0x70f   :  { %7071 = vsyncpa [#allocation7], 1 }
 0x710   :  { %7073 = vsyncpa [#allocation7 + $0x1], 1 }
 0x711   :  { %7074 = vsyncpa [#allocation8], 1 }
 0x712   :  { %7076 = vsyncpa [#allocation8 + $0x1], 1 }
 0x713   :  { %7077 = vsyncpa [#allocation13], 1 }
 0x714   :  { %7079 = vsyncpa [#allocation13 + $0x1], 1 }
 0x715   :  { %7080 = vsyncpa [#allocation9], 1 }
 0x716   :  { %7082 = vsyncpa [#allocation9 + $0x1], 1 }

</bundles_post_ra>
